<compile_context>
chip_gen: v5e
topology: v5e:2x2
jax: 0.10.0
libtpu: 0.0.40
codegen_flags: <defaults>
</compile_context>

<pallas_src>
import functools

import jax
import jax.numpy as jnp
from jax import lax
from jax.experimental import pallas as pl
from jax.experimental.pallas import tpu as pltpu


def _round_up(v, m):
    return (v + m - 1) // m * m


# ----------------------------------------------------------------------------
# Fused Pallas kernel: whole RetinaNet head (both branches) for one image.
# ----------------------------------------------------------------------------
def _fused_head_kernel(*refs, S, H, W, Cpad, Cf):
    """refs layout (inputs, outputs, scratch):
      [0]              x                 (1, H, W, Cpad)    bf16
      [1 .. S]         cls conv weights  (9*Cpad, Cf)       bf16
      [1+S .. 2S]      cls conv biases   (1, Cf)            f32
      [1+2S .. 3S]     reg conv weights  (9*Cpad, Cf)       bf16
      [1+3S .. 4S]     reg conv biases   (1, Cf)            f32
      [1+4S + 0..3]    retina_cls w, b, retina_reg w, b     (co padded to 128x)
      [5+4S], [6+4S]   cls_out (1, H*W, Ccls_p) f32, reg_out (1, H*W, Creg_p) f32
      [7+4S]           pad scratch (H+2, W+2, Cpad) bf16
    """
    x_ref = refs[0]
    i = 1
    cls_ws = refs[i:i + S]; i += S
    cls_bs = refs[i:i + S]; i += S
    reg_ws = refs[i:i + S]; i += S
    reg_bs = refs[i:i + S]; i += S
    w_cls_h, b_cls_h, w_reg_h, b_reg_h = refs[i:i + 4]; i += 4
    cls_out, reg_out = refs[i], refs[i + 1]
    pad_ref = refs[i + 2]

    # Zero the padded buffer once per grid step; only its interior is ever
    # rewritten afterwards, so the 1-pixel halo stays zero for every layer.
    pad_ref[...] = jnp.zeros_like(pad_ref)

    def im2col():
        xp = pad_ref[...]                                      # (H+2, W+2, Cpad) bf16
        cols = [xp[dh:dh + H, dw:dw + W, :].reshape(H * W, Cpad)
                for dh in range(3) for dw in range(3)]
        return jnp.concatenate(cols, axis=-1)                  # (H*W, 9*Cpad)

    def write_act(act_f32):                                    # (H*W, Cf) f32
        a = act_f32.astype(jnp.bfloat16)
        if Cf < Cpad:  # only when in_channels > feat_channels (not the default)
            a = jnp.concatenate(
                [a, jnp.zeros((H * W, Cpad - Cf), jnp.bfloat16)], axis=-1)
        pad_ref[1:H + 1, 1:W + 1, :] = a.reshape(H, W, Cpad)

    def run_branch(ws, bs, w_head, b_head, out_ref):
        # Seed the padded buffer with the (shared, already-VMEM-resident) input.
        pad_ref[1:H + 1, 1:W + 1, :] = x_ref[0]
        for li in range(S):
            acc = jnp.dot(im2col(), ws[li][...],
                          preferred_element_type=jnp.float32)  # MXU, K = 9*Cpad
            acc = acc + bs[li][...]
            acc = jnp.maximum(acc, 0.0)        # TODO(synk): ReLU assumed for CBA
            write_act(acc)
        acc = jnp.dot(im2col(), w_head[...],
                      preferred_element_type=jnp.float32)
        acc = acc + b_head[...]
        out_ref[0] = acc.astype(out_ref.dtype)                 # lane-dense, unmasked vst

    run_branch(cls_ws, cls_bs, w_cls_h, b_cls_h, cls_out)
    run_branch(reg_ws, reg_bs, w_reg_h, b_reg_h, reg_out)


# ----------------------------------------------------------------------------
# Wrapper: parameter prep + one fused pallas_call per level.
# ----------------------------------------------------------------------------
def retinanet_head_forward_single(params, x_nchw):
    """Matches RetinaNetHead.forward_single.  Input NCHW, outputs NCHW."""
    N, Cin, H, W = x_nchw.shape
    S = len(params["cls_convs"])
    Cf = params["cls_convs"][0][0].shape[-1]          # feat_channels
    Cpad = max(Cin, Cf)
    Ccls = params["retina_cls"][0].shape[-1]
    Creg = params["retina_reg"][0].shape[-1]
    Ccls_p = _round_up(Ccls, 128)                     # lane-dense head outputs
    Creg_p = _round_up(Creg, 128)

    # NCHW -> NHWC; channel axis (lanes) zero-padded to Cpad if needed; bf16.
    x = jnp.transpose(x_nchw, (0, 2, 3, 1))
    if Cpad > Cin:
        x = jnp.pad(x, ((0, 0), (0, 0), (0, 0), (0, Cpad - Cin)))
    x = x.astype(jnp.bfloat16)

    def prep_w(w, co_pad=None):
        # (3,3,ci,co) -> tap-major (9*Cpad, co[_pad]); K (and optionally N)
        # zero-padded; bf16.
        _, _, ci, co = w.shape
        co_pad = co if co_pad is None else co_pad
        w = jnp.pad(w, ((0, 0), (0, 0), (0, Cpad - ci), (0, co_pad - co)))
        return w.reshape(9 * Cpad, co_pad).astype(jnp.bfloat16)

    def prep_b(b, co_pad=None):
        co_pad = b.shape[0] if co_pad is None else co_pad
        b = jnp.pad(b, (0, co_pad - b.shape[0]))
        return b.reshape(1, -1).astype(jnp.float32)

    inputs = [x]
    inputs += [prep_w(w) for (w, _) in params["cls_convs"]]
    inputs += [prep_b(b) for (_, b) in params["cls_convs"]]
    inputs += [prep_w(w) for (w, _) in params["reg_convs"]]
    inputs += [prep_b(b) for (_, b) in params["reg_convs"]]
    inputs += [prep_w(params["retina_cls"][0], Ccls_p),
               prep_b(params["retina_cls"][1], Ccls_p),
               prep_w(params["retina_reg"][0], Creg_p),
               prep_b(params["retina_reg"][1], Creg_p)]

    def _const_spec(shape):
        return pl.BlockSpec(shape, lambda n, _r=len(shape): (0,) * _r)

    in_specs = [pl.BlockSpec((1, H, W, Cpad), lambda n: (n, 0, 0, 0))]
    in_specs += [_const_spec(a.shape) for a in inputs[1:]]

    out_shape = (jax.ShapeDtypeStruct((N, H * W, Ccls_p), jnp.float32),
                 jax.ShapeDtypeStruct((N, H * W, Creg_p), jnp.float32))
    out_specs = [pl.BlockSpec((1, H * W, Ccls_p), lambda n: (n, 0, 0)),
                 pl.BlockSpec((1, H * W, Creg_p), lambda n: (n, 0, 0))]

    flops = 2 * N * H * W * 9 * Cpad * (2 * S * Cf + Ccls_p + Creg_p)
    bytes_accessed = int(sum(a.size * a.dtype.itemsize for a in inputs)
                         + N * H * W * (Ccls_p + Creg_p) * 4)

    kern = functools.partial(_fused_head_kernel, S=S, H=H, W=W, Cpad=Cpad, Cf=Cf)
    cls_flat, reg_flat = pl.pallas_call(
        kern,
        out_shape=out_shape,
        grid_spec=pltpu.PrefetchScalarGridSpec(
            num_scalar_prefetch=0,
            grid=(N,),
            in_specs=in_specs,
            out_specs=out_specs,
            scratch_shapes=[pltpu.VMEM((H + 2, W + 2, Cpad), jnp.bfloat16)]),
        compiler_params=pltpu.CompilerParams(
            dimension_semantics=("parallel",)),
        cost_estimate=pl.CostEstimate(flops=flops, transcendentals=0,
                                      bytes_accessed=bytes_accessed),
    )(*inputs)

    # Lane-dense (N, H*W, Cout_pad) -> drop padding -> NHWC -> NCHW.
    cls_score = jnp.transpose(
        cls_flat[:, :, :Ccls].reshape(N, H, W, Ccls), (0, 3, 1, 2))
    bbox_pred = jnp.transpose(
        reg_flat[:, :, :Creg].reshape(N, H, W, Creg), (0, 3, 1, 2))
    return cls_score, bbox_pred


def retinanet_head_forward(params, x):
    """Matches RetinaNetHead.forward: accepts a tensor or a tuple/list of tensors."""
    if isinstance(x, (tuple, list)):
        return [retinanet_head_forward_single(params, xi) for xi in x]
    return retinanet_head_forward_single(params, x)


# ----------------------------------------------------------------------------
# Parameter construction (deterministic, synthetic)
# ----------------------------------------------------------------------------
def init_retinanet_head_params(key, in_channels, feat_channels, num_anchors,
                               num_class, stacked_convs):
    """Weights stored in HWIO (3,3,Cin,Cout) f32; biases (Cout,) f32."""
    params = {"cls_convs": [], "reg_convs": []}

    def conv_p(key, cin, cout):
        kw, kb = jax.random.split(key)
        w = 0.05 * jax.random.normal(kw, (3, 3, cin, cout), jnp.float32)
        b = 0.05 * jax.random.normal(kb, (cout,), jnp.float32)
        return w, b

    keys = jax.random.split(key, 2 * stacked_convs + 2)
    k = 0
    for i in range(stacked_convs):
        cin = in_channels if i == 0 else feat_channels
        params["cls_convs"].append(conv_p(keys[k], cin, feat_channels)); k += 1
    for i in range(stacked_convs):
        cin = in_channels if i == 0 else feat_channels
        params["reg_convs"].append(conv_p(keys[k], cin, feat_channels)); k += 1
    params["retina_cls"] = conv_p(keys[k], feat_channels, num_anchors * num_class); k += 1
    params["retina_reg"] = conv_p(keys[k], feat_channels, num_anchors * 4)
    return params


# ----------------------------------------------------------------------------
# Pure-JAX reference (same bf16 operand / f32 accumulate rounding points)
# ----------------------------------------------------------------------------
def _conv3x3_ref(x_nhwc, w_hwio, b, relu):
    y = lax.conv_general_dilated(
        x_nhwc.astype(jnp.bfloat16), w_hwio.astype(jnp.bfloat16),
        window_strides=(1, 1), padding=((1, 1), (1, 1)),
        dimension_numbers=("NHWC", "HWIO", "NHWC"),
        preferred_element_type=jnp.float32)
    y = y + b[None, None, None, :].astype(jnp.float32)
    return jnp.maximum(y, 0.0) if relu else y


def _forward_single_ref(params, x_nchw):
    x = jnp.transpose(x_nchw, (0, 2, 3, 1))
    cls_feat = x
    for (w, b) in params["cls_convs"]:
        cls_feat = _conv3x3_ref(cls_feat, w, b, True)
    reg_feat = x
    for (w, b) in params["reg_convs"]:
        reg_feat = _conv3x3_ref(reg_feat, w, b, True)
    cls_score = _conv3x3_ref(cls_feat, *params["retina_cls"], False)
    bbox_pred = _conv3x3_ref(reg_feat, *params["retina_reg"], False)
    return (jnp.transpose(cls_score, (0, 3, 1, 2)),
            jnp.transpose(bbox_pred, (0, 3, 1, 2)))


if __name__ == "__main__":
    # Small, module-consistent shapes: FPN feature map, NCHW.
    N, C, H, W = 2, 16, 8, 8
    in_channels = C
    feat_channels = 16
    num_anchors = 9
    num_class = 81
    stacked_convs = 4

    key = jax.random.PRNGKey(0)
    k_param, k_x = jax.random.split(key)
    params = init_retinanet_head_params(
        k_param, in_channels, feat_channels, num_anchors, num_class,
        stacked_convs)
    x = jax.random.normal(k_x, (N, C, H, W), jnp.float32)

    cls_score, bbox_pred = retinanet_head_forward(params, x)
    cls_score = jax.block_until_ready(cls_score)
    bbox_pred = jax.block_until_ready(bbox_pred)

    assert cls_score.shape == (N, num_anchors * num_class, H, W), cls_score.shape
    assert bbox_pred.shape == (N, num_anchors * 4, H, W), bbox_pred.shape

    # Cross-check against the pure-JAX reference (same bf16/f32 rounding points;
    # only accumulation order differs).
    cls_ref, reg_ref = _forward_single_ref(params, x)
    assert jnp.allclose(cls_score, cls_ref, atol=5e-3, rtol=5e-3)
    assert jnp.allclose(bbox_pred, reg_ref, atol=5e-3, rtol=5e-3)

    print("KERNEL_OK")
</pallas_src>

<mosaic_0001>
module attributes {stable_mosaic.version = 11 : i64} {
  func.func @_fused_head_kernel(%arg0: i32, %arg1: memref<1x8x8x16xbf16, #tpu.memory_space<vmem>>, %arg2: memref<144x16xbf16, #tpu.memory_space<vmem>>, %arg3: memref<144x16xbf16, #tpu.memory_space<vmem>>, %arg4: memref<144x16xbf16, #tpu.memory_space<vmem>>, %arg5: memref<144x16xbf16, #tpu.memory_space<vmem>>, %arg6: memref<1x16xf32, #tpu.memory_space<vmem>>, %arg7: memref<1x16xf32, #tpu.memory_space<vmem>>, %arg8: memref<1x16xf32, #tpu.memory_space<vmem>>, %arg9: memref<1x16xf32, #tpu.memory_space<vmem>>, %arg10: memref<144x16xbf16, #tpu.memory_space<vmem>>, %arg11: memref<144x16xbf16, #tpu.memory_space<vmem>>, %arg12: memref<144x16xbf16, #tpu.memory_space<vmem>>, %arg13: memref<144x16xbf16, #tpu.memory_space<vmem>>, %arg14: memref<1x16xf32, #tpu.memory_space<vmem>>, %arg15: memref<1x16xf32, #tpu.memory_space<vmem>>, %arg16: memref<1x16xf32, #tpu.memory_space<vmem>>, %arg17: memref<1x16xf32, #tpu.memory_space<vmem>>, %arg18: memref<144x768xbf16, #tpu.memory_space<vmem>>, %arg19: memref<1x768xf32, #tpu.memory_space<vmem>>, %arg20: memref<144x128xbf16, #tpu.memory_space<vmem>>, %arg21: memref<1x128xf32, #tpu.memory_space<vmem>>, %arg22: memref<1x64x768xf32, #tpu.memory_space<vmem>>, %arg23: memref<1x64x128xf32, #tpu.memory_space<vmem>>, %arg24: memref<10x10x16xbf16, #tpu.memory_space<vmem>>) attributes {dimension_semantics = [#tpu.dimension_semantics<parallel>], iteration_bounds = array<i64: 2>, scalar_prefetch = 0 : i64, scratch_operands = 1 : i64, tpu.core_type = #tpu.core_type<tc>, window_params = [{transform_indices = @transform_0, window_bounds = array<i64: 1, 8, 8, 16>}, {pipeline_mode = #tpu.pipeline_mode<synchronous>, transform_indices = @transform_1, window_bounds = array<i64: 144, 16>}, {pipeline_mode = #tpu.pipeline_mode<synchronous>, transform_indices = @transform_2, window_bounds = array<i64: 144, 16>}, {pipeline_mode = #tpu.pipeline_mode<synchronous>, transform_indices = @transform_3, window_bounds = array<i64: 144, 16>}, {pipeline_mode = #tpu.pipeline_mode<synchronous>, transform_indices = @transform_4, window_bounds = array<i64: 144, 16>}, {pipeline_mode = #tpu.pipeline_mode<synchronous>, transform_indices = @transform_5, window_bounds = array<i64: 1, 16>}, {pipeline_mode = #tpu.pipeline_mode<synchronous>, transform_indices = @transform_6, window_bounds = array<i64: 1, 16>}, {pipeline_mode = #tpu.pipeline_mode<synchronous>, transform_indices = @transform_7, window_bounds = array<i64: 1, 16>}, {pipeline_mode = #tpu.pipeline_mode<synchronous>, transform_indices = @transform_8, window_bounds = array<i64: 1, 16>}, {pipeline_mode = #tpu.pipeline_mode<synchronous>, transform_indices = @transform_9, window_bounds = array<i64: 144, 16>}, {pipeline_mode = #tpu.pipeline_mode<synchronous>, transform_indices = @transform_10, window_bounds = array<i64: 144, 16>}, {pipeline_mode = #tpu.pipeline_mode<synchronous>, transform_indices = @transform_11, window_bounds = array<i64: 144, 16>}, {pipeline_mode = #tpu.pipeline_mode<synchronous>, transform_indices = @transform_12, window_bounds = array<i64: 144, 16>}, {pipeline_mode = #tpu.pipeline_mode<synchronous>, transform_indices = @transform_13, window_bounds = array<i64: 1, 16>}, {pipeline_mode = #tpu.pipeline_mode<synchronous>, transform_indices = @transform_14, window_bounds = array<i64: 1, 16>}, {pipeline_mode = #tpu.pipeline_mode<synchronous>, transform_indices = @transform_15, window_bounds = array<i64: 1, 16>}, {pipeline_mode = #tpu.pipeline_mode<synchronous>, transform_indices = @transform_16, window_bounds = array<i64: 1, 16>}, {pipeline_mode = #tpu.pipeline_mode<synchronous>, transform_indices = @transform_17, window_bounds = array<i64: 144, 768>}, {pipeline_mode = #tpu.pipeline_mode<synchronous>, transform_indices = @transform_18, window_bounds = array<i64: 1, 768>}, {pipeline_mode = #tpu.pipeline_mode<synchronous>, transform_indices = @transform_19, window_bounds = array<i64: 144, 128>}, {pipeline_mode = #tpu.pipeline_mode<synchronous>, transform_indices = @transform_20, window_bounds = array<i64: 1, 128>}, {transform_indices = @transform_21, window_bounds = array<i64: 1, 64, 768>}, {transform_indices = @transform_22, window_bounds = array<i64: 1, 64, 128>}]} {
    %cst = arith.constant 0.000000e+00 : bf16
    %0 = vector.broadcast %cst : bf16 to vector<10x10x16xbf16>
    %c0 = arith.constant 0 : index
    %c0_0 = arith.constant 0 : index
    %c0_1 = arith.constant 0 : index
    %1 = vector.load %arg24[%c0, %c0_0, %c0_1] : memref<10x10x16xbf16, #tpu.memory_space<vmem>>, vector<10x10x16xbf16>
    tpu.vector_store %arg24[%c0, %c0_0, %c0_1], %0 {strides = array<i32>} : memref<10x10x16xbf16, #tpu.memory_space<vmem>>, vector<10x10x16xbf16>,
    %c0_2 = arith.constant 0 : index
    %c0_3 = arith.constant 0 : index
    %c0_4 = arith.constant 0 : index
    %c0_5 = arith.constant 0 : index
    %2 = vector.load %arg1[%c0_2, %c0_3, %c0_4, %c0_5] : memref<1x8x8x16xbf16, #tpu.memory_space<vmem>>, vector<1x8x8x16xbf16>
    %3 = vector.shape_cast %2 : vector<1x8x8x16xbf16> to vector<8x8x16xbf16>
    %c1 = arith.constant 1 : index
    %c1_6 = arith.constant 1 : index
    %c0_7 = arith.constant 0 : index
    %4 = vector.load %arg24[%c1, %c1_6, %c0_7] : memref<10x10x16xbf16, #tpu.memory_space<vmem>>, vector<8x8x16xbf16>
    tpu.vector_store %arg24[%c1, %c1_6, %c0_7], %3 {strides = array<i32>} : memref<10x10x16xbf16, #tpu.memory_space<vmem>>, vector<8x8x16xbf16>,
    %c0_8 = arith.constant 0 : index
    %c0_9 = arith.constant 0 : index
    %c0_10 = arith.constant 0 : index
    %5 = vector.load %arg24[%c0_8, %c0_9, %c0_10] : memref<10x10x16xbf16, #tpu.memory_space<vmem>>, vector<10x10x16xbf16>
    %6 = vector.extract_strided_slice %5 {offsets = [0, 0, 0], sizes = [8, 8, 16], strides = [1, 1, 1]} : vector<10x10x16xbf16> to vector<8x8x16xbf16>
    %7 = vector.shape_cast %6 : vector<8x8x16xbf16> to vector<64x16xbf16>
    %8 = vector.extract_strided_slice %5 {offsets = [0, 1, 0], sizes = [8, 8, 16], strides = [1, 1, 1]} : vector<10x10x16xbf16> to vector<8x8x16xbf16>
    %9 = vector.shape_cast %8 : vector<8x8x16xbf16> to vector<64x16xbf16>
    %10 = vector.extract_strided_slice %5 {offsets = [0, 2, 0], sizes = [8, 8, 16], strides = [1, 1, 1]} : vector<10x10x16xbf16> to vector<8x8x16xbf16>
    %11 = vector.shape_cast %10 : vector<8x8x16xbf16> to vector<64x16xbf16>
    %12 = vector.extract_strided_slice %5 {offsets = [1, 0, 0], sizes = [8, 8, 16], strides = [1, 1, 1]} : vector<10x10x16xbf16> to vector<8x8x16xbf16>
    %13 = vector.shape_cast %12 : vector<8x8x16xbf16> to vector<64x16xbf16>
    %14 = vector.extract_strided_slice %5 {offsets = [1, 1, 0], sizes = [8, 8, 16], strides = [1, 1, 1]} : vector<10x10x16xbf16> to vector<8x8x16xbf16>
    %15 = vector.shape_cast %14 : vector<8x8x16xbf16> to vector<64x16xbf16>
    %16 = vector.extract_strided_slice %5 {offsets = [1, 2, 0], sizes = [8, 8, 16], strides = [1, 1, 1]} : vector<10x10x16xbf16> to vector<8x8x16xbf16>
    %17 = vector.shape_cast %16 : vector<8x8x16xbf16> to vector<64x16xbf16>
    %18 = vector.extract_strided_slice %5 {offsets = [2, 0, 0], sizes = [8, 8, 16], strides = [1, 1, 1]} : vector<10x10x16xbf16> to vector<8x8x16xbf16>
    %19 = vector.shape_cast %18 : vector<8x8x16xbf16> to vector<64x16xbf16>
    %20 = vector.extract_strided_slice %5 {offsets = [2, 1, 0], sizes = [8, 8, 16], strides = [1, 1, 1]} : vector<10x10x16xbf16> to vector<8x8x16xbf16>
    %21 = vector.shape_cast %20 : vector<8x8x16xbf16> to vector<64x16xbf16>
    %22 = vector.extract_strided_slice %5 {offsets = [2, 2, 0], sizes = [8, 8, 16], strides = [1, 1, 1]} : vector<10x10x16xbf16> to vector<8x8x16xbf16>
    %23 = vector.shape_cast %22 : vector<8x8x16xbf16> to vector<64x16xbf16>
    %24 = tpu.concatenate %7, %9, %11, %13, %15, %17, %19, %21, %23 in 1 : vector<64x16xbf16>, vector<64x16xbf16>, vector<64x16xbf16>, vector<64x16xbf16>, vector<64x16xbf16>, vector<64x16xbf16>, vector<64x16xbf16>, vector<64x16xbf16>, vector<64x16xbf16> -> vector<64x144xbf16>
    %c0_11 = arith.constant 0 : index
    %c0_12 = arith.constant 0 : index
    %25 = vector.load %arg2[%c0_11, %c0_12] : memref<144x16xbf16, #tpu.memory_space<vmem>>, vector<144x16xbf16>
    %cst_13 = arith.constant dense<0.000000e+00> : vector<64x16xf32>
    %26 = tpu.matmul %24, %25, %cst_13 {dimension_numbers = #tpu.dot_dimension_numbers<[1], [0], [0], [1], [0, 0, 1, 1], [], []>} : vector<64x144xbf16>, vector<144x16xbf16>, vector<64x16xf32> -> vector<64x16xf32>
    %c0_14 = arith.constant 0 : index
    %c0_15 = arith.constant 0 : index
    %27 = vector.load %arg6[%c0_14, %c0_15] : memref<1x16xf32, #tpu.memory_space<vmem>>, vector<1x16xf32>
    %28 = vector.broadcast %27 : vector<1x16xf32> to vector<64x16xf32>
    %29 = arith.addf %26, %28 : vector<64x16xf32>
    %cst_16 = arith.constant 0.000000e+00 : f32
    %30 = vector.broadcast %cst_16 : f32 to vector<64x16xf32>
    %31 = arith.maximumf %29, %30 : vector<64x16xf32>
    %32 = arith.truncf %31 : vector<64x16xf32> to vector<64x16xbf16>
    %33 = vector.shape_cast %32 : vector<64x16xbf16> to vector<8x8x16xbf16>
    %c1_17 = arith.constant 1 : index
    %c1_18 = arith.constant 1 : index
    %c0_19 = arith.constant 0 : index
    %34 = vector.load %arg24[%c1_17, %c1_18, %c0_19] : memref<10x10x16xbf16, #tpu.memory_space<vmem>>, vector<8x8x16xbf16>
    tpu.vector_store %arg24[%c1_17, %c1_18, %c0_19], %33 {strides = array<i32>} : memref<10x10x16xbf16, #tpu.memory_space<vmem>>, vector<8x8x16xbf16>,
    %c0_20 = arith.constant 0 : index
    %c0_21 = arith.constant 0 : index
    %c0_22 = arith.constant 0 : index
    %35 = vector.load %arg24[%c0_20, %c0_21, %c0_22] : memref<10x10x16xbf16, #tpu.memory_space<vmem>>, vector<10x10x16xbf16>
    %36 = vector.extract_strided_slice %35 {offsets = [0, 0, 0], sizes = [8, 8, 16], strides = [1, 1, 1]} : vector<10x10x16xbf16> to vector<8x8x16xbf16>
    %37 = vector.shape_cast %36 : vector<8x8x16xbf16> to vector<64x16xbf16>
    %38 = vector.extract_strided_slice %35 {offsets = [0, 1, 0], sizes = [8, 8, 16], strides = [1, 1, 1]} : vector<10x10x16xbf16> to vector<8x8x16xbf16>
    %39 = vector.shape_cast %38 : vector<8x8x16xbf16> to vector<64x16xbf16>
    %40 = vector.extract_strided_slice %35 {offsets = [0, 2, 0], sizes = [8, 8, 16], strides = [1, 1, 1]} : vector<10x10x16xbf16> to vector<8x8x16xbf16>
    %41 = vector.shape_cast %40 : vector<8x8x16xbf16> to vector<64x16xbf16>
    %42 = vector.extract_strided_slice %35 {offsets = [1, 0, 0], sizes = [8, 8, 16], strides = [1, 1, 1]} : vector<10x10x16xbf16> to vector<8x8x16xbf16>
    %43 = vector.shape_cast %42 : vector<8x8x16xbf16> to vector<64x16xbf16>
    %44 = vector.extract_strided_slice %35 {offsets = [1, 1, 0], sizes = [8, 8, 16], strides = [1, 1, 1]} : vector<10x10x16xbf16> to vector<8x8x16xbf16>
    %45 = vector.shape_cast %44 : vector<8x8x16xbf16> to vector<64x16xbf16>
    %46 = vector.extract_strided_slice %35 {offsets = [1, 2, 0], sizes = [8, 8, 16], strides = [1, 1, 1]} : vector<10x10x16xbf16> to vector<8x8x16xbf16>
    %47 = vector.shape_cast %46 : vector<8x8x16xbf16> to vector<64x16xbf16>
    %48 = vector.extract_strided_slice %35 {offsets = [2, 0, 0], sizes = [8, 8, 16], strides = [1, 1, 1]} : vector<10x10x16xbf16> to vector<8x8x16xbf16>
    %49 = vector.shape_cast %48 : vector<8x8x16xbf16> to vector<64x16xbf16>
    %50 = vector.extract_strided_slice %35 {offsets = [2, 1, 0], sizes = [8, 8, 16], strides = [1, 1, 1]} : vector<10x10x16xbf16> to vector<8x8x16xbf16>
    %51 = vector.shape_cast %50 : vector<8x8x16xbf16> to vector<64x16xbf16>
    %52 = vector.extract_strided_slice %35 {offsets = [2, 2, 0], sizes = [8, 8, 16], strides = [1, 1, 1]} : vector<10x10x16xbf16> to vector<8x8x16xbf16>
    %53 = vector.shape_cast %52 : vector<8x8x16xbf16> to vector<64x16xbf16>
    %54 = tpu.concatenate %37, %39, %41, %43, %45, %47, %49, %51, %53 in 1 : vector<64x16xbf16>, vector<64x16xbf16>, vector<64x16xbf16>, vector<64x16xbf16>, vector<64x16xbf16>, vector<64x16xbf16>, vector<64x16xbf16>, vector<64x16xbf16>, vector<64x16xbf16> -> vector<64x144xbf16>
    %c0_23 = arith.constant 0 : index
    %c0_24 = arith.constant 0 : index
    %55 = vector.load %arg3[%c0_23, %c0_24] : memref<144x16xbf16, #tpu.memory_space<vmem>>, vector<144x16xbf16>
    %cst_25 = arith.constant dense<0.000000e+00> : vector<64x16xf32>
    %56 = tpu.matmul %54, %55, %cst_25 {dimension_numbers = #tpu.dot_dimension_numbers<[1], [0], [0], [1], [0, 0, 1, 1], [], []>} : vector<64x144xbf16>, vector<144x16xbf16>, vector<64x16xf32> -> vector<64x16xf32>
    %c0_26 = arith.constant 0 : index
    %c0_27 = arith.constant 0 : index
    %57 = vector.load %arg7[%c0_26, %c0_27] : memref<1x16xf32, #tpu.memory_space<vmem>>, vector<1x16xf32>
    %58 = vector.broadcast %57 : vector<1x16xf32> to vector<64x16xf32>
    %59 = arith.addf %56, %58 : vector<64x16xf32>
    %cst_28 = arith.constant 0.000000e+00 : f32
    %60 = vector.broadcast %cst_28 : f32 to vector<64x16xf32>
    %61 = arith.maximumf %59, %60 : vector<64x16xf32>
    %62 = arith.truncf %61 : vector<64x16xf32> to vector<64x16xbf16>
    %63 = vector.shape_cast %62 : vector<64x16xbf16> to vector<8x8x16xbf16>
    %c1_29 = arith.constant 1 : index
    %c1_30 = arith.constant 1 : index
    %c0_31 = arith.constant 0 : index
    %64 = vector.load %arg24[%c1_29, %c1_30, %c0_31] : memref<10x10x16xbf16, #tpu.memory_space<vmem>>, vector<8x8x16xbf16>
    tpu.vector_store %arg24[%c1_29, %c1_30, %c0_31], %63 {strides = array<i32>} : memref<10x10x16xbf16, #tpu.memory_space<vmem>>, vector<8x8x16xbf16>,
    %c0_32 = arith.constant 0 : index
    %c0_33 = arith.constant 0 : index
    %c0_34 = arith.constant 0 : index
    %65 = vector.load %arg24[%c0_32, %c0_33, %c0_34] : memref<10x10x16xbf16, #tpu.memory_space<vmem>>, vector<10x10x16xbf16>
    %66 = vector.extract_strided_slice %65 {offsets = [0, 0, 0], sizes = [8, 8, 16], strides = [1, 1, 1]} : vector<10x10x16xbf16> to vector<8x8x16xbf16>
    %67 = vector.shape_cast %66 : vector<8x8x16xbf16> to vector<64x16xbf16>
    %68 = vector.extract_strided_slice %65 {offsets = [0, 1, 0], sizes = [8, 8, 16], strides = [1, 1, 1]} : vector<10x10x16xbf16> to vector<8x8x16xbf16>
    %69 = vector.shape_cast %68 : vector<8x8x16xbf16> to vector<64x16xbf16>
    %70 = vector.extract_strided_slice %65 {offsets = [0, 2, 0], sizes = [8, 8, 16], strides = [1, 1, 1]} : vector<10x10x16xbf16> to vector<8x8x16xbf16>
    %71 = vector.shape_cast %70 : vector<8x8x16xbf16> to vector<64x16xbf16>
    %72 = vector.extract_strided_slice %65 {offsets = [1, 0, 0], sizes = [8, 8, 16], strides = [1, 1, 1]} : vector<10x10x16xbf16> to vector<8x8x16xbf16>
    %73 = vector.shape_cast %72 : vector<8x8x16xbf16> to vector<64x16xbf16>
    %74 = vector.extract_strided_slice %65 {offsets = [1, 1, 0], sizes = [8, 8, 16], strides = [1, 1, 1]} : vector<10x10x16xbf16> to vector<8x8x16xbf16>
    %75 = vector.shape_cast %74 : vector<8x8x16xbf16> to vector<64x16xbf16>
    %76 = vector.extract_strided_slice %65 {offsets = [1, 2, 0], sizes = [8, 8, 16], strides = [1, 1, 1]} : vector<10x10x16xbf16> to vector<8x8x16xbf16>
    %77 = vector.shape_cast %76 : vector<8x8x16xbf16> to vector<64x16xbf16>
    %78 = vector.extract_strided_slice %65 {offsets = [2, 0, 0], sizes = [8, 8, 16], strides = [1, 1, 1]} : vector<10x10x16xbf16> to vector<8x8x16xbf16>
    %79 = vector.shape_cast %78 : vector<8x8x16xbf16> to vector<64x16xbf16>
    %80 = vector.extract_strided_slice %65 {offsets = [2, 1, 0], sizes = [8, 8, 16], strides = [1, 1, 1]} : vector<10x10x16xbf16> to vector<8x8x16xbf16>
    %81 = vector.shape_cast %80 : vector<8x8x16xbf16> to vector<64x16xbf16>
    %82 = vector.extract_strided_slice %65 {offsets = [2, 2, 0], sizes = [8, 8, 16], strides = [1, 1, 1]} : vector<10x10x16xbf16> to vector<8x8x16xbf16>
    %83 = vector.shape_cast %82 : vector<8x8x16xbf16> to vector<64x16xbf16>
    %84 = tpu.concatenate %67, %69, %71, %73, %75, %77, %79, %81, %83 in 1 : vector<64x16xbf16>, vector<64x16xbf16>, vector<64x16xbf16>, vector<64x16xbf16>, vector<64x16xbf16>, vector<64x16xbf16>, vector<64x16xbf16>, vector<64x16xbf16>, vector<64x16xbf16> -> vector<64x144xbf16>
    %c0_35 = arith.constant 0 : index
    %c0_36 = arith.constant 0 : index
    %85 = vector.load %arg4[%c0_35, %c0_36] : memref<144x16xbf16, #tpu.memory_space<vmem>>, vector<144x16xbf16>
    %cst_37 = arith.constant dense<0.000000e+00> : vector<64x16xf32>
    %86 = tpu.matmul %84, %85, %cst_37 {dimension_numbers = #tpu.dot_dimension_numbers<[1], [0], [0], [1], [0, 0, 1, 1], [], []>} : vector<64x144xbf16>, vector<144x16xbf16>, vector<64x16xf32> -> vector<64x16xf32>
    %c0_38 = arith.constant 0 : index
    %c0_39 = arith.constant 0 : index
    %87 = vector.load %arg8[%c0_38, %c0_39] : memref<1x16xf32, #tpu.memory_space<vmem>>, vector<1x16xf32>
    %88 = vector.broadcast %87 : vector<1x16xf32> to vector<64x16xf32>
    %89 = arith.addf %86, %88 : vector<64x16xf32>
    %cst_40 = arith.constant 0.000000e+00 : f32
    %90 = vector.broadcast %cst_40 : f32 to vector<64x16xf32>
    %91 = arith.maximumf %89, %90 : vector<64x16xf32>
    %92 = arith.truncf %91 : vector<64x16xf32> to vector<64x16xbf16>
    %93 = vector.shape_cast %92 : vector<64x16xbf16> to vector<8x8x16xbf16>
    %c1_41 = arith.constant 1 : index
    %c1_42 = arith.constant 1 : index
    %c0_43 = arith.constant 0 : index
    %94 = vector.load %arg24[%c1_41, %c1_42, %c0_43] : memref<10x10x16xbf16, #tpu.memory_space<vmem>>, vector<8x8x16xbf16>
    tpu.vector_store %arg24[%c1_41, %c1_42, %c0_43], %93 {strides = array<i32>} : memref<10x10x16xbf16, #tpu.memory_space<vmem>>, vector<8x8x16xbf16>,
    %c0_44 = arith.constant 0 : index
    %c0_45 = arith.constant 0 : index
    %c0_46 = arith.constant 0 : index
    %95 = vector.load %arg24[%c0_44, %c0_45, %c0_46] : memref<10x10x16xbf16, #tpu.memory_space<vmem>>, vector<10x10x16xbf16>
    %96 = vector.extract_strided_slice %95 {offsets = [0, 0, 0], sizes = [8, 8, 16], strides = [1, 1, 1]} : vector<10x10x16xbf16> to vector<8x8x16xbf16>
    %97 = vector.shape_cast %96 : vector<8x8x16xbf16> to vector<64x16xbf16>
    %98 = vector.extract_strided_slice %95 {offsets = [0, 1, 0], sizes = [8, 8, 16], strides = [1, 1, 1]} : vector<10x10x16xbf16> to vector<8x8x16xbf16>
    %99 = vector.shape_cast %98 : vector<8x8x16xbf16> to vector<64x16xbf16>
    %100 = vector.extract_strided_slice %95 {offsets = [0, 2, 0], sizes = [8, 8, 16], strides = [1, 1, 1]} : vector<10x10x16xbf16> to vector<8x8x16xbf16>
    %101 = vector.shape_cast %100 : vector<8x8x16xbf16> to vector<64x16xbf16>
    %102 = vector.extract_strided_slice %95 {offsets = [1, 0, 0], sizes = [8, 8, 16], strides = [1, 1, 1]} : vector<10x10x16xbf16> to vector<8x8x16xbf16>
    %103 = vector.shape_cast %102 : vector<8x8x16xbf16> to vector<64x16xbf16>
    %104 = vector.extract_strided_slice %95 {offsets = [1, 1, 0], sizes = [8, 8, 16], strides = [1, 1, 1]} : vector<10x10x16xbf16> to vector<8x8x16xbf16>
    %105 = vector.shape_cast %104 : vector<8x8x16xbf16> to vector<64x16xbf16>
    %106 = vector.extract_strided_slice %95 {offsets = [1, 2, 0], sizes = [8, 8, 16], strides = [1, 1, 1]} : vector<10x10x16xbf16> to vector<8x8x16xbf16>
    %107 = vector.shape_cast %106 : vector<8x8x16xbf16> to vector<64x16xbf16>
    %108 = vector.extract_strided_slice %95 {offsets = [2, 0, 0], sizes = [8, 8, 16], strides = [1, 1, 1]} : vector<10x10x16xbf16> to vector<8x8x16xbf16>
    %109 = vector.shape_cast %108 : vector<8x8x16xbf16> to vector<64x16xbf16>
    %110 = vector.extract_strided_slice %95 {offsets = [2, 1, 0], sizes = [8, 8, 16], strides = [1, 1, 1]} : vector<10x10x16xbf16> to vector<8x8x16xbf16>
    %111 = vector.shape_cast %110 : vector<8x8x16xbf16> to vector<64x16xbf16>
    %112 = vector.extract_strided_slice %95 {offsets = [2, 2, 0], sizes = [8, 8, 16], strides = [1, 1, 1]} : vector<10x10x16xbf16> to vector<8x8x16xbf16>
    %113 = vector.shape_cast %112 : vector<8x8x16xbf16> to vector<64x16xbf16>
    %114 = tpu.concatenate %97, %99, %101, %103, %105, %107, %109, %111, %113 in 1 : vector<64x16xbf16>, vector<64x16xbf16>, vector<64x16xbf16>, vector<64x16xbf16>, vector<64x16xbf16>, vector<64x16xbf16>, vector<64x16xbf16>, vector<64x16xbf16>, vector<64x16xbf16> -> vector<64x144xbf16>
    %c0_47 = arith.constant 0 : index
    %c0_48 = arith.constant 0 : index
    %115 = vector.load %arg5[%c0_47, %c0_48] : memref<144x16xbf16, #tpu.memory_space<vmem>>, vector<144x16xbf16>
    %cst_49 = arith.constant dense<0.000000e+00> : vector<64x16xf32>
    %116 = tpu.matmul %114, %115, %cst_49 {dimension_numbers = #tpu.dot_dimension_numbers<[1], [0], [0], [1], [0, 0, 1, 1], [], []>} : vector<64x144xbf16>, vector<144x16xbf16>, vector<64x16xf32> -> vector<64x16xf32>
    %c0_50 = arith.constant 0 : index
    %c0_51 = arith.constant 0 : index
    %117 = vector.load %arg9[%c0_50, %c0_51] : memref<1x16xf32, #tpu.memory_space<vmem>>, vector<1x16xf32>
    %118 = vector.broadcast %117 : vector<1x16xf32> to vector<64x16xf32>
    %119 = arith.addf %116, %118 : vector<64x16xf32>
    %cst_52 = arith.constant 0.000000e+00 : f32
    %120 = vector.broadcast %cst_52 : f32 to vector<64x16xf32>
    %121 = arith.maximumf %119, %120 : vector<64x16xf32>
    %122 = arith.truncf %121 : vector<64x16xf32> to vector<64x16xbf16>
    %123 = vector.shape_cast %122 : vector<64x16xbf16> to vector<8x8x16xbf16>
    %c1_53 = arith.constant 1 : index
    %c1_54 = arith.constant 1 : index
    %c0_55 = arith.constant 0 : index
    %124 = vector.load %arg24[%c1_53, %c1_54, %c0_55] : memref<10x10x16xbf16, #tpu.memory_space<vmem>>, vector<8x8x16xbf16>
    tpu.vector_store %arg24[%c1_53, %c1_54, %c0_55], %123 {strides = array<i32>} : memref<10x10x16xbf16, #tpu.memory_space<vmem>>, vector<8x8x16xbf16>,
    %c0_56 = arith.constant 0 : index
    %c0_57 = arith.constant 0 : index
    %c0_58 = arith.constant 0 : index
    %125 = vector.load %arg24[%c0_56, %c0_57, %c0_58] : memref<10x10x16xbf16, #tpu.memory_space<vmem>>, vector<10x10x16xbf16>
    %126 = vector.extract_strided_slice %125 {offsets = [0, 0, 0], sizes = [8, 8, 16], strides = [1, 1, 1]} : vector<10x10x16xbf16> to vector<8x8x16xbf16>
    %127 = vector.shape_cast %126 : vector<8x8x16xbf16> to vector<64x16xbf16>
    %128 = vector.extract_strided_slice %125 {offsets = [0, 1, 0], sizes = [8, 8, 16], strides = [1, 1, 1]} : vector<10x10x16xbf16> to vector<8x8x16xbf16>
    %129 = vector.shape_cast %128 : vector<8x8x16xbf16> to vector<64x16xbf16>
    %130 = vector.extract_strided_slice %125 {offsets = [0, 2, 0], sizes = [8, 8, 16], strides = [1, 1, 1]} : vector<10x10x16xbf16> to vector<8x8x16xbf16>
    %131 = vector.shape_cast %130 : vector<8x8x16xbf16> to vector<64x16xbf16>
    %132 = vector.extract_strided_slice %125 {offsets = [1, 0, 0], sizes = [8, 8, 16], strides = [1, 1, 1]} : vector<10x10x16xbf16> to vector<8x8x16xbf16>
    %133 = vector.shape_cast %132 : vector<8x8x16xbf16> to vector<64x16xbf16>
    %134 = vector.extract_strided_slice %125 {offsets = [1, 1, 0], sizes = [8, 8, 16], strides = [1, 1, 1]} : vector<10x10x16xbf16> to vector<8x8x16xbf16>
    %135 = vector.shape_cast %134 : vector<8x8x16xbf16> to vector<64x16xbf16>
    %136 = vector.extract_strided_slice %125 {offsets = [1, 2, 0], sizes = [8, 8, 16], strides = [1, 1, 1]} : vector<10x10x16xbf16> to vector<8x8x16xbf16>
    %137 = vector.shape_cast %136 : vector<8x8x16xbf16> to vector<64x16xbf16>
    %138 = vector.extract_strided_slice %125 {offsets = [2, 0, 0], sizes = [8, 8, 16], strides = [1, 1, 1]} : vector<10x10x16xbf16> to vector<8x8x16xbf16>
    %139 = vector.shape_cast %138 : vector<8x8x16xbf16> to vector<64x16xbf16>
    %140 = vector.extract_strided_slice %125 {offsets = [2, 1, 0], sizes = [8, 8, 16], strides = [1, 1, 1]} : vector<10x10x16xbf16> to vector<8x8x16xbf16>
    %141 = vector.shape_cast %140 : vector<8x8x16xbf16> to vector<64x16xbf16>
    %142 = vector.extract_strided_slice %125 {offsets = [2, 2, 0], sizes = [8, 8, 16], strides = [1, 1, 1]} : vector<10x10x16xbf16> to vector<8x8x16xbf16>
    %143 = vector.shape_cast %142 : vector<8x8x16xbf16> to vector<64x16xbf16>
    %144 = tpu.concatenate %127, %129, %131, %133, %135, %137, %139, %141, %143 in 1 : vector<64x16xbf16>, vector<64x16xbf16>, vector<64x16xbf16>, vector<64x16xbf16>, vector<64x16xbf16>, vector<64x16xbf16>, vector<64x16xbf16>, vector<64x16xbf16>, vector<64x16xbf16> -> vector<64x144xbf16>
    %c0_59 = arith.constant 0 : index
    %c0_60 = arith.constant 0 : index
    %145 = vector.load %arg18[%c0_59, %c0_60] : memref<144x768xbf16, #tpu.memory_space<vmem>>, vector<144x768xbf16>
    %cst_61 = arith.constant dense<0.000000e+00> : vector<64x768xf32>
    %146 = tpu.matmul %144, %145, %cst_61 {dimension_numbers = #tpu.dot_dimension_numbers<[1], [0], [0], [1], [0, 0, 1, 1], [], []>} : vector<64x144xbf16>, vector<144x768xbf16>, vector<64x768xf32> -> vector<64x768xf32>
    %c0_62 = arith.constant 0 : index
    %c0_63 = arith.constant 0 : index
    %147 = vector.load %arg19[%c0_62, %c0_63] : memref<1x768xf32, #tpu.memory_space<vmem>>, vector<1x768xf32>
    %148 = vector.broadcast %147 : vector<1x768xf32> to vector<64x768xf32>
    %149 = arith.addf %146, %148 : vector<64x768xf32>
    %c0_64 = arith.constant 0 : index
    %c0_65 = arith.constant 0 : index
    %c0_66 = arith.constant 0 : index
    %150 = vector.load %arg22[%c0_64, %c0_65, %c0_66] : memref<1x64x768xf32, #tpu.memory_space<vmem>>, vector<1x64x768xf32>
    %151 = vector.shape_cast %150 : vector<1x64x768xf32> to vector<64x768xf32>
    %152 = vector.shape_cast %149 : vector<64x768xf32> to vector<1x64x768xf32>
    tpu.vector_store %arg22[%c0_64, %c0_65, %c0_66], %152 {strides = array<i32>} : memref<1x64x768xf32, #tpu.memory_space<vmem>>, vector<1x64x768xf32>,
    %c0_67 = arith.constant 0 : index
    %c0_68 = arith.constant 0 : index
    %c0_69 = arith.constant 0 : index
    %c0_70 = arith.constant 0 : index
    %153 = vector.load %arg1[%c0_67, %c0_68, %c0_69, %c0_70] : memref<1x8x8x16xbf16, #tpu.memory_space<vmem>>, vector<1x8x8x16xbf16>
    %154 = vector.shape_cast %153 : vector<1x8x8x16xbf16> to vector<8x8x16xbf16>
    %c1_71 = arith.constant 1 : index
    %c1_72 = arith.constant 1 : index
    %c0_73 = arith.constant 0 : index
    %155 = vector.load %arg24[%c1_71, %c1_72, %c0_73] : memref<10x10x16xbf16, #tpu.memory_space<vmem>>, vector<8x8x16xbf16>
    tpu.vector_store %arg24[%c1_71, %c1_72, %c0_73], %154 {strides = array<i32>} : memref<10x10x16xbf16, #tpu.memory_space<vmem>>, vector<8x8x16xbf16>,
    %c0_74 = arith.constant 0 : index
    %c0_75 = arith.constant 0 : index
    %c0_76 = arith.constant 0 : index
    %156 = vector.load %arg24[%c0_74, %c0_75, %c0_76] : memref<10x10x16xbf16, #tpu.memory_space<vmem>>, vector<10x10x16xbf16>
    %157 = vector.extract_strided_slice %156 {offsets = [0, 0, 0], sizes = [8, 8, 16], strides = [1, 1, 1]} : vector<10x10x16xbf16> to vector<8x8x16xbf16>
    %158 = vector.shape_cast %157 : vector<8x8x16xbf16> to vector<64x16xbf16>
    %159 = vector.extract_strided_slice %156 {offsets = [0, 1, 0], sizes = [8, 8, 16], strides = [1, 1, 1]} : vector<10x10x16xbf16> to vector<8x8x16xbf16>
    %160 = vector.shape_cast %159 : vector<8x8x16xbf16> to vector<64x16xbf16>
    %161 = vector.extract_strided_slice %156 {offsets = [0, 2, 0], sizes = [8, 8, 16], strides = [1, 1, 1]} : vector<10x10x16xbf16> to vector<8x8x16xbf16>
    %162 = vector.shape_cast %161 : vector<8x8x16xbf16> to vector<64x16xbf16>
    %163 = vector.extract_strided_slice %156 {offsets = [1, 0, 0], sizes = [8, 8, 16], strides = [1, 1, 1]} : vector<10x10x16xbf16> to vector<8x8x16xbf16>
    %164 = vector.shape_cast %163 : vector<8x8x16xbf16> to vector<64x16xbf16>
    %165 = vector.extract_strided_slice %156 {offsets = [1, 1, 0], sizes = [8, 8, 16], strides = [1, 1, 1]} : vector<10x10x16xbf16> to vector<8x8x16xbf16>
    %166 = vector.shape_cast %165 : vector<8x8x16xbf16> to vector<64x16xbf16>
    %167 = vector.extract_strided_slice %156 {offsets = [1, 2, 0], sizes = [8, 8, 16], strides = [1, 1, 1]} : vector<10x10x16xbf16> to vector<8x8x16xbf16>
    %168 = vector.shape_cast %167 : vector<8x8x16xbf16> to vector<64x16xbf16>
    %169 = vector.extract_strided_slice %156 {offsets = [2, 0, 0], sizes = [8, 8, 16], strides = [1, 1, 1]} : vector<10x10x16xbf16> to vector<8x8x16xbf16>
    %170 = vector.shape_cast %169 : vector<8x8x16xbf16> to vector<64x16xbf16>
    %171 = vector.extract_strided_slice %156 {offsets = [2, 1, 0], sizes = [8, 8, 16], strides = [1, 1, 1]} : vector<10x10x16xbf16> to vector<8x8x16xbf16>
    %172 = vector.shape_cast %171 : vector<8x8x16xbf16> to vector<64x16xbf16>
    %173 = vector.extract_strided_slice %156 {offsets = [2, 2, 0], sizes = [8, 8, 16], strides = [1, 1, 1]} : vector<10x10x16xbf16> to vector<8x8x16xbf16>
    %174 = vector.shape_cast %173 : vector<8x8x16xbf16> to vector<64x16xbf16>
    %175 = tpu.concatenate %158, %160, %162, %164, %166, %168, %170, %172, %174 in 1 : vector<64x16xbf16>, vector<64x16xbf16>, vector<64x16xbf16>, vector<64x16xbf16>, vector<64x16xbf16>, vector<64x16xbf16>, vector<64x16xbf16>, vector<64x16xbf16>, vector<64x16xbf16> -> vector<64x144xbf16>
    %c0_77 = arith.constant 0 : index
    %c0_78 = arith.constant 0 : index
    %176 = vector.load %arg10[%c0_77, %c0_78] : memref<144x16xbf16, #tpu.memory_space<vmem>>, vector<144x16xbf16>
    %cst_79 = arith.constant dense<0.000000e+00> : vector<64x16xf32>
    %177 = tpu.matmul %175, %176, %cst_79 {dimension_numbers = #tpu.dot_dimension_numbers<[1], [0], [0], [1], [0, 0, 1, 1], [], []>} : vector<64x144xbf16>, vector<144x16xbf16>, vector<64x16xf32> -> vector<64x16xf32>
    %c0_80 = arith.constant 0 : index
    %c0_81 = arith.constant 0 : index
    %178 = vector.load %arg14[%c0_80, %c0_81] : memref<1x16xf32, #tpu.memory_space<vmem>>, vector<1x16xf32>
    %179 = vector.broadcast %178 : vector<1x16xf32> to vector<64x16xf32>
    %180 = arith.addf %177, %179 : vector<64x16xf32>
    %cst_82 = arith.constant 0.000000e+00 : f32
    %181 = vector.broadcast %cst_82 : f32 to vector<64x16xf32>
    %182 = arith.maximumf %180, %181 : vector<64x16xf32>
    %183 = arith.truncf %182 : vector<64x16xf32> to vector<64x16xbf16>
    %184 = vector.shape_cast %183 : vector<64x16xbf16> to vector<8x8x16xbf16>
    %c1_83 = arith.constant 1 : index
    %c1_84 = arith.constant 1 : index
    %c0_85 = arith.constant 0 : index
    %185 = vector.load %arg24[%c1_83, %c1_84, %c0_85] : memref<10x10x16xbf16, #tpu.memory_space<vmem>>, vector<8x8x16xbf16>
    tpu.vector_store %arg24[%c1_83, %c1_84, %c0_85], %184 {strides = array<i32>} : memref<10x10x16xbf16, #tpu.memory_space<vmem>>, vector<8x8x16xbf16>,
    %c0_86 = arith.constant 0 : index
    %c0_87 = arith.constant 0 : index
    %c0_88 = arith.constant 0 : index
    %186 = vector.load %arg24[%c0_86, %c0_87, %c0_88] : memref<10x10x16xbf16, #tpu.memory_space<vmem>>, vector<10x10x16xbf16>
    %187 = vector.extract_strided_slice %186 {offsets = [0, 0, 0], sizes = [8, 8, 16], strides = [1, 1, 1]} : vector<10x10x16xbf16> to vector<8x8x16xbf16>
    %188 = vector.shape_cast %187 : vector<8x8x16xbf16> to vector<64x16xbf16>
    %189 = vector.extract_strided_slice %186 {offsets = [0, 1, 0], sizes = [8, 8, 16], strides = [1, 1, 1]} : vector<10x10x16xbf16> to vector<8x8x16xbf16>
    %190 = vector.shape_cast %189 : vector<8x8x16xbf16> to vector<64x16xbf16>
    %191 = vector.extract_strided_slice %186 {offsets = [0, 2, 0], sizes = [8, 8, 16], strides = [1, 1, 1]} : vector<10x10x16xbf16> to vector<8x8x16xbf16>
    %192 = vector.shape_cast %191 : vector<8x8x16xbf16> to vector<64x16xbf16>
    %193 = vector.extract_strided_slice %186 {offsets = [1, 0, 0], sizes = [8, 8, 16], strides = [1, 1, 1]} : vector<10x10x16xbf16> to vector<8x8x16xbf16>
    %194 = vector.shape_cast %193 : vector<8x8x16xbf16> to vector<64x16xbf16>
    %195 = vector.extract_strided_slice %186 {offsets = [1, 1, 0], sizes = [8, 8, 16], strides = [1, 1, 1]} : vector<10x10x16xbf16> to vector<8x8x16xbf16>
    %196 = vector.shape_cast %195 : vector<8x8x16xbf16> to vector<64x16xbf16>
    %197 = vector.extract_strided_slice %186 {offsets = [1, 2, 0], sizes = [8, 8, 16], strides = [1, 1, 1]} : vector<10x10x16xbf16> to vector<8x8x16xbf16>
    %198 = vector.shape_cast %197 : vector<8x8x16xbf16> to vector<64x16xbf16>
    %199 = vector.extract_strided_slice %186 {offsets = [2, 0, 0], sizes = [8, 8, 16], strides = [1, 1, 1]} : vector<10x10x16xbf16> to vector<8x8x16xbf16>
    %200 = vector.shape_cast %199 : vector<8x8x16xbf16> to vector<64x16xbf16>
    %201 = vector.extract_strided_slice %186 {offsets = [2, 1, 0], sizes = [8, 8, 16], strides = [1, 1, 1]} : vector<10x10x16xbf16> to vector<8x8x16xbf16>
    %202 = vector.shape_cast %201 : vector<8x8x16xbf16> to vector<64x16xbf16>
    %203 = vector.extract_strided_slice %186 {offsets = [2, 2, 0], sizes = [8, 8, 16], strides = [1, 1, 1]} : vector<10x10x16xbf16> to vector<8x8x16xbf16>
    %204 = vector.shape_cast %203 : vector<8x8x16xbf16> to vector<64x16xbf16>
    %205 = tpu.concatenate %188, %190, %192, %194, %196, %198, %200, %202, %204 in 1 : vector<64x16xbf16>, vector<64x16xbf16>, vector<64x16xbf16>, vector<64x16xbf16>, vector<64x16xbf16>, vector<64x16xbf16>, vector<64x16xbf16>, vector<64x16xbf16>, vector<64x16xbf16> -> vector<64x144xbf16>
    %c0_89 = arith.constant 0 : index
    %c0_90 = arith.constant 0 : index
    %206 = vector.load %arg11[%c0_89, %c0_90] : memref<144x16xbf16, #tpu.memory_space<vmem>>, vector<144x16xbf16>
    %cst_91 = arith.constant dense<0.000000e+00> : vector<64x16xf32>
    %207 = tpu.matmul %205, %206, %cst_91 {dimension_numbers = #tpu.dot_dimension_numbers<[1], [0], [0], [1], [0, 0, 1, 1], [], []>} : vector<64x144xbf16>, vector<144x16xbf16>, vector<64x16xf32> -> vector<64x16xf32>
    %c0_92 = arith.constant 0 : index
    %c0_93 = arith.constant 0 : index
    %208 = vector.load %arg15[%c0_92, %c0_93] : memref<1x16xf32, #tpu.memory_space<vmem>>, vector<1x16xf32>
    %209 = vector.broadcast %208 : vector<1x16xf32> to vector<64x16xf32>
    %210 = arith.addf %207, %209 : vector<64x16xf32>
    %cst_94 = arith.constant 0.000000e+00 : f32
    %211 = vector.broadcast %cst_94 : f32 to vector<64x16xf32>
    %212 = arith.maximumf %210, %211 : vector<64x16xf32>
    %213 = arith.truncf %212 : vector<64x16xf32> to vector<64x16xbf16>
    %214 = vector.shape_cast %213 : vector<64x16xbf16> to vector<8x8x16xbf16>
    %c1_95 = arith.constant 1 : index
    %c1_96 = arith.constant 1 : index
    %c0_97 = arith.constant 0 : index
    %215 = vector.load %arg24[%c1_95, %c1_96, %c0_97] : memref<10x10x16xbf16, #tpu.memory_space<vmem>>, vector<8x8x16xbf16>
    tpu.vector_store %arg24[%c1_95, %c1_96, %c0_97], %214 {strides = array<i32>} : memref<10x10x16xbf16, #tpu.memory_space<vmem>>, vector<8x8x16xbf16>,
    %c0_98 = arith.constant 0 : index
    %c0_99 = arith.constant 0 : index
    %c0_100 = arith.constant 0 : index
    %216 = vector.load %arg24[%c0_98, %c0_99, %c0_100] : memref<10x10x16xbf16, #tpu.memory_space<vmem>>, vector<10x10x16xbf16>
    %217 = vector.extract_strided_slice %216 {offsets = [0, 0, 0], sizes = [8, 8, 16], strides = [1, 1, 1]} : vector<10x10x16xbf16> to vector<8x8x16xbf16>
    %218 = vector.shape_cast %217 : vector<8x8x16xbf16> to vector<64x16xbf16>
    %219 = vector.extract_strided_slice %216 {offsets = [0, 1, 0], sizes = [8, 8, 16], strides = [1, 1, 1]} : vector<10x10x16xbf16> to vector<8x8x16xbf16>
    %220 = vector.shape_cast %219 : vector<8x8x16xbf16> to vector<64x16xbf16>
    %221 = vector.extract_strided_slice %216 {offsets = [0, 2, 0], sizes = [8, 8, 16], strides = [1, 1, 1]} : vector<10x10x16xbf16> to vector<8x8x16xbf16>
    %222 = vector.shape_cast %221 : vector<8x8x16xbf16> to vector<64x16xbf16>
    %223 = vector.extract_strided_slice %216 {offsets = [1, 0, 0], sizes = [8, 8, 16], strides = [1, 1, 1]} : vector<10x10x16xbf16> to vector<8x8x16xbf16>
    %224 = vector.shape_cast %223 : vector<8x8x16xbf16> to vector<64x16xbf16>
    %225 = vector.extract_strided_slice %216 {offsets = [1, 1, 0], sizes = [8, 8, 16], strides = [1, 1, 1]} : vector<10x10x16xbf16> to vector<8x8x16xbf16>
    %226 = vector.shape_cast %225 : vector<8x8x16xbf16> to vector<64x16xbf16>
    %227 = vector.extract_strided_slice %216 {offsets = [1, 2, 0], sizes = [8, 8, 16], strides = [1, 1, 1]} : vector<10x10x16xbf16> to vector<8x8x16xbf16>
    %228 = vector.shape_cast %227 : vector<8x8x16xbf16> to vector<64x16xbf16>
    %229 = vector.extract_strided_slice %216 {offsets = [2, 0, 0], sizes = [8, 8, 16], strides = [1, 1, 1]} : vector<10x10x16xbf16> to vector<8x8x16xbf16>
    %230 = vector.shape_cast %229 : vector<8x8x16xbf16> to vector<64x16xbf16>
    %231 = vector.extract_strided_slice %216 {offsets = [2, 1, 0], sizes = [8, 8, 16], strides = [1, 1, 1]} : vector<10x10x16xbf16> to vector<8x8x16xbf16>
    %232 = vector.shape_cast %231 : vector<8x8x16xbf16> to vector<64x16xbf16>
    %233 = vector.extract_strided_slice %216 {offsets = [2, 2, 0], sizes = [8, 8, 16], strides = [1, 1, 1]} : vector<10x10x16xbf16> to vector<8x8x16xbf16>
    %234 = vector.shape_cast %233 : vector<8x8x16xbf16> to vector<64x16xbf16>
    %235 = tpu.concatenate %218, %220, %222, %224, %226, %228, %230, %232, %234 in 1 : vector<64x16xbf16>, vector<64x16xbf16>, vector<64x16xbf16>, vector<64x16xbf16>, vector<64x16xbf16>, vector<64x16xbf16>, vector<64x16xbf16>, vector<64x16xbf16>, vector<64x16xbf16> -> vector<64x144xbf16>
    %c0_101 = arith.constant 0 : index
    %c0_102 = arith.constant 0 : index
    %236 = vector.load %arg12[%c0_101, %c0_102] : memref<144x16xbf16, #tpu.memory_space<vmem>>, vector<144x16xbf16>
    %cst_103 = arith.constant dense<0.000000e+00> : vector<64x16xf32>
    %237 = tpu.matmul %235, %236, %cst_103 {dimension_numbers = #tpu.dot_dimension_numbers<[1], [0], [0], [1], [0, 0, 1, 1], [], []>} : vector<64x144xbf16>, vector<144x16xbf16>, vector<64x16xf32> -> vector<64x16xf32>
    %c0_104 = arith.constant 0 : index
    %c0_105 = arith.constant 0 : index
    %238 = vector.load %arg16[%c0_104, %c0_105] : memref<1x16xf32, #tpu.memory_space<vmem>>, vector<1x16xf32>
    %239 = vector.broadcast %238 : vector<1x16xf32> to vector<64x16xf32>
    %240 = arith.addf %237, %239 : vector<64x16xf32>
    %cst_106 = arith.constant 0.000000e+00 : f32
    %241 = vector.broadcast %cst_106 : f32 to vector<64x16xf32>
    %242 = arith.maximumf %240, %241 : vector<64x16xf32>
    %243 = arith.truncf %242 : vector<64x16xf32> to vector<64x16xbf16>
    %244 = vector.shape_cast %243 : vector<64x16xbf16> to vector<8x8x16xbf16>
    %c1_107 = arith.constant 1 : index
    %c1_108 = arith.constant 1 : index
    %c0_109 = arith.constant 0 : index
    %245 = vector.load %arg24[%c1_107, %c1_108, %c0_109] : memref<10x10x16xbf16, #tpu.memory_space<vmem>>, vector<8x8x16xbf16>
    tpu.vector_store %arg24[%c1_107, %c1_108, %c0_109], %244 {strides = array<i32>} : memref<10x10x16xbf16, #tpu.memory_space<vmem>>, vector<8x8x16xbf16>,
    %c0_110 = arith.constant 0 : index
    %c0_111 = arith.constant 0 : index
    %c0_112 = arith.constant 0 : index
    %246 = vector.load %arg24[%c0_110, %c0_111, %c0_112] : memref<10x10x16xbf16, #tpu.memory_space<vmem>>, vector<10x10x16xbf16>
    %247 = vector.extract_strided_slice %246 {offsets = [0, 0, 0], sizes = [8, 8, 16], strides = [1, 1, 1]} : vector<10x10x16xbf16> to vector<8x8x16xbf16>
    %248 = vector.shape_cast %247 : vector<8x8x16xbf16> to vector<64x16xbf16>
    %249 = vector.extract_strided_slice %246 {offsets = [0, 1, 0], sizes = [8, 8, 16], strides = [1, 1, 1]} : vector<10x10x16xbf16> to vector<8x8x16xbf16>
    %250 = vector.shape_cast %249 : vector<8x8x16xbf16> to vector<64x16xbf16>
    %251 = vector.extract_strided_slice %246 {offsets = [0, 2, 0], sizes = [8, 8, 16], strides = [1, 1, 1]} : vector<10x10x16xbf16> to vector<8x8x16xbf16>
    %252 = vector.shape_cast %251 : vector<8x8x16xbf16> to vector<64x16xbf16>
    %253 = vector.extract_strided_slice %246 {offsets = [1, 0, 0], sizes = [8, 8, 16], strides = [1, 1, 1]} : vector<10x10x16xbf16> to vector<8x8x16xbf16>
    %254 = vector.shape_cast %253 : vector<8x8x16xbf16> to vector<64x16xbf16>
    %255 = vector.extract_strided_slice %246 {offsets = [1, 1, 0], sizes = [8, 8, 16], strides = [1, 1, 1]} : vector<10x10x16xbf16> to vector<8x8x16xbf16>
    %256 = vector.shape_cast %255 : vector<8x8x16xbf16> to vector<64x16xbf16>
    %257 = vector.extract_strided_slice %246 {offsets = [1, 2, 0], sizes = [8, 8, 16], strides = [1, 1, 1]} : vector<10x10x16xbf16> to vector<8x8x16xbf16>
    %258 = vector.shape_cast %257 : vector<8x8x16xbf16> to vector<64x16xbf16>
    %259 = vector.extract_strided_slice %246 {offsets = [2, 0, 0], sizes = [8, 8, 16], strides = [1, 1, 1]} : vector<10x10x16xbf16> to vector<8x8x16xbf16>
    %260 = vector.shape_cast %259 : vector<8x8x16xbf16> to vector<64x16xbf16>
    %261 = vector.extract_strided_slice %246 {offsets = [2, 1, 0], sizes = [8, 8, 16], strides = [1, 1, 1]} : vector<10x10x16xbf16> to vector<8x8x16xbf16>
    %262 = vector.shape_cast %261 : vector<8x8x16xbf16> to vector<64x16xbf16>
    %263 = vector.extract_strided_slice %246 {offsets = [2, 2, 0], sizes = [8, 8, 16], strides = [1, 1, 1]} : vector<10x10x16xbf16> to vector<8x8x16xbf16>
    %264 = vector.shape_cast %263 : vector<8x8x16xbf16> to vector<64x16xbf16>
    %265 = tpu.concatenate %248, %250, %252, %254, %256, %258, %260, %262, %264 in 1 : vector<64x16xbf16>, vector<64x16xbf16>, vector<64x16xbf16>, vector<64x16xbf16>, vector<64x16xbf16>, vector<64x16xbf16>, vector<64x16xbf16>, vector<64x16xbf16>, vector<64x16xbf16> -> vector<64x144xbf16>
    %c0_113 = arith.constant 0 : index
    %c0_114 = arith.constant 0 : index
    %266 = vector.load %arg13[%c0_113, %c0_114] : memref<144x16xbf16, #tpu.memory_space<vmem>>, vector<144x16xbf16>
    %cst_115 = arith.constant dense<0.000000e+00> : vector<64x16xf32>
    %267 = tpu.matmul %265, %266, %cst_115 {dimension_numbers = #tpu.dot_dimension_numbers<[1], [0], [0], [1], [0, 0, 1, 1], [], []>} : vector<64x144xbf16>, vector<144x16xbf16>, vector<64x16xf32> -> vector<64x16xf32>
    %c0_116 = arith.constant 0 : index
    %c0_117 = arith.constant 0 : index
    %268 = vector.load %arg17[%c0_116, %c0_117] : memref<1x16xf32, #tpu.memory_space<vmem>>, vector<1x16xf32>
    %269 = vector.broadcast %268 : vector<1x16xf32> to vector<64x16xf32>
    %270 = arith.addf %267, %269 : vector<64x16xf32>
    %cst_118 = arith.constant 0.000000e+00 : f32
    %271 = vector.broadcast %cst_118 : f32 to vector<64x16xf32>
    %272 = arith.maximumf %270, %271 : vector<64x16xf32>
    %273 = arith.truncf %272 : vector<64x16xf32> to vector<64x16xbf16>
    %274 = vector.shape_cast %273 : vector<64x16xbf16> to vector<8x8x16xbf16>
    %c1_119 = arith.constant 1 : index
    %c1_120 = arith.constant 1 : index
    %c0_121 = arith.constant 0 : index
    %275 = vector.load %arg24[%c1_119, %c1_120, %c0_121] : memref<10x10x16xbf16, #tpu.memory_space<vmem>>, vector<8x8x16xbf16>
    tpu.vector_store %arg24[%c1_119, %c1_120, %c0_121], %274 {strides = array<i32>} : memref<10x10x16xbf16, #tpu.memory_space<vmem>>, vector<8x8x16xbf16>,
    %c0_122 = arith.constant 0 : index
    %c0_123 = arith.constant 0 : index
    %c0_124 = arith.constant 0 : index
    %276 = vector.load %arg24[%c0_122, %c0_123, %c0_124] : memref<10x10x16xbf16, #tpu.memory_space<vmem>>, vector<10x10x16xbf16>
    %277 = vector.extract_strided_slice %276 {offsets = [0, 0, 0], sizes = [8, 8, 16], strides = [1, 1, 1]} : vector<10x10x16xbf16> to vector<8x8x16xbf16>
    %278 = vector.shape_cast %277 : vector<8x8x16xbf16> to vector<64x16xbf16>
    %279 = vector.extract_strided_slice %276 {offsets = [0, 1, 0], sizes = [8, 8, 16], strides = [1, 1, 1]} : vector<10x10x16xbf16> to vector<8x8x16xbf16>
    %280 = vector.shape_cast %279 : vector<8x8x16xbf16> to vector<64x16xbf16>
    %281 = vector.extract_strided_slice %276 {offsets = [0, 2, 0], sizes = [8, 8, 16], strides = [1, 1, 1]} : vector<10x10x16xbf16> to vector<8x8x16xbf16>
    %282 = vector.shape_cast %281 : vector<8x8x16xbf16> to vector<64x16xbf16>
    %283 = vector.extract_strided_slice %276 {offsets = [1, 0, 0], sizes = [8, 8, 16], strides = [1, 1, 1]} : vector<10x10x16xbf16> to vector<8x8x16xbf16>
    %284 = vector.shape_cast %283 : vector<8x8x16xbf16> to vector<64x16xbf16>
    %285 = vector.extract_strided_slice %276 {offsets = [1, 1, 0], sizes = [8, 8, 16], strides = [1, 1, 1]} : vector<10x10x16xbf16> to vector<8x8x16xbf16>
    %286 = vector.shape_cast %285 : vector<8x8x16xbf16> to vector<64x16xbf16>
    %287 = vector.extract_strided_slice %276 {offsets = [1, 2, 0], sizes = [8, 8, 16], strides = [1, 1, 1]} : vector<10x10x16xbf16> to vector<8x8x16xbf16>
    %288 = vector.shape_cast %287 : vector<8x8x16xbf16> to vector<64x16xbf16>
    %289 = vector.extract_strided_slice %276 {offsets = [2, 0, 0], sizes = [8, 8, 16], strides = [1, 1, 1]} : vector<10x10x16xbf16> to vector<8x8x16xbf16>
    %290 = vector.shape_cast %289 : vector<8x8x16xbf16> to vector<64x16xbf16>
    %291 = vector.extract_strided_slice %276 {offsets = [2, 1, 0], sizes = [8, 8, 16], strides = [1, 1, 1]} : vector<10x10x16xbf16> to vector<8x8x16xbf16>
    %292 = vector.shape_cast %291 : vector<8x8x16xbf16> to vector<64x16xbf16>
    %293 = vector.extract_strided_slice %276 {offsets = [2, 2, 0], sizes = [8, 8, 16], strides = [1, 1, 1]} : vector<10x10x16xbf16> to vector<8x8x16xbf16>
    %294 = vector.shape_cast %293 : vector<8x8x16xbf16> to vector<64x16xbf16>
    %295 = tpu.concatenate %278, %280, %282, %284, %286, %288, %290, %292, %294 in 1 : vector<64x16xbf16>, vector<64x16xbf16>, vector<64x16xbf16>, vector<64x16xbf16>, vector<64x16xbf16>, vector<64x16xbf16>, vector<64x16xbf16>, vector<64x16xbf16>, vector<64x16xbf16> -> vector<64x144xbf16>
    %c0_125 = arith.constant 0 : index
    %c0_126 = arith.constant 0 : index
    %296 = vector.load %arg20[%c0_125, %c0_126] : memref<144x128xbf16, #tpu.memory_space<vmem>>, vector<144x128xbf16>
    %cst_127 = arith.constant dense<0.000000e+00> : vector<64x128xf32>
    %297 = tpu.matmul %295, %296, %cst_127 {dimension_numbers = #tpu.dot_dimension_numbers<[1], [0], [0], [1], [0, 0, 1, 1], [], []>} : vector<64x144xbf16>, vector<144x128xbf16>, vector<64x128xf32> -> vector<64x128xf32>
    %c0_128 = arith.constant 0 : index
    %c0_129 = arith.constant 0 : index
    %298 = vector.load %arg21[%c0_128, %c0_129] : memref<1x128xf32, #tpu.memory_space<vmem>>, vector<1x128xf32>
    %299 = vector.broadcast %298 : vector<1x128xf32> to vector<64x128xf32>
    %300 = arith.addf %297, %299 : vector<64x128xf32>
    %c0_130 = arith.constant 0 : index
    %c0_131 = arith.constant 0 : index
    %c0_132 = arith.constant 0 : index
    %301 = vector.load %arg23[%c0_130, %c0_131, %c0_132] : memref<1x64x128xf32, #tpu.memory_space<vmem>>, vector<1x64x128xf32>
    %302 = vector.shape_cast %301 : vector<1x64x128xf32> to vector<64x128xf32>
    %303 = vector.shape_cast %300 : vector<64x128xf32> to vector<1x64x128xf32>
    tpu.vector_store %arg23[%c0_130, %c0_131, %c0_132], %303 {strides = array<i32>} : memref<1x64x128xf32, #tpu.memory_space<vmem>>, vector<1x64x128xf32>,
    return
  }
  func.func @transform_0(%arg0: i32) -> (i32, i32, i32, i32) {
    %c0_i32 = arith.constant 0 : i32
    %c0_i32_0 = arith.constant 0 : i32
    %c0_i32_1 = arith.constant 0 : i32
    %c0_i32_2 = arith.constant 0 : i32
    return %arg0, %c0_i32, %c0_i32_0, %c0_i32_1 : i32, i32, i32, i32
  }
  func.func @transform_1(%arg0: i32) -> (i32, i32) {
    %c0_i32 = arith.constant 0 : i32
    %c0_i32_0 = arith.constant 0 : i32
    %c0_i32_1 = arith.constant 0 : i32
    return %c0_i32, %c0_i32_0 : i32, i32
  }
  func.func @transform_2(%arg0: i32) -> (i32, i32) {
    %c0_i32 = arith.constant 0 : i32
    %c0_i32_0 = arith.constant 0 : i32
    %c0_i32_1 = arith.constant 0 : i32
    return %c0_i32, %c0_i32_0 : i32, i32
  }
  func.func @transform_3(%arg0: i32) -> (i32, i32) {
    %c0_i32 = arith.constant 0 : i32
    %c0_i32_0 = arith.constant 0 : i32
    %c0_i32_1 = arith.constant 0 : i32
    return %c0_i32, %c0_i32_0 : i32, i32
  }
  func.func @transform_4(%arg0: i32) -> (i32, i32) {
    %c0_i32 = arith.constant 0 : i32
    %c0_i32_0 = arith.constant 0 : i32
    %c0_i32_1 = arith.constant 0 : i32
    return %c0_i32, %c0_i32_0 : i32, i32
  }
  func.func @transform_5(%arg0: i32) -> (i32, i32) {
    %c0_i32 = arith.constant 0 : i32
    %c0_i32_0 = arith.constant 0 : i32
    %c0_i32_1 = arith.constant 0 : i32
    return %c0_i32, %c0_i32_0 : i32, i32
  }
  func.func @transform_6(%arg0: i32) -> (i32, i32) {
    %c0_i32 = arith.constant 0 : i32
    %c0_i32_0 = arith.constant 0 : i32
    %c0_i32_1 = arith.constant 0 : i32
    return %c0_i32, %c0_i32_0 : i32, i32
  }
  func.func @transform_7(%arg0: i32) -> (i32, i32) {
    %c0_i32 = arith.constant 0 : i32
    %c0_i32_0 = arith.constant 0 : i32
    %c0_i32_1 = arith.constant 0 : i32
    return %c0_i32, %c0_i32_0 : i32, i32
  }
  func.func @transform_8(%arg0: i32) -> (i32, i32) {
    %c0_i32 = arith.constant 0 : i32
    %c0_i32_0 = arith.constant 0 : i32
    %c0_i32_1 = arith.constant 0 : i32
    return %c0_i32, %c0_i32_0 : i32, i32
  }
  func.func @transform_9(%arg0: i32) -> (i32, i32) {
    %c0_i32 = arith.constant 0 : i32
    %c0_i32_0 = arith.constant 0 : i32
    %c0_i32_1 = arith.constant 0 : i32
    return %c0_i32, %c0_i32_0 : i32, i32
  }
  func.func @transform_10(%arg0: i32) -> (i32, i32) {
    %c0_i32 = arith.constant 0 : i32
    %c0_i32_0 = arith.constant 0 : i32
    %c0_i32_1 = arith.constant 0 : i32
    return %c0_i32, %c0_i32_0 : i32, i32
  }
  func.func @transform_11(%arg0: i32) -> (i32, i32) {
    %c0_i32 = arith.constant 0 : i32
    %c0_i32_0 = arith.constant 0 : i32
    %c0_i32_1 = arith.constant 0 : i32
    return %c0_i32, %c0_i32_0 : i32, i32
  }
  func.func @transform_12(%arg0: i32) -> (i32, i32) {
    %c0_i32 = arith.constant 0 : i32
    %c0_i32_0 = arith.constant 0 : i32
    %c0_i32_1 = arith.constant 0 : i32
    return %c0_i32, %c0_i32_0 : i32, i32
  }
  func.func @transform_13(%arg0: i32) -> (i32, i32) {
    %c0_i32 = arith.constant 0 : i32
    %c0_i32_0 = arith.constant 0 : i32
    %c0_i32_1 = arith.constant 0 : i32
    return %c0_i32, %c0_i32_0 : i32, i32
  }
  func.func @transform_14(%arg0: i32) -> (i32, i32) {
    %c0_i32 = arith.constant 0 : i32
    %c0_i32_0 = arith.constant 0 : i32
    %c0_i32_1 = arith.constant 0 : i32
    return %c0_i32, %c0_i32_0 : i32, i32
  }
  func.func @transform_15(%arg0: i32) -> (i32, i32) {
    %c0_i32 = arith.constant 0 : i32
    %c0_i32_0 = arith.constant 0 : i32
    %c0_i32_1 = arith.constant 0 : i32
    return %c0_i32, %c0_i32_0 : i32, i32
  }
  func.func @transform_16(%arg0: i32) -> (i32, i32) {
    %c0_i32 = arith.constant 0 : i32
    %c0_i32_0 = arith.constant 0 : i32
    %c0_i32_1 = arith.constant 0 : i32
    return %c0_i32, %c0_i32_0 : i32, i32
  }
  func.func @transform_17(%arg0: i32) -> (i32, i32) {
    %c0_i32 = arith.constant 0 : i32
    %c0_i32_0 = arith.constant 0 : i32
    %c0_i32_1 = arith.constant 0 : i32
    return %c0_i32, %c0_i32_0 : i32, i32
  }
  func.func @transform_18(%arg0: i32) -> (i32, i32) {
    %c0_i32 = arith.constant 0 : i32
    %c0_i32_0 = arith.constant 0 : i32
    %c0_i32_1 = arith.constant 0 : i32
    return %c0_i32, %c0_i32_0 : i32, i32
  }
  func.func @transform_19(%arg0: i32) -> (i32, i32) {
    %c0_i32 = arith.constant 0 : i32
    %c0_i32_0 = arith.constant 0 : i32
    %c0_i32_1 = arith.constant 0 : i32
    return %c0_i32, %c0_i32_0 : i32, i32
  }
  func.func @transform_20(%arg0: i32) -> (i32, i32) {
    %c0_i32 = arith.constant 0 : i32
    %c0_i32_0 = arith.constant 0 : i32
    %c0_i32_1 = arith.constant 0 : i32
    return %c0_i32, %c0_i32_0 : i32, i32
  }
  func.func @transform_21(%arg0: i32) -> (i32, i32, i32) {
    %c0_i32 = arith.constant 0 : i32
    %c0_i32_0 = arith.constant 0 : i32
    %c0_i32_1 = arith.constant 0 : i32
    return %arg0, %c0_i32, %c0_i32_0 : i32, i32, i32
  }
  func.func @transform_22(%arg0: i32) -> (i32, i32, i32) {
    %c0_i32 = arith.constant 0 : i32
    %c0_i32_0 = arith.constant 0 : i32
    %c0_i32_1 = arith.constant 0 : i32
    return %arg0, %c0_i32, %c0_i32_0 : i32, i32, i32
  }
}

</mosaic_0001>

<bundles_post_ra>
// kernel: tpu_custom_call.1
= control target key start
LH: loop header
LB: loop body
LE: loop exit
PB: predicated region body
PF: predicated region fallthrough
CT: control target
= control target key end

     0   :  { %s13053_s0 = inlined_call_operand.vmem [shape: bf16[2,8,8,16], index: 0, kind: input, shape index: {}]   ;;  %s13054_s1 = inlined_call_operand.vmem [shape: bf16[144,16], index: 1, kind: input, shape index: {}]   ;;  %s13055_s2 = inlined_call_operand.vmem [shape: bf16[144,16], index: 2, kind: input, shape index: {}]   ;;  %s13056_s3 = inlined_call_operand.vmem [shape: bf16[144,16], index: 3, kind: input, shape index: {}]   ;;  %s13057_s4 = inlined_call_operand.vmem [shape: bf16[144,16], index: 4, kind: input, shape index: {}]   ;;  %s13058_s5 = inlined_call_operand.vmem [shape: f32[1,16], index: 5, kind: input, shape index: {}]   ;;  %s13059_s6 = inlined_call_operand.vmem [shape: f32[1,16], index: 6, kind: input, shape index: {}]   ;;  %s13060_s7 = inlined_call_operand.vmem [shape: f32[1,16], index: 7, kind: input, shape index: {}]   ;;  %s13061_s8 = inlined_call_operand.vmem [shape: f32[1,16], index: 8, kind: input, shape index: {}]   ;;  %s13062_s9 = inlined_call_operand.vmem [shape: bf16[144,16], index: 9, kind: input, shape index: {}]   ;;  %s13063_s10 = inlined_call_operand.vmem [shape: bf16[144,16], index: 10, kind: input, shape index: {}]   ;;  %s13064_s11 = inlined_call_operand.vmem [shape: bf16[144,16], index: 11, kind: input, shape index: {}]   ;;  %s13065_s12 = inlined_call_operand.vmem [shape: bf16[144,16], index: 12, kind: input, shape index: {}]   ;;  %s13066_s13 = inlined_call_operand.vmem [shape: f32[1,16], index: 13, kind: input, shape index: {}]   ;;  %s13067_s14 = inlined_call_operand.vmem [shape: f32[1,16], index: 14, kind: input, shape index: {}]   ;;  %s13068_s15 = inlined_call_operand.vmem [shape: f32[1,16], index: 15, kind: input, shape index: {}]   ;;  %s13069_s16 = inlined_call_operand.vmem [shape: f32[1,16], index: 16, kind: input, shape index: {}]   ;;  %s13070_s17 = inlined_call_operand.vmem [shape: bf16[144,768], index: 17, kind: input, shape index: {}]   ;;  %s13071_s18 = inlined_call_operand.vmem [shape: f32[1,768], index: 18, kind: input, shape index: {}]   ;;  %s13072_s19 = inlined_call_operand.vmem [shape: bf16[144,128], index: 19, kind: input, shape index: {}]   ;;  %s13073_s20 = inlined_call_operand.vmem [shape: f32[1,128], index: 20, kind: input, shape index: {}]   ;;  %s13074_s21 = inlined_call_operand.hbm [shape: f32[2,64,768], index: 21, kind: output, shape index: {0}]   ;;  %s13075_s22 = inlined_call_operand.hbm [shape: f32[2,64,128], index: 22, kind: output, shape index: {1}]  }
   0x1   :  { %13110 = sst [smem:[#allocation17_spill]] %s13053_s0 }
   0x2   :  { %13111 = sst [smem:[#allocation18_spill]] %s13054_s1 }
   0x3   :  { %13112 = sst [smem:[#allocation19_spill]] %s13055_s2 }
   0x4   :  { %13113 = sst [smem:[#allocation20_spill]] %s13056_s3 }
   0x5   :  { %13114 = sst [smem:[#allocation21_spill]] %s13057_s4 }
   0x6   :  { %13115 = sst [smem:[#allocation22_spill]] %s13058_s5 }
   0x7   :  { %13116 = sst [smem:[#allocation23_spill]] %s13059_s6 }
   0x8   :  { %13117 = sst [smem:[#allocation24_spill]] %s13060_s7 }
   0x9   :  { %13118 = sst [smem:[#allocation25_spill]] %s13061_s8 }
   0xa   :  { %13119 = sst [smem:[#allocation26_spill]] %s13069_s16 }
   0xb   :  { %13120 = sst [smem:[#allocation27_spill]] %s13072_s19 }
   0xc   :  { %13121 = sst [smem:[#allocation28_spill]] %s13073_s20 }
   0xd   :  { %13122 = sst [smem:[#allocation29_spill]] %s13074_s21 }
   0xe   :  { %13123 = sst [smem:[#allocation30_spill]] %s13075_s22 }
   0xf   :  { %28 = vsyncpa [#allocation4], 0 }
  0x10   :  { %30 = vsyncpa [#allocation4 + $0x1], 0 }
  0x11   :  { %31 = vsyncpa [#allocation6], 0 }
  0x12   :  { %33 = vsyncpa [#allocation6 + $0x1], 0  ;;  %s9480_s3 = smov 0   ;;  %s9482_s28 = smov 0  }
  0x13   :  { %s9484_s29 = smov 0   ;;  %s9486_s30 = smov 0  }
  0x14 LB: > { %13124 = sst [smem:[#allocation9_spill]] %s9340_s3  ;;  %s9501_s4 = sadd.s32 4294967295, %s9352_s30   ;;  %s9352_s30 = sphi %s9486_s30, %s13169_s30   ;;  %s9348_s29 = sphi %s9484_s29, %s13171_s29   ;;  %s9344_s28 = sphi %s9482_s28, %s13173_s28   ;;  %s9340_s3 = sphi %s9480_s3, %s13172_s3  }
  0x15   : > { %13125 = sst [smem:[#allocation10_spill]] %s9348_s29  ;;  %s8331_s0 = sadd.s32 4294967294, %s9352_s30  }
  0x16   : > { %13126 = sst [smem:[#allocation11_spill]] %s9352_s30  ;;  %s9505_s23 = sadd.s32 1, %s9352_s30  }
  0x17   : > { %13127 = sst [smem:[#allocation12_spill]] %s9501_s4  ;;  %s492_s1 = sadd.s32 1, %s9348_s29 }
  0x18   : > { %13128 = sst [smem:[#allocation13_spill]] %s9505_s23  ;;  %s489_s5 = ssub.s32 %s9352_s30, %s9505_s23 }
  0x19   : > { %p502_p0 = scmp.ne.s32.totalorder %s9348_s29, %s9344_s28  ;;  %p490_p1 = scmp.eq.s32.totalorder %s489_s5, 0 }
  0x1a   : > { %p503_p2 = scmp.eq.s32.totalorder %s9501_s4, 1  ;;  %p508_p3 = scmp.ne.s32.totalorder %s9344_s28, %s9340_s3 }
  0x1b   : > { %p509_p4 = scmp.eq.s32.totalorder %s8331_s0, 1  ;;  %p8334_p7 = scmp.ge.s32.totalorder %s9352_s30, 1 }
  0x1c   : > { %s9516_s24 = scalar_select %p490_p1, %s9348_s29, %s492_s1  }
  0x1d   : > { %p9518_p5 = por %p503_p2, %p502_p0  ;;  %p9522_p6 = por %p509_p4, %p508_p3 }
  0x1e   : > { %13129 = sst [smem:[#allocation14_spill]] %s9516_s24  ;;  %p621_p8 = scmp.lt.s32.totalorder %s9352_s30, 3 }
  0x1f   : > { %s13130_s6 = scalar_select %p9518_p5, 1, 0 }
  0x20   : > { %s13132_s25 = scalar_select %p9522_p6, 1, 0 }
  0x21   : > { %13131 = sst [smem:[#allocation15_spill]] %s13130_s6  ;;  %p622_p9 = pnand %p8334_p7, %p621_p8 }
  0x22   : > { %13133 = sst [smem:[#allocation16_spill]] %s13132_s25  ;;  %p688_p10 = scmp.lt.s32.totalorder (!%p622_p9), %s9501_s4, 1 }
  0x23   : > { %625 = sbr.rel (%p622_p9) target bundleno = 3076 (0xc04), region = 104  ;;  %s13134_s1 = sld [smem:[#allocation17_spill]] (!%p622_p9) }
  0x24   : > { %s13084_s27 = smov (!%p622_p9), 32   ;;  %s13086_s0 = smov (!%p622_p9), 80  }
  0x25   : > { %s13145_s29 = sld [smem:[#allocation18_spill]] (!%p622_p9)  ;;  %s13148_s24 = smov (!%p622_p9), 64  }
  0x26   : > { %s13149_s25 = smov (!%p622_p9), 80   ;;  %s13151_s30 = sld [smem:[#allocation22_spill]] (!%p622_p9) }
  0x27   : > { %s13155_s20 = sld [smem:[#allocation20_spill]] (!%p622_p9) }
  0x28   : > { %vm694_vm0 = vcmask 125952   ;;  %v9354_v0 = vmov 0   ;;  %s689_s26 = scalar_select %p688_p10, %s9501_s4, 1  ;;  %vm806_vm1 = vsmask.f32 7938  ;;  %vm696_vm2 = vcmask 122880  }
  0x29   : > { %702 = vst.msk [vmem:[#allocation2 + $0x18] sm:$0xf] %vm694_vm0, %v9354_v0  ;;  %vm812_vm3 = vsmask.f32 256  ;;  %vm9562_vm4 = vmand %vm694_vm0, %vm806_vm1  ;;  %vm1010_vm5 = vcmask 1042432   ;;  %vm1011_vm6 = vcmask 1046532  }
  0x2a   : > { %704 = vst.msk [vmem:[#allocation2 + $0x20] sm:$0xf] %vm694_vm0, %v9354_v0  ;;  %s9044_s2 = sshll.u32 %s689_s26, 5  ;;  %vm9594_vm7 = vmand %vm696_vm2, %vm812_vm3  ;;  %vm879_vm8 = vsmask.f32 3328  ;;  %s13080_s26 = smov 48  }
  0x2b   : > { %695 = vst.msk [vmem:[#allocation2] sm:$0xf] %vm694_vm0, %v9354_v0  ;;  %s9541_s5 = scalar_lea.vmem %s13134_s1, %s9044_s2  ;;  %vm880_vm9 = vsmask.f32 7440  ;;  %vm9626_vm10 = vmor %vm1010_vm5, %vm1011_vm6  ;;  %s13082_s2 = smov 96   ;;  %vm1198_vm12 = vcmask 130048  }
  0x2c   : > { %698 = vst.msk [vmem:[#allocation2 + $0x8] sm:$0xf] %vm694_vm0, %v9354_v0  ;;  %v718_v1 = vld [vmem:[%s9541_s5 + $0x8] sm:$0xf]  ;;  %v719_v2 = vld [vmem:[%s9541_s5 + $0xc] sm:$0xf]  ;;  %vm9671_vm11 = vmor %vm879_vm8, %vm880_vm9  ;;  %s13146_s23 = smov %s13145_s29 }
  0x2d   : > { %700 = vst.msk [vmem:[#allocation2 + $0x10] sm:$0xf] %vm694_vm0, %v9354_v0  ;;  %v741_v3 = vshrl.u32 %v718_v1, 16  ;;  %v744_v4 = vshll.u32 %v718_v1, 16  ;;  %v749_v5 = vshrl.u32 %v719_v2, 16  ;;  %v752_v6 = vshll.u32 %v719_v2, 16 }
  0x2e   : > { %706 = vst.msk [vmem:[#allocation2 + $0x28] sm:$0xf] %vm694_vm0, %v9354_v0  ;;  %v716_v8 = vld [vmem:[%s9541_s5] sm:$0xf]  ;;  %v717_v13 = vld [vmem:[%s9541_s5 + $0x4] sm:$0xf] }
  0x2f   : > { %708 = vst.msk [vmem:[#allocation2 + $0x30] sm:$0xf] %vm694_vm0, %v9354_v0  ;;  %v9554_v9 = vrot.slane %v741_v3, 7  ;;  %v9556_v10 = vrot.slane %v749_v5, 7  ;;  %v725_v14 = vshrl.u32 %v716_v8, 16  ;;  %v728_v15 = vshll.u32 %v716_v8, 16 }
  0x30   : > { %v823_v7 = vld [vmem:[#allocation2 + $0x18] sm:$0xf]  ;;  %710 = vst.msk [vmem:[#allocation2 + $0x38] sm:$0xf] %vm694_vm0, %v9354_v0  ;;  %v733_v18 = vshrl.u32 %v717_v13, 16  ;;  %v736_v19 = vshll.u32 %v717_v13, 16 }
  0x31   : > { %v829_v11 = vld [vmem:[#allocation2 + $0x20] sm:$0xf]  ;;  %712 = vst.msk [vmem:[#allocation2 + $0x40] sm:$0xf] %vm694_vm0, %v9354_v0  ;;  %v746_v16 = vor.u32 %v744_v4, %v9554_v9  ;;  %v754_v17 = vor.u32 %v752_v6, %v9556_v10  ;;  %v727_v20 = vrot.slane %v725_v14, 7  ;;  %v747_v36 = vrot.slane %v9554_v9, 4 }
  0x32   : > { %714 = vst.msk [vmem:[#allocation2 + $0x48] sm:$0xf] %vm694_vm0, %v9354_v0  ;;  %v9571_v21 = vld [vmem:[#allocation2] sm:$0xf]  ;;  %v735_v24 = vrot.slane %v733_v18, 7  ;;  %v755_v45 = vrot.slane %v9556_v10, 4 }
  0x33   : > { %697 = vst.msk [vmem:[#allocation2 + $0x4] sm:$0x1] %vm696_vm2, %v9354_v0  ;;  %v824_v22 = vsel %vm9562_vm4, %v746_v16, %v823_v7  ;;  %v830_v23 = vsel %vm9562_vm4, %v754_v17, %v829_v11  ;;  %v808_v25 = vld [vmem:[#allocation2 + $0x8] sm:$0xf]  ;;  %v883_v26 = vshrl.u32 %v9571_v21, 16  ;;  %v730_v27 = vor.u32 %v728_v15, %v727_v20  ;;  %s13088_s1 = smov 64  }
  0x34   : > { %699 = vst.msk [vmem:[#allocation2 + $0xc] sm:$0x1] %vm696_vm2, %v9354_v0  ;;  %v817_v28 = vld [vmem:[#allocation2 + $0x10] sm:$0xf]  ;;  %v886_v29 = vshll.u32 %v9571_v21, 16  ;;  %v738_v30 = vor.u32 %v736_v19, %v735_v24  ;;  %v731_v31 = vrot.slane %v727_v20, 4  ;;  %v1085_v59 = vunpack.c.l.b16 %v9571_v21 }
  0x35   : > { %825 = vst [vmem:[#allocation2 + $0x18] sm:$0xf] %v824_v22  ;;  %v8338_v32 = vrot.slane %v9571_v21, 9  ;;  %v885_v33 = vrot.slane %v883_v26, 4  ;;  %v809_v34 = vsel %vm9562_vm4, %v730_v27, %v808_v25  ;;  %v720_v37 = vld [vmem:[%s9541_s5 + $0x10] sm:$0xf] }
  0x36   : > { %831 = vst [vmem:[#allocation2 + $0x20] sm:$0xf] %v830_v23  ;;  %v888_v35 = vrot.slane %v886_v29, 5  ;;  %v818_v38 = vsel %vm9562_vm4, %v738_v30, %v817_v28  ;;  %v739_v39 = vrot.slane %v735_v24, 4  ;;  %v757_v40 = vshrl.u32 %v720_v37, 16  ;;  %s13154_s4 = sld [smem:[#allocation23_spill]] }
  0x37   : > { %701 = vst.msk [vmem:[#allocation2 + $0x14] sm:$0x1] %vm696_vm2, %v9354_v0  ;;  %v760_v41 = vshll.u32 %v720_v37, 16  ;;  %v835_v48 = vld [vmem:[#allocation2 + $0x28] sm:$0xf]  ;;  %vm1211_vm13 = vcmask 261120  }
  0x38   : > { %810 = vst [vmem:[#allocation2 + $0x8] sm:$0xf] %v809_v34  ;;  %v889_v43 = vor.u32 %v888_v35, %v885_v33  ;;  %v9601_v46 = vrot.slane %v757_v40, 7  ;;  %vm1220_vm14 = vcmask 392192   ;;  %vm1229_vm15 = vcmask 523264   ;;  %s13156_s7 = sld [smem:[#allocation24_spill]] }
  0x39   : > { %819 = vst [vmem:[#allocation2 + $0x10] sm:$0xf] %v818_v38  ;;  %vm1238_vm0 = vcmask 654336   ;;  %vm1247_vm1 = vcmask 785408   ;;  %s13157_s21 = sld [smem:[#allocation21_spill]] }
  0x3a   : > { %v860_v44 = vld [vmem:[#allocation2 + $0x4] sm:$0x1]  ;;  %703 = vst.msk [vmem:[#allocation2 + $0x1c] sm:$0x1] %vm696_vm2, %v9354_v0  ;;  %v762_v53 = vor.u32 %v760_v41, %v9601_v46  ;;  %v9615_v56 = vrot.slane %v889_v43, 4  ;;  %v763_v57 = vrot.slane %v9601_v46, 4 }
  0x3b   : > { %v814_v47 = vld [vmem:[#allocation2 + $0xc] sm:$0x1]  ;;  %705 = vst.msk [vmem:[#allocation2 + $0x24] sm:$0x1] %vm696_vm2, %v9354_v0  ;;  %v1015_v51 = vrot.slane %v860_v44, 5  ;;  %v892_v52 = vshll.u32 %v860_v44, 16 }
  0x3c   : > { %v9605_v49 = vld [vmem:[#allocation2 + $0x18] sm:$0xf]  ;;  %v815_v50 = vsel %vm9594_vm7, %v731_v31, %v814_v47  ;;  %707 = vst.msk [vmem:[#allocation2 + $0x2c] sm:$0x1] %vm696_vm2, %v9354_v0  ;;  %v836_v10 = vsel %vm9562_vm4, %v762_v53, %v835_v48  ;;  %s13158_s8 = sld [smem:[#allocation25_spill]] }
  0x3d   : > { %v9612_v54 = vld [vmem:[#allocation2 + $0x20] sm:$0xf]  ;;  %v1088_v55 = vunpack.c.l.b16 %v9605_v49  ;;  %816 = vst [vmem:[#allocation2 + $0xc] sm:$0x1] %v815_v50  ;;  %v925_v61 = vshrl.u32 %v9605_v49, 16  ;;  %v928_v62 = vshll.u32 %v9605_v49, 16  ;;  %v1016_v17 = vsel %vm9626_vm10, %v8338_v32, %v1015_v51 }
  0x3e   : > { %v1089_v58 = vunpack.c.l.b16 %v9612_v54  ;;  %709 = vst.msk [vmem:[#allocation2 + $0x34] sm:$0x1] %vm696_vm2, %v9354_v0  ;;  %v820_v60 = vld [vmem:[#allocation2 + $0x14] sm:$0x1]  ;;  %v9634_v3 = vrot.slane %v892_v52, 5  ;;  %v939_v4 = vshrl.u32 %v9612_v54, 16  ;;  %v1117_v35 = vunpack.c.l.b16 %v1016_v17 }
  0x3f   : > { %v861_v63 = vld [vmem:[#allocation2 + $0x8] sm:$0xf]  ;;  %711 = vst.msk [vmem:[#allocation2 + $0x3c] sm:$0x1] %vm696_vm2, %v9354_v0  ;;  %v821_v2 = vsel %vm9594_vm7, %v739_v39, %v820_v60  ;;  %v927_v27 = vrot.slane %v925_v61, 4  ;;  %v930_v28 = vrot.slane %v928_v62, 5 }
  0x40   : > { %v1139_v5 = vpack.c.b16 %v1089_v58, %v1088_v55  ;;  %v9639_v6 = vld [vmem:[#allocation2 + $0x10] sm:$0xf]  ;;  %v1086_v7 = vunpack.c.l.b16 %v861_v63  ;;  %713 = vst.msk [vmem:[#allocation2 + $0x44] sm:$0x1] %vm696_vm2, %v9354_v0  ;;  %v897_v8 = vshrl.u32 %v861_v63, 16  ;;  %v900_v13 = vshll.u32 %v861_v63, 16 }
  0x41   : > { %v1087_v11 = vunpack.c.l.b16 %v9639_v6  ;;  %715 = vst.msk [vmem:[#allocation2 + $0x4c] sm:$0x1] %vm696_vm2, %v9354_v0  ;;  %v911_v14 = vshrl.u32 %v9639_v6, 16  ;;  %v914_v15 = vshll.u32 %v9639_v6, 16  ;;  %v8339_v18 = vrot.slane %v861_v63, 9  ;;  %s13161_s3 = sld [smem:[#allocation12_spill]] }
  0x42   : > { %1144 = vrot.lane.b32.xlu0 %v1139_v5, %s13080_s26  ;;  %v9651_v16 = vpack.c.b16 %v1086_v7, %v1085_v59  ;;  %822 = vst [vmem:[#allocation2 + $0x14] sm:$0x1] %v821_v2  ;;  %v899_v19 = vrot.slane %v897_v8, 4  ;;  %v826_v20 = vld [vmem:[#allocation2 + $0x1c] sm:$0x1]  ;;  %v902_v22 = vrot.slane %v900_v13, 5  ;;  %v895_v47 = vsel %vm9671_vm11, %v9615_v56, %v9634_v3 }
  0x43   : > { %v1138_v21 = vpack.c.b16 %v1087_v11, %v1086_v7  ;;  %v913_v0 = vrot.slane %v911_v14, 4  ;;  %v916_v23 = vrot.slane %v914_v15, 5  ;;  %v832_v24 = vld [vmem:[#allocation2 + $0x24] sm:$0x1]  ;;  %v827_v26 = vsel %vm9594_vm7, %v747_v36, %v826_v20  ;;  %837 = vst [vmem:[#allocation2 + $0x28] sm:$0xf] %v836_v10 }
  0x44   : > { %v862_v25 = vld [vmem:[#allocation2 + $0xc] sm:$0x1]  ;;  %v833_v29 = vsel %vm9594_vm7, %v755_v45, %v832_v24  ;;  %v903_v31 = vor.u32 %v902_v22, %v899_v19  ;;  %828 = vst [vmem:[#allocation2 + $0x1c] sm:$0x1] %v827_v26  ;;  %v942_v9 = vshll.u32 %v9612_v54, 16  ;;  %v9663_v37 = vpack.c.b16 %v1088_v55, %v1087_v11 }
  0x45   : > { %1142 = vrot.lane.b32.xlu1 %v1138_v21, %s13080_s26  ;;  %v1019_v30 = vrot.slane %v862_v25, 5  ;;  %v906_v32 = vshll.u32 %v862_v25, 16  ;;  %v917_v33 = vor.u32 %v916_v23, %v913_v0  ;;  %v838_v34 = vld [vmem:[#allocation2 + $0x2c] sm:$0x1]  ;;  %834 = vst [vmem:[#allocation2 + $0x24] sm:$0x1] %v833_v29  ;;  %v931_v48 = vor.u32 %v930_v28, %v927_v27 }
  0x46   : > { %v839_v36 = vsel %vm9594_vm7, %v763_v57, %v838_v34  ;;  %v904_v40 = vrot.slane %v903_v31, 4  ;;  %v941_v44 = vrot.slane %v939_v4, 4  ;;  %1178 = vrot.lane.b32.xlu2 %v9663_v37, %s13082_s2  ;;  %v8340_v50 = vrot.slane %v9639_v6, 9  ;;  %v721_v51 = vld [vmem:[%s9541_s5 + $0x14] sm:$0xf]  ;;  %s13096_s26 = smov 16  }
  0x47   : > { %v1020_v38 = vsel %vm9626_vm10, %v8339_v18, %v1019_v30  ;;  %v908_v41 = vrot.slane %v906_v32, 5  ;;  %840 = vst [vmem:[#allocation2 + $0x2c] sm:$0x1] %v839_v36  ;;  %v918_v46 = vrot.slane %v917_v33, 4  ;;  %v944_v57 = vrot.slane %v942_v9, 5  ;;  %s13093_s2 = smov 112  }
  0x48   : > { %v1118_v43 = vunpack.c.l.b16 %v1020_v38  ;;  %v1097_v61 = vunpack.c.l.b16 %v895_v47  ;;  %v765_v56 = vshrl.u32 %v721_v51, 16  ;;  %v932_v3 = vrot.slane %v931_v48, 4  ;;  %v722_v22 = vld [vmem:[%s9541_s5 + $0x18] sm:$0xf]  ;;  %v841_v29 = vld [vmem:[#allocation2 + $0x30] sm:$0xf] }
  0x49   : > { %v864_v45 = vld [vmem:[#allocation2 + $0x14] sm:$0x1]  ;;  %v909_v53 = vsel %vm9671_vm11, %v904_v40, %v908_v41  ;;  %v945_v8 = vor.u32 %v944_v57, %v941_v44  ;;  %v768_v11 = vshll.u32 %v721_v51, 16  ;;  %v773_v30 = vshrl.u32 %v722_v22, 16  ;;  %v723_v40 = vld [vmem:[%s9541_s5 + $0x1c] sm:$0xf] }
  0x4a   : > { %v1125_v52 = vpack.c.b16 %v1118_v43, %v1117_v35  ;;  %v920_v55 = vshll.u32 %v864_v45, 16  ;;  %v1023_v59 = vrot.slane %v864_v45, 5  ;;  %v9686_v63 = vld [vmem:[#allocation2 + $0x28] sm:$0xf]  ;;  %v1098_v2 = vunpack.c.l.b16 %v909_v53  ;;  %v844_v35 = vld [vmem:[#allocation2 + $0x34] sm:$0x1] }
  0x4b   : > { %v866_v62 = vld [vmem:[#allocation2 + $0x1c] sm:$0x1]  ;;  %v953_v15 = vshrl.u32 %v9686_v63, 16  ;;  %v956_v17 = vshll.u32 %v9686_v63, 16  ;;  %v767_v21 = vrot.slane %v765_v56, 7  ;;  %v946_v26 = vrot.slane %v945_v8, 4 }
  0x4c   : > { %1129 = vrot.lane.b32.xlu0 %v1125_v52, %s13084_s27  ;;  %v922_v60 = vrot.slane %v920_v55, 5  ;;  %v934_v4 = vshll.u32 %v866_v62, 16  ;;  %v868_v5 = vld [vmem:[#allocation2 + $0x24] sm:$0x1]  ;;  %v1024_v6 = vsel %vm9626_vm10, %v8340_v50, %v1023_v59  ;;  %v1105_v18 = vpack.c.b16 %v1098_v2, %v1097_v61  ;;  %v847_v50 = vld [vmem:[#allocation2 + $0x38] sm:$0xf] }
  0x4d   : > { %v1119_v10 = vunpack.c.l.b16 %v1024_v6  ;;  %v948_v19 = vshll.u32 %v868_v5, 16  ;;  %v955_v27 = vrot.slane %v953_v15, 4  ;;  %v958_v28 = vrot.slane %v956_v17, 5  ;;  %v850_v53 = vld [vmem:[#allocation2 + $0x3c] sm:$0x1] }
  0x4e   : > { %v923_v7 = vsel %vm9671_vm11, %v918_v46, %v922_v60  ;;  %v936_v14 = vrot.slane %v934_v4, 5  ;;  %v9699_v25 = vld [vmem:[#allocation2 + $0x2c] sm:$0x1]  ;;  %v8341_v32 = vrot.slane %v9605_v49, 9  ;;  %v1027_v33 = vrot.slane %v866_v62, 5 }
  0x4f   : > { %v1099_v13 = vunpack.c.l.b16 %v923_v7  ;;  %v1164_v20 = vpack.c.b16 %v1119_v10, %v1118_v43  ;;  %v950_v31 = vrot.slane %v948_v19, 5  ;;  %v770_v34 = vor.u32 %v768_v11, %v767_v21  ;;  %v853_v6 = vld [vmem:[#allocation2 + $0x40] sm:$0xf]  ;;  %v856_v7 = vld [vmem:[#allocation2 + $0x44] sm:$0x1] }
  0x50   : > { %v937_v23 = vsel %vm9671_vm11, %v932_v3, %v936_v14  ;;  %v962_v9 = vshll.u32 %v9699_v25, 16  ;;  %v8342_v36 = vrot.slane %v9612_v54, 9  ;;  %v771_v38 = vrot.slane %v767_v21, 4 }
  0x51   : > { %v1151_v0 = vpack.c.b16 %v1099_v13, %v1098_v2  ;;  %v9697_v24 = vunpack.c.l.b16 %v937_v23  ;;  %1168 = vrot.lane.b32.xlu2 %v1164_v20, %s13086_s0  ;;  %v1031_v43 = vrot.slane %v868_v5, 5  ;;  %v1028_v44 = vsel %vm9626_vm10, %v8341_v32, %v1027_v33 }
  0x52   : > { %v842_v45 = vsel %vm9562_vm4, %v770_v34, %v841_v29  ;;  %v1120_v46 = vunpack.c.l.b16 %v1028_v44  ;;  %v845_v49 = vsel %vm9594_vm7, %v771_v38, %v844_v35  ;;  %v775_v47 = vrot.slane %v773_v30, 7 }
  0x53   : > { %1155 = vrot.lane.b32.xlu1 %v1151_v0, %s13088_s1  ;;  %v1106_v41 = vpack.c.b16 %v9697_v24, %v1099_v13  ;;  %843 = vst [vmem:[#allocation2 + $0x30] sm:$0xf] %v842_v45  ;;  %v776_v48 = vshll.u32 %v722_v22, 16  ;;  %v951_v51 = vsel %vm9671_vm11, %v946_v26, %v950_v31  ;;  %v959_v52 = vor.u32 %v958_v28, %v955_v27 }
  0x54   : > { %1109 = vrot.lane.b32.xlu0 %v1105_v18, %s13096_s26  ;;  %846 = vst [vmem:[#allocation2 + $0x34] sm:$0x1] %v845_v49  ;;  %v781_v55 = vshrl.u32 %v723_v40, 16  ;;  %v784_v57 = vshll.u32 %v723_v40, 16  ;;  %v9717_v59 = vpack.c.b16 %v1120_v46, %v1119_v10  ;;  %v779_v61 = vrot.slane %v775_v47, 4 }
  0x55   : > { %v778_v60 = vor.u32 %v776_v48, %v775_v47  ;;  %v1032_v62 = vsel %vm9626_vm10, %v8342_v36, %v1031_v43  ;;  %v1101_v2 = vunpack.c.l.b16 %v951_v51  ;;  %v1090_v3 = vunpack.c.l.b16 %v9686_v63 }
  0x56   : > { %v783_v56 = vrot.slane %v781_v55, 7  ;;  %v851_v5 = vsel %vm9594_vm7, %v779_v61, %v850_v53  ;;  %v960_v8 = vrot.slane %v959_v52, 4  ;;  %v964_v10 = vrot.slane %v962_v9, 5 }
  0x57   : > { %v848_v4 = vsel %vm9562_vm4, %v778_v60, %v847_v50  ;;  %v8343_v14 = vrot.slane %v9686_v63, 9  ;;  %v1035_v15 = vrot.slane %v9699_v25, 5  ;;  %v1121_v17 = vunpack.c.l.b16 %v1032_v62  ;;  %852 = vst [vmem:[#allocation2 + $0x3c] sm:$0x1] %v851_v5  ;;  %v9052_v60 = vld [vmem:[%s13145_s29 + $0x38] sm:$0xff]  ;;  %s13147_s29 = smov 48  }
  0x58   : > { %849 = vst [vmem:[#allocation2 + $0x38] sm:$0xf] %v848_v4  ;;  %v786_v11 = vor.u32 %v784_v57, %v783_v56  ;;  %v787_v13 = vrot.slane %v783_v56, 4  ;;  %v1152_v21 = vpack.c.b16 %v1101_v2, %v9697_v24  ;;  %v9745_v25 = vpack.c.b16 %v1090_v3, %v1089_v58  ;;  %v9778_v4 = vld [vmem:[#allocation2 + $0x48] sm:$0xf]  ;;  %1357 = vmatpush.bf16.msra.mxu0 %v9052_v60 }
  0x59   : > { %1131 = vrot.lane.b32.xlu2 %v9717_v59, %s13084_s27  ;;  %v1165_v22 = vpack.c.b16 %v1121_v17, %v1120_v46  ;;  %v965_v26 = vsel %vm9671_vm11, %v960_v8, %v964_v10  ;;  %v1036_v27 = vsel %vm9626_vm10, %v8343_v14, %v1035_v15  ;;  %s13143_s27 = smov 96   ;;  %vm1256_vm2 = vcmask 916480  }
  0x5a   : > { %v9732_v18 = vld [vmem:[#allocation2 + $0x30] sm:$0xf]  ;;  %v854_v19 = vsel %vm9562_vm4, %v786_v11, %v853_v6  ;;  %v857_v20 = vsel %vm9594_vm7, %v787_v13, %v856_v7  ;;  %v1102_v31 = vunpack.c.l.b16 %v965_v26  ;;  %v1122_v32 = vunpack.c.l.b16 %v1036_v27 }
  0x5b   : > { %1111 = vrot.lane.b32.xlu1 %v1106_v41, %s13096_s26  ;;  %v967_v0 = vshrl.u32 %v9732_v18, 16  ;;  %v970_v23 = vshll.u32 %v9732_v18, 16  ;;  %855 = vst [vmem:[#allocation2 + $0x40] sm:$0xf] %v854_v19  ;;  %v872_v28 = vld [vmem:[#allocation2 + $0x34] sm:$0x1]  ;;  %v1091_v53 = vunpack.c.l.b16 %v9732_v18 }
  0x5c   : > { %1188 = vrot.lane.b32.xlu0 %v1106_v41, %s13093_s2  ;;  %858 = vst [vmem:[#allocation2 + $0x44] sm:$0x1] %v857_v20  ;;  %v976_v30 = vshll.u32 %v872_v28, 16  ;;  %v8344_v35 = vrot.slane %v9732_v18, 9  ;;  %v1039_v9 = vrot.slane %v872_v28, 5  ;;  %v1107_v44 = vpack.c.b16 %v1102_v31, %v1101_v2  ;;  %v9051_v6 = vld [vmem:[%s13146_s23 + $0x30] sm:$0xff] }
  0x5d   : > { %v969_v24 = vrot.slane %v967_v0, 4  ;;  %v972_v29 = vrot.slane %v970_v23, 5  ;;  %v9762_v46 = vpack.c.b16 %v1122_v32, %v1121_v17  ;;  %v1140_v7 = vpack.c.b16 %v1091_v53, %v1090_v3  ;;  %1358 = vmatpush.bf16.msra.mxu0 %v9051_v6  ;;  %v9794_v23 = vld [vmem:[#allocation2 + $0x4c] sm:$0x1] }
  0x5e   : > { %v874_v36 = vld [vmem:[#allocation2 + $0x3c] sm:$0x1]  ;;  %v978_v40 = vrot.slane %v976_v30, 5  ;;  %v1040_v47 = vsel %vm9626_vm10, %v8344_v35, %v1039_v9  ;;  %v1066_v11 = vshrl.u32 %v9778_v4, 16  ;;  %v1069_v17 = vshll.u32 %v9778_v4, 16 }
  0x5f   : > { %v9753_v54 = vld [vmem:[#allocation2 + $0x38] sm:$0xf]  ;;  %v973_v58 = vor.u32 %v972_v29, %v969_v24  ;;  %v990_v49 = vshll.u32 %v874_v36, 16  ;;  %v1123_v55 = vunpack.c.l.b16 %v1040_v47  ;;  %v1043_v19 = vrot.slane %v874_v36, 5 }
  0x60   : > { %v981_v33 = vshrl.u32 %v9753_v54, 16  ;;  %v984_v34 = vshll.u32 %v9753_v54, 16  ;;  %v1092_v18 = vunpack.c.l.b16 %v9753_v54  ;;  %v8345_v3 = vrot.slane %v9753_v54, 9 }
  0x61   : > { %1170 = vrot.lane.b32.xlu2 %v1165_v22, %s13086_s0  ;;  %v974_v38 = vrot.slane %v973_v58, 4  ;;  %s13144_s0 = smov 32   ;;  %v992_v57 = vrot.slane %v990_v49, 5  ;;  %v1166_v10 = vpack.c.b16 %v1123_v55, %v1122_v32  ;;  %v1068_v22 = vrot.slane %v1066_v11, 4 }
  0x62   : > { %v983_v41 = vrot.slane %v981_v33, 4  ;;  %v986_v43 = vrot.slane %v984_v34, 5  ;;  %v9760_v45 = vld [vmem:[#allocation2 + $0x40] sm:$0xf]  ;;  %v1071_v0 = vrot.slane %v1069_v17, 5  ;;  %v9796_v26 = vpack.c.b16 %v1092_v18, %v1091_v53  ;;  %v9047_v53 = vld [vmem:[%s13146_s23 + $0x10] sm:$0xff] }
  0x63   : > { %1157 = vrot.lane.b32.xlu1 %v1152_v21, %s13088_s1  ;;  %v1046_v50 = vshrl.u32 %v9760_v45, 16  ;;  %v1049_v51 = vshll.u32 %v9760_v45, 16  ;;  %v979_v52 = vsel %vm9671_vm11, %v974_v38, %v978_v40  ;;  %v876_v5 = vld [vmem:[#allocation2 + $0x44] sm:$0x1]  ;;  %v1044_v28 = vsel %vm9626_vm10, %v8345_v3, %v1043_v19  ;;  %s13152_s1 = sld [smem:[#allocation19_spill]] }
  0x64   : > { %1180 = vrot.lane.b32.xlu0 %v9745_v25, %s13143_s27  ;;  %v987_v48 = vor.u32 %v986_v43, %v983_v41  ;;  %v1103_v62 = vunpack.c.l.b16 %v979_v52  ;;  %v1055_v15 = vshll.u32 %v876_v5, 16  ;;  %v1072_v29 = vor.u32 %v1071_v0, %v1068_v22  ;;  %v9048_v52 = vld [vmem:[%s13146_s23 + $0x18] sm:$0xff] }
  0x65   : > { %v1048_v56 = vrot.slane %v1046_v50, 4  ;;  %v1051_v2 = vrot.slane %v1049_v51, 5  ;;  %v1075_v30 = vshll.u32 %v9794_v23, 16  ;;  %v1137_v54 = vunpack.c.l.b16 %v9760_v45  ;;  %v9050_v50 = vld [vmem:[%s13146_s23 + $0x28] sm:$0xff]  ;;  %v9049_v51 = vld [vmem:[%s13146_s23 + $0x20] sm:$0xff] }
  0x66   : > { %v988_v61 = vrot.slane %v987_v48, 4  ;;  %v1153_v8 = vpack.c.b16 %v1103_v62, %v1102_v31  ;;  %v1057_v21 = vrot.slane %v1055_v15, 5  ;;  %v1124_v31 = vunpack.c.l.b16 %v1044_v28  ;;  %1359 = vmatpush.bf16.msra.mxu0 %v9050_v50 }
  0x67   : > { %v1052_v14 = vor.u32 %v1051_v2, %v1048_v56  ;;  %v8346_v32 = vrot.slane %v9760_v45, 9  ;;  %v1063_v33 = vrot.slane %v876_v5, 5  ;;  %v1073_v34 = vrot.slane %v1072_v29, 4 }
  0x68   : > { %v993_v13 = vsel %vm9671_vm11, %v988_v61, %v992_v57  ;;  %v1077_v35 = vrot.slane %v1075_v30, 5  ;;  %v1128_v9 = vpack.c.b16 %v1124_v31, %v1123_v55  ;;  %v1141_v36 = vpack.c.b16 %v1137_v54, %v1092_v18  ;;  %v9053_v55 = vld [vmem:[%s13146_s23 + $0x40] sm:$0xff]  ;;  %v9046_v57 = vld [vmem:[%s13146_s23 + $0x8] sm:$0xff] }
  0x69   : > { %1113 = vrot.lane.b32.xlu2 %v1107_v44, %s13096_s26  ;;  %v1104_v63 = vunpack.c.l.b16 %v993_v13  ;;  %v1053_v20 = vrot.slane %v1052_v14, 4  ;;  %v9811_v40 = vsel %vm9626_vm10, %v8346_v32, %v1063_v33  ;;  %1393 = vmatpush.bf16.msra.mxu1 %v9053_v55  ;;  %v9045_v61 = vld [vmem:[%s13146_s23] sm:$0xff] }
  0x6a   : > { %v1078_v41 = vsel %vm9671_vm11, %v1073_v34, %v1077_v35  ;;  %v1163_v43 = vunpack.c.l.b16 %v9811_v40  ;;  %1360 = vmatpush.bf16.msra.mxu0 %v9049_v51 }
  0x6b   : > { %1190 = vrot.lane.b32.xlu1 %v1107_v44, %s13093_s2  ;;  %v1108_v27 = vpack.c.b16 %v1104_v63, %v1103_v62  ;;  %v1058_v24 = vsel %vm9671_vm11, %v1053_v20, %v1057_v21  ;;  %s13150_s2 = smov 112   ;;  %v1176_v44 = vunpack.c.l.b16 %v9778_v4  ;;  %v1186_v45 = vunpack.c.l.b16 %v1078_v41 }
  0x6c   : > { %1133 = vrot.lane.b32.xlu0 %v9762_v46, %s13144_s0  ;;  %v1150_v58 = vunpack.c.l.b16 %v1058_v24  ;;  %v1167_v49 = vpack.c.b16 %v1163_v43, %v1124_v31  ;;  %8384 = vmatmul.msk.bf16.vlgmr.msra.gmra.mxu1 %vm1198_vm12, %v9717_v59 }
  0x6d   : > { %v1177_v47 = vpack.c.b16 %v1176_v44, %v1137_v54  ;;  %v8347_v54 = vrot.slane %v9778_v4, 9 }
  0x6e   : > { %v1154_v38 = vpack.c.b16 %v1150_v58, %v1104_v63  ;;  %v1187_v48 = vpack.c.b16 %v1186_v45, %v1150_v58  ;;  %1361 = vmatpush.bf16.msra.mxu0 %v9048_v52  ;;  %v1083_v58 = vrot.slane %v9794_v23, 5 }
  0x70   : > { %v1084_v32 = vsel %vm9626_vm10, %v8347_v54, %v1083_v58 }
  0x71   : > { %1159 = vrot.lane.b32.xlu2 %v1153_v8, %s13148_s24  ;;  %v1196_v34 = vunpack.c.l.b16 %v1084_v32 }
  0x72   : > { %1362 = vmatpush.bf16.msra.mxu0 %v9047_v53 }
  0x73   : > { %1146 = vrot.lane.b32.xlu1 %v1140_v7, %s13147_s29 }
  0x74   : > { %1172 = vrot.lane.b32.xlu0 %v1166_v10, %s13149_s25 }
  0x76   : > { %1363 = vmatpush.bf16.msra.mxu0 %v9046_v57 }
  0x79   : > { %1192 = vrot.lane.b32.xlu2 %v1108_v27, %s13150_s2 }
  0x7a   : > { %1364 = vmatpush.bf16.msra.mxu0 %v9045_v61 }
  0x7b   : > { %1182 = vrot.lane.b32.xlu1 %v9796_v26, %s13143_s27 }
  0x7c   : > { %1115 = vrot.lane.b32.xlu0 %v1108_v27, %s13096_s26  ;;  %8385 = vmatmul.msk.bf16.gmra.mxu1 %vm1198_vm12, %v9762_v46  ;;  %s13153_s26 = smov 16  }
  0x81   : > { %1148 = vrot.lane.b32.xlu2 %v1141_v36, %s13147_s29 }
  0x83   : > { %1135 = vrot.lane.b32.xlu1 %v1128_v9, %s13144_s0 }
  0x84   : > { %1161 = vrot.lane.b32.xlu0 %v1154_v38, %s13148_s24 }
  0x89   : > { %1184 = vrot.lane.b32.xlu2 %v1177_v47, %s13143_s27 }
  0x8b   : > { %1174 = vrot.lane.b32.xlu1 %v1167_v49, %s13149_s25 }
  0x8c   : > { %1194 = vrot.lane.b32.xlu0 %v1187_v48, %s13150_s2  ;;  %8386 = vmatmul.msk.bf16.gmra.mxu1 %vm1198_vm12, %v1128_v9  ;;  %v1197_v9 = vpack.c.b16 %v1196_v34, %v1163_v43 }
  0x9c   : > { %8387 = vmatmul.msk.bf16.gmra.mxu1 %vm1198_vm12, %v1197_v9 }
  0xa0   : > { %v1179_v60 = vpop.permute.xlu2 %1178 }
  0xab   : > { %v1169_v56 = vpop.permute.xlu2 %1168 }
  0xb3   : > { %v1132_v6 = vpop.permute.xlu2 %1131 }
  0xb4   : > { %v1145_v62 = vpop.permute.xlu0 %1144 }
  0xb7   : > { %v1143_v2 = vpop.permute.xlu1 %1142 }
  0xbb   : > { %v1171_v46 = vpop.permute.xlu2 %1170 }
  0xbe   : > { %v1130_v5 = vpop.permute.xlu0 %1129 }
  0xc3   : > { %v1114_v19 = vpop.permute.xlu2 %1113 }
  0xc5   : > { %v1156_v7 = vpop.permute.xlu1 %1155 }
  0xc6   : > { %v1110_v8 = vpop.permute.xlu0 %1109 }
  0xc7   : > { %v1201_v59 = vsel %vm1198_vm12, %v9651_v16, %v1110_v8 }
  0xc8   : > { %v1213_v10 = vsel %vm1211_vm13, %v1201_v59, %v1130_v5 }
  0xc9   : > { %v1222_v11 = vsel %vm1220_vm14, %v1213_v10, %v1143_v2  ;;  %v1559_v10 = vld [vmem:[#allocation2] sm:$0xf] }
  0xca   : > { %v1231_v13 = vsel %vm1229_vm15, %v1222_v11, %v1156_v7 }
  0xcb   : > { %v1240_v14 = vsel %vm1238_vm0, %v1231_v13, %v1169_v56  ;;  %v1160_v30 = vpop.permute.xlu2 %1159 }
  0xcc   : > { %v1249_v18 = vsel %vm1247_vm1, %v1240_v14, %v1179_v60 }
  0xcd   : > { %v1112_v15 = vpop.permute.xlu1 %1111 }
  0xce   : > { %v1189_v17 = vpop.permute.xlu0 %1188  ;;  %v1204_v63 = vsel %vm1198_vm12, %v9663_v37, %v1112_v15  ;;  %v1207_v37 = vsel %vm1198_vm12, %v9745_v25, %v1114_v19  ;;  %v1580_v15 = vshrl.u32 %v1559_v10, 16  ;;  %v1514_v19 = vld [vmem:[#allocation2 + $0xc] sm:$0x1] }
  0xcf   : > { %v1258_v16 = vsel %vm1256_vm2, %v1249_v18, %v1189_v17  ;;  %v1215_v3 = vsel %vm1211_vm13, %v1204_v63, %v1132_v6  ;;  %v1583_v63 = vshll.u32 %v1559_v10, 16 }
  0xd0   : > { %1365 = vmatmul.bf16.vlgmr.msra.gmra.mxu0 %v1258_v16  ;;  %v1224_v22 = vsel %vm1220_vm14, %v1215_v3, %v1145_v62  ;;  %v1511_v3 = vld [vmem:[#allocation2 + $0x8] sm:$0xf] }
  0xd3   : > { %v1193_v4 = vpop.permute.xlu2 %1192 }
  0xd5   : > { %v1158_v20 = vpop.permute.xlu1 %1157 }
  0xd6   : > { %v1181_v21 = vpop.permute.xlu0 %1180  ;;  %v1233_v0 = vsel %vm1229_vm15, %v1224_v22, %v1158_v20 }
  0xd7   : > { %v1242_v27 = vsel %vm1238_vm0, %v1233_v0, %v1171_v46  ;;  %v1560_v0 = vld [vmem:[#allocation2 + $0x4] sm:$0x1] }
  0xd8   : > { %v1251_v28 = vsel %vm1247_vm1, %v1242_v27, %v1181_v21  ;;  %v1582_v27 = vrot.slane %v1580_v15, 4  ;;  %v1709_v54 = vrot.slane %v1560_v0, 5  ;;  %v1526_v15 = vld [vmem:[#allocation2 + $0x1c] sm:$0x1] }
  0xdb   : > { %v1149_v47 = vpop.permute.xlu2 %1148 }
  0xdd   : > { %v1191_v24 = vpop.permute.xlu1 %1190 }
  0xde   : > { %v1134_v29 = vpop.permute.xlu0 %1133  ;;  %v1261_v31 = vsel %vm1256_vm2, %v1251_v28, %v1191_v24 }
  0xdf   : > { %v1217_v33 = vsel %vm1211_vm13, %v1207_v37, %v1134_v29  ;;  %v8388_v37 = vrot.slane %v1559_v10, 9 }
  0xe0   : > { %1370 = vmatmul.bf16.gmra.mxu0 %v1261_v31 }
  0xe3   : > { %v1185_v53 = vpop.permute.xlu2 %1184 }
  0xe5   : > { %v1147_v35 = vpop.permute.xlu1 %1146 }
  0xe6   : > { %v1226_v36 = vsel %vm1220_vm14, %v1217_v33, %v1147_v35  ;;  %v1173_v38 = vpop.permute.xlu0 %1172 }
  0xe7   : > { %v1235_v25 = vsel %vm1229_vm15, %v1226_v36, %v1160_v30  ;;  %v1585_v30 = vrot.slane %v1583_v63, 5 }
  0xe8   : > { %v1244_v23 = vsel %vm1238_vm0, %v1235_v25, %v1173_v38  ;;  %v1517_v38 = vld [vmem:[#allocation2 + $0x10] sm:$0xf]  ;;  %v1520_v25 = vld [vmem:[#allocation2 + $0x14] sm:$0x1] }
  0xe9   : > { %v1395_v56 = vpop.f32.mrf.mxu1  ;;  %v1586_v36 = vor.u32 %v1585_v30, %v1582_v27 }
  0xed   : > { %v1183_v41 = vpop.permute.xlu1 %1182 }
  0xee   : > { %v1253_v44 = vsel %vm1247_vm1, %v1244_v23, %v1183_v41  ;;  %v1116_v45 = vpop.permute.xlu0 %1115 }
  0xef   : > { %v1264_v49 = vsel %vm1256_vm2, %v1253_v44, %v1193_v4  ;;  %v1210_v40 = vsel %vm1198_vm12, %v9796_v26, %v1116_v45  ;;  %v9893_v26 = vld [vmem:[%s13151_s30] ss:$0 sm:$0xff]  ;;  %v1710_v4 = vsel %vm9626_vm10, %v8388_v37, %v1709_v54  ;;  %v1589_v45 = vshll.u32 %v1560_v0, 16  ;;  %s13159_s30 = sld [smem:[#allocation26_spill]] }
  0xf0   : > { %1375 = vmatmul.bf16.gmra.mxu0 %v1264_v49  ;;  %v1779_v49 = vunpack.c.l.b16 %v1559_v10 }
  0xf1   : > { %v1397_v2 = vpop.f32.mrf.mxu1 }
  0xf5   : > { %v1136_v43 = vpop.permute.xlu1 %1135 }
  0xf6   : > { %v1219_v48 = vsel %vm1211_vm13, %v1210_v40, %v1136_v43  ;;  %v1162_v50 = vpop.permute.xlu0 %1161 }
  0xf7   : > { %v1228_v51 = vsel %vm1220_vm14, %v1219_v48, %v1149_v47 }
  0xf8   : > { %v1237_v52 = vsel %vm1229_vm15, %v1228_v51, %v1162_v50  ;;  %v1587_v50 = vrot.slane %v1586_v36, 4 }
  0xf9   : > { %v1400_v46 = vpop.f32.mrf.mxu1 }
  0xfd   : > { %v1175_v55 = vpop.permute.xlu1 %1174 }
  0xfe   : > { %v1246_v57 = vsel %vm1238_vm0, %v1237_v52, %v1175_v55  ;;  %v1195_v60 = vpop.permute.xlu0 %1194  ;;  %v1811_v55 = vunpack.c.l.b16 %v1710_v4 }
  0xff   : > { %v1255_v61 = vsel %vm1247_vm1, %v1246_v57, %v1185_v53 }
 0x100   : > { %v1267_v62 = vsel %vm1256_vm2, %v1255_v61, %v1195_v60 }
 0x101   : > { %1380 = vmatmul.bf16.gmra.mxu0 %v1267_v62  ;;  %v1402_v9 = vpop.f32.mrf.mxu1 }
 0x14d   : > { %v1366_v5 = vpop.f32.mrf.mxu0 }
 0x14e   : > { %v1367_v6 = vadd.f32 %v9893_v26, %v1366_v5 }
 0x150   : > { %v1396_v7 = vadd.f32 %v1395_v56, %v1367_v6 }
 0x152   : > { %v1415_v8 = vmax.f32 %v1396_v7, 0.0 }
 0x154   : > { %v1423_v59 = vpack.c.bf16 %v1415_v8, %v1415_v8 }
 0x155   : > { %v1368_v11 = vpop.f32.mrf.mxu0 }
 0x156   : > { %v1432_v13 = vshrl.u32 %v1423_v59, 16  ;;  %v1369_v14 = vadd.f32 %v9893_v26, %v1368_v11  ;;  %v1435_v18 = vshll.u32 %v1423_v59, 16 }
 0x158   : > { %v1434_v17 = vrot.slane %v1432_v13, 7  ;;  %v1398_v16 = vadd.f32 %v1397_v2, %v1369_v14  ;;  %v1591_v2 = vrot.slane %v1589_v45, 5  ;;  %v1405_v13 = vpop.f32.mrf.mxu1 }
 0x15a   : > { %v1437_v20 = vor.u32 %v1435_v18, %v1434_v17  ;;  %v1438_v21 = vrot.slane %v1434_v17, 4  ;;  %v1416_v22 = vmax.f32 %v1398_v16, 0.0 }
 0x15c   : > { %v1512_v28 = vsel %vm9562_vm4, %v1437_v20, %v1511_v3  ;;  %v1515_v24 = vsel %vm9594_vm7, %v1438_v21, %v1514_v19  ;;  %v1424_v29 = vpack.c.bf16 %v1416_v22, %v1416_v22  ;;  %v1592_v19 = vsel %vm9671_vm11, %v1587_v50, %v1591_v2 }
 0x15d   : > { %1513 = vst [vmem:[#allocation2 + $0x8] sm:$0xf] %v1512_v28  ;;  %v1371_v31 = vpop.f32.mrf.mxu0  ;;  %v1791_v37 = vunpack.c.l.b16 %v1592_v19 }
 0x15e   : > { %1516 = vst [vmem:[#allocation2 + $0xc] sm:$0x1] %v1515_v24  ;;  %v1440_v58 = vshrl.u32 %v1424_v29, 16  ;;  %v1372_v32 = vadd.f32 %v9893_v26, %v1371_v31  ;;  %v1443_v34 = vshll.u32 %v1424_v29, 16 }
 0x160   : > { %v1442_v33 = vrot.slane %v1440_v58, 7  ;;  %v1401_v35 = vadd.f32 %v1400_v46, %v1372_v32  ;;  %v1523_v46 = vld [vmem:[#allocation2 + $0x18] sm:$0xf] }
 0x162   : > { %v1445_v23 = vor.u32 %v1443_v34, %v1442_v33  ;;  %v1446_v41 = vrot.slane %v1442_v33, 4  ;;  %v1417_v44 = vmax.f32 %v1401_v35, 0.0 }
 0x164   : > { %v1518_v47 = vsel %vm9562_vm4, %v1445_v23, %v1517_v38  ;;  %v1521_v40 = vsel %vm9594_vm7, %v1446_v41, %v1520_v25  ;;  %v1425_v43 = vpack.c.bf16 %v1417_v44, %v1417_v44  ;;  %v1561_v48 = vld [vmem:[#allocation2 + $0x8] sm:$0xf]  ;;  %v1529_v41 = vld [vmem:[#allocation2 + $0x20] sm:$0xf] }
 0x165   : > { %1519 = vst [vmem:[#allocation2 + $0x10] sm:$0xf] %v1518_v47  ;;  %v1373_v51 = vpop.f32.mrf.mxu0  ;;  %v1562_v52 = vld [vmem:[#allocation2 + $0xc] sm:$0x1]  ;;  %v8389_v53 = vrot.slane %v1561_v48, 9  ;;  %v1780_v57 = vunpack.c.l.b16 %v1561_v48  ;;  %v1594_v60 = vshrl.u32 %v1561_v48, 16 }
 0x166   : > { %1522 = vst [vmem:[#allocation2 + $0x14] sm:$0x1] %v1521_v40  ;;  %v1448_v61 = vshrl.u32 %v1425_v43, 16  ;;  %v1374_v62 = vadd.f32 %v9893_v26, %v1373_v51  ;;  %v1713_v56 = vrot.slane %v1562_v52, 5  ;;  %v1451_v5 = vshll.u32 %v1425_v43, 16 }
 0x167   : > { %v1596_v6 = vrot.slane %v1594_v60, 4  ;;  %v1597_v7 = vshll.u32 %v1561_v48, 16  ;;  %v9909_v8 = vpack.c.b16 %v1780_v57, %v1779_v49  ;;  %v1603_v14 = vshll.u32 %v1562_v52, 16  ;;  %v1532_v47 = vld [vmem:[#allocation2 + $0x24] sm:$0x1] }
 0x168   : > { %v1450_v59 = vrot.slane %v1448_v61, 7  ;;  %v1403_v10 = vadd.f32 %v1402_v9, %v1374_v62  ;;  %v1714_v11 = vsel %vm9626_vm10, %v8389_v53, %v1713_v56  ;;  %v9924_v9 = vld [vmem:[%s13152_s1 + $0x40] sm:$0xff] }
 0x169   : > { %v1812_v17 = vunpack.c.l.b16 %v1714_v11  ;;  %v1599_v18 = vrot.slane %v1597_v7, 5  ;;  %v1605_v24 = vrot.slane %v1603_v14, 5  ;;  %9181 = vmatpush.bf16.msra.mxu3 %v9924_v9 }
 0x16a   : > { %v1453_v16 = vor.u32 %v1451_v5, %v1450_v59  ;;  %v1454_v63 = vrot.slane %v1450_v59, 4  ;;  %v1418_v3 = vmax.f32 %v1403_v10, 0.0 }
 0x16b   : > { %v1819_v20 = vpack.c.b16 %v1812_v17, %v1811_v55  ;;  %v1600_v21 = vor.u32 %v1599_v18, %v1596_v6 }
 0x16c   : > { %v1524_v22 = vsel %vm9562_vm4, %v1453_v16, %v1523_v46  ;;  %v1527_v0 = vsel %vm9594_vm7, %v1454_v63, %v1526_v15  ;;  %v1426_v27 = vpack.c.bf16 %v1418_v3, %v1418_v3  ;;  %v1563_v28 = vld [vmem:[#allocation2 + $0x10] sm:$0xf] }
 0x16d   : > { %1525 = vst [vmem:[#allocation2 + $0x18] sm:$0xf] %v1524_v22  ;;  %1823 = vrot.lane.b32.xlu2 %v1819_v20, %s13144_s0  ;;  %v1376_v29 = vpop.f32.mrf.mxu0  ;;  %v1781_v30 = vunpack.c.l.b16 %v1563_v28  ;;  %v1601_v31 = vrot.slane %v1600_v21, 4  ;;  %v1564_v54 = vld [vmem:[#allocation2 + $0x14] sm:$0x1]  ;;  %v8390_v58 = vrot.slane %v1563_v28, 9 }
 0x16e   : > { %1528 = vst [vmem:[#allocation2 + $0x1c] sm:$0x1] %v1527_v0  ;;  %v1456_v32 = vshrl.u32 %v1426_v27, 16  ;;  %v1459_v33 = vshll.u32 %v1426_v27, 16  ;;  %v1377_v34 = vadd.f32 %v9893_v26, %v1376_v29  ;;  %v1717_v35 = vrot.slane %v1564_v54, 5 }
 0x16f   : > { %v1832_v36 = vpack.c.b16 %v1781_v30, %v1780_v57  ;;  %v1606_v38 = vsel %vm9671_vm11, %v1601_v31, %v1605_v24  ;;  %v1608_v25 = vshrl.u32 %v1563_v28, 16  ;;  %v1611_v4 = vshll.u32 %v1563_v28, 16  ;;  %v1407_v57 = vpop.f32.mrf.mxu1  ;;  %v1535_v20 = vld [vmem:[#allocation2 + $0x28] sm:$0xf]  ;;  %v1538_v27 = vld [vmem:[#allocation2 + $0x2c] sm:$0x1] }
 0x170   : > { %v1458_v23 = vrot.slane %v1456_v32, 7  ;;  %v1406_v44 = vadd.f32 %v1405_v13, %v1377_v34  ;;  %v1792_v45 = vunpack.c.l.b16 %v1606_v38  ;;  %v1718_v49 = vsel %vm9626_vm10, %v8390_v58, %v1717_v35 }
 0x171   : > { %1836 = vrot.lane.b32.xlu0 %v1832_v36, %s13147_s29  ;;  %v1813_v40 = vunpack.c.l.b16 %v1718_v49  ;;  %v1610_v43 = vrot.slane %v1608_v25, 4  ;;  %v1613_v48 = vrot.slane %v1611_v4, 5  ;;  %v1617_v50 = vshll.u32 %v1564_v54, 16 }
 0x172   : > { %v1461_v51 = vor.u32 %v1459_v33, %v1458_v23  ;;  %v1462_v52 = vrot.slane %v1458_v23, 4  ;;  %v1419_v53 = vmax.f32 %v1406_v44, 0.0  ;;  %v1799_v55 = vpack.c.b16 %v1792_v45, %v1791_v37 }
 0x173   : > { %v1858_v60 = vpack.c.b16 %v1813_v40, %v1812_v17  ;;  %v1614_v61 = vor.u32 %v1613_v48, %v1610_v43  ;;  %v1619_v6 = vrot.slane %v1617_v50, 5 }
 0x174   : > { %v1530_v62 = vsel %vm9562_vm4, %v1461_v51, %v1529_v41  ;;  %v1533_v56 = vsel %vm9594_vm7, %v1462_v52, %v1532_v47  ;;  %v1427_v2 = vpack.c.bf16 %v1419_v53, %v1419_v53  ;;  %1803 = vrot.lane.b32.xlu1 %v1799_v55, %s13153_s26  ;;  %v1565_v5 = vld [vmem:[#allocation2 + $0x18] sm:$0xf] }
 0x175   : > { %1531 = vst [vmem:[#allocation2 + $0x20] sm:$0xf] %v1530_v62  ;;  %1862 = vrot.lane.b32.xlu2 %v1858_v60, %s13149_s25  ;;  %v1378_v7 = vpop.f32.mrf.mxu0  ;;  %v1782_v59 = vunpack.c.l.b16 %v1565_v5  ;;  %v1615_v10 = vrot.slane %v1614_v61, 4  ;;  %v1566_v11 = vld [vmem:[#allocation2 + $0x1c] sm:$0x1]  ;;  %v8391_v13 = vrot.slane %v1565_v5, 9 }
 0x176   : > { %1534 = vst [vmem:[#allocation2 + $0x24] sm:$0x1] %v1533_v56  ;;  %v1464_v14 = vshrl.u32 %v1427_v2, 16  ;;  %v1467_v46 = vshll.u32 %v1427_v2, 16  ;;  %v1379_v15 = vadd.f32 %v9893_v26, %v1378_v7  ;;  %v1721_v17 = vrot.slane %v1566_v11, 5 }
 0x177   : > { %v9939_v18 = vpack.c.b16 %v1782_v59, %v1781_v30  ;;  %v1620_v16 = vsel %vm9671_vm11, %v1615_v10, %v1619_v6  ;;  %v1622_v63 = vshrl.u32 %v1565_v5, 16  ;;  %v1625_v3 = vshll.u32 %v1565_v5, 16  ;;  %v1410_v36 = vpop.f32.mrf.mxu1  ;;  %v1541_v62 = vld [vmem:[#allocation2 + $0x30] sm:$0xf]  ;;  %v1544_v56 = vld [vmem:[#allocation2 + $0x34] sm:$0x1] }
 0x178   : > { %v1466_v19 = vrot.slane %v1464_v14, 7  ;;  %v1408_v21 = vadd.f32 %v1407_v57, %v1379_v15  ;;  %v1793_v22 = vunpack.c.l.b16 %v1620_v16  ;;  %v9945_v0 = vsel %vm9626_vm10, %v8391_v13, %v1721_v17 }
 0x179   : > { %1872 = vrot.lane.b32.xlu0 %v9939_v18, %s13143_s27  ;;  %v1814_v28 = vunpack.c.l.b16 %v9945_v0  ;;  %v1624_v24 = vrot.slane %v1622_v63, 4  ;;  %v1627_v29 = vrot.slane %v1625_v3, 5  ;;  %v1631_v30 = vshll.u32 %v1566_v11, 16  ;;  %v1550_v0 = vld [vmem:[#allocation2 + $0x3c] sm:$0x1] }
 0x17a   : > { %v1469_v31 = vor.u32 %v1467_v46, %v1466_v19  ;;  %v1470_v37 = vrot.slane %v1466_v19, 4  ;;  %v1420_v54 = vmax.f32 %v1408_v21, 0.0  ;;  %v1845_v58 = vpack.c.b16 %v1793_v22, %v1792_v45 }
 0x17b   : > { %v1628_v32 = vor.u32 %v1627_v29, %v1624_v24  ;;  %v1633_v25 = vrot.slane %v1631_v30, 5  ;;  %v9959_v4 = vpack.c.b16 %v1814_v28, %v1813_v40 }
 0x17c   : > { %v1536_v33 = vsel %vm9562_vm4, %v1469_v31, %v1535_v20  ;;  %v1539_v34 = vsel %vm9594_vm7, %v1470_v37, %v1538_v27  ;;  %v1428_v35 = vpack.c.bf16 %v1420_v54, %v1420_v54  ;;  %1849 = vrot.lane.b32.xlu1 %v1845_v58, %s13148_s24  ;;  %v9955_v38 = vld [vmem:[#allocation2 + $0x20] sm:$0xf] }
 0x17d   : > { %1537 = vst [vmem:[#allocation2 + $0x28] sm:$0xf] %v1536_v33  ;;  %v1783_v23 = vunpack.c.l.b16 %v9955_v38  ;;  %v1629_v41 = vrot.slane %v1628_v32, 4  ;;  %v1568_v44 = vld [vmem:[#allocation2 + $0x24] sm:$0x1]  ;;  %v8392_v45 = vrot.slane %v9955_v38, 9 }
 0x17e   : > { %1540 = vst [vmem:[#allocation2 + $0x2c] sm:$0x1] %v1539_v34  ;;  %v1472_v49 = vshrl.u32 %v1428_v35, 16  ;;  %v1475_v47 = vshll.u32 %v1428_v35, 16  ;;  %v1381_v43 = vpop.f32.mrf.mxu0  ;;  %v1725_v48 = vrot.slane %v1568_v44, 5  ;;  %v1636_v50 = vshrl.u32 %v9955_v38, 16 }
 0x17f   : > { %v1382_v51 = vadd.f32 %v9893_v26, %v1381_v43  ;;  %v1833_v52 = vpack.c.b16 %v1783_v23, %v1782_v59  ;;  %v1634_v40 = vsel %vm9671_vm11, %v1629_v41, %v1633_v25  ;;  %v1639_v53 = vshll.u32 %v9955_v38, 16  ;;  %v1547_v41 = vld [vmem:[#allocation2 + $0x38] sm:$0xf] }
 0x180   : > { %v1474_v55 = vrot.slane %v1472_v49, 7  ;;  %v1794_v57 = vunpack.c.l.b16 %v1634_v40  ;;  %v1726_v60 = vsel %vm9626_vm10, %v8392_v45, %v1725_v48  ;;  %v1638_v61 = vrot.slane %v1636_v50, 4 }
 0x181   : > { %v1411_v2 = vadd.f32 %v1410_v36, %v1382_v51  ;;  %1825 = vrot.lane.b32.xlu0 %v9959_v4, %s13144_s0  ;;  %v1641_v5 = vrot.slane %v1639_v53, 5  ;;  %v1645_v6 = vshll.u32 %v1568_v44, 16  ;;  %v1815_v13 = vunpack.c.l.b16 %v1726_v60 }
 0x182   : > { %v1477_v7 = vor.u32 %v1475_v47, %v1474_v55  ;;  %v1478_v59 = vrot.slane %v1474_v55, 4  ;;  %v1800_v10 = vpack.c.b16 %v1794_v57, %v1793_v22  ;;  %v1412_v22 = vpop.f32.mrf.mxu1 }
 0x183   : > { %v1421_v11 = vmax.f32 %v1411_v2, 0.0  ;;  %v1642_v14 = vor.u32 %v1641_v5, %v1638_v61  ;;  %v1647_v17 = vrot.slane %v1645_v6, 5  ;;  %v1859_v37 = vpack.c.b16 %v1815_v13, %v1814_v28 }
 0x184   : > { %v1542_v46 = vsel %vm9562_vm4, %v1477_v7, %v1541_v62  ;;  %v1545_v15 = vsel %vm9594_vm7, %v1478_v59, %v1544_v56  ;;  %1838 = vrot.lane.b32.xlu1 %v1833_v52, %s13147_s29  ;;  %1805 = vrot.lane.b32.xlu2 %v1800_v10, %s13153_s26  ;;  %v9980_v16 = vld [vmem:[#allocation2 + $0x28] sm:$0xf] }
 0x185   : > { %1543 = vst [vmem:[#allocation2 + $0x30] sm:$0xf] %v1542_v46  ;;  %v1429_v63 = vpack.c.bf16 %v1421_v11, %v1421_v11  ;;  %v1643_v3 = vrot.slane %v1642_v14, 4  ;;  %v1570_v19 = vld [vmem:[#allocation2 + $0x2c] sm:$0x1]  ;;  %v8393_v20 = vrot.slane %v9980_v16, 9 }
 0x186   : > { %1546 = vst [vmem:[#allocation2 + $0x34] sm:$0x1] %v1545_v15  ;;  %v1383_v21 = vpop.f32.mrf.mxu0  ;;  %v1729_v27 = vrot.slane %v1570_v19, 5  ;;  %v1650_v24 = vshrl.u32 %v9980_v16, 16  ;;  %v1653_v29 = vshll.u32 %v9980_v16, 16  ;;  %v1659_v44 = vshll.u32 %v1570_v19, 16 }
 0x187   : > { %v1480_v30 = vshrl.u32 %v1429_v63, 16  ;;  %v1384_v31 = vadd.f32 %v9893_v26, %v1383_v21  ;;  %v1648_v54 = vsel %vm9671_vm11, %v1643_v3, %v1647_v17  ;;  %v1483_v58 = vshll.u32 %v1429_v63, 16  ;;  %v1556_v14 = vld [vmem:[#allocation2 + $0x44] sm:$0x1] }
 0x188   : > { %v1795_v32 = vunpack.c.l.b16 %v1648_v54  ;;  %v9992_v33 = vsel %vm9626_vm10, %v8393_v20, %v1729_v27  ;;  %v1652_v34 = vrot.slane %v1650_v24, 4  ;;  %v1655_v26 = vrot.slane %v1653_v29, 5 }
 0x189   : > { %v1482_v35 = vrot.slane %v1480_v30, 7  ;;  %v1413_v36 = vadd.f32 %v1412_v22, %v1384_v31  ;;  %1864 = vrot.lane.b32.xlu0 %v1859_v37, %s13149_s25  ;;  %v1816_v25 = vunpack.c.l.b16 %v9992_v33  ;;  %v1661_v61 = vrot.slane %v1659_v44, 5 }
 0x18a   : > { %v1846_v28 = vpack.c.b16 %v1795_v32, %v1794_v57  ;;  %v1656_v50 = vor.u32 %v1655_v26, %v1652_v34  ;;  %v1784_v57 = vunpack.c.l.b16 %v9980_v16 }
 0x18b   : > { %v1485_v45 = vor.u32 %v1483_v58, %v1482_v35  ;;  %v1486_v49 = vrot.slane %v1482_v35, 4  ;;  %v1422_v47 = vmax.f32 %v1413_v36, 0.0  ;;  %v1821_v43 = vpack.c.b16 %v1816_v25, %v1815_v13  ;;  %v1553_v13 = vld [vmem:[#allocation2 + $0x40] sm:$0xf] }
 0x18c   : > { %v9998_v48 = vld [vmem:[#allocation2 + $0x30] sm:$0xf]  ;;  %1851 = vrot.lane.b32.xlu2 %v1846_v28, %s13148_s24  ;;  %1882 = vrot.lane.b32.xlu1 %v1800_v10, %s13150_s2  ;;  %v1657_v60 = vrot.slane %v1656_v50, 4  ;;  %v10014_v46 = vpack.c.b16 %v1784_v57, %v1783_v23 }
 0x18d   : > { %v1548_v51 = vsel %vm9562_vm4, %v1485_v45, %v1547_v41  ;;  %v1551_v52 = vsel %vm9594_vm7, %v1486_v49, %v1550_v0  ;;  %v1430_v40 = vpack.c.bf16 %v1422_v47, %v1422_v47  ;;  %8435 = vmatmul.msk.bf16.vlgmr.msra.gmra.mxu3 %vm1198_vm12, %v1821_v43  ;;  %v1572_v53 = vld [vmem:[#allocation2 + $0x34] sm:$0x1]  ;;  %v1664_v55 = vshrl.u32 %v9998_v48, 16 }
 0x18e   : > { %1549 = vst [vmem:[#allocation2 + $0x38] sm:$0xf] %v1548_v51  ;;  %v1667_v62 = vshll.u32 %v9998_v48, 16  ;;  %v1662_v5 = vsel %vm9671_vm11, %v1657_v60, %v1661_v61  ;;  %v1673_v7 = vshll.u32 %v1572_v53, 16  ;;  %v8394_v17 = vrot.slane %v9998_v48, 9 }
 0x18f   : > { %1552 = vst [vmem:[#allocation2 + $0x3c] sm:$0x1] %v1551_v52  ;;  %v1488_v56 = vshrl.u32 %v1430_v40, 16  ;;  %v1666_v2 = vrot.slane %v1664_v55, 4  ;;  %v1491_v10 = vshll.u32 %v1430_v40, 16  ;;  %v1796_v11 = vunpack.c.l.b16 %v1662_v5 }
 0x190   : > { %v1669_v6 = vrot.slane %v1667_v62, 5  ;;  %v1733_v16 = vrot.slane %v1572_v53, 5  ;;  %v1675_v21 = vrot.slane %v1673_v7, 5  ;;  %v1785_v24 = vunpack.c.l.b16 %v9998_v48  ;;  %v1577_v51 = vld [vmem:[#allocation2 + $0x48] sm:$0xf] }
 0x191   : > { %v1490_v59 = vrot.slane %v1488_v56, 7  ;;  %v1801_v19 = vpack.c.b16 %v1796_v11, %v1795_v32  ;;  %v1578_v40 = vld [vmem:[#allocation2 + $0x4c] sm:$0x1]  ;;  %v8397_v5 = vrot.slane %v1577_v51, 9 }
 0x192   : > { %v1670_v15 = vor.u32 %v1669_v6, %v1666_v2  ;;  %v1734_v30 = vsel %vm9626_vm10, %v8394_v17, %v1733_v16  ;;  %v1834_v44 = vpack.c.b16 %v1785_v24, %v1784_v57  ;;  %v1777_v6 = vrot.slane %v1578_v40, 5 }
 0x193   : > { %v1493_v63 = vor.u32 %v1491_v10, %v1490_v59  ;;  %v1494_v3 = vrot.slane %v1490_v59, 4  ;;  %1807 = vrot.lane.b32.xlu0 %v1801_v19, %s13153_s26  ;;  %v1817_v0 = vunpack.c.l.b16 %v1734_v30  ;;  %v1870_v30 = vunpack.c.l.b16 %v1577_v51 }
 0x194   : > { %1874 = vrot.lane.b32.xlu1 %v10014_v46, %s13143_s27  ;;  %v1671_v20 = vrot.slane %v1670_v15, 4  ;;  %1884 = vrot.lane.b32.xlu2 %v1801_v19, %s13150_s2  ;;  %v1778_v33 = vsel %vm9626_vm10, %v8397_v5, %v1777_v6 }
 0x195   : > { %v1554_v22 = vsel %vm9562_vm4, %v1493_v63, %v1553_v13  ;;  %v1557_v38 = vsel %vm9594_vm7, %v1494_v3, %v1556_v14  ;;  %v10025_v23 = vld [vmem:[#allocation2 + $0x38] sm:$0xf]  ;;  %v1860_v7 = vpack.c.b16 %v1817_v0, %v1816_v25  ;;  %v1760_v13 = vshrl.u32 %v1577_v51, 16 }
 0x196   : > { %1555 = vst [vmem:[#allocation2 + $0x40] sm:$0xf] %v1554_v22  ;;  %v1676_v27 = vsel %vm9671_vm11, %v1671_v20, %v1675_v21  ;;  %v1574_v29 = vld [vmem:[#allocation2 + $0x3c] sm:$0x1]  ;;  %v8395_v31 = vrot.slane %v10025_v23, 9  ;;  %v1678_v58 = vshrl.u32 %v10025_v23, 16  ;;  %v1786_v57 = vunpack.c.l.b16 %v10025_v23 }
 0x197   : > { %1558 = vst [vmem:[#allocation2 + $0x44] sm:$0x1] %v1557_v38  ;;  %v1797_v37 = vunpack.c.l.b16 %v1676_v27  ;;  %v1737_v54 = vrot.slane %v1574_v29, 5  ;;  %v1681_v32 = vshll.u32 %v10025_v23, 16  ;;  %v1687_v34 = vshll.u32 %v1574_v29, 16 }
 0x198   : > { %v1680_v26 = vrot.slane %v1678_v58, 4  ;;  %v10049_v10 = vpack.c.b16 %v1786_v57, %v1785_v24  ;;  %v1763_v14 = vshll.u32 %v1577_v51, 16  ;;  %v1762_v63 = vrot.slane %v1760_v13, 4 }
 0x199   : > { %v1847_v35 = vpack.c.b16 %v1797_v37, %v1796_v11  ;;  %v10037_v36 = vsel %vm9626_vm10, %v8395_v31, %v1737_v54  ;;  %v1683_v41 = vrot.slane %v1681_v32, 5  ;;  %v1689_v48 = vrot.slane %v1687_v34, 5 }
 0x19a   : > { %v1818_v28 = vunpack.c.l.b16 %v10037_v36  ;;  %v1765_v3 = vrot.slane %v1763_v14, 5  ;;  %v1890_v20 = vunpack.c.l.b16 %v1778_v33  ;;  %v1769_v27 = vshll.u32 %v1578_v40, 16 }
 0x19b   : > { %v1684_v45 = vor.u32 %v1683_v41, %v1680_v26  ;;  %1853 = vrot.lane.b32.xlu0 %v1847_v35, %s13148_s24  ;;  %v9061_v26 = vld [vmem:[%s13152_s1 + $0x38] sm:$0xff]  ;;  %v9060_v41 = vld [vmem:[%s13152_s1 + $0x30] sm:$0xff] }
 0x19c   : > { %1827 = vrot.lane.b32.xlu1 %v1821_v43, %s13144_s0  ;;  %v1822_v49 = vpack.c.b16 %v1818_v28, %v1817_v0  ;;  %1840 = vrot.lane.b32.xlu2 %v1834_v44, %s13147_s29  ;;  %v1766_v23 = vor.u32 %v1765_v3, %v1762_v63  ;;  %v9059_v0 = vld [vmem:[%s13152_s1 + $0x28] sm:$0xff]  ;;  %v9057_v44 = vld [vmem:[%s13152_s1 + $0x18] sm:$0xff] }
 0x19d   : > { %v1685_v47 = vrot.slane %v1684_v45, 4  ;;  %v1575_v50 = vld [vmem:[#allocation2 + $0x40] sm:$0xf]  ;;  %2044 = vmatpush.bf16.msra.mxu2 %v9061_v26  ;;  %v9056_v45 = vld [vmem:[%s13152_s1 + $0x10] sm:$0xff] }
 0x19e   : > { %8436 = vmatmul.msk.bf16.gmra.mxu3 %vm1198_vm12, %v1822_v49  ;;  %v1576_v52 = vld [vmem:[#allocation2 + $0x44] sm:$0x1]  ;;  %v1740_v53 = vshrl.u32 %v1575_v50, 16  ;;  %v1743_v55 = vshll.u32 %v1575_v50, 16  ;;  %v8396_v56 = vrot.slane %v1575_v50, 9  ;;  %v1831_v17 = vunpack.c.l.b16 %v1575_v50 }
 0x19f   : > { %v1690_v43 = vsel %vm9671_vm11, %v1685_v47, %v1689_v48  ;;  %v1757_v2 = vrot.slane %v1576_v52, 5  ;;  %v1749_v25 = vshll.u32 %v1576_v52, 16  ;;  %v1767_v31 = vrot.slane %v1766_v23, 4  ;;  %v9054_v47 = vld [vmem:[%s13152_s1] sm:$0xff] }
 0x1a0   : > { %v1798_v60 = vunpack.c.l.b16 %v1690_v43  ;;  %v1742_v61 = vrot.slane %v1740_v53, 4  ;;  %v1745_v62 = vrot.slane %v1743_v55, 5  ;;  %v1835_v22 = vpack.c.b16 %v1831_v17, %v1786_v57 }
 0x1a1   : > { %v1758_v15 = vsel %vm9626_vm10, %v8396_v56, %v1757_v2  ;;  %v1751_v21 = vrot.slane %v1749_v25, 5  ;;  %v1871_v32 = vpack.c.b16 %v1870_v30, %v1831_v17  ;;  %2045 = vmatpush.bf16.msra.mxu2 %v9060_v41 }
 0x1a2   : > { %v1802_v59 = vpack.c.b16 %v1798_v60, %v1797_v37  ;;  %v1746_v11 = vor.u32 %v1745_v62, %v1742_v61  ;;  %v1857_v19 = vunpack.c.l.b16 %v1758_v15  ;;  %v1771_v37 = vrot.slane %v1769_v27, 5 }
 0x1a4   : > { %1866 = vrot.lane.b32.xlu1 %v1860_v7, %s13149_s25  ;;  %1876 = vrot.lane.b32.xlu2 %v10049_v10, %s13143_s27  ;;  %v1747_v16 = vrot.slane %v1746_v11, 4  ;;  %v1891_v24 = vpack.c.b16 %v1890_v20, %v1857_v19  ;;  %v1861_v58 = vpack.c.b16 %v1857_v19, %v1818_v28  ;;  %v1772_v34 = vsel %vm9671_vm11, %v1767_v31, %v1771_v37  ;;  %v9058_v28 = vld [vmem:[%s13152_s1 + $0x20] sm:$0xff] }
 0x1a5   : > { %1886 = vrot.lane.b32.xlu0 %v1802_v59, %s13150_s2  ;;  %v1880_v35 = vunpack.c.l.b16 %v1772_v34  ;;  %2046 = vmatpush.bf16.msra.mxu2 %v9059_v0 }
 0x1a6   : > { %v1752_v38 = vsel %vm9671_vm11, %v1747_v16, %v1751_v21 }
 0x1a7   : > { %v1844_v29 = vunpack.c.l.b16 %v1752_v38 }
 0x1a9   : > { %v1848_v54 = vpack.c.b16 %v1844_v29, %v1798_v60  ;;  %v1881_v36 = vpack.c.b16 %v1880_v35, %v1844_v29  ;;  %2047 = vmatpush.bf16.msra.mxu2 %v9058_v28 }
 0x1ac   : > { %1809 = vrot.lane.b32.xlu1 %v1802_v59, %s13153_s26  ;;  %1829 = vrot.lane.b32.xlu2 %v1822_v49, %s13144_s0  ;;  %v9055_v49 = vld [vmem:[%s13152_s1 + $0x8] sm:$0xff] }
 0x1ad   : > { %1842 = vrot.lane.b32.xlu0 %v1835_v22, %s13147_s29  ;;  %2048 = vmatpush.bf16.msra.mxu2 %v9057_v44 }
 0x1ae   : > { %8437 = vmatmul.msk.bf16.gmra.mxu3 %vm1198_vm12, %v1891_v24 }
 0x1b1   : > { %2049 = vmatpush.bf16.msra.mxu2 %v9056_v45 }
 0x1b4   : > { %1855 = vrot.lane.b32.xlu1 %v1848_v54, %s13148_s24  ;;  %1868 = vrot.lane.b32.xlu2 %v1861_v58, %s13149_s25 }
 0x1b5   : > { %1878 = vrot.lane.b32.xlu0 %v1871_v32, %s13143_s27  ;;  %2050 = vmatpush.bf16.msra.mxu2 %v9055_v49 }
 0x1b9   : > { %2051 = vmatpush.bf16.msra.mxu2 %v9054_v47 }
 0x1bc   : > { %1888 = vrot.lane.b32.xlu1 %v1881_v36, %s13150_s2 }
 0x1bd   : > { %2080 = vmatpush.bf16.msrb.mxu2 %v9924_v9 }
 0x1c7   : > { %v1824_v48 = vpop.permute.xlu2 %1823 }
 0x1cf   : > { %v1863_v51 = vpop.permute.xlu2 %1862 }
 0x1de   : > { %v1806_v53 = vpop.permute.xlu2 %1805 }
 0x1e3   : > { %v1837_v50 = vpop.permute.xlu0 %1836 }
 0x1e6   : > { %v1804_v52 = vpop.permute.xlu1 %1803  ;;  %v1852_v56 = vpop.permute.xlu2 %1851 }
 0x1e7   : > { %v1894_v57 = vsel %vm1198_vm12, %v9909_v8, %v1804_v52  ;;  %v1897_v8 = vsel %vm1198_vm12, %v9939_v18, %v1806_v53 }
 0x1e8   : > { %v1905_v60 = vsel %vm1211_vm13, %v1894_v57, %v1824_v48  ;;  %v10137_v48 = vld [vmem:[%s13154_s4] ss:$0 sm:$0xff]  ;;  %s13160_s4 = sld [smem:[#allocation27_spill]] }
 0x1e9   : > { %v1913_v62 = vsel %vm1220_vm14, %v1905_v60, %v1837_v50 }
 0x1eb   : > { %v1873_v40 = vpop.permute.xlu0 %1872 }
 0x1ee   : > { %v1850_v55 = vpop.permute.xlu1 %1849  ;;  %v1885_v11 = vpop.permute.xlu2 %1884  ;;  %v9175_v39 = vld [vmem:[%s13160_s4 + $0x20] sm:$0xff] }
 0x1ef   : > { %v1921_v2 = vsel %vm1229_vm15, %v1913_v62, %v1850_v55 }
 0x1f0   : > { %v1929_v9 = vsel %vm1238_vm0, %v1921_v2, %v1863_v51 }
 0x1f1   : > { %v1937_v7 = vsel %vm1247_vm1, %v1929_v9, %v1873_v40 }
 0x1f3   : > { %v1826_v43 = vpop.permute.xlu0 %1825 }
 0x1f4   : > { %v1907_v13 = vsel %vm1211_vm13, %v1897_v8, %v1826_v43 }
 0x1f6   : > { %v1839_v61 = vpop.permute.xlu1 %1838  ;;  %v1841_v16 = vpop.permute.xlu2 %1840 }
 0x1f7   : > { %v1915_v15 = vsel %vm1220_vm14, %v1907_v13, %v1839_v61 }
 0x1f8   : > { %v1923_v25 = vsel %vm1229_vm15, %v1915_v15, %v1852_v56 }
 0x1fb   : > { %v1865_v5 = vpop.permute.xlu0 %1864 }
 0x1fc   : > { %v1931_v17 = vsel %vm1238_vm0, %v1923_v25, %v1865_v5 }
 0x1fe   : > { %v1883_v6 = vpop.permute.xlu1 %1882  ;;  %v1877_v38 = vpop.permute.xlu2 %1876 }
 0x1ff   : > { %v1945_v59 = vsel %vm1256_vm2, %v1937_v7, %v1883_v6  ;;  %v2210_v6 = vld [vmem:[#allocation2 + $0x18] sm:$0xf]  ;;  %v2213_v7 = vld [vmem:[#allocation2 + $0x1c] sm:$0x1] }
 0x200   : > { %2052 = vmatmul.bf16.vlgmr.msra.gmra.mxu2 %v1945_v59 }
 0x205   : > { %v1808_v33 = vpop.permute.xlu0 %1807 }
 0x206   : > { %v1875_v14 = vpop.permute.xlu1 %1874  ;;  %v1900_v18 = vsel %vm1198_vm12, %v10014_v46, %v1808_v33  ;;  %v1830_v54 = vpop.permute.xlu2 %1829 }
 0x207   : > { %v1939_v63 = vsel %vm1247_vm1, %v1931_v17, %v1875_v14 }
 0x208   : > { %v1948_v20 = vsel %vm1256_vm2, %v1939_v63, %v1885_v11 }
 0x20d   : > { %v1854_v19 = vpop.permute.xlu0 %1853 }
 0x20e   : > { %v1828_v3 = vpop.permute.xlu1 %1827  ;;  %v1869_v26 = vpop.permute.xlu2 %1868 }
 0x20f   : > { %v1909_v21 = vsel %vm1211_vm13, %v1900_v18, %v1828_v3  ;;  %v2219_v18 = vld [vmem:[#allocation2 + $0x24] sm:$0x1] }
 0x210   : > { %2057 = vmatmul.bf16.gmra.mxu2 %v1948_v20  ;;  %v1917_v22 = vsel %vm1220_vm14, %v1909_v21, %v1841_v16  ;;  %v2087_v49 = vpop.f32.mrf.mxu3  ;;  %v2216_v20 = vld [vmem:[#allocation2 + $0x20] sm:$0xf] }
 0x211   : > { %v1925_v27 = vsel %vm1229_vm15, %v1917_v22, %v1854_v19 }
 0x216   : > { %v1867_v23 = vpop.permute.xlu1 %1866 }
 0x217   : > { %v1933_v24 = vsel %vm1238_vm0, %v1925_v27, %v1867_v23  ;;  %v1887_v29 = vpop.permute.xlu0 %1886 }
 0x218   : > { %v1941_v30 = vsel %vm1247_vm1, %v1933_v24, %v1877_v38  ;;  %v2089_v52 = vpop.f32.mrf.mxu3 }
 0x219   : > { %v1951_v37 = vsel %vm1256_vm2, %v1941_v30, %v1887_v29 }
 0x21e   : > { %v1810_v31 = vpop.permute.xlu1 %1809 }
 0x21f   : > { %v1903_v46 = vsel %vm1198_vm12, %v10049_v10, %v1810_v31  ;;  %v1843_v58 = vpop.permute.xlu0 %1842 }
 0x220   : > { %2062 = vmatmul.bf16.gmra.mxu2 %v1951_v37  ;;  %v1911_v32 = vsel %vm1211_vm13, %v1903_v46, %v1830_v54 }
 0x221   : > { %v1919_v35 = vsel %vm1220_vm14, %v1911_v32, %v1843_v58  ;;  %v2092_v56 = vpop.f32.mrf.mxu3 }
 0x226   : > { %v1856_v34 = vpop.permute.xlu1 %1855 }
 0x227   : > { %v1927_v36 = vsel %vm1229_vm15, %v1919_v35, %v1856_v34  ;;  %v1879_v0 = vpop.permute.xlu0 %1878 }
 0x228   : > { %v1935_v41 = vsel %vm1238_vm0, %v1927_v36, %v1869_v26 }
 0x229   : > { %v1943_v28 = vsel %vm1247_vm1, %v1935_v41, %v1879_v0  ;;  %v2094_v19 = vpop.f32.mrf.mxu3 }
 0x22e   : > { %v1889_v44 = vpop.permute.xlu1 %1888 }
 0x22f   : > { %v1954_v45 = vsel %vm1256_vm2, %v1943_v28, %v1889_v44  ;;  %v2222_v28 = vld [vmem:[#allocation2 + $0x28] sm:$0xf]  ;;  %v2225_v44 = vld [vmem:[#allocation2 + $0x2c] sm:$0x1] }
 0x230   : > { %2067 = vmatmul.bf16.gmra.mxu2 %v1954_v45 }
 0x240   : > { %8434 = vmatmul.msk.bf16.vlgmr.msrb.gmra.mxu2 %vm1198_vm12, %v9959_v4 }
 0x283   : > { %v10130_v10 = vpop.f32.mrf.mxu2 }
 0x28b   : > { %v10132_v47 = vpop.f32.mrf.mxu2 }
 0x293   : > { %v2058_v50 = vpop.f32.mrf.mxu2 }
 0x294   : > { %v2059_v51 = vadd.f32 %v10137_v48, %v2058_v50 }
 0x296   : > { %v2088_v40 = vadd.f32 %v2087_v49, %v2059_v51 }
 0x298   : > { %v2104_v53 = vmax.f32 %v2088_v40, 0.0 }
 0x29a   : > { %v2112_v55 = vpack.c.bf16 %v2104_v53, %v2104_v53  ;;  %v2097_v53 = vpop.f32.mrf.mxu3 }
 0x29b   : > { %v2060_v57 = vpop.f32.mrf.mxu2 }
 0x29c   : > { %v2135_v43 = vshrl.u32 %v2112_v55, 16  ;;  %v2061_v4 = vadd.f32 %v10137_v48, %v2060_v57  ;;  %v2138_v61 = vshll.u32 %v2112_v55, 16 }
 0x29e   : > { %v2137_v60 = vrot.slane %v2135_v43, 7  ;;  %v2090_v62 = vadd.f32 %v2089_v52, %v2061_v4 }
 0x2a0   : > { %v2140_v2 = vor.u32 %v2138_v61, %v2137_v60  ;;  %v2141_v9 = vrot.slane %v2137_v60, 4  ;;  %v2105_v5 = vmax.f32 %v2090_v62, 0.0 }
 0x2a2   : > { %v2211_v59 = vsel %vm9562_vm4, %v2140_v2, %v2210_v6  ;;  %v2214_v11 = vsel %vm9594_vm7, %v2141_v9, %v2213_v7  ;;  %v2113_v8 = vpack.c.bf16 %v2105_v5, %v2105_v5 }
 0x2a3   : > { %2212 = vst [vmem:[#allocation2 + $0x18] sm:$0xf] %v2211_v59  ;;  %v2063_v13 = vpop.f32.mrf.mxu2 }
 0x2a4   : > { %2215 = vst [vmem:[#allocation2 + $0x1c] sm:$0x1] %v2214_v11  ;;  %v2143_v14 = vshrl.u32 %v2113_v8, 16  ;;  %v2064_v15 = vadd.f32 %v10137_v48, %v2063_v13  ;;  %v2146_v25 = vshll.u32 %v2113_v8, 16 }
 0x2a6   : > { %v2145_v33 = vrot.slane %v2143_v14, 7  ;;  %v2093_v17 = vadd.f32 %v2092_v56, %v2064_v15 }
 0x2a8   : > { %v2148_v16 = vor.u32 %v2146_v25, %v2145_v33  ;;  %v2149_v63 = vrot.slane %v2145_v33, 4  ;;  %v2106_v3 = vmax.f32 %v2093_v17, 0.0 }
 0x2aa   : > { %v2217_v21 = vsel %vm9562_vm4, %v2148_v16, %v2216_v20  ;;  %v2220_v22 = vsel %vm9594_vm7, %v2149_v63, %v2219_v18  ;;  %v2114_v38 = vpack.c.bf16 %v2106_v3, %v2106_v3  ;;  %v10150_v23 = vld [vmem:[#allocation2 + $0x18] sm:$0xf]  ;;  %v2228_v20 = vld [vmem:[#allocation2 + $0x30] sm:$0xf]  ;;  %v2231_v18 = vld [vmem:[#allocation2 + $0x34] sm:$0x1] }
 0x2ab   : > { %2218 = vst [vmem:[#allocation2 + $0x20] sm:$0xf] %v2217_v21  ;;  %v2065_v27 = vpop.f32.mrf.mxu2  ;;  %v2253_v24 = vld [vmem:[#allocation2 + $0x1c] sm:$0x1]  ;;  %v2309_v29 = vshrl.u32 %v10150_v23, 16  ;;  %v8441_v37 = vrot.slane %v10150_v23, 9  ;;  %v2469_v57 = vunpack.c.l.b16 %v10150_v23 }
 0x2ac   : > { %2221 = vst [vmem:[#allocation2 + $0x24] sm:$0x1] %v2220_v22  ;;  %v2151_v30 = vshrl.u32 %v2114_v38, 16  ;;  %v2066_v31 = vadd.f32 %v10137_v48, %v2065_v27  ;;  %v2408_v54 = vrot.slane %v2253_v24, 5  ;;  %v2312_v58 = vshll.u32 %v10150_v23, 16 }
 0x2ad   : > { %v2311_v46 = vrot.slane %v2309_v29, 4  ;;  %v2154_v34 = vshll.u32 %v2114_v38, 16  ;;  %v2318_v61 = vshll.u32 %v2253_v24, 16 }
 0x2ae   : > { %v2153_v32 = vrot.slane %v2151_v30, 7  ;;  %v2095_v35 = vadd.f32 %v2094_v19, %v2066_v31  ;;  %v2314_v36 = vrot.slane %v2312_v58, 5  ;;  %v10158_v45 = vsel %vm9626_vm10, %v8441_v37, %v2408_v54  ;;  %v2099_v58 = vpop.f32.mrf.mxu3 }
 0x2af   : > { %v2501_v9 = vunpack.c.l.b16 %v10158_v45  ;;  %v2320_v19 = vrot.slane %v2318_v61, 5 }
 0x2b0   : > { %v2156_v26 = vor.u32 %v2154_v34, %v2153_v32  ;;  %v2157_v41 = vrot.slane %v2153_v32, 4  ;;  %v2107_v0 = vmax.f32 %v2095_v35, 0.0  ;;  %v2315_v49 = vor.u32 %v2314_v36, %v2311_v46 }
 0x2b2   : > { %v2223_v50 = vsel %vm9562_vm4, %v2156_v26, %v2222_v28  ;;  %v2226_v51 = vsel %vm9594_vm7, %v2157_v41, %v2225_v44  ;;  %v2115_v52 = vpack.c.bf16 %v2107_v0, %v2107_v0  ;;  %v10164_v40 = vld [vmem:[#allocation2 + $0x20] sm:$0xf]  ;;  %v2316_v6 = vrot.slane %v2315_v49, 4 }
 0x2b3   : > { %2224 = vst [vmem:[#allocation2 + $0x28] sm:$0xf] %v2223_v50  ;;  %v2068_v55 = vpop.f32.mrf.mxu2  ;;  %v2470_v43 = vunpack.c.l.b16 %v10164_v40  ;;  %v2255_v4 = vld [vmem:[#allocation2 + $0x24] sm:$0x1]  ;;  %v8442_v60 = vrot.slane %v10164_v40, 9  ;;  %v2323_v7 = vshrl.u32 %v10164_v40, 16 }
 0x2b4   : > { %2227 = vst [vmem:[#allocation2 + $0x2c] sm:$0x1] %v2226_v51  ;;  %v2159_v62 = vshrl.u32 %v2115_v52, 16  ;;  %v2069_v56 = vadd.f32 %v10137_v48, %v2068_v55  ;;  %v2412_v2 = vrot.slane %v2255_v4, 5  ;;  %v2326_v59 = vshll.u32 %v10164_v40, 16 }
 0x2b5   : > { %v2520_v5 = vpack.c.b16 %v2470_v43, %v2469_v57  ;;  %v2162_v8 = vshll.u32 %v2115_v52, 16  ;;  %v2325_v33 = vrot.slane %v2323_v7, 4  ;;  %v2332_v17 = vshll.u32 %v2255_v4, 16  ;;  %v2234_v50 = vld [vmem:[#allocation2 + $0x38] sm:$0xf]  ;;  %v9071_v52 = vld [vmem:[%s13155_s20 + $0x40] sm:$0xff] }
 0x2b6   : > { %v2161_v11 = vrot.slane %v2159_v62, 7  ;;  %v2098_v13 = vadd.f32 %v2097_v53, %v2069_v56  ;;  %v10179_v14 = vsel %vm9626_vm10, %v8442_v60, %v2412_v2  ;;  %v2328_v25 = vrot.slane %v2326_v59, 5  ;;  %v2237_v51 = vld [vmem:[#allocation2 + $0x3c] sm:$0x1]  ;;  %2767 = vmatpush.bf16.msrb.mxu3 %v9071_v52 }
 0x2b7   : > { %2525 = vrot.lane.b32.xlu2 %v2520_v5, %s13147_s29  ;;  %v2502_v15 = vunpack.c.l.b16 %v10179_v14  ;;  %v2321_v29 = vsel %vm9671_vm11, %v2316_v6, %v2320_v19  ;;  %v2334_v37 = vrot.slane %v2332_v17, 5  ;;  %v2054_v53 = vadd.f32 %v10137_v48, %v10130_v10 }
 0x2b8   : > { %v2164_v16 = vor.u32 %v2162_v8, %v2161_v11  ;;  %v2165_v63 = vrot.slane %v2161_v11, 4  ;;  %v2108_v3 = vmax.f32 %v2098_v13, 0.0  ;;  %v2329_v22 = vor.u32 %v2328_v25, %v2325_v33  ;;  %v10213_v11 = vld [vmem:[#allocation2] sm:$0xf]  ;;  %v2243_v13 = vld [vmem:[#allocation2 + $0x44] sm:$0x1] }
 0x2b9   : > { %v2546_v21 = vpack.c.b16 %v2502_v15, %v2501_v9  ;;  %v10197_v34 = vunpack.c.l.b16 %v2321_v29  ;;  %v2240_v8 = vld [vmem:[#allocation2 + $0x40] sm:$0xf]  ;;  %v2056_v33 = vadd.f32 %v10137_v48, %v10132_v47 }
 0x2ba   : > { %v2229_v38 = vsel %vm9562_vm4, %v2164_v16, %v2228_v20  ;;  %v2232_v27 = vsel %vm9594_vm7, %v2165_v63, %v2231_v18  ;;  %v2116_v24 = vpack.c.bf16 %v2108_v3, %v2108_v3  ;;  %v2330_v31 = vrot.slane %v2329_v22, 4 }
 0x2bb   : > { %2230 = vst [vmem:[#allocation2 + $0x30] sm:$0xf] %v2229_v38  ;;  %2551 = vrot.lane.b32.xlu1 %v2546_v21, %s13149_s25  ;;  %v2070_v30 = vpop.f32.mrf.mxu2  ;;  %v2267_v3 = vshrl.u32 %v10213_v11, 16  ;;  %v2270_v21 = vshll.u32 %v10213_v11, 16 }
 0x2bc   : > { %2233 = vst [vmem:[#allocation2 + $0x34] sm:$0x1] %v2232_v27  ;;  %v2167_v54 = vshrl.u32 %v2116_v24, 16  ;;  %v2071_v46 = vadd.f32 %v10137_v48, %v2070_v30  ;;  %v2335_v32 = vsel %vm9671_vm11, %v2330_v31, %v2334_v37  ;;  %v2170_v36 = vshll.u32 %v2116_v24, 16  ;;  %v2198_v48 = vld [vmem:[#allocation2 + $0x8] sm:$0xf] }
 0x2bd   : > { %v10199_v41 = vunpack.c.l.b16 %v2335_v32  ;;  %v2201_v27 = vld [vmem:[#allocation2 + $0xc] sm:$0x1]  ;;  %v2269_v24 = vrot.slane %v2267_v3, 4  ;;  %v2247_v37 = vld [vmem:[#allocation2 + $0x4] sm:$0x1] }
 0x2be   : > { %v2169_v35 = vrot.slane %v2167_v54, 7  ;;  %v2100_v26 = vadd.f32 %v2099_v58, %v2071_v46  ;;  %v2272_v54 = vrot.slane %v2270_v21, 5  ;;  %v8438_v58 = vrot.slane %v10213_v11, 9 }
 0x2bf   : > { %v2533_v49 = vpack.c.b16 %v10199_v41, %v10197_v34  ;;  %v2396_v32 = vrot.slane %v2247_v37, 5 }
 0x2c0   : > { %v2172_v0 = vor.u32 %v2170_v36, %v2169_v35  ;;  %v2173_v28 = vrot.slane %v2169_v35, 4  ;;  %v2109_v44 = vmax.f32 %v2100_v26, 0.0  ;;  %v2273_v26 = vor.u32 %v2272_v54, %v2269_v24 }
 0x2c1   : > { %2538 = vrot.lane.b32.xlu0 %v2533_v49, %s13148_s24  ;;  %v2204_v49 = vld [vmem:[#allocation2 + $0x10] sm:$0xf] }
 0x2c2   : > { %v2235_v55 = vsel %vm9562_vm4, %v2172_v0, %v2234_v50  ;;  %v2238_v4 = vsel %vm9594_vm7, %v2173_v28, %v2237_v51  ;;  %v2117_v60 = vpack.c.bf16 %v2109_v44, %v2109_v44  ;;  %v2276_v0 = vshll.u32 %v2247_v37, 16  ;;  %v2207_v50 = vld [vmem:[#allocation2 + $0x14] sm:$0x1] }
 0x2c3   : > { %2236 = vst [vmem:[#allocation2 + $0x38] sm:$0xf] %v2235_v55  ;;  %v2082_v61 = vpop.f32.mrf.mxu2  ;;  %v2397_v51 = vsel %vm9626_vm10, %v8438_v58, %v2396_v32 }
 0x2c4   : > { %2239 = vst [vmem:[#allocation2 + $0x3c] sm:$0x1] %v2238_v4  ;;  %v2175_v62 = vshrl.u32 %v2117_v60, 16  ;;  %v2083_v56 = vadd.f32 %v2082_v61, %v2054_v53  ;;  %v2178_v5 = vshll.u32 %v2117_v60, 16  ;;  %v2274_v4 = vrot.slane %v2273_v26, 4 }
 0x2c5   : > { %v2278_v60 = vrot.slane %v2276_v0, 5 }
 0x2c6   : > { %v2177_v2 = vrot.slane %v2175_v62, 7  ;;  %v2102_v6 = vmax.f32 %v2083_v56, 0.0 }
 0x2c8   : > { %v2180_v7 = vor.u32 %v2178_v5, %v2177_v2  ;;  %v2181_v10 = vrot.slane %v2177_v2, 4  ;;  %v2110_v59 = vpack.c.bf16 %v2102_v6, %v2102_v6  ;;  %v2498_v6 = vunpack.c.l.b16 %v2397_v51  ;;  %v2257_v51 = vld [vmem:[#allocation2 + $0x2c] sm:$0x1] }
 0x2ca   : > { %v2241_v25 = vsel %vm9562_vm4, %v2180_v7, %v2240_v8  ;;  %v2244_v17 = vsel %vm9594_vm7, %v2181_v10, %v2243_v13  ;;  %v2119_v16 = vshrl.u32 %v2110_v59, 16  ;;  %v2122_v20 = vshll.u32 %v2110_v59, 16 }
 0x2cb   : > { %2242 = vst [vmem:[#allocation2 + $0x40] sm:$0xf] %v2241_v25  ;;  %v2084_v63 = vpop.f32.mrf.mxu2 }
 0x2cc   : > { %2245 = vst [vmem:[#allocation2 + $0x44] sm:$0x1] %v2244_v17  ;;  %v2121_v19 = vrot.slane %v2119_v16, 7  ;;  %v2085_v18 = vadd.f32 %v2084_v63, %v2056_v33  ;;  %v10236_v33 = vld [vmem:[#allocation2 + $0x28] sm:$0xf]  ;;  %v2279_v17 = vsel %vm9671_vm11, %v2274_v4, %v2278_v60  ;;  %v2466_v63 = vunpack.c.l.b16 %v10213_v11 }
 0x2cd   : > { %v10256_v4 = vld [vmem:[#allocation2 + $0x30] sm:$0xf] }
 0x2ce   : > { %v2124_v22 = vor.u32 %v2122_v20, %v2121_v19  ;;  %v2125_v38 = vrot.slane %v2121_v19, 4  ;;  %v2103_v47 = vmax.f32 %v2085_v18, 0.0  ;;  %v2337_v19 = vshrl.u32 %v10236_v33, 16 }
 0x2cf   : > { %v2340_v20 = vshll.u32 %v10236_v33, 16 }
 0x2d0   : > { %v2199_v29 = vsel %vm9562_vm4, %v2124_v22, %v2198_v48  ;;  %v2202_v30 = vsel %vm9594_vm7, %v2125_v38, %v2201_v27  ;;  %v2111_v31 = vpack.c.bf16 %v2103_v47, %v2103_v47  ;;  %v2478_v38 = vunpack.c.l.b16 %v2279_v17 }
 0x2d1   : > { %2200 = vst [vmem:[#allocation2 + $0x8] sm:$0xf] %v2199_v29  ;;  %v2339_v58 = vrot.slane %v2337_v19, 4  ;;  %v2342_v26 = vrot.slane %v2340_v20, 5 }
 0x2d2   : > { %2203 = vst [vmem:[#allocation2 + $0xc] sm:$0x1] %v2202_v30  ;;  %v2127_v46 = vshrl.u32 %v2111_v31, 16  ;;  %v2130_v36 = vshll.u32 %v2111_v31, 16 }
 0x2d4   : > { %v2129_v35 = vrot.slane %v2127_v46, 7 }
 0x2d6   : > { %v2132_v28 = vor.u32 %v2130_v36, %v2129_v35  ;;  %v2133_v44 = vrot.slane %v2129_v35, 4 }
 0x2d8   : > { %v2205_v52 = vsel %vm9562_vm4, %v2132_v28, %v2204_v49  ;;  %v2208_v53 = vsel %vm9594_vm7, %v2133_v44, %v2207_v50  ;;  %v2248_v55 = vld [vmem:[#allocation2 + $0x8] sm:$0xf] }
 0x2d9   : > { %2206 = vst [vmem:[#allocation2 + $0x10] sm:$0xf] %v2205_v52  ;;  %v2249_v61 = vld [vmem:[#allocation2 + $0xc] sm:$0x1]  ;;  %v8439_v62 = vrot.slane %v2248_v55, 9  ;;  %v2281_v56 = vshrl.u32 %v2248_v55, 16  ;;  %v2467_v59 = vunpack.c.l.b16 %v2248_v55 }
 0x2da   : > { %2209 = vst [vmem:[#allocation2 + $0x14] sm:$0x1] %v2208_v53  ;;  %v2400_v2 = vrot.slane %v2249_v61, 5  ;;  %v2284_v5 = vshll.u32 %v2248_v55, 16  ;;  %v2290_v13 = vshll.u32 %v2249_v61, 16  ;;  %v2343_v55 = vor.u32 %v2342_v26, %v2339_v58 }
 0x2db   : > { %v2283_v7 = vrot.slane %v2281_v56, 4  ;;  %v10243_v47 = vpack.c.b16 %v2467_v59, %v2466_v63  ;;  %v2346_v61 = vshll.u32 %v2257_v51, 16  ;;  %v2416_v56 = vrot.slane %v2257_v51, 5  ;;  %v2259_v63 = vld [vmem:[#allocation2 + $0x34] sm:$0x1] }
 0x2dc   : > { %v2401_v10 = vsel %vm9626_vm10, %v8439_v62, %v2400_v2  ;;  %v2286_v8 = vrot.slane %v2284_v5, 5  ;;  %v2292_v22 = vrot.slane %v2290_v13, 5  ;;  %v2344_v2 = vrot.slane %v2343_v55, 4 }
 0x2dd   : > { %v2499_v25 = vunpack.c.l.b16 %v2401_v10  ;;  %v2351_v5 = vshrl.u32 %v10256_v4, 16  ;;  %v2348_v10 = vrot.slane %v2346_v61, 5  ;;  %v2360_v20 = vshll.u32 %v2259_v63, 16  ;;  %v2263_v61 = vld [vmem:[#allocation2 + $0x44] sm:$0x1] }
 0x2de   : > { %v2287_v16 = vor.u32 %v2286_v8, %v2283_v7 }
 0x2df   : > { %v2506_v3 = vpack.c.b16 %v2499_v25, %v2498_v6  ;;  %v2354_v6 = vshll.u32 %v10256_v4, 16  ;;  %v2353_v8 = vrot.slane %v2351_v5, 4 }
 0x2e0   : > { %v2250_v18 = vld [vmem:[#allocation2 + $0x10] sm:$0xf]  ;;  %v2288_v21 = vrot.slane %v2287_v16, 4 }
 0x2e1   : > { %2510 = vrot.lane.b32.xlu0 %v2506_v3, %s13144_s0  ;;  %v2468_v48 = vunpack.c.l.b16 %v2250_v18  ;;  %v2251_v27 = vld [vmem:[#allocation2 + $0x14] sm:$0x1]  ;;  %v8440_v24 = vrot.slane %v2250_v18, 9  ;;  %v2295_v29 = vshrl.u32 %v2250_v18, 16  ;;  %v2298_v30 = vshll.u32 %v2250_v18, 16 }
 0x2e2   : > { %v2293_v11 = vsel %vm9671_vm11, %v2288_v21, %v2292_v22  ;;  %v2404_v31 = vrot.slane %v2251_v27, 5  ;;  %v2304_v36 = vshll.u32 %v2251_v27, 16  ;;  %v2356_v13 = vrot.slane %v2354_v6, 5 }
 0x2e3   : > { %v2519_v37 = vpack.c.b16 %v2468_v48, %v2467_v59  ;;  %v2479_v54 = vunpack.c.l.b16 %v2293_v11  ;;  %v2297_v46 = vrot.slane %v2295_v29, 4  ;;  %v2300_v35 = vrot.slane %v2298_v30, 5 }
 0x2e4   : > { %v2405_v32 = vsel %vm9626_vm10, %v8440_v24, %v2404_v31  ;;  %v2306_v53 = vrot.slane %v2304_v36, 5  ;;  %v10262_v62 = vpack.c.b16 %v2469_v57, %v2468_v48  ;;  %v2349_v59 = vsel %vm9671_vm11, %v2344_v2, %v2348_v10  ;;  %v2261_v24 = vld [vmem:[#allocation2 + $0x3c] sm:$0x1] }
 0x2e5   : > { %2523 = vrot.lane.b32.xlu1 %v2519_v37, %s13147_s29  ;;  %v2486_v0 = vpack.c.b16 %v2479_v54, %v2478_v38  ;;  %v2500_v28 = vunpack.c.l.b16 %v2405_v32  ;;  %v2301_v44 = vor.u32 %v2300_v35, %v2297_v46  ;;  %v2483_v16 = vunpack.c.l.b16 %v2349_v59  ;;  %v9070_v32 = vld [vmem:[%s13155_s20 + $0x38] sm:$0xff] }
 0x2e6   : > { %v2357_v3 = vor.u32 %v2356_v13, %v2353_v8  ;;  %v2471_v27 = vunpack.c.l.b16 %v10236_v33  ;;  %v2362_v29 = vrot.slane %v2360_v20, 5  ;;  %v2472_v30 = vunpack.c.l.b16 %v10256_v4  ;;  %2731 = vmatpush.bf16.msrb.mxu1 %v9070_v32  ;;  %v9068_v8 = vld [vmem:[%s13155_s20 + $0x28] sm:$0xff]  ;;  %v9066_v32 = vld [vmem:[%s13155_s20 + $0x18] sm:$0xff] }
 0x2e7   : > { %2490 = vrot.lane.b32.xlu2 %v2486_v0, %s13153_s26  ;;  %v2507_v49 = vpack.c.b16 %v2501_v9, %v2500_v28  ;;  %v2545_v50 = vpack.c.b16 %v2500_v28, %v2499_v25  ;;  %v2302_v52 = vrot.slane %v2301_v44, 4  ;;  %v8443_v9 = vrot.slane %v10236_v33, 9  ;;  %v10278_v25 = vld [vmem:[#allocation2 + $0x38] sm:$0xf]  ;;  %v2262_v44 = vld [vmem:[#allocation2 + $0x40] sm:$0xf] }
 0x2e8   : > { %v2368_v19 = vshll.u32 %v10278_v25, 16  ;;  %v2488_v21 = vpack.c.b16 %v2483_v16, %v10199_v41  ;;  %v2358_v22 = vrot.slane %v2357_v3, 4  ;;  %v2424_v11 = vrot.slane %v2261_v24, 5 }
 0x2e9   : > { %8484 = vmatmul.msk.bf16.vlgmr.msrb.gmra.mxu3 %vm1198_vm12, %v2507_v49  ;;  %2549 = vrot.lane.b32.xlu0 %v2545_v50, %s13149_s25  ;;  %v2307_v60 = vsel %vm9671_vm11, %v2302_v52, %v2306_v53  ;;  %v10273_v57 = vsel %vm9626_vm10, %v8443_v9, %v2416_v56  ;;  %v10300_v31 = vpack.c.b16 %v2471_v27, %v2470_v43  ;;  %v8444_v37 = vrot.slane %v10256_v4, 9  ;;  %v2265_v9 = vld [vmem:[#allocation2 + $0x4c] sm:$0x1] }
 0x2ea   : > { %v2480_v45 = vunpack.c.l.b16 %v2307_v60  ;;  %v2503_v17 = vunpack.c.l.b16 %v10273_v57  ;;  %v2370_v48 = vrot.slane %v2368_v19, 5  ;;  %v2363_v14 = vsel %vm9671_vm11, %v2358_v22, %v2362_v29  ;;  %v9069_v60 = vld [vmem:[%s13155_s20 + $0x30] sm:$0xff] }
 0x2eb   : > { %v2420_v33 = vrot.slane %v2259_v63, 5  ;;  %v2521_v46 = vpack.c.b16 %v2472_v30, %v2471_v27  ;;  %v2484_v58 = vunpack.c.l.b16 %v2363_v14  ;;  %v2473_v0 = vunpack.c.l.b16 %v10278_v25  ;;  %2732 = vmatpush.bf16.msrb.mxu1 %v9069_v60 }
 0x2ec   : > { %v2532_v7 = vpack.c.b16 %v2480_v45, %v2479_v54  ;;  %v2487_v23 = vpack.c.b16 %v10197_v34, %v2480_v45  ;;  %v2365_v34 = vshrl.u32 %v10278_v25, 16  ;;  %v2508_v18 = vpack.c.b16 %v2503_v17, %v2502_v15  ;;  %v2264_v45 = vld [vmem:[#allocation2 + $0x48] sm:$0xf] }
 0x2ed   : > { %2559 = vrot.lane.b32.xlu1 %v10262_v62, %s13143_s27  ;;  %v8445_v15 = vrot.slane %v10278_v25, 9  ;;  %v2374_v54 = vshll.u32 %v2261_v24, 16  ;;  %v2421_v40 = vsel %vm9626_vm10, %v8444_v37, %v2420_v33  ;;  %v2534_v26 = vpack.c.b16 %v2484_v58, %v2483_v16 }
 0x2ee   : > { %v2367_v38 = vrot.slane %v2365_v34, 4  ;;  %v2504_v50 = vunpack.c.l.b16 %v2421_v40  ;;  %v2427_v51 = vshrl.u32 %v2262_v44, 16  ;;  %v2430_v52 = vshll.u32 %v2262_v44, 16  ;;  %v9064_v40 = vld [vmem:[%s13155_s20 + $0x8] sm:$0xff] }
 0x2ef   : > { %2536 = vrot.lane.b32.xlu2 %v2532_v7, %s13148_s24  ;;  %v2425_v35 = vsel %vm9626_vm10, %v8445_v15, %v2424_v11  ;;  %v2376_v43 = vrot.slane %v2374_v54, 5  ;;  %v10318_v53 = vpack.c.b16 %v2473_v0, %v2472_v30  ;;  %v8446_v6 = vrot.slane %v2262_v44, 9  ;;  %2733 = vmatpush.bf16.msrb.mxu1 %v9068_v8 }
 0x2f0   : > { %v2371_v41 = vor.u32 %v2370_v48, %v2367_v38  ;;  %v2505_v28 = vunpack.c.l.b16 %v2425_v35  ;;  %v2429_v56 = vrot.slane %v2427_v51, 4  ;;  %v2432_v2 = vrot.slane %v2430_v52, 5  ;;  %v9067_v48 = vld [vmem:[%s13155_s20 + $0x20] sm:$0xff] }
 0x2f1   : > { %2492 = vrot.lane.b32.xlu0 %v2487_v23, %s13153_s26  ;;  %v2444_v7 = vrot.slane %v2263_v61, 5  ;;  %v8447_v10 = vrot.slane %v2264_v45, 9  ;;  %v2547_v59 = vpack.c.b16 %v2504_v50, %v2503_v17  ;;  %v2447_v25 = vshrl.u32 %v2264_v45, 16 }
 0x2f2   : > { %v2372_v36 = vrot.slane %v2371_v41, 4  ;;  %v2509_v55 = vpack.c.b16 %v2505_v28, %v2504_v50  ;;  %v2433_v13 = vor.u32 %v2432_v2, %v2429_v56  ;;  %v2450_v16 = vshll.u32 %v2264_v45, 16 }
 0x2f3   : > { %v2518_v63 = vunpack.c.l.b16 %v2262_v44  ;;  %v2445_v3 = vsel %vm9626_vm10, %v8446_v6, %v2444_v7  ;;  %v2436_v19 = vshll.u32 %v2263_v61, 16  ;;  %v2449_v17 = vrot.slane %v2447_v25, 4  ;;  %2734 = vmatpush.bf16.msrb.mxu1 %v9067_v48 }
 0x2f4   : > { %v2434_v57 = vrot.slane %v2433_v13, 4  ;;  %v2452_v20 = vrot.slane %v2450_v16, 5  ;;  %v2456_v29 = vshll.u32 %v2265_v9, 16  ;;  %v2557_v15 = vunpack.c.l.b16 %v2264_v45 }
 0x2f5   : > { %2512 = vrot.lane.b32.xlu1 %v2507_v49, %s13144_s0  ;;  %v2377_v49 = vsel %vm9671_vm11, %v2372_v36, %v2376_v43  ;;  %v2438_v38 = vrot.slane %v2436_v19, 5  ;;  %v9065_v36 = vld [vmem:[%s13155_s20 + $0x10] sm:$0xff] }
 0x2f6   : > { %v2485_v4 = vunpack.c.l.b16 %v2377_v49  ;;  %v2453_v24 = vor.u32 %v2452_v20, %v2449_v17  ;;  %v2458_v37 = vrot.slane %v2456_v29, 5  ;;  %v2558_v33 = vpack.c.b16 %v2557_v15, %v2518_v63 }
 0x2f7   : > { %2569 = vrot.lane.b32.xlu2 %v2487_v23, %s13150_s2  ;;  %v2464_v23 = vrot.slane %v2265_v9, 5  ;;  %v2439_v27 = vsel %vm9671_vm11, %v2434_v57, %v2438_v38  ;;  %2735 = vmatpush.bf16.msrb.mxu1 %v9066_v32 }
 0x2f8   : > { %v2489_v5 = vpack.c.b16 %v2485_v4, %v2484_v58  ;;  %v2531_v11 = vunpack.c.l.b16 %v2439_v27  ;;  %v2454_v41 = vrot.slane %v2453_v24, 4 }
 0x2f9   : > { %8485 = vmatmul.msk.bf16.gmra.mxu3 %vm1198_vm12, %v2508_v18  ;;  %2571 = vrot.lane.b32.xlu0 %v2488_v21, %s13150_s2  ;;  %v2465_v34 = vsel %vm9626_vm10, %v8447_v10, %v2464_v23 }
 0x2fa   : > { %v2577_v22 = vunpack.c.l.b16 %v2465_v34  ;;  %v2535_v54 = vpack.c.b16 %v2531_v11, %v2485_v4 }
 0x2fb   : > { %2736 = vmatpush.bf16.msrb.mxu1 %v9065_v36 }
 0x2fd   : > { %2494 = vrot.lane.b32.xlu1 %v2488_v21, %s13153_s26  ;;  %v2544_v21 = vunpack.c.l.b16 %v2445_v3 }
 0x2ff   : > { %2561 = vrot.lane.b32.xlu2 %v10300_v31, %s13143_s27  ;;  %v2548_v30 = vpack.c.b16 %v2544_v21, %v2505_v28  ;;  %v2578_v14 = vpack.c.b16 %v2577_v22, %v2544_v21  ;;  %2737 = vmatpush.bf16.msrb.mxu1 %v9064_v40 }
 0x301   : > { %2527 = vrot.lane.b32.xlu0 %v2521_v46, %s13147_s29  ;;  %v2459_v46 = vsel %vm9671_vm11, %v2454_v41, %v2458_v37 }
 0x302   : > { %v2567_v58 = vunpack.c.l.b16 %v2459_v46 }
 0x304   : > { %v2568_v35 = vpack.c.b16 %v2567_v58, %v2531_v11 }
 0x305   : > { %2540 = vrot.lane.b32.xlu1 %v2534_v26, %s13148_s24  ;;  %v9063_v26 = vld [vmem:[%s13155_s20] sm:$0xff] }
 0x306   : > { %2738 = vmatpush.bf16.msrb.mxu1 %v9063_v26 }
 0x307   : > { %2514 = vrot.lane.b32.xlu2 %v2508_v18, %s13144_s0  ;;  %v2522_v18 = vpack.c.b16 %v2518_v63, %v2473_v0 }
 0x309   : > { %2563 = vrot.lane.b32.xlu0 %v10318_v53, %s13143_s27  ;;  %8486 = vmatmul.msk.bf16.gmra.mxu3 %vm1198_vm12, %v2509_v55 }
 0x30d   : > { %2573 = vrot.lane.b32.xlu1 %v2489_v5, %s13150_s2 }
 0x30f   : > { %2553 = vrot.lane.b32.xlu2 %v2547_v59, %s13149_s25 }
 0x311   : > { %2516 = vrot.lane.b32.xlu0 %v2509_v55, %s13144_s0  ;;  %v2526_v43 = vpop.permute.xlu2 %2525 }
 0x315   : > { %2529 = vrot.lane.b32.xlu1 %v2522_v18, %s13147_s29 }
 0x317   : > { %2496 = vrot.lane.b32.xlu2 %v2489_v5, %s13153_s26 }
 0x319   : > { %2555 = vrot.lane.b32.xlu0 %v2548_v30, %s13149_s25  ;;  %8487 = vmatmul.msk.bf16.gmra.mxu3 %vm1198_vm12, %v2578_v14 }
 0x31d   : > { %2565 = vrot.lane.b32.xlu1 %v2558_v33, %s13143_s27 }
 0x31f   : > { %2542 = vrot.lane.b32.xlu2 %v2535_v54, %s13148_s24 }
 0x327   : > { %2575 = vrot.lane.b32.xlu2 %v2568_v35, %s13150_s2 }
 0x32d   : > { %v2552_v49 = vpop.permute.xlu1 %2551 }
 0x333   : > { %v2539_v44 = vpop.permute.xlu0 %2538 }
 0x341   : > { %v2491_v0 = vpop.permute.xlu2 %2490 }
 0x342   : > { %v2581_v52 = vsel %vm1198_vm12, %v10243_v47, %v2491_v0 }
 0x349   : > { %v2537_v28 = vpop.permute.xlu2 %2536 }
 0x351   : > { %v2570_v51 = vpop.permute.xlu2 %2569 }
 0x353   : > { %v2511_v50 = vpop.permute.xlu0 %2510 }
 0x354   : > { %v2592_v4 = vsel %vm1211_vm13, %v2581_v52, %v2511_v50 }
 0x357   : > { %v2524_v55 = vpop.permute.xlu1 %2523 }
 0x358   : > { %v2600_v60 = vsel %vm1220_vm14, %v2592_v4, %v2524_v55 }
 0x359   : > { %v2608_v45 = vsel %vm1229_vm15, %v2600_v60, %v2537_v28  ;;  %v2562_v9 = vpop.permute.xlu2 %2561 }
 0x35b   : > { %v2550_v61 = vpop.permute.xlu0 %2549 }
 0x35c   : > { %v2616_v56 = vsel %vm1238_vm0, %v2608_v45, %v2550_v61 }
 0x35f   : > { %v2560_v2 = vpop.permute.xlu1 %2559 }
 0x360   : > { %v2624_v5 = vsel %vm1247_vm1, %v2616_v56, %v2560_v2 }
 0x361   : > { %v2632_v6 = vsel %vm1256_vm2, %v2624_v5, %v2570_v51  ;;  %v2515_v23 = vpop.permute.xlu2 %2514 }
 0x362   : > { %2739 = vmatmul.bf16.vlgmr.msrb.gmra.mxu1 %v2632_v6  ;;  %v2934_v6 = vld [vmem:[#allocation2 + $0x4] sm:$0x1] }
 0x363   : > { %v2493_v7 = vpop.permute.xlu0 %2492 }
 0x364   : > { %v2584_v47 = vsel %vm1198_vm12, %v10262_v62, %v2493_v7  ;;  %v2885_v7 = vld [vmem:[#allocation2 + $0x8] sm:$0xf] }
 0x367   : > { %v2513_v10 = vpop.permute.xlu1 %2512 }
 0x368   : > { %v2594_v59 = vsel %vm1211_vm13, %v2584_v47, %v2513_v10  ;;  %v2888_v47 = vld [vmem:[#allocation2 + $0xc] sm:$0x1] }
 0x369   : > { %v2602_v8 = vsel %vm1220_vm14, %v2594_v59, %v2526_v43  ;;  %v2554_v19 = vpop.permute.xlu2 %2553 }
 0x36a   : > { %v2610_v13 = vsel %vm1229_vm15, %v2602_v8, %v2539_v44 }
 0x36b   : > { %v2572_v25 = vpop.permute.xlu0 %2571  ;;  %v2618_v16 = vsel %vm1238_vm0, %v2610_v13, %v2552_v49  ;;  %v10402_v49 = vld [vmem:[#allocation2] sm:$0xf] }
 0x36c   : > { %v2626_v63 = vsel %vm1247_vm1, %v2618_v16, %v2562_v9  ;;  %v2769_v36 = vpop.f32.mrf.mxu3  ;;  %v2954_v4 = vshrl.u32 %v10402_v49, 16  ;;  %v2957_v9 = vshll.u32 %v10402_v49, 16  ;;  %v8488_v16 = vrot.slane %v10402_v49, 9 }
 0x36d   : > { %v2635_v34 = vsel %vm1256_vm2, %v2626_v63, %v2572_v25  ;;  %v3083_v63 = vrot.slane %v2934_v6, 5 }
 0x36e   : > { %v2956_v10 = vrot.slane %v2954_v4, 4  ;;  %v2959_v13 = vrot.slane %v2957_v9, 5 }
 0x36f   : > { %v2495_v3 = vpop.permute.xlu1 %2494 }
 0x370   : > { %v2587_v62 = vsel %vm1198_vm12, %v10300_v31, %v2495_v3 }
 0x371   : > { %v2596_v17 = vsel %vm1211_vm13, %v2587_v62, %v2515_v23  ;;  %v2497_v38 = vpop.permute.xlu2 %2496 }
 0x372   : > { %2744 = vmatmul.bf16.gmra.mxu1 %v2635_v34  ;;  %v2590_v14 = vsel %vm1198_vm12, %v10318_v53, %v2497_v38  ;;  %v10399_v53 = vld [vmem:[%s13156_s7] ss:$0 sm:$0xff]  ;;  %s11734_s7 = sand.u32 1, %s9344_s28  }
 0x373   : > { %v2528_v57 = vpop.permute.xlu0 %2527  ;;  %s9190_s1 = smul.u32 384, %s11734_s7 }
 0x374   : > { %v2604_v18 = vsel %vm1220_vm14, %v2596_v17, %v2528_v57  ;;  %v2771_v40 = vpop.f32.mrf.mxu3 }
 0x377   : > { %v2541_v20 = vpop.permute.xlu1 %2540 }
 0x378   : > { %v2612_v21 = vsel %vm1229_vm15, %v2604_v18, %v2541_v20  ;;  %v2960_v20 = vor.u32 %v2959_v13, %v2956_v10  ;;  %v3084_v18 = vsel %vm9626_vm10, %v8488_v16, %v3083_v63 }
 0x379   : > { %v2620_v48 = vsel %vm1238_vm0, %v2612_v21, %v2554_v19  ;;  %v2543_v30 = vpop.permute.xlu2 %2542 }
 0x37b   : > { %v2564_v22 = vpop.permute.xlu0 %2563 }
 0x37c   : > { %v2628_v27 = vsel %vm1247_vm1, %v2620_v48, %v2564_v22  ;;  %v2774_v50 = vpop.f32.mrf.mxu3  ;;  %v2963_v48 = vshll.u32 %v2934_v6, 16 }
 0x37f   : > { %v2574_v24 = vpop.permute.xlu1 %2573 }
 0x380   : > { %v2638_v29 = vsel %vm1256_vm2, %v2628_v27, %v2574_v24  ;;  %v2891_v27 = vld [vmem:[#allocation2 + $0x10] sm:$0xf]  ;;  %v2894_v24 = vld [vmem:[#allocation2 + $0x14] sm:$0x1] }
 0x381   : > { %v2576_v58 = vpop.permute.xlu2 %2575 }
 0x382   : > { %2749 = vmatmul.bf16.gmra.mxu1 %v2638_v29  ;;  %v3153_v29 = vunpack.c.l.b16 %v10402_v49 }
 0x383   : > { %v2517_v31 = vpop.permute.xlu0 %2516 }
 0x384   : > { %v2598_v11 = vsel %vm1211_vm13, %v2590_v14, %v2517_v31  ;;  %v2776_v19 = vpop.f32.mrf.mxu3 }
 0x387   : > { %v2530_v15 = vpop.permute.xlu1 %2529 }
 0x388   : > { %v2606_v41 = vsel %vm1220_vm14, %v2598_v11, %v2530_v15  ;;  %v2961_v11 = vrot.slane %v2960_v20, 4 }
 0x389   : > { %v2614_v37 = vsel %vm1229_vm15, %v2606_v41, %v2543_v30 }
 0x38b   : > { %v2556_v33 = vpop.permute.xlu0 %2555 }
 0x38c   : > { %v2622_v54 = vsel %vm1238_vm0, %v2614_v37, %v2556_v33 }
 0x38f   : > { %v2566_v46 = vpop.permute.xlu1 %2565 }
 0x390   : > { %v2630_v32 = vsel %vm1247_vm1, %v2622_v54, %v2566_v46  ;;  %v3185_v54 = vunpack.c.l.b16 %v3084_v18 }
 0x391   : > { %v2641_v35 = vsel %vm1256_vm2, %v2630_v32, %v2576_v58 }
 0x392   : > { %2754 = vmatmul.bf16.gmra.mxu1 %v2641_v35 }
 0x3df   : > { %v2740_v43 = vpop.f32.mrf.mxu1 }
 0x3e0   : > { %v2741_v26 = vadd.f32 %v10399_v53, %v2740_v43  ;;  %v9080_v43 = vld [vmem:[%s13157_s21 + $0x40] sm:$0xff] }
 0x3e1   : > { %3454 = vmatpush.bf16.msra.mxu2 %v9080_v43 }
 0x3e2   : > { %v2770_v0 = vadd.f32 %v2769_v36, %v2741_v26 }
 0x3e4   : > { %v2789_v28 = vmax.f32 %v2770_v0, 0.0 }
 0x3e6   : > { %v2797_v44 = vpack.c.bf16 %v2789_v28, %v2789_v28 }
 0x3e7   : > { %v2742_v51 = vpop.f32.mrf.mxu1 }
 0x3e8   : > { %v2806_v52 = vshrl.u32 %v2797_v44, 16  ;;  %v2743_v55 = vadd.f32 %v10399_v53, %v2742_v51  ;;  %v2809_v61 = vshll.u32 %v2797_v44, 16 }
 0x3ea   : > { %v2808_v60 = vrot.slane %v2806_v52, 7  ;;  %v2772_v45 = vadd.f32 %v2771_v40, %v2743_v55  ;;  %v2965_v40 = vrot.slane %v2963_v48, 5  ;;  %v2779_v55 = vpop.f32.mrf.mxu3 }
 0x3ec   : > { %v2811_v56 = vor.u32 %v2809_v61, %v2808_v60  ;;  %v2812_v2 = vrot.slane %v2808_v60, 4  ;;  %v2790_v5 = vmax.f32 %v2772_v45, 0.0 }
 0x3ee   : > { %v2886_v23 = vsel %vm9562_vm4, %v2811_v56, %v2885_v7  ;;  %v2889_v59 = vsel %vm9594_vm7, %v2812_v2, %v2888_v47  ;;  %v2798_v8 = vpack.c.bf16 %v2790_v5, %v2790_v5  ;;  %v2966_v56 = vsel %vm9671_vm11, %v2961_v11, %v2965_v40  ;;  %v2897_v2 = vld [vmem:[#allocation2 + $0x18] sm:$0xf]  ;;  %v2900_v5 = vld [vmem:[#allocation2 + $0x1c] sm:$0x1] }
 0x3ef   : > { %2887 = vst [vmem:[#allocation2 + $0x8] sm:$0xf] %v2886_v23  ;;  %v2745_v25 = vpop.f32.mrf.mxu1  ;;  %v3165_v63 = vunpack.c.l.b16 %v2966_v56 }
 0x3f0   : > { %2890 = vst [vmem:[#allocation2 + $0xc] sm:$0x1] %v2889_v59  ;;  %v2814_v3 = vshrl.u32 %v2798_v8, 16  ;;  %v2746_v34 = vadd.f32 %v10399_v53, %v2745_v25  ;;  %v2817_v57 = vshll.u32 %v2798_v8, 16 }
 0x3f2   : > { %v2816_v62 = vrot.slane %v2814_v3, 7  ;;  %v2775_v17 = vadd.f32 %v2774_v50, %v2746_v34 }
 0x3f4   : > { %v2819_v21 = vor.u32 %v2817_v57, %v2816_v62  ;;  %v2820_v22 = vrot.slane %v2816_v62, 4  ;;  %v2791_v38 = vmax.f32 %v2775_v17, 0.0 }
 0x3f6   : > { %v2892_v31 = vsel %vm9562_vm4, %v2819_v21, %v2891_v27  ;;  %v2895_v30 = vsel %vm9594_vm7, %v2820_v22, %v2894_v24  ;;  %v2799_v14 = vpack.c.bf16 %v2791_v38, %v2791_v38  ;;  %v2935_v15 = vld [vmem:[#allocation2 + $0x8] sm:$0xf] }
 0x3f7   : > { %2893 = vst [vmem:[#allocation2 + $0x10] sm:$0xf] %v2892_v31  ;;  %v2747_v41 = vpop.f32.mrf.mxu1  ;;  %v2936_v37 = vld [vmem:[#allocation2 + $0xc] sm:$0x1]  ;;  %v8489_v33 = vrot.slane %v2935_v15, 9  ;;  %v3154_v46 = vunpack.c.l.b16 %v2935_v15  ;;  %v2968_v58 = vshrl.u32 %v2935_v15, 16 }
 0x3f8   : > { %2896 = vst [vmem:[#allocation2 + $0x14] sm:$0x1] %v2895_v30  ;;  %v2822_v32 = vshrl.u32 %v2799_v14, 16  ;;  %v2748_v35 = vadd.f32 %v10399_v53, %v2747_v41  ;;  %v3087_v36 = vrot.slane %v2936_v37, 5  ;;  %v2825_v26 = vshll.u32 %v2799_v14, 16 }
 0x3f9   : > { %v2970_v0 = vrot.slane %v2968_v58, 4  ;;  %v2971_v28 = vshll.u32 %v2935_v15, 16  ;;  %v10424_v44 = vpack.c.b16 %v3154_v46, %v3153_v29  ;;  %v2977_v52 = vshll.u32 %v2936_v37, 16 }
 0x3fa   : > { %v2824_v49 = vrot.slane %v2822_v32, 7  ;;  %v2777_v50 = vadd.f32 %v2776_v19, %v2748_v35  ;;  %v3088_v51 = vsel %vm9626_vm10, %v8489_v33, %v3087_v36  ;;  %v2781_v33 = vpop.f32.mrf.mxu3 }
 0x3fb   : > { %v3186_v4 = vunpack.c.l.b16 %v3088_v51  ;;  %v2973_v60 = vrot.slane %v2971_v28, 5  ;;  %v2979_v8 = vrot.slane %v2977_v52, 5 }
 0x3fc   : > { %v2827_v61 = vor.u32 %v2825_v26, %v2824_v49  ;;  %v2828_v45 = vrot.slane %v2824_v49, 4  ;;  %v2792_v9 = vmax.f32 %v2777_v50, 0.0 }
 0x3fd   : > { %v3193_v6 = vpack.c.b16 %v3186_v4, %v3185_v54  ;;  %v2974_v7 = vor.u32 %v2973_v60, %v2970_v0  ;;  %v2903_v54 = vld [vmem:[#allocation2 + $0x20] sm:$0xf] }
 0x3fe   : > { %v2898_v47 = vsel %vm9562_vm4, %v2827_v61, %v2897_v2  ;;  %v2901_v10 = vsel %vm9594_vm7, %v2828_v45, %v2900_v5  ;;  %v2800_v23 = vpack.c.bf16 %v2792_v9, %v2792_v9  ;;  %v2937_v59 = vld [vmem:[#allocation2 + $0x10] sm:$0xf] }
 0x3ff   : > { %2899 = vst [vmem:[#allocation2 + $0x18] sm:$0xf] %v2898_v47  ;;  %3197 = vrot.lane.b32.xlu1 %v3193_v6, %s13144_s0  ;;  %v2750_v13 = vpop.f32.mrf.mxu1  ;;  %v3155_v25 = vunpack.c.l.b16 %v2937_v59  ;;  %v2975_v16 = vrot.slane %v2974_v7, 4  ;;  %v2938_v3 = vld [vmem:[#allocation2 + $0x14] sm:$0x1]  ;;  %v8490_v34 = vrot.slane %v2937_v59, 9 }
 0x400   : > { %2902 = vst [vmem:[#allocation2 + $0x1c] sm:$0x1] %v2901_v10  ;;  %v2830_v19 = vshrl.u32 %v2800_v23, 16  ;;  %v2833_v62 = vshll.u32 %v2800_v23, 16  ;;  %v2751_v57 = vadd.f32 %v10399_v53, %v2750_v13  ;;  %v3091_v17 = vrot.slane %v2938_v3, 5 }
 0x401   : > { %v3206_v20 = vpack.c.b16 %v3155_v25, %v3154_v46  ;;  %v2980_v18 = vsel %vm9671_vm11, %v2975_v16, %v2979_v8  ;;  %v2982_v21 = vshrl.u32 %v2937_v59, 16  ;;  %v2985_v22 = vshll.u32 %v2937_v59, 16  ;;  %v2906_v46 = vld [vmem:[#allocation2 + $0x24] sm:$0x1] }
 0x402   : > { %v2832_v38 = vrot.slane %v2830_v19, 7  ;;  %v2780_v48 = vadd.f32 %v2779_v55, %v2751_v57  ;;  %v3166_v27 = vunpack.c.l.b16 %v2980_v18  ;;  %v3092_v24 = vsel %vm9626_vm10, %v8490_v34, %v3091_v17 }
 0x403   : > { %3210 = vrot.lane.b32.xlu2 %v3206_v20, %s13147_s29  ;;  %v3187_v29 = vunpack.c.l.b16 %v3092_v24  ;;  %v2984_v31 = vrot.slane %v2982_v21, 4  ;;  %v2987_v30 = vrot.slane %v2985_v22, 5  ;;  %v2991_v14 = vshll.u32 %v2938_v3, 16  ;;  %v2912_v3 = vld [vmem:[#allocation2 + $0x2c] sm:$0x1]  ;;  %v2784_v21 = vpop.f32.mrf.mxu3 }
 0x404   : > { %v2835_v15 = vor.u32 %v2833_v62, %v2832_v38  ;;  %v2836_v11 = vrot.slane %v2832_v38, 4  ;;  %v2793_v41 = vmax.f32 %v2780_v48, 0.0  ;;  %v3173_v37 = vpack.c.b16 %v3166_v27, %v3165_v63  ;;  %v2909_v63 = vld [vmem:[#allocation2 + $0x28] sm:$0xf] }
 0x405   : > { %v3232_v58 = vpack.c.b16 %v3187_v29, %v3186_v4  ;;  %v2988_v32 = vor.u32 %v2987_v30, %v2984_v31  ;;  %v2993_v26 = vrot.slane %v2991_v14, 5 }
 0x406   : > { %v2904_v35 = vsel %vm9562_vm4, %v2835_v15, %v2903_v54  ;;  %v2907_v36 = vsel %vm9594_vm7, %v2836_v11, %v2906_v46  ;;  %v2801_v40 = vpack.c.bf16 %v2793_v41, %v2793_v41  ;;  %3177 = vrot.lane.b32.xlu0 %v3173_v37, %s13153_s26  ;;  %v2939_v43 = vld [vmem:[#allocation2 + $0x18] sm:$0xf] }
 0x407   : > { %2905 = vst [vmem:[#allocation2 + $0x20] sm:$0xf] %v2904_v35  ;;  %3236 = vrot.lane.b32.xlu1 %v3232_v58, %s13149_s25  ;;  %v2940_v0 = vld [vmem:[#allocation2 + $0x1c] sm:$0x1]  ;;  %v8491_v28 = vrot.slane %v2939_v43, 9  ;;  %v2752_v49 = vpop.f32.mrf.mxu1  ;;  %v3156_v50 = vunpack.c.l.b16 %v2939_v43  ;;  %v2989_v51 = vrot.slane %v2988_v32, 4 }
 0x408   : > { %2908 = vst [vmem:[#allocation2 + $0x24] sm:$0x1] %v2907_v36  ;;  %v2838_v52 = vshrl.u32 %v2801_v40, 16  ;;  %v2841_v55 = vshll.u32 %v2801_v40, 16  ;;  %v3095_v4 = vrot.slane %v2940_v0, 5  ;;  %v2753_v60 = vadd.f32 %v10399_v53, %v2752_v49 }
 0x409   : > { %v10448_v61 = vpack.c.b16 %v3156_v50, %v3155_v25  ;;  %v2994_v45 = vsel %vm9671_vm11, %v2989_v51, %v2993_v26  ;;  %v2996_v9 = vshrl.u32 %v2939_v43, 16  ;;  %v2999_v56 = vshll.u32 %v2939_v43, 16  ;;  %v2915_v49 = vld [vmem:[#allocation2 + $0x30] sm:$0xf] }
 0x40a   : > { %v2840_v2 = vrot.slane %v2838_v52, 7  ;;  %v10454_v5 = vsel %vm9626_vm10, %v8491_v28, %v3095_v4  ;;  %v2782_v6 = vadd.f32 %v2781_v33, %v2753_v60  ;;  %v3167_v7 = vunpack.c.l.b16 %v2994_v45 }
 0x40b   : > { %v3188_v47 = vunpack.c.l.b16 %v10454_v5  ;;  %3246 = vrot.lane.b32.xlu2 %v10448_v61, %s13143_s27  ;;  %v2998_v10 = vrot.slane %v2996_v9, 4  ;;  %v3001_v23 = vrot.slane %v2999_v56, 5  ;;  %v3005_v59 = vshll.u32 %v2940_v0, 16 }
 0x40c   : > { %v2843_v8 = vor.u32 %v2841_v55, %v2840_v2  ;;  %v2844_v13 = vrot.slane %v2840_v2, 4  ;;  %v2794_v25 = vmax.f32 %v2782_v6, 0.0  ;;  %v3219_v16 = vpack.c.b16 %v3167_v7, %v3166_v27 }
 0x40d   : > { %v3194_v34 = vpack.c.b16 %v3188_v47, %v3187_v29  ;;  %v3002_v19 = vor.u32 %v3001_v23, %v2998_v10  ;;  %v3007_v18 = vrot.slane %v3005_v59, 5 }
 0x40e   : > { %v2910_v62 = vsel %vm9562_vm4, %v2843_v8, %v2909_v63  ;;  %v2913_v57 = vsel %vm9594_vm7, %v2844_v13, %v2912_v3  ;;  %v2802_v17 = vpack.c.bf16 %v2794_v25, %v2794_v25  ;;  %3223 = vrot.lane.b32.xlu0 %v3219_v16, %s13148_s24  ;;  %v10466_v20 = vld [vmem:[#allocation2 + $0x20] sm:$0xf]  ;;  %v2786_v8 = vpop.f32.mrf.mxu3 }
 0x40f   : > { %2911 = vst [vmem:[#allocation2 + $0x28] sm:$0xf] %v2910_v62  ;;  %8534 = vmatmul.msk.bf16.vlgmr.msra.gmra.mxu2 %vm1198_vm12, %v3194_v34  ;;  %v2755_v22 = vpop.f32.mrf.mxu1  ;;  %v3157_v38 = vunpack.c.l.b16 %v10466_v20  ;;  %v3003_v48 = vrot.slane %v3002_v19, 4  ;;  %v2942_v27 = vld [vmem:[#allocation2 + $0x24] sm:$0x1]  ;;  %v8492_v24 = vrot.slane %v10466_v20, 9 }
 0x410   : > { %2914 = vst [vmem:[#allocation2 + $0x2c] sm:$0x1] %v2913_v57  ;;  %v2846_v29 = vshrl.u32 %v2802_v17, 16  ;;  %v2849_v31 = vshll.u32 %v2802_v17, 16  ;;  %v2756_v30 = vadd.f32 %v10399_v53, %v2755_v22  ;;  %v3099_v14 = vrot.slane %v2942_v27, 5 }
 0x411   : > { %v3207_v15 = vpack.c.b16 %v3157_v38, %v3156_v50  ;;  %v3008_v11 = vsel %vm9671_vm11, %v3003_v48, %v3007_v18  ;;  %v3010_v41 = vshrl.u32 %v10466_v20, 16  ;;  %v3013_v37 = vshll.u32 %v10466_v20, 16  ;;  %v2918_v50 = vld [vmem:[#allocation2 + $0x34] sm:$0x1]  ;;  %v2921_v48 = vld [vmem:[#allocation2 + $0x38] sm:$0xf] }
 0x412   : > { %v2848_v33 = vrot.slane %v2846_v29, 7  ;;  %v2785_v54 = vadd.f32 %v2784_v21, %v2756_v30  ;;  %v3168_v46 = vunpack.c.l.b16 %v3008_v11  ;;  %v3100_v58 = vsel %vm9626_vm10, %v8492_v24, %v3099_v14 }
 0x413   : > { %3199 = vrot.lane.b32.xlu2 %v3194_v34, %s13144_s0  ;;  %v3189_v32 = vunpack.c.l.b16 %v3100_v58  ;;  %v3012_v35 = vrot.slane %v3010_v41, 4  ;;  %v3015_v36 = vrot.slane %v3013_v37, 5  ;;  %v3019_v40 = vshll.u32 %v2942_v27, 16  ;;  %v2924_v27 = vld [vmem:[#allocation2 + $0x3c] sm:$0x1] }
 0x414   : > { %v2851_v43 = vor.u32 %v2849_v31, %v2848_v33  ;;  %v2852_v26 = vrot.slane %v2848_v33, 4  ;;  %v2795_v0 = vmax.f32 %v2785_v54, 0.0  ;;  %v3174_v28 = vpack.c.b16 %v3168_v46, %v3167_v7 }
 0x415   : > { %v3016_v51 = vor.u32 %v3015_v36, %v3012_v35  ;;  %v3021_v60 = vrot.slane %v3019_v40, 5  ;;  %v3233_v23 = vpack.c.b16 %v3189_v32, %v3188_v47 }
 0x416   : > { %v2916_v52 = vsel %vm9562_vm4, %v2851_v43, %v2915_v49  ;;  %v2919_v55 = vsel %vm9594_vm7, %v2852_v26, %v2918_v50  ;;  %v2803_v4 = vpack.c.bf16 %v2795_v0, %v2795_v0  ;;  %3212 = vrot.lane.b32.xlu0 %v3207_v15, %s13147_s29  ;;  %3179 = vrot.lane.b32.xlu1 %v3174_v28, %s13153_s26  ;;  %v10487_v45 = vld [vmem:[#allocation2 + $0x28] sm:$0xf] }
 0x417   : > { %2917 = vst [vmem:[#allocation2 + $0x30] sm:$0xf] %v2916_v52  ;;  %v2757_v9 = vpop.f32.mrf.mxu1  ;;  %v3017_v56 = vrot.slane %v3016_v51, 4  ;;  %v2944_v2 = vld [vmem:[#allocation2 + $0x2c] sm:$0x1]  ;;  %v8493_v6 = vrot.slane %v10487_v45, 9  ;;  %v3158_v41 = vunpack.c.l.b16 %v10487_v45 }
 0x418   : > { %2920 = vst [vmem:[#allocation2 + $0x34] sm:$0x1] %v2919_v55  ;;  %v2854_v7 = vshrl.u32 %v2803_v4, 16  ;;  %v2758_v10 = vadd.f32 %v10399_v53, %v2757_v9  ;;  %v3103_v59 = vrot.slane %v2944_v2, 5  ;;  %v2857_v13 = vshll.u32 %v2803_v4, 16 }
 0x419   : > { %v3022_v25 = vsel %vm9671_vm11, %v3017_v56, %v3021_v60  ;;  %v3024_v16 = vshrl.u32 %v10487_v45, 16  ;;  %v3027_v63 = vshll.u32 %v10487_v45, 16  ;;  %v3033_v57 = vshll.u32 %v2944_v2, 16  ;;  %v2927_v60 = vld [vmem:[#allocation2 + $0x40] sm:$0xf] }
 0x41a   : > { %v2856_v3 = vrot.slane %v2854_v7, 7  ;;  %v2787_v34 = vadd.f32 %v2786_v8, %v2758_v10  ;;  %v3169_v19 = vunpack.c.l.b16 %v3022_v25  ;;  %v10499_v62 = vsel %vm9626_vm10, %v8493_v6, %v3103_v59  ;;  %v2930_v45 = vld [vmem:[#allocation2 + $0x44] sm:$0x1] }
 0x41b   : > { %3238 = vrot.lane.b32.xlu2 %v3233_v23, %s13149_s25  ;;  %v3190_v53 = vunpack.c.l.b16 %v10499_v62  ;;  %v3026_v5 = vrot.slane %v3024_v16, 4  ;;  %v3029_v47 = vrot.slane %v3027_v63, 5  ;;  %v3035_v15 = vrot.slane %v3033_v57, 5 }
 0x41c   : > { %v2859_v17 = vor.u32 %v2857_v13, %v2856_v3  ;;  %v2860_v18 = vrot.slane %v2856_v3, 4  ;;  %v2796_v21 = vmax.f32 %v2787_v34, 0.0  ;;  %v3220_v22 = vpack.c.b16 %v3169_v19, %v3168_v46 }
 0x41d   : > { %v10505_v24 = vpack.c.b16 %v3190_v53, %v3189_v32  ;;  %v3030_v29 = vor.u32 %v3029_v47, %v3026_v5 }
 0x41e   : > { %v2922_v31 = vsel %vm9562_vm4, %v2859_v17, %v2921_v48  ;;  %v2925_v30 = vsel %vm9594_vm7, %v2860_v18, %v2924_v27  ;;  %v2804_v14 = vpack.c.bf16 %v2796_v21, %v2796_v21  ;;  %3225 = vrot.lane.b32.xlu1 %v3220_v22, %s13148_s24  ;;  %3256 = vrot.lane.b32.xlu0 %v3174_v28, %s13150_s2  ;;  %v10513_v11 = vld [vmem:[#allocation2 + $0x30] sm:$0xf]  ;;  %v2951_v22 = vld [vmem:[#allocation2 + $0x48] sm:$0xf]  ;;  %v2952_v48 = vld [vmem:[#allocation2 + $0x4c] sm:$0x1] }
 0x41f   : > { %2923 = vst [vmem:[#allocation2 + $0x38] sm:$0xf] %v2922_v31  ;;  %8535 = vmatmul.msk.bf16.gmra.mxu2 %vm1198_vm12, %v10505_v24  ;;  %v3031_v37 = vrot.slane %v3030_v29, 4  ;;  %v2946_v33 = vld [vmem:[#allocation2 + $0x34] sm:$0x1]  ;;  %v3038_v54 = vshrl.u32 %v10513_v11, 16  ;;  %v10524_v28 = vpack.c.b16 %v3158_v41, %v3157_v38  ;;  %v3159_v16 = vunpack.c.l.b16 %v10513_v11 }
 0x420   : > { %2926 = vst [vmem:[#allocation2 + $0x3c] sm:$0x1] %v2925_v30  ;;  %v2862_v46 = vshrl.u32 %v2804_v14, 16  ;;  %v3041_v58 = vshll.u32 %v10513_v11, 16  ;;  %v2865_v32 = vshll.u32 %v2804_v14, 16  ;;  %v3047_v0 = vshll.u32 %v2946_v33, 16 }
 0x421   : > { %v3036_v35 = vsel %vm9671_vm11, %v3031_v37, %v3035_v15  ;;  %v3040_v36 = vrot.slane %v3038_v54, 4  ;;  %v8494_v49 = vrot.slane %v10513_v11, 9  ;;  %v3107_v50 = vrot.slane %v2946_v33, 5  ;;  %v9079_v30 = vld [vmem:[%s13157_s21 + $0x38] sm:$0xff]  ;;  %v9078_v33 = vld [vmem:[%s13157_s21 + $0x30] sm:$0xff] }
 0x422   : > { %v2864_v40 = vrot.slane %v2862_v46, 7  ;;  %v3170_v43 = vunpack.c.l.b16 %v3036_v35  ;;  %v3043_v26 = vrot.slane %v3041_v58, 5  ;;  %v3049_v38 = vrot.slane %v3047_v0, 5  ;;  %3418 = vmatpush.bf16.msrb.mxu0 %v9079_v30 }
 0x423   : > { %v3108_v59 = vsel %vm9626_vm10, %v8494_v49, %v3107_v50  ;;  %v3208_v18 = vpack.c.b16 %v3159_v16, %v3158_v41  ;;  %v3151_v37 = vrot.slane %v2952_v48, 5  ;;  %v3134_v50 = vshrl.u32 %v2951_v22, 16 }
 0x424   : > { %v2867_v51 = vor.u32 %v2865_v32, %v2864_v40  ;;  %v2868_v52 = vrot.slane %v2864_v40, 4  ;;  %v3175_v55 = vpack.c.b16 %v3170_v43, %v3169_v19  ;;  %v3044_v4 = vor.u32 %v3043_v26, %v3040_v36 }
 0x425   : > { %v3191_v47 = vunpack.c.l.b16 %v3108_v59  ;;  %v3244_v59 = vunpack.c.l.b16 %v2951_v22 }
 0x426   : > { %v2928_v9 = vsel %vm9562_vm4, %v2867_v51, %v2927_v60  ;;  %v2931_v56 = vsel %vm9594_vm7, %v2868_v52, %v2930_v45  ;;  %3248 = vrot.lane.b32.xlu0 %v10524_v28, %s13143_s27  ;;  %3181 = vrot.lane.b32.xlu2 %v3175_v55, %s13153_s26  ;;  %v3045_v20 = vrot.slane %v3044_v4, 4  ;;  %v10534_v2 = vld [vmem:[#allocation2 + $0x38] sm:$0xf]  ;;  %v3137_v51 = vshll.u32 %v2951_v22, 16 }
 0x427   : > { %2929 = vst [vmem:[#allocation2 + $0x40] sm:$0xf] %v2928_v9  ;;  %3258 = vrot.lane.b32.xlu1 %v3175_v55, %s13150_s2  ;;  %v2948_v6 = vld [vmem:[#allocation2 + $0x3c] sm:$0x1]  ;;  %v8495_v7 = vrot.slane %v10534_v2, 9  ;;  %v3052_v10 = vshrl.u32 %v10534_v2, 16  ;;  %v3160_v54 = vunpack.c.l.b16 %v10534_v2  ;;  %3419 = vmatpush.bf16.msrb.mxu0 %v9078_v33 }
 0x428   : > { %2932 = vst [vmem:[#allocation2 + $0x44] sm:$0x1] %v2931_v56  ;;  %v3050_v23 = vsel %vm9671_vm11, %v3045_v20, %v3049_v38  ;;  %v3111_v8 = vrot.slane %v2948_v6, 5  ;;  %v3055_v13 = vshll.u32 %v10534_v2, 16  ;;  %v3061_v19 = vshll.u32 %v2948_v6, 16 }
 0x429   : > { %v3171_v25 = vunpack.c.l.b16 %v3050_v23  ;;  %v3054_v63 = vrot.slane %v3052_v10, 4  ;;  %v10570_v0 = vpack.c.b16 %v3160_v54, %v3159_v16  ;;  %v3136_v45 = vrot.slane %v3134_v50, 4  ;;  %v9077_v10 = vld [vmem:[%s13157_s21 + $0x28] sm:$0xff] }
 0x42a   : > { %v10547_v3 = vsel %vm9626_vm10, %v8495_v7, %v3111_v8  ;;  %v3057_v34 = vrot.slane %v3055_v13, 5  ;;  %v3063_v29 = vrot.slane %v3061_v19, 5  ;;  %v3139_v9 = vrot.slane %v3137_v51, 5  ;;  %v9076_v19 = vld [vmem:[%s13157_s21 + $0x20] sm:$0xff] }
 0x42b   : > { %v3221_v5 = vpack.c.b16 %v3171_v25, %v3170_v43  ;;  %v3192_v57 = vunpack.c.l.b16 %v10547_v3  ;;  %v3234_v43 = vpack.c.b16 %v3191_v47, %v3190_v53  ;;  %v3143_v7 = vshll.u32 %v2952_v48, 16  ;;  %3420 = vmatpush.bf16.msrb.mxu0 %v9077_v10  ;;  %v9075_v3 = vld [vmem:[%s13157_s21 + $0x18] sm:$0xff] }
 0x42c   : > { %v3058_v17 = vor.u32 %v3057_v34, %v3054_v63  ;;  %v3140_v6 = vor.u32 %v3139_v9, %v3136_v45 }
 0x42d   : > { %v3196_v21 = vpack.c.b16 %v3192_v57, %v3191_v47  ;;  %v3145_v13 = vrot.slane %v3143_v7, 5 }
 0x42e   : > { %3201 = vrot.lane.b32.xlu0 %v10505_v24, %s13144_s0  ;;  %3227 = vrot.lane.b32.xlu2 %v3221_v5, %s13148_s24  ;;  %v3059_v27 = vrot.slane %v3058_v17, 4  ;;  %v2949_v31 = vld [vmem:[#allocation2 + $0x40] sm:$0xf]  ;;  %v8497_v24 = vrot.slane %v2951_v22, 9  ;;  %v3141_v8 = vrot.slane %v3140_v6, 4  ;;  %v9073_v17 = vld [vmem:[%s13157_s21 + $0x8] sm:$0xff] }
 0x42f   : > { %3214 = vrot.lane.b32.xlu1 %v3208_v18, %s13147_s29  ;;  %8536 = vmatmul.msk.bf16.gmra.mxu2 %vm1198_vm12, %v3196_v21  ;;  %v2950_v14 = vld [vmem:[#allocation2 + $0x44] sm:$0x1]  ;;  %v3114_v15 = vshrl.u32 %v2949_v31, 16  ;;  %v3117_v11 = vshll.u32 %v2949_v31, 16  ;;  %v8496_v35 = vrot.slane %v2949_v31, 9  ;;  %v3205_v53 = vunpack.c.l.b16 %v2949_v31 }
 0x430   : > { %v3064_v41 = vsel %vm9671_vm11, %v3059_v27, %v3063_v29  ;;  %v3131_v36 = vrot.slane %v2950_v14, 5  ;;  %v3152_v26 = vsel %vm9626_vm10, %v8497_v24, %v3151_v37  ;;  %v3123_v62 = vshll.u32 %v2950_v14, 16  ;;  %3421 = vmatpush.bf16.msrb.mxu0 %v9076_v19  ;;  %v9072_v18 = vld [vmem:[%s13157_s21] sm:$0xff] }
 0x431   : > { %v3172_v46 = vunpack.c.l.b16 %v3064_v41  ;;  %v3116_v58 = vrot.slane %v3114_v15, 4  ;;  %v3119_v32 = vrot.slane %v3117_v11, 5  ;;  %v3264_v55 = vunpack.c.l.b16 %v3152_v26 }
 0x432   : > { %v3132_v52 = vsel %vm9626_vm10, %v8496_v35, %v3131_v36  ;;  %v3125_v56 = vrot.slane %v3123_v62, 5  ;;  %v3209_v20 = vpack.c.b16 %v3205_v53, %v3160_v54  ;;  %v3245_v16 = vpack.c.b16 %v3244_v59, %v3205_v53 }
 0x433   : > { %v3176_v40 = vpack.c.b16 %v3172_v46, %v3171_v25  ;;  %v3120_v49 = vor.u32 %v3119_v32, %v3116_v58  ;;  %v3231_v4 = vunpack.c.l.b16 %v3132_v52  ;;  %v3146_v34 = vsel %vm9671_vm11, %v3141_v8, %v3145_v13 }
 0x434   : > { %v3254_v5 = vunpack.c.l.b16 %v3146_v34  ;;  %3422 = vmatpush.bf16.msrb.mxu0 %v9075_v3 }
 0x435   : > { %v3121_v60 = vrot.slane %v3120_v49, 4  ;;  %v3265_v38 = vpack.c.b16 %v3264_v55, %v3231_v4  ;;  %v3235_v63 = vpack.c.b16 %v3231_v4, %v3192_v57  ;;  %v9074_v57 = vld [vmem:[%s13157_s21 + $0x10] sm:$0xff] }
 0x436   : > { %3240 = vrot.lane.b32.xlu0 %v3234_v43, %s13149_s25  ;;  %3260 = vrot.lane.b32.xlu2 %v3176_v40, %s13150_s2 }
 0x437   : > { %3250 = vrot.lane.b32.xlu1 %v10570_v0, %s13143_s27  ;;  %v3126_v2 = vsel %vm9671_vm11, %v3121_v60, %v3125_v56 }
 0x438   : > { %v3218_v23 = vunpack.c.l.b16 %v3126_v2  ;;  %3423 = vmatpush.bf16.msrb.mxu0 %v9074_v57  ;;  %v10645_v57 = vld [vmem:[%s13158_s8] ss:$0 sm:$0xff] }
 0x43a   : > { %v3222_v25 = vpack.c.b16 %v3218_v23, %v3172_v46  ;;  %v3255_v47 = vpack.c.b16 %v3254_v5, %v3218_v23 }
 0x43c   : > { %3424 = vmatpush.bf16.msrb.mxu0 %v9073_v17 }
 0x43e   : > { %3183 = vrot.lane.b32.xlu0 %v3176_v40, %s13153_s26  ;;  %3216 = vrot.lane.b32.xlu2 %v3209_v20, %s13147_s29 }
 0x43f   : > { %3203 = vrot.lane.b32.xlu1 %v3196_v21, %s13144_s0  ;;  %8537 = vmatmul.msk.bf16.gmra.mxu2 %vm1198_vm12, %v3265_v38 }
 0x440   : > { %3425 = vmatpush.bf16.msrb.mxu0 %v9072_v18 }
 0x446   : > { %3229 = vrot.lane.b32.xlu0 %v3222_v25, %s13148_s24  ;;  %3252 = vrot.lane.b32.xlu2 %v3245_v16, %s13143_s27 }
 0x447   : > { %3242 = vrot.lane.b32.xlu1 %v3235_v63, %s13149_s25 }
 0x44e   : > { %3262 = vrot.lane.b32.xlu0 %v3255_v47, %s13150_s2 }
 0x45d   : > { %v3211_v21 = vpop.permute.xlu2 %3210 }
 0x465   : > { %v3247_v27 = vpop.permute.xlu2 %3246 }
 0x46d   : > { %v3200_v30 = vpop.permute.xlu2 %3199 }
 0x471   : > { %v3198_v22 = vpop.permute.xlu1 %3197 }
 0x475   : > { %v3239_v33 = vpop.permute.xlu2 %3238 }
 0x478   : > { %v3178_v48 = vpop.permute.xlu0 %3177 }
 0x479   : > { %v3237_v29 = vpop.permute.xlu1 %3236  ;;  %v3268_v14 = vsel %vm1198_vm12, %v10424_v44, %v3178_v48 }
 0x47a   : > { %v3279_v15 = vsel %vm1211_vm13, %v3268_v14, %v3198_v22  ;;  %v3620_v22 = vld [vmem:[#allocation2] sm:$0xf] }
 0x47b   : > { %v3287_v24 = vsel %vm1220_vm14, %v3279_v15, %v3211_v21 }
 0x480   : > { %v3224_v31 = vpop.permute.xlu0 %3223  ;;  %v3182_v40 = vpop.permute.xlu2 %3181 }
 0x481   : > { %v3295_v37 = vsel %vm1229_vm15, %v3287_v24, %v3224_v31 }
 0x482   : > { %v3303_v54 = vsel %vm1238_vm0, %v3295_v37, %v3237_v29  ;;  %v3644_v29 = vshll.u32 %v3620_v22, 16 }
 0x483   : > { %v3311_v32 = vsel %vm1247_vm1, %v3303_v54, %v3247_v27  ;;  %v3641_v27 = vshrl.u32 %v3620_v22, 16 }
 0x488   : > { %v3180_v11 = vpop.permute.xlu1 %3179  ;;  %v3213_v41 = vpop.permute.xlu0 %3212 }
 0x489   : > { %v3271_v44 = vsel %vm1198_vm12, %v10448_v61, %v3180_v11  ;;  %v3228_v55 = vpop.permute.xlu2 %3227  ;;  %v3274_v61 = vsel %vm1198_vm12, %v10524_v28, %v3182_v40  ;;  %v3643_v11 = vrot.slane %v3641_v27, 4 }
 0x48a   : > { %v3281_v36 = vsel %vm1211_vm13, %v3271_v44, %v3200_v30  ;;  %v4763_v30 = vld [vmem:[%s9541_s5] sm:$0xf]  ;;  %v4765_v44 = vld [vmem:[%s9541_s5 + $0x8] sm:$0xf] }
 0x48b   : > { %v3289_v49 = vsel %vm1220_vm14, %v3281_v36, %v3213_v41  ;;  %v3646_v41 = vrot.slane %v3644_v29, 5  ;;  %v3621_v36 = vld [vmem:[#allocation2 + $0x4] sm:$0x1]  ;;  %v4775_v40 = vshll.u32 %v4763_v30, 16 }
 0x490   : > { %v3226_v46 = vpop.permute.xlu1 %3225  ;;  %v3257_v58 = vpop.permute.xlu0 %3256 }
 0x491   : > { %v3319_v35 = vsel %vm1256_vm2, %v3311_v32, %v3257_v58  ;;  %v3297_v50 = vsel %vm1229_vm15, %v3289_v49, %v3226_v46  ;;  %v3261_v38 = vpop.permute.xlu2 %3260  ;;  %v4764_v46 = vld [vmem:[%s9541_s5 + $0x4] sm:$0xf] }
 0x492   : > { %3426 = vmatmul.bf16.vlgmr.msrb.gmra.mxu0 %v3319_v35  ;;  %v3305_v51 = vsel %vm1238_vm0, %v3297_v50, %v3239_v33  ;;  %v4772_v33 = vshrl.u32 %v4763_v30, 16  ;;  %v9129_v30 = vld [vmem:[%s13070_s17 + $0x184] sm:$0xf] }
 0x498   : > { %v3249_v26 = vpop.permute.xlu0 %3248 }
 0x499   : > { %v3259_v43 = vpop.permute.xlu1 %3258  ;;  %v3313_v52 = vsel %vm1247_vm1, %v3305_v51, %v3249_v26  ;;  %v3217_v59 = vpop.permute.xlu2 %3216  ;;  %v3650_v26 = vshll.u32 %v3621_v36, 16  ;;  %v10652_v51 = vrot.slane %v4772_v33, 7 }
 0x49a   : > { %v3322_v4 = vsel %vm1256_vm2, %v3313_v52, %v3259_v43  ;;  %v3647_v43 = vor.u32 %v3646_v41, %v3643_v11 }
 0x4a0   : > { %v3202_v53 = vpop.permute.xlu0 %3201 }
 0x4a1   : > { %v3215_v62 = vpop.permute.xlu1 %3214  ;;  %v3283_v60 = vsel %vm1211_vm13, %v3274_v61, %v3202_v53  ;;  %v3253_v19 = vpop.permute.xlu2 %3252  ;;  %v3572_v53 = vld [vmem:[#allocation2 + $0x8] sm:$0xf]  ;;  %v4788_v61 = vshrl.u32 %v4765_v44, 16 }
 0x4a2   : > { %3431 = vmatmul.bf16.gmra.mxu0 %v3322_v4  ;;  %v3291_v45 = vsel %vm1220_vm14, %v3283_v60, %v3215_v62  ;;  %v4766_v62 = vld [vmem:[%s9541_s5 + $0xc] sm:$0xf]  ;;  %v4780_v4 = vshrl.u32 %v4764_v46, 16 }
 0x4a3   : > { %v3299_v20 = vsel %vm1229_vm15, %v3291_v45, %v3228_v55  ;;  %v3575_v55 = vld [vmem:[#allocation2 + $0xc] sm:$0x1] }
 0x4a8   : > { %v3241_v56 = vpop.permute.xlu0 %3240 }
 0x4a9   : > { %v3251_v9 = vpop.permute.xlu1 %3250  ;;  %v3307_v2 = vsel %vm1238_vm0, %v3299_v20, %v3241_v56  ;;  %v8538_v56 = vrot.slane %v3620_v22, 9  ;;  %v9132_v22 = vld [vmem:[%s13070_s17 + $0x194] sm:$0xf0] }
 0x4aa   : > { %v3315_v6 = vsel %vm1247_vm1, %v3307_v2, %v3251_v9  ;;  %v3770_v2 = vrot.slane %v3621_v36, 5 }
 0x4ab   : > { %v3325_v23 = vsel %vm1256_vm2, %v3315_v6, %v3261_v38  ;;  %v4796_v38 = vshrl.u32 %v4766_v62, 16  ;;  %v3648_v6 = vrot.slane %v3647_v43, 4 }
 0x4b0   : > { %v3184_v10 = vpop.permute.xlu0 %3183 }
 0x4b1   : > { %v3204_v7 = vpop.permute.xlu1 %3203  ;;  %v3277_v28 = vsel %vm1198_vm12, %v10570_v0, %v3184_v10  ;;  %v3456_v0 = vpop.f32.mrf.mxu2  ;;  %v4777_v10 = vor.u32 %v4775_v40, %v10652_v51 }
 0x4b2   : > { %3436 = vmatmul.bf16.gmra.mxu0 %v3325_v23  ;;  %v3285_v8 = vsel %vm1211_vm13, %v3277_v28, %v3204_v7  ;;  %v3652_v7 = vrot.slane %v3650_v26, 5 }
 0x4b3   : > { %v3293_v25 = vsel %vm1220_vm14, %v3285_v8, %v3217_v59  ;;  %v10661_v59 = vrot.slane %v4780_v4, 7  ;;  %v4783_v8 = vshll.u32 %v4764_v46, 16 }
 0x4b5   : > { %v10687_v11 = vor.u32 %v4783_v8, %v10661_v59  ;;  %v4786_v41 = vrot.slane %v10661_v59, 4 }
 0x4b8   : > { %v3230_v13 = vpop.permute.xlu0 %3229 }
 0x4b9   : > { %v3243_v16 = vpop.permute.xlu1 %3242  ;;  %v3301_v63 = vsel %vm1229_vm15, %v3293_v25, %v3230_v13  ;;  %v3458_v17 = vpop.f32.mrf.mxu2  ;;  %v10663_v13 = vrot.slane %v4788_v61, 7  ;;  %v4791_v25 = vshll.u32 %v4765_v44, 16 }
 0x4ba   : > { %v3309_v34 = vsel %vm1238_vm0, %v3301_v63, %v3243_v16  ;;  %v4778_v63 = vrot.slane %v10652_v51, 4 }
 0x4bb   : > { %v3317_v47 = vsel %vm1247_vm1, %v3309_v34, %v3253_v19 }
 0x4c0   : > { %v3263_v5 = vpop.permute.xlu0 %3262 }
 0x4c1   : > { %v3328_v3 = vsel %vm1256_vm2, %v3317_v47, %v3263_v5  ;;  %v3461_v24 = vpop.f32.mrf.mxu2  ;;  %v3578_v47 = vld [vmem:[#allocation2 + $0x10] sm:$0xf] }
 0x4c2   : > { %3441 = vmatmul.bf16.gmra.mxu0 %v3328_v3  ;;  %v10666_v3 = vrot.slane %v4796_v38, 7 }
 0x4c9   : > { %v3463_v16 = vpop.f32.mrf.mxu2 }
 0x50f   : > { %v3427_v18 = vpop.f32.mrf.mxu0 }
 0x510   : > { %v3428_v21 = vadd.f32 %v10645_v57, %v3427_v18  ;;  %v3653_v18 = vsel %vm9671_vm11, %v3648_v6, %v3652_v7 }
 0x511   : > { %v10709_v51 = vunpack.c.l.b16 %v3653_v18 }
 0x512   : > { %v3457_v48 = vadd.f32 %v3456_v0, %v3428_v21  ;;  %v4799_v0 = vshll.u32 %v4766_v62, 16  ;;  %v8742_v21 = vld [vmem:[%s13070_s17 + $0x180] sm:$0xf] }
 0x514   : > { %v3476_v31 = vmax.f32 %v3457_v48, 0.0  ;;  %v10706_v26 = vor.u32 %v4799_v0, %v10666_v3 }
 0x516   : > { %v3484_v14 = vpack.c.bf16 %v3476_v31, %v3476_v31  ;;  %v8743_v31 = vor.u32 %v9132_v22, %v8742_v21 }
 0x517   : > { %v3429_v15 = vpop.f32.mrf.mxu0 }
 0x518   : > { %v3493_v37 = vshrl.u32 %v3484_v14, 16  ;;  %v3430_v54 = vadd.f32 %v10645_v57, %v3429_v15  ;;  %v3496_v32 = vshll.u32 %v3484_v14, 16  ;;  %v8744_v14 = vld [vmem:[%s13070_s17 + $0x198] sm:$0xf0]  ;;  %v3581_v15 = vld [vmem:[#allocation2 + $0x14] sm:$0x1]  ;;  %4403 = vmatpush.bf16.msra.mxu3 %v8743_v31 }
 0x519   : > { %v8747_v33 = vor.u32 %v9129_v30, %v8744_v14 }
 0x51a   : > { %v3495_v58 = vrot.slane %v3493_v37, 7  ;;  %v3459_v35 = vadd.f32 %v3458_v17, %v3430_v54  ;;  %v10670_v17 = vsel %vm9626_vm10, %v8538_v56, %v3770_v2  ;;  %v10694_v37 = vld [vmem:[%s9541_s5 + $0x10] sm:$0xf]  ;;  %v4802_v2 = vrot.slane %v10666_v3, 4 }
 0x51b   : > { %4461 = vmatpush.bf16.msrb.mxu2 %v8747_v33 }
 0x51c   : > { %v3498_v49 = vor.u32 %v3496_v32, %v3495_v58  ;;  %v3499_v50 = vrot.slane %v3495_v58, 4  ;;  %v3477_v52 = vmax.f32 %v3459_v35, 0.0  ;;  %v4794_v35 = vrot.slane %v10663_v13, 4 }
 0x51e   : > { %v3573_v60 = vsel %vm9562_vm4, %v3498_v49, %v3572_v53  ;;  %v3576_v45 = vsel %vm9594_vm7, %v3499_v50, %v3575_v55  ;;  %v3485_v9 = vpack.c.bf16 %v3477_v52, %v3477_v52  ;;  %v3872_v50 = vunpack.c.l.b16 %v10670_v17 }
 0x51f   : > { %3574 = vst [vmem:[#allocation2 + $0x8] sm:$0xf] %v3573_v60  ;;  %v3432_v20 = vpop.f32.mrf.mxu0  ;;  %v4804_v55 = vshrl.u32 %v10694_v37, 16 }
 0x520   : > { %3577 = vst [vmem:[#allocation2 + $0xc] sm:$0x1] %v3576_v45  ;;  %v3501_v23 = vshrl.u32 %v3485_v9, 16  ;;  %v3433_v28 = vadd.f32 %v10645_v57, %v3432_v20  ;;  %v3504_v19 = vshll.u32 %v3485_v9, 16 }
 0x522   : > { %v3503_v34 = vrot.slane %v3501_v23, 7  ;;  %v3462_v5 = vadd.f32 %v3461_v24, %v3433_v28  ;;  %v10691_v24 = vor.u32 %v4791_v25, %v10663_v13  ;;  %v3466_v23 = vpop.f32.mrf.mxu2 }
 0x524   : > { %v3506_v48 = vor.u32 %v3504_v19, %v3503_v34  ;;  %v3507_v27 = vrot.slane %v3503_v34, 4  ;;  %v3478_v29 = vmax.f32 %v3462_v5, 0.0  ;;  %v3584_v34 = vld [vmem:[#allocation2 + $0x18] sm:$0xf]  ;;  %v3587_v19 = vld [vmem:[#allocation2 + $0x1c] sm:$0x1] }
 0x525   : > { %v10724_v5 = vrot.slane %v4804_v55, 7 }
 0x526   : > { %v4851_v54 = vld [vmem:[#allocation2 + $0x8] sm:$0xf]  ;;  %v3579_v46 = vsel %vm9562_vm4, %v3506_v48, %v3578_v47  ;;  %v3582_v58 = vsel %vm9594_vm7, %v3507_v27, %v3581_v15  ;;  %v3486_v32 = vpack.c.bf16 %v3478_v29, %v3478_v29 }
 0x527   : > { %v10701_v44 = vld [vmem:[#allocation2 + $0x8] sm:$0xf]  ;;  %v4852_v36 = vsel %vm9562_vm4, %v4777_v10, %v4851_v54  ;;  %v4854_v40 = vld [vmem:[#allocation2 + $0xc] sm:$0x1]  ;;  %3580 = vst [vmem:[#allocation2 + $0x10] sm:$0xf] %v3579_v46  ;;  %v3434_v43 = vpop.f32.mrf.mxu0 }
 0x528   : > { %v3623_v49 = vld [vmem:[#allocation2 + $0xc] sm:$0x1]  ;;  %v4855_v52 = vsel %vm9594_vm7, %v4778_v63, %v4854_v40  ;;  %3583 = vst [vmem:[#allocation2 + $0x14] sm:$0x1] %v3582_v58  ;;  %v3509_v62 = vshrl.u32 %v3486_v32, 16  ;;  %v3435_v53 = vadd.f32 %v10645_v57, %v3434_v43  ;;  %v8539_v4 = vrot.slane %v10701_v44, 9 }
 0x529   : > { %v3774_v61 = vrot.slane %v3623_v49, 5  ;;  %4853 = vst [vmem:[#allocation2 + $0x8] sm:$0xf] %v4852_v36  ;;  %v3655_v60 = vshrl.u32 %v10701_v44, 16  ;;  %v3658_v45 = vshll.u32 %v10701_v44, 16  ;;  %v3512_v56 = vshll.u32 %v3486_v32, 16 }
 0x52a   : > { %v3511_v9 = vrot.slane %v3509_v62, 7  ;;  %v3464_v20 = vadd.f32 %v3463_v16, %v3435_v53  ;;  %4856 = vst [vmem:[#allocation2 + $0xc] sm:$0x1] %v4855_v52  ;;  %v3664_v38 = vshll.u32 %v3623_v49, 16  ;;  %v3841_v16 = vunpack.c.l.b16 %v10701_v44  ;;  %v10755_v62 = vld [vmem:[%s9541_s5 + $0x14] sm:$0xf] }
 0x52b   : > { %v10721_v6 = vsel %vm9626_vm10, %v8539_v4, %v3774_v61  ;;  %v3657_v7 = vrot.slane %v3655_v60, 4  ;;  %v3660_v10 = vrot.slane %v3658_v45, 5  ;;  %v4807_v58 = vshll.u32 %v10694_v37, 16  ;;  %v3590_v45 = vld [vmem:[#allocation2 + $0x20] sm:$0xf] }
 0x52c   : > { %v3514_v28 = vor.u32 %v3512_v56, %v3511_v9  ;;  %v3515_v8 = vrot.slane %v3511_v9, 4  ;;  %v3479_v25 = vmax.f32 %v3464_v20, 0.0  ;;  %v3873_v63 = vunpack.c.l.b16 %v10721_v6  ;;  %v3593_v20 = vld [vmem:[#allocation2 + $0x24] sm:$0x1] }
 0x52d   : > { %v3661_v47 = vor.u32 %v3660_v10, %v3657_v7  ;;  %v3666_v0 = vrot.slane %v3664_v38, 5  ;;  %v4810_v36 = vrot.slane %v10724_v5, 4  ;;  %v4812_v7 = vshrl.u32 %v10755_v62, 16 }
 0x52e   : > { %v4857_v17 = vld [vmem:[#allocation2 + $0x10] sm:$0xf]  ;;  %v3585_v18 = vsel %vm9562_vm4, %v3514_v28, %v3584_v34  ;;  %v3588_v21 = vsel %vm9594_vm7, %v3515_v8, %v3587_v19  ;;  %v3487_v22 = vpack.c.bf16 %v3479_v25, %v3479_v25  ;;  %v3880_v48 = vpack.c.b16 %v3873_v63, %v3872_v50  ;;  %v3468_v28 = vpop.f32.mrf.mxu2 }
 0x52f   : > { %v10733_v27 = vld [vmem:[#allocation2 + $0x10] sm:$0xf]  ;;  %v4858_v29 = vsel %vm9562_vm4, %v10687_v11, %v4857_v17  ;;  %v4860_v31 = vld [vmem:[#allocation2 + $0x14] sm:$0x1]  ;;  %3586 = vst [vmem:[#allocation2 + $0x18] sm:$0xf] %v3585_v18  ;;  %v3437_v30 = vpop.f32.mrf.mxu0 }
 0x530   : > { %v3842_v14 = vunpack.c.l.b16 %v10733_v27  ;;  %v3662_v15 = vrot.slane %v3661_v47, 4  ;;  %v8540_v33 = vrot.slane %v10733_v27, 9  ;;  %v4861_v54 = vsel %vm9594_vm7, %v4786_v41, %v4860_v31  ;;  %3589 = vst [vmem:[#allocation2 + $0x1c] sm:$0x1] %v3588_v21  ;;  %3884 = vrot.lane.b32.xlu2 %v3880_v48, %s13144_s0  ;;  %v3625_v32 = vld [vmem:[#allocation2 + $0x14] sm:$0x1] }
 0x531   : > { %v3517_v46 = vshrl.u32 %v3487_v22, 16  ;;  %v3438_v11 = vadd.f32 %v10645_v57, %v3437_v30  ;;  %4859 = vst [vmem:[#allocation2 + $0x10] sm:$0xf] %v4858_v29  ;;  %v3778_v41 = vrot.slane %v3625_v32, 5  ;;  %v3520_v49 = vshll.u32 %v3487_v22, 16 }
 0x532   : > { %v3893_v40 = vpack.c.b16 %v3842_v14, %v3841_v16  ;;  %v3667_v59 = vsel %vm9671_vm11, %v3662_v15, %v3666_v0  ;;  %4862 = vst [vmem:[#allocation2 + $0x14] sm:$0x1] %v4861_v54  ;;  %v3669_v53 = vshrl.u32 %v10733_v27, 16  ;;  %v3672_v55 = vshll.u32 %v10733_v27, 16  ;;  %v10779_v0 = vld [vmem:[%s9541_s5 + $0x18] sm:$0xf] }
 0x533   : > { %v3519_v43 = vrot.slane %v3517_v46, 7  ;;  %v3467_v50 = vadd.f32 %v3466_v23, %v3438_v11  ;;  %v10752_v52 = vunpack.c.l.b16 %v3667_v59  ;;  %v10760_v37 = vsel %vm9626_vm10, %v8540_v33, %v3778_v41 }
 0x534   : > { %3897 = vrot.lane.b32.xlu0 %v3893_v40, %s13147_s29  ;;  %v3678_v4 = vshll.u32 %v3625_v32, 16  ;;  %v3874_v38 = vunpack.c.l.b16 %v10760_v37  ;;  %v3671_v10 = vrot.slane %v3669_v53, 4  ;;  %v3674_v23 = vrot.slane %v3672_v55, 5  ;;  %v3599_v37 = vld [vmem:[#allocation2 + $0x2c] sm:$0x1] }
 0x535   : > { %v3522_v61 = vor.u32 %v3520_v49, %v3519_v43  ;;  %v3523_v60 = vrot.slane %v3519_v43, 4  ;;  %v3480_v9 = vmax.f32 %v3467_v50, 0.0  ;;  %v3860_v56 = vpack.c.b16 %v10752_v52, %v10709_v51  ;;  %v3596_v43 = vld [vmem:[#allocation2 + $0x28] sm:$0xf] }
 0x536   : > { %v4863_v8 = vld [vmem:[#allocation2 + $0x18] sm:$0xf]  ;;  %v10773_v47 = vor.u32 %v4807_v58, %v10724_v5  ;;  %v3919_v21 = vpack.c.b16 %v3874_v38, %v3873_v63  ;;  %v3675_v29 = vor.u32 %v3674_v23, %v3671_v10  ;;  %v3680_v15 = vrot.slane %v3678_v4, 5 }
 0x537   : > { %v3591_v25 = vsel %vm9562_vm4, %v3522_v61, %v3590_v45  ;;  %v3594_v34 = vsel %vm9594_vm7, %v3523_v60, %v3593_v20  ;;  %v3488_v19 = vpack.c.bf16 %v3480_v9, %v3480_v9  ;;  %3864 = vrot.lane.b32.xlu1 %v3860_v56, %s13153_s26  ;;  %v10776_v51 = vld [vmem:[#allocation2 + $0x18] sm:$0xf]  ;;  %v4864_v17 = vsel %vm9562_vm4, %v10691_v24, %v4863_v8  ;;  %v4866_v18 = vld [vmem:[#allocation2 + $0x1c] sm:$0x1]  ;;  %v3439_v48 = vpop.f32.mrf.mxu0 }
 0x538   : > { %3592 = vst [vmem:[#allocation2 + $0x20] sm:$0xf] %v3591_v25  ;;  %v10786_v22 = vld [vmem:[#allocation2 + $0x1c] sm:$0x1]  ;;  %v3843_v27 = vunpack.c.l.b16 %v10776_v51  ;;  %v4867_v31 = vsel %vm9594_vm7, %v4794_v35, %v4866_v18  ;;  %v8541_v24 = vrot.slane %v10776_v51, 9  ;;  %3923 = vrot.lane.b32.xlu2 %v3919_v21, %s13149_s25  ;;  %v3440_v63 = vadd.f32 %v10645_v57, %v3439_v48 }
 0x539   : > { %3595 = vst [vmem:[#allocation2 + $0x24] sm:$0x1] %v3594_v34  ;;  %v3525_v30 = vshrl.u32 %v3488_v19, 16  ;;  %v3782_v6 = vrot.slane %v10786_v22, 5  ;;  %v3676_v13 = vrot.slane %v3675_v29, 4  ;;  %v3528_v46 = vshll.u32 %v3488_v19, 16  ;;  %v3471_v34 = vpop.f32.mrf.mxu2 }
 0x53a   : > { %4865 = vst [vmem:[#allocation2 + $0x18] sm:$0xf] %v4864_v17  ;;  %v10799_v33 = vpack.c.b16 %v3843_v27, %v3842_v14  ;;  %v4820_v35 = vshrl.u32 %v10779_v0, 16  ;;  %v3683_v11 = vshrl.u32 %v10776_v51, 16  ;;  %v3469_v32 = vadd.f32 %v3468_v28, %v3440_v63 }
 0x53b   : > { %v3527_v54 = vrot.slane %v3525_v30, 7  ;;  %4868 = vst [vmem:[#allocation2 + $0x1c] sm:$0x1] %v4867_v31  ;;  %v10805_v58 = vsel %vm9626_vm10, %v8541_v24, %v3782_v6  ;;  %v3681_v14 = vsel %vm9671_vm11, %v3676_v13, %v3680_v15  ;;  %v3686_v40 = vshll.u32 %v10776_v51, 16  ;;  %v10857_v15 = vld [vmem:[%s9541_s5 + $0x1c] sm:$0xf] }
 0x53c   : > { %3933 = vrot.lane.b32.xlu0 %v10799_v33, %s13143_s27  ;;  %v3875_v49 = vunpack.c.l.b16 %v10805_v58  ;;  %v10813_v50 = vunpack.c.l.b16 %v3681_v14  ;;  %v3481_v53 = vmax.f32 %v3469_v32, 0.0  ;;  %v10815_v55 = vrot.slane %v4812_v7, 7  ;;  %v3602_v14 = vld [vmem:[#allocation2 + $0x30] sm:$0xf]  ;;  %s11753_s5 = scalar_lea.vmem [#allocation3], %s9190_s1 }
 0x53d   : > { %v3530_v59 = vor.u32 %v3528_v46, %v3527_v54  ;;  %v3531_v41 = vrot.slane %v3527_v54, 4  ;;  %v4815_v4 = vshll.u32 %v10755_v62, 16  ;;  %v3685_v61 = vrot.slane %v3683_v11, 4 }
 0x53e   : > { %v10824_v56 = vpack.c.b16 %v3875_v49, %v3874_v38  ;;  %v3906_v20 = vpack.c.b16 %v10813_v50, %v10752_v52  ;;  %v3489_v23 = vpack.c.bf16 %v3481_v53, %v3481_v53  ;;  %v10833_v8 = vrot.slane %v4820_v35, 7 }
 0x53f   : > { %v4869_v60 = vld [vmem:[#allocation2 + $0x20] sm:$0xf]  ;;  %v3597_v45 = vsel %vm9562_vm4, %v3530_v59, %v3596_v43  ;;  %v3600_v9 = vsel %vm9594_vm7, %v3531_v41, %v3599_v37  ;;  %v3442_v28 = vpop.f32.mrf.mxu0  ;;  %v3688_v25 = vrot.slane %v3686_v40, 5  ;;  %v3692_v19 = vshll.u32 %v10786_v22, 16  ;;  %v3605_v40 = vld [vmem:[#allocation2 + $0x34] sm:$0x1] }
 0x540   : > { %v10828_v10 = vld [vmem:[#allocation2 + $0x20] sm:$0xf]  ;;  %v4870_v62 = vsel %vm9562_vm4, %v10706_v26, %v4869_v60  ;;  %v4872_v7 = vld [vmem:[#allocation2 + $0x24] sm:$0x1]  ;;  %3598 = vst [vmem:[#allocation2 + $0x28] sm:$0xf] %v3597_v45  ;;  %3910 = vrot.lane.b32.xlu1 %v3906_v20, %s13148_s24  ;;  %8764 = vmatmul.msk.bf16.vlgmr.msra.gmra.mxu3 %vm1198_vm12, %v10824_v56  ;;  %v3443_v26 = vadd.f32 %v10645_v57, %v3442_v28 }
 0x541   : > { %v4873_v38 = vsel %vm9594_vm7, %v4802_v2, %v4872_v7  ;;  %3601 = vst [vmem:[#allocation2 + $0x2c] sm:$0x1] %v3600_v9  ;;  %v3844_v52 = vunpack.c.l.b16 %v10828_v10  ;;  %v10845_v17 = vld [vmem:[#allocation2 + $0x24] sm:$0x1]  ;;  %v3533_v18 = vshrl.u32 %v3489_v23, 16  ;;  %v10848_v3 = vor.u32 %v4815_v4, %v10815_v55  ;;  %8768 = vmatmul.msk.bf16.vlgmr.msrb.gmra.mxu2 %vm1198_vm12, %v10824_v56 }
 0x542   : > { %v4818_v2 = vrot.slane %v10815_v55, 4  ;;  %4871 = vst [vmem:[#allocation2 + $0x20] sm:$0xf] %v4870_v62  ;;  %v3689_v21 = vor.u32 %v3688_v25, %v3685_v61  ;;  %v3536_v48 = vshll.u32 %v3489_v23, 16  ;;  %v3472_v29 = vadd.f32 %v3471_v34, %v3443_v26 }
 0x543   : > { %v4823_v31 = vshll.u32 %v10779_v0, 16  ;;  %v3694_v30 = vrot.slane %v3692_v19, 5  ;;  %4874 = vst [vmem:[#allocation2 + $0x24] sm:$0x1] %v4873_v38  ;;  %v3535_v22 = vrot.slane %v3533_v18, 7  ;;  %v8542_v6 = vrot.slane %v10828_v10, 9  ;;  %v3473_v19 = vpop.f32.mrf.mxu2 }
 0x544   : > { %3886 = vrot.lane.b32.xlu0 %v10824_v56, %s13144_s0  ;;  %v3690_v24 = vrot.slane %v3689_v21, 4  ;;  %v3786_v63 = vrot.slane %v10845_v17, 5  ;;  %v3482_v13 = vmax.f32 %v3472_v29, 0.0  ;;  %v4826_v54 = vrot.slane %v10833_v8, 4 }
 0x545   : > { %v3894_v46 = vpack.c.b16 %v3844_v52, %v3843_v27  ;;  %v3697_v35 = vshrl.u32 %v10828_v10, 16  ;;  %v3538_v11 = vor.u32 %v3536_v48, %v3535_v22  ;;  %v3539_v32 = vrot.slane %v3535_v22, 4  ;;  %v3608_v22 = vld [vmem:[#allocation2 + $0x38] sm:$0xf] }
 0x546   : > { %v3695_v59 = vsel %vm9671_vm11, %v3690_v24, %v3694_v30  ;;  %v3787_v41 = vsel %vm9626_vm10, %v8542_v6, %v3786_v63  ;;  %v3490_v37 = vpack.c.bf16 %v3482_v13, %v3482_v13  ;;  %v4828_v51 = vshrl.u32 %v10857_v15, 16  ;;  %v3611_v6 = vld [vmem:[#allocation2 + $0x3c] sm:$0x1] }
 0x547   : > { %v4875_v43 = vld [vmem:[#allocation2 + $0x28] sm:$0xf]  ;;  %v10871_v53 = vunpack.c.l.b16 %v3695_v59  ;;  %v3876_v4 = vunpack.c.l.b16 %v3787_v41  ;;  %v3603_v45 = vsel %vm9562_vm4, %v3538_v11, %v3602_v14  ;;  %v3606_v9 = vsel %vm9594_vm7, %v3539_v32, %v3605_v40  ;;  %v3444_v20 = vpop.f32.mrf.mxu0 }
 0x548   : > { %v10874_v27 = vld [vmem:[#allocation2 + $0x28] sm:$0xf]  ;;  %v4876_v61 = vsel %vm9562_vm4, %v10773_v47, %v4875_v43  ;;  %v4878_v60 = vld [vmem:[#allocation2 + $0x2c] sm:$0x1]  ;;  %3604 = vst [vmem:[#allocation2 + $0x30] sm:$0xf] %v3603_v45  ;;  %3899 = vrot.lane.b32.xlu1 %v3894_v46, %s13147_s29  ;;  %v3445_v34 = vadd.f32 %v10645_v57, %v3444_v20 }
 0x549   : > { %v3631_v62 = vld [vmem:[#allocation2 + $0x2c] sm:$0x1]  ;;  %v8543_v7 = vrot.slane %v10874_v27, 9  ;;  %v4879_v23 = vsel %vm9594_vm7, %v4810_v36, %v4878_v60  ;;  %v3541_v28 = vshrl.u32 %v3490_v37, 16  ;;  %v3861_v47 = vpack.c.b16 %v10871_v53, %v10813_v50  ;;  %3607 = vst [vmem:[#allocation2 + $0x34] sm:$0x1] %v3606_v9 }
 0x54a   : > { %v3699_v25 = vrot.slane %v3697_v35, 4  ;;  %v3920_v38 = vpack.c.b16 %v3876_v4, %v3875_v49  ;;  %v3790_v26 = vrot.slane %v3631_v62, 5  ;;  %v3700_v5 = vshll.u32 %v10828_v10, 16  ;;  %4877 = vst [vmem:[#allocation2 + $0x28] sm:$0xf] %v4876_v61 }
 0x54b   : > { %v3543_v18 = vrot.slane %v3541_v28, 7  ;;  %v3544_v36 = vshll.u32 %v3490_v37, 16  ;;  %3866 = vrot.lane.b32.xlu2 %v3861_v47, %s13153_s26  ;;  %v3706_v21 = vshll.u32 %v10845_v17, 16  ;;  %v3711_v50 = vshrl.u32 %v10874_v27, 16  ;;  %4880 = vst [vmem:[#allocation2 + $0x2c] sm:$0x1] %v4879_v23 }
 0x54c   : > { %v3474_v48 = vadd.f32 %v3473_v19, %v3445_v34  ;;  %3925 = vrot.lane.b32.xlu0 %v3920_v38, %s13149_s25  ;;  %v10901_v57 = vsel %vm9626_vm10, %v8543_v7, %v3790_v26  ;;  %v3702_v58 = vrot.slane %v3700_v5, 5  ;;  %v3714_v49 = vshll.u32 %v10874_v27, 16 }
 0x54d   : > { %v3546_v29 = vor.u32 %v3544_v36, %v3543_v18  ;;  %v3547_v30 = vrot.slane %v3543_v18, 4  ;;  %v10904_v24 = vrot.slane %v4828_v51, 7  ;;  %v3877_v17 = vunpack.c.l.b16 %v10901_v57  ;;  %v3614_v36 = vld [vmem:[#allocation2 + $0x40] sm:$0xf]  ;;  %v9126_v57 = vld [vmem:[%s13070_s17 + $0x164] sm:$0xf0] }
 0x54e   : > { %v3483_v63 = vmax.f32 %v3474_v48, 0.0  ;;  %v3703_v13 = vor.u32 %v3702_v58, %v3699_v25  ;;  %v3708_v46 = vrot.slane %v3706_v21, 5  ;;  %v3713_v35 = vrot.slane %v3711_v50, 4  ;;  %v3617_v21 = vld [vmem:[#allocation2 + $0x44] sm:$0x1] }
 0x54f   : > { %v3609_v11 = vsel %vm9562_vm4, %v3546_v29, %v3608_v22  ;;  %v3612_v32 = vsel %vm9594_vm7, %v3547_v30, %v3611_v6  ;;  %v10913_v14 = vpack.c.b16 %v3877_v17, %v3876_v4  ;;  %v3716_v40 = vrot.slane %v3714_v49, 5  ;;  %v4881_v59 = vld [vmem:[#allocation2 + $0x30] sm:$0xf] }
 0x550   : > { %3610 = vst [vmem:[#allocation2 + $0x38] sm:$0xf] %v3609_v11  ;;  %v3491_v41 = vpack.c.bf16 %v3483_v63, %v3483_v63  ;;  %v3704_v43 = vrot.slane %v3703_v13, 4  ;;  %v3720_v37 = vshll.u32 %v3631_v62, 16  ;;  %v4882_v51 = vsel %vm9562_vm4, %v10848_v3, %v4881_v59  ;;  %v4884_v61 = vld [vmem:[#allocation2 + $0x34] sm:$0x1]  ;;  %3943 = vrot.lane.b32.xlu1 %v3861_v47, %s13150_s2 }
 0x551   : > { %3613 = vst [vmem:[#allocation2 + $0x3c] sm:$0x1] %v3612_v32  ;;  %v4825_v60 = vor.u32 %v4823_v31, %v10833_v8  ;;  %8765 = vmatmul.msk.bf16.gmra.mxu3 %vm1198_vm12, %v10913_v14  ;;  %v3717_v4 = vor.u32 %v3716_v40, %v3713_v35  ;;  %v10924_v45 = vld [vmem:[#allocation2 + $0x30] sm:$0xf]  ;;  %v4885_v9 = vsel %vm9594_vm7, %v4818_v2, %v4884_v61  ;;  %v3845_v0 = vunpack.c.l.b16 %v10874_v27  ;;  %v3633_v31 = vld [vmem:[#allocation2 + $0x34] sm:$0x1] }
 0x552   : > { %v3549_v3 = vshrl.u32 %v3491_v41, 16  ;;  %v3709_v20 = vsel %vm9671_vm11, %v3704_v43, %v3708_v46  ;;  %8769 = vmatmul.msk.bf16.gmra.mxu2 %vm1198_vm12, %v10913_v14  ;;  %4883 = vst [vmem:[#allocation2 + $0x30] sm:$0xf] %v4882_v51  ;;  %v3722_v23 = vrot.slane %v3720_v37, 5  ;;  %v3725_v28 = vshrl.u32 %v10924_v45, 16 }
 0x553   : > { %v3856_v62 = vunpack.c.l.b16 %v3709_v20  ;;  %v3718_v7 = vrot.slane %v3717_v4, 4  ;;  %4886 = vst [vmem:[#allocation2 + $0x34] sm:$0x1] %v4885_v9  ;;  %v3552_v47 = vshll.u32 %v3491_v41, 16  ;;  %v4831_v2 = vshll.u32 %v10857_v15, 16 }
 0x554   : > { %v3551_v55 = vrot.slane %v3549_v3, 7  ;;  %v3728_v25 = vshll.u32 %v10924_v45, 16  ;;  %v3727_v26 = vrot.slane %v3725_v28, 4  ;;  %v8544_v5 = vrot.slane %v10924_v45, 9  ;;  %v8750_v28 = vld [vmem:[%s13070_s17 + $0x188] sm:$0xf] }
 0x555   : > { %v3907_v34 = vpack.c.b16 %v3856_v62, %v10871_v53  ;;  %v3723_v38 = vsel %vm9671_vm11, %v3718_v7, %v3722_v23  ;;  %v10947_v15 = vpack.c.b16 %v3845_v0, %v3844_v52  ;;  %v3734_v53 = vshll.u32 %v3633_v31, 16  ;;  %v10988_v23 = vld [vmem:[#allocation2 + $0x4c] sm:$0x1] }
 0x556   : > { %v3554_v19 = vor.u32 %v3552_v47, %v3551_v55  ;;  %v3555_v18 = vrot.slane %v3551_v55, 4  ;;  %v3857_v50 = vunpack.c.l.b16 %v3723_v38  ;;  %v3730_v48 = vrot.slane %v3728_v25, 5 }
 0x557   : > { %v4887_v58 = vld [vmem:[#allocation2 + $0x38] sm:$0xf]  ;;  %3912 = vrot.lane.b32.xlu2 %v3907_v34, %s13148_s24  ;;  %v3794_v29 = vrot.slane %v3633_v31, 5  ;;  %v3736_v59 = vrot.slane %v3734_v53, 5  ;;  %v4833_v41 = vor.u32 %v4831_v2, %v10904_v24  ;;  %v4834_v3 = vrot.slane %v10904_v24, 4 }
 0x558   : > { %v10949_v49 = vld [vmem:[#allocation2 + $0x38] sm:$0xf]  ;;  %v4888_v30 = vsel %vm9562_vm4, %v4825_v60, %v4887_v58  ;;  %v4890_v22 = vld [vmem:[#allocation2 + $0x3c] sm:$0x1]  ;;  %v3615_v6 = vsel %vm9562_vm4, %v3554_v19, %v3614_v36  ;;  %v3618_v63 = vsel %vm9594_vm7, %v3555_v18, %v3617_v21  ;;  %v3862_v13 = vpack.c.b16 %v3857_v50, %v3856_v62  ;;  %3935 = vrot.lane.b32.xlu1 %v10947_v15, %s13143_s27  ;;  %v10981_v31 = vld [vmem:[#allocation2 + $0x48] sm:$0xf] }
 0x559   : > { %v3635_v10 = vld [vmem:[#allocation2 + $0x3c] sm:$0x1]  ;;  %v4891_v52 = vsel %vm9594_vm7, %v4826_v54, %v4890_v22  ;;  %3616 = vst [vmem:[#allocation2 + $0x40] sm:$0xf] %v3615_v6  ;;  %v3731_v46 = vor.u32 %v3730_v48, %v3727_v26  ;;  %v10965_v35 = vsel %vm9626_vm10, %v8544_v5, %v3794_v29  ;;  %v8545_v11 = vrot.slane %v10949_v49, 9 }
 0x55a   : > { %3619 = vst [vmem:[#allocation2 + $0x44] sm:$0x1] %v3618_v63  ;;  %3868 = vrot.lane.b32.xlu0 %v3862_v13, %s13153_s26  ;;  %v3798_v32 = vrot.slane %v3635_v10, 5  ;;  %v3739_v8 = vshrl.u32 %v10949_v49, 16  ;;  %v3742_v54 = vshll.u32 %v10949_v49, 16  ;;  %v3878_v37 = vunpack.c.l.b16 %v10965_v35 }
 0x55b   : > { %v3732_v40 = vrot.slane %v3731_v46, 4  ;;  %4889 = vst [vmem:[#allocation2 + $0x38] sm:$0xf] %v4888_v30  ;;  %v3748_v9 = vshll.u32 %v3635_v10, 16  ;;  %v9133_v24 = vld [vmem:[%s13070_s17 + $0x19c] sm:$0xf0]  ;;  %v3846_v5 = vunpack.c.l.b16 %v10924_v45 }
 0x55c   : > { %v10974_v43 = vsel %vm9626_vm10, %v8545_v11, %v3798_v32  ;;  %4892 = vst [vmem:[#allocation2 + $0x3c] sm:$0x1] %v4891_v52  ;;  %v3741_v51 = vrot.slane %v3739_v8, 4  ;;  %v3744_v4 = vrot.slane %v3742_v54, 5  ;;  %v8751_v25 = vor.u32 %v9133_v24, %v8750_v28  ;;  %v9130_v34 = vld [vmem:[%s13070_s17 + $0x18c] sm:$0xf] }
 0x55d   : > { %v3737_v61 = vsel %vm9671_vm11, %v3732_v40, %v3736_v59  ;;  %v3879_v60 = vunpack.c.l.b16 %v10974_v43  ;;  %v3750_v18 = vrot.slane %v3748_v9, 5  ;;  %v8752_v45 = vld [vmem:[%s13070_s17 + $0x1a0] sm:$0xf0]  ;;  %v8547_v58 = vrot.slane %v10981_v31, 9  ;;  %v8718_v40 = vld [vmem:[%s13070_s17 + $0x150] sm:$0xf] }
 0x55e   : > { %v3858_v20 = vunpack.c.l.b16 %v3737_v61  ;;  %v3745_v7 = vor.u32 %v3744_v4, %v3741_v51  ;;  %v3838_v53 = vrot.slane %v10988_v23, 5  ;;  %4519 = vmatpush.bf16.msrb.mxu3 %v8751_v25  ;;  %v8755_v52 = vor.u32 %v9130_v34, %v8752_v45  ;;  %v4899_v54 = vld [vmem:[#allocation2] sm:$0xf]  ;;  %v11049_v51 = vld [vmem:[#allocation2 + $0x8] sm:$0xf] }
 0x55f   : > { %3945 = vrot.lane.b32.xlu2 %v3862_v13, %s13150_s2  ;;  %v10986_v62 = vpack.c.b16 %v3879_v60, %v3878_v37  ;;  %v3895_v13 = vpack.c.b16 %v3846_v5, %v3845_v0  ;;  %v3921_v35 = vpack.c.b16 %v3878_v37, %v3877_v17  ;;  %v3821_v27 = vshrl.u32 %v10981_v31, 16 }
 0x560   : > { %v4893_v55 = vld [vmem:[#allocation2 + $0x40] sm:$0xf]  ;;  %v3908_v47 = vpack.c.b16 %v3858_v20, %v3857_v50  ;;  %3888 = vrot.lane.b32.xlu1 %v10913_v14, %s13144_s0  ;;  %v3746_v19 = vrot.slane %v3745_v7, 4  ;;  %v3839_v11 = vsel %vm9626_vm10, %v8547_v58, %v3838_v53  ;;  %4577 = vmatpush.bf16.msra.mxu2 %v8755_v52  ;;  %v3824_v0 = vshll.u32 %v10981_v31, 16 }
 0x561   : > { %v10996_v2 = vld [vmem:[#allocation2 + $0x40] sm:$0xf]  ;;  %v4894_v38 = vsel %vm9562_vm4, %v4833_v41, %v4893_v55  ;;  %v4896_v26 = vld [vmem:[#allocation2 + $0x44] sm:$0x1]  ;;  %8766 = vmatmul.msk.bf16.gmra.mxu3 %vm1198_vm12, %v10986_v62  ;;  %v3847_v17 = vunpack.c.l.b16 %v10949_v49  ;;  %v3951_v37 = vunpack.c.l.b16 %v3839_v11  ;;  %v8719_v61 = vor.u32 %v9126_v57, %v8718_v40 }
 0x562   : > { %v3637_v36 = vld [vmem:[#allocation2 + $0x44] sm:$0x1]  ;;  %v4897_v21 = vsel %vm9594_vm7, %v4834_v3, %v4896_v26  ;;  %3914 = vrot.lane.b32.xlu0 %v3908_v47, %s13148_s24  ;;  %8770 = vmatmul.msk.bf16.gmra.mxu2 %vm1198_vm12, %v10986_v62  ;;  %4895 = vst [vmem:[#allocation2 + $0x40] sm:$0xf] %v4894_v38  ;;  %v3801_v50 = vshrl.u32 %v10996_v2, 16  ;;  %v3751_v48 = vsel %vm9671_vm11, %v3746_v19, %v3750_v18  ;;  %v3804_v29 = vshll.u32 %v10996_v2, 16 }
 0x563   : > { %4898 = vst [vmem:[#allocation2 + $0x44] sm:$0x1] %v4897_v21  ;;  %v11022_v30 = vunpack.c.l.b16 %v3751_v48  ;;  %v8546_v22 = vrot.slane %v10996_v2, 9  ;;  %v3818_v6 = vrot.slane %v3637_v36, 5  ;;  %v3810_v59 = vshll.u32 %v3637_v36, 16  ;;  %4367 = vmatpush.bf16.msra.mxu1 %v8719_v61 }
 0x564   : > { %v3803_v63 = vrot.slane %v3801_v50, 4  ;;  %v3806_v10 = vrot.slane %v3804_v29, 5  ;;  %v3892_v4 = vunpack.c.l.b16 %v10996_v2  ;;  %v3823_v3 = vrot.slane %v3821_v27, 4  ;;  %v8694_v2 = vld [vmem:[%s13070_s17 + $0x120] sm:$0xf] }
 0x565   : > { %v3863_v46 = vpack.c.b16 %v11022_v30, %v3858_v20  ;;  %v11035_v32 = vsel %vm9626_vm10, %v8546_v22, %v3818_v6  ;;  %v3826_v20 = vrot.slane %v3824_v0, 5  ;;  %v11052_v7 = vpack.c.b16 %v3847_v17, %v3846_v5  ;;  %v4900_v26 = vld [vmem:[#allocation2 + $0x4] sm:$0x1]  ;;  %v9120_v18 = vld [vmem:[%s13070_s17 + $0x134] sm:$0xf0] }
 0x566   : > { %v3807_v8 = vor.u32 %v3806_v10, %v3803_v63  ;;  %v3918_v41 = vunpack.c.l.b16 %v11035_v32  ;;  %v4920_v28 = vshrl.u32 %v4899_v54, 16  ;;  %v4923_v24 = vshll.u32 %v4899_v54, 16  ;;  %v4902_v36 = vld [vmem:[#allocation2 + $0xc] sm:$0x1]  ;;  %v11080_v6 = vld [vmem:[#allocation2 + $0x10] sm:$0xf] }
 0x567   : > { %3901 = vrot.lane.b32.xlu2 %v3895_v13, %s13147_s29  ;;  %v3812_v49 = vrot.slane %v3810_v59, 5  ;;  %v4934_v55 = vshrl.u32 %v11049_v51, 16  ;;  %v4937_v47 = vshll.u32 %v11049_v51, 16  ;;  %v3896_v34 = vpack.c.b16 %v3892_v4, %v3847_v17  ;;  %v11085_v0 = vld [vmem:[#allocation2 + $0x18] sm:$0xf] }
 0x568   : > { %3927 = vrot.lane.b32.xlu1 %v3921_v35, %s13149_s25  ;;  %v3808_v9 = vrot.slane %v3807_v8, 4  ;;  %v11060_v25 = vpack.c.b16 %v3951_v37, %v3918_v41  ;;  %v3827_v5 = vor.u32 %v3826_v20, %v3823_v3  ;;  %v3830_v19 = vshll.u32 %v10988_v23, 16  ;;  %v8670_v17 = vld [vmem:[%s13070_s17 + $0xf0] sm:$0xf]  ;;  %v9114_v59 = vld [vmem:[%s13070_s17 + $0x104] sm:$0xf0] }
 0x569   : > { %v4922_v21 = vrot.slane %v4920_v28, 4  ;;  %v4925_v50 = vrot.slane %v4923_v24, 5  ;;  %v8695_v45 = vor.u32 %v9120_v18, %v8694_v2  ;;  %v4936_v48 = vrot.slane %v4934_v55, 4 }
 0x56a   : > { %3947 = vrot.lane.b32.xlu0 %v3863_v46, %s13150_s2  ;;  %v3813_v38 = vsel %vm9671_vm11, %v3808_v9, %v3812_v49  ;;  %v4939_v23 = vrot.slane %v4937_v47, 5  ;;  %v3931_v53 = vunpack.c.l.b16 %v10981_v31  ;;  %v8788_v29 = vrot.slane %v4899_v54, 9  ;;  %v4904_v9 = vld [vmem:[#allocation2 + $0x14] sm:$0x1] }
 0x56b   : > { %v11077_v58 = vunpack.c.l.b16 %v3813_v38  ;;  %v5049_v22 = vrot.slane %v4900_v26, 5  ;;  %4368 = vmatpush.bf16.msra.mxu1 %v8695_v45  ;;  %v3828_v63 = vrot.slane %v3827_v5, 4  ;;  %v3832_v13 = vrot.slane %v3830_v19, 5 }
 0x56c   : > { %v8789_v10 = vrot.slane %v11049_v51, 9  ;;  %v5053_v52 = vrot.slane %v4902_v36, 5  ;;  %v4929_v35 = vshll.u32 %v4900_v26, 16  ;;  %v4940_v11 = vor.u32 %v4939_v23, %v4936_v48  ;;  %v11118_v23 = vld [vmem:[#allocation2 + $0x1c] sm:$0x1] }
 0x56d   : > { %v4948_v8 = vshrl.u32 %v11080_v6, 16  ;;  %v4951_v27 = vshll.u32 %v11080_v6, 16  ;;  %v3909_v31 = vpack.c.b16 %v11077_v58, %v11022_v30  ;;  %v3932_v40 = vpack.c.b16 %v3931_v53, %v3892_v4 }
 0x56e   : > { %v4943_v57 = vshll.u32 %v4902_v36, 16  ;;  %v3833_v54 = vsel %vm9671_vm11, %v3828_v63, %v3832_v13  ;;  %v5050_v37 = vsel %vm9626_vm10, %v8788_v29, %v5049_v22  ;;  %v5054_v61 = vsel %vm9626_vm10, %v8789_v10, %v5053_v52 }
 0x56f   : > { %3937 = vrot.lane.b32.xlu2 %v11052_v7, %s13143_s27  ;;  %v8671_v30 = vor.u32 %v9114_v59, %v8670_v17  ;;  %v4962_v3 = vshrl.u32 %v11085_v0, 16  ;;  %v4965_v20 = vshll.u32 %v11085_v0, 16  ;;  %v4931_v28 = vrot.slane %v4929_v35, 5 }
 0x570   : > { %3870 = vrot.lane.b32.xlu1 %v3863_v46, %s13153_s26  ;;  %v4926_v46 = vor.u32 %v4925_v50, %v4922_v21  ;;  %v4941_v24 = vrot.slane %v4940_v11, 4  ;;  %v4950_v49 = vrot.slane %v4948_v8, 4  ;;  %v4953_v55 = vrot.slane %v4951_v27, 5  ;;  %v11112_v21 = vld [vmem:[#allocation2 + $0x20] sm:$0xf] }
 0x571   : > { %8767 = vmatmul.msk.bf16.gmra.mxu3 %vm1198_vm12, %v11060_v25  ;;  %4369 = vmatpush.bf16.msra.mxu1 %v8671_v30  ;;  %v3941_v47 = vunpack.c.l.b16 %v3833_v54  ;;  %v5151_v2 = vunpack.c.l.b16 %v5050_v37  ;;  %v4945_v38 = vrot.slane %v4943_v57, 5  ;;  %v8790_v26 = vrot.slane %v11080_v6, 9  ;;  %v11144_v54 = vld [vmem:[#allocation2 + $0x28] sm:$0xf]  ;;  %v11148_v30 = vld [vmem:[#allocation2 + $0x24] sm:$0x1] }
 0x572   : > { %3903 = vrot.lane.b32.xlu0 %v3896_v34, %s13147_s29  ;;  %8771 = vmatmul.msk.bf16.gmra.mxu2 %vm1198_vm12, %v11060_v25  ;;  %v4927_v4 = vrot.slane %v4926_v46, 4  ;;  %v5152_v34 = vunpack.c.l.b16 %v5054_v61  ;;  %v5057_v5 = vrot.slane %v4904_v9, 5  ;;  %v3922_v19 = vpack.c.b16 %v3918_v41, %v3879_v60  ;;  %v8646_v60 = vld [vmem:[%s13070_s17 + $0xc0] sm:$0xf]  ;;  %v9108_v41 = vld [vmem:[%s13070_s17 + $0xd4] sm:$0xf0] }
 0x573   : > { %v4964_v18 = vrot.slane %v4962_v3, 4  ;;  %v4967_v36 = vrot.slane %v4965_v20, 5  ;;  %v4946_v45 = vsel %vm9671_vm11, %v4941_v24, %v4945_v38  ;;  %v4954_v48 = vor.u32 %v4953_v55, %v4950_v49  ;;  %v9102_v3 = vld [vmem:[%s13070_s17 + $0xa4] sm:$0xf0]  ;;  %v9123_v20 = vld [vmem:[%s13070_s17 + $0x154] sm:$0xf] }
 0x574   : > { %v4932_v50 = vsel %vm9671_vm11, %v4927_v4, %v4931_v28  ;;  %v3942_v43 = vpack.c.b16 %v3941_v47, %v11077_v58  ;;  %v5159_v53 = vpack.c.b16 %v5152_v34, %v5151_v2  ;;  %v4957_v32 = vshll.u32 %v4904_v9, 16  ;;  %v8622_v9 = vld [vmem:[%s13070_s17 + $0x90] sm:$0xf]  ;;  %v8720_v47 = vld [vmem:[%s13070_s17 + $0x168] sm:$0xf0] }
 0x575   : > { %v11130_v29 = vsel %vm9626_vm10, %v8790_v26, %v5057_v5  ;;  %v4976_v22 = vshrl.u32 %v11112_v21, 16  ;;  %v4979_v63 = vshll.u32 %v11112_v21, 16  ;;  %v8647_v13 = vor.u32 %v9108_v41, %v8646_v60  ;;  %v11186_v41 = vld [vmem:[#allocation2 + $0x2c] sm:$0x1] }
 0x576   : > { %v5131_v58 = vunpack.c.l.b16 %v4932_v50  ;;  %v5132_v10 = vunpack.c.l.b16 %v4946_v45  ;;  %v4968_v52 = vor.u32 %v4967_v36, %v4964_v18  ;;  %v4955_v46 = vrot.slane %v4954_v48, 4 }
 0x577   : > { %3890 = vrot.lane.b32.xlu2 %v10986_v62, %s13144_s0  ;;  %v4971_v35 = vshll.u32 %v11118_v23, 16  ;;  %v5121_v11 = vunpack.c.l.b16 %v11080_v6  ;;  %v5153_v8 = vunpack.c.l.b16 %v11130_v29  ;;  %4370 = vmatpush.bf16.msra.mxu1 %v8647_v13  ;;  %v4959_v27 = vrot.slane %v4957_v32, 5 }
 0x578   : > { %3916 = vrot.lane.b32.xlu1 %v3909_v31, %s13148_s24  ;;  %v4978_v31 = vrot.slane %v4976_v22, 4  ;;  %v5139_v57 = vpack.c.b16 %v5132_v10, %v5131_v58  ;;  %v5120_v17 = vunpack.c.l.b16 %v11049_v51  ;;  %v4969_v59 = vrot.slane %v4968_v52, 4  ;;  %v8696_v22 = vld [vmem:[%s13070_s17 + $0x138] sm:$0xf0]  ;;  %v8598_v52 = vld [vmem:[%s13070_s17 + $0x60] sm:$0xf] }
 0x579   : > { %v4960_v37 = vsel %vm9671_vm11, %v4955_v46, %v4959_v27  ;;  %v4973_v61 = vrot.slane %v4971_v35, 5  ;;  %v5198_v4 = vpack.c.b16 %v5153_v8, %v5152_v34  ;;  %v4990_v24 = vshrl.u32 %v11144_v54, 16  ;;  %v9096_v46 = vld [vmem:[%s13070_s17 + $0x74] sm:$0xf0]  ;;  %v9111_v35 = vld [vmem:[%s13070_s17 + $0xf4] sm:$0xf] }
 0x57a   : > { %3939 = vrot.lane.b32.xlu0 %v3932_v40, %s13143_s27  ;;  %v4981_v40 = vrot.slane %v4979_v63, 5  ;;  %v5172_v6 = vpack.c.b16 %v5121_v11, %v5120_v17  ;;  %v4993_v49 = vshll.u32 %v11144_v54, 16  ;;  %v8623_v55 = vor.u32 %v9102_v3, %v8622_v9 }
 0x57b   : > { %v5133_v2 = vunpack.c.l.b16 %v4960_v37  ;;  %v4974_v34 = vsel %vm9671_vm11, %v4969_v59, %v4973_v61  ;;  %v8723_v38 = vor.u32 %v9123_v20, %v8720_v47  ;;  %v4985_v26 = vshll.u32 %v11148_v30, 16 }
 0x57c   : > { %v4982_v28 = vor.u32 %v4981_v40, %v4978_v31  ;;  %4371 = vmatpush.bf16.msra.mxu1 %v8623_v55  ;;  %v5122_v5 = vunpack.c.l.b16 %v11085_v0  ;;  %v5061_v18 = vrot.slane %v11118_v23, 5  ;;  %v5134_v36 = vunpack.c.l.b16 %v4974_v34  ;;  %v9117_v23 = vld [vmem:[%s13070_s17 + $0x124] sm:$0xf]  ;;  %v8672_v40 = vld [vmem:[%s13070_s17 + $0x108] sm:$0xf0] }
 0x57d   : > { %4425 = vmatpush.bf16.msra.mxu0 %v8723_v38  ;;  %v4992_v45 = vrot.slane %v4990_v24, 4  ;;  %v4995_v48 = vrot.slane %v4993_v49, 5  ;;  %v4999_v27 = vshll.u32 %v11186_v41, 16  ;;  %v8599_v31 = vor.u32 %v9096_v46, %v8598_v52  ;;  %v8648_v24 = vld [vmem:[%s13070_s17 + $0xd8] sm:$0xf0] }
 0x57e   : > { %v4983_v50 = vrot.slane %v4982_v28, 4  ;;  %v11180_v32 = vpack.c.b16 %v5122_v5, %v5121_v11  ;;  %v5140_v63 = vpack.c.b16 %v5134_v36, %v5133_v2  ;;  %v8792_v59 = vrot.slane %v11112_v21, 9  ;;  %v9090_v34 = vld [vmem:[%s13070_s17 + $0x44] sm:$0xf0]  ;;  %v9099_v38 = vld [vmem:[%s13070_s17 + $0x94] sm:$0xf] }
 0x57f   : > { %3929 = vrot.lane.b32.xlu2 %v3922_v19, %s13149_s25  ;;  %v8791_v19 = vrot.slane %v11085_v0, 9  ;;  %v4996_v58 = vor.u32 %v4995_v48, %v4992_v45  ;;  %v5065_v37 = vrot.slane %v11148_v30, 5  ;;  %v8675_v61 = vor.u32 %v9111_v35, %v8672_v40  ;;  %v9105_v30 = vld [vmem:[%s13070_s17 + $0xc4] sm:$0xf]  ;;  %v11288_v40 = vld [vmem:[#allocation2 + $0x4c] sm:$0x1] }
 0x580   : > { %3949 = vrot.lane.b32.xlu1 %v3942_v43, %s13150_s2  ;;  %v5185_v43 = vpack.c.b16 %v5133_v2, %v5132_v10  ;;  %v8699_v10 = vor.u32 %v9117_v23, %v8696_v22  ;;  %4372 = vmatpush.bf16.msra.mxu1 %v8599_v31  ;;  %v5001_v9 = vrot.slane %v4999_v27, 5  ;;  %v8651_v55 = vor.u32 %v9105_v30, %v8648_v24  ;;  %v8574_v2 = vld [vmem:[%s13070_s17 + $0x30] sm:$0xf]  ;;  %v11267_v23 = vld [vmem:[#allocation2 + $0x38] sm:$0xf] }
 0x581   : > { %8772 = vmatmul.msk.bf16.vlgmr.msrb.gmra.mxu3 %vm1198_vm12, %v10824_v56  ;;  %v11184_v60 = vsel %vm9626_vm10, %v8791_v19, %v5061_v18  ;;  %v11228_v28 = vsel %vm9626_vm10, %v8792_v59, %v5065_v37  ;;  %v5123_v47 = vunpack.c.l.b16 %v11112_v21  ;;  %v8624_v21 = vld [vmem:[%s13070_s17 + $0xa8] sm:$0xf0]  ;;  %v8793_v22 = vrot.slane %v11144_v54, 9  ;;  %v9093_v0 = vld [vmem:[%s13070_s17 + $0x64] sm:$0xf] }
 0x582   : > { %5163 = vrot.lane.b32.xlu0 %v5159_v53, %s13144_s0  ;;  %8776 = vmatmul.msk.bf16.vlgmr.msra.gmra.mxu2 %vm1198_vm12, %v10824_v56  ;;  %v4987_v53 = vrot.slane %v4985_v26, 5  ;;  %v5154_v11 = vunpack.c.l.b16 %v11184_v60  ;;  %v8575_v26 = vor.u32 %v9090_v34, %v8574_v2  ;;  %v5155_v19 = vunpack.c.l.b16 %v11228_v28  ;;  %v11286_v31 = vld [vmem:[#allocation2 + $0x48] sm:$0xf]  ;;  %v8550_v37 = vld [vmem:[%s13070_s17] sm:$0xf] }
 0x583   : > { %4426 = vmatpush.bf16.msra.mxu0 %v8699_v10  ;;  %v5173_v60 = vpack.c.b16 %v5123_v47, %v5122_v5  ;;  %v8600_v5 = vld [vmem:[%s13070_s17 + $0x78] sm:$0xf0]  ;;  %v5018_v35 = vshrl.u32 %v11267_v23, 16  ;;  %v5124_v59 = vunpack.c.l.b16 %v11144_v54  ;;  %v9134_v30 = vld [vmem:[%s13070_s17 + $0x1a4] sm:$0xf0] }
 0x584   : > { %v4988_v13 = vsel %vm9671_vm11, %v4983_v50, %v4987_v53  ;;  %v11224_v3 = vpack.c.b16 %v5154_v11, %v5153_v8  ;;  %v8627_v50 = vor.u32 %v9099_v38, %v8624_v21  ;;  %4373 = vmatpush.bf16.msra.mxu1 %v8575_v26  ;;  %v11263_v53 = vld [vmem:[#allocation2 + $0x44] sm:$0x1]  ;;  %v8603_v27 = vor.u32 %v9093_v0, %v8600_v5 }
 0x585   : > { %v5097_v52 = vrot.slane %v11263_v53, 5  ;;  %v5020_v38 = vrot.slane %v5018_v35, 4 }
 0x587   : > { %5143 = vrot.lane.b32.xlu2 %v5139_v57, %s13153_s26  ;;  %v5135_v57 = vunpack.c.l.b16 %v4988_v13  ;;  %4427 = vmatpush.bf16.msra.mxu0 %v8675_v61  ;;  %v9084_v61 = vld [vmem:[%s13070_s17 + $0x14] sm:$0xf0] }
 0x588   : > { %5176 = vrot.lane.b32.xlu1 %v5172_v6, %s13147_s29  ;;  %v4997_v6 = vrot.slane %v4996_v58, 4  ;;  %v5199_v58 = vpack.c.b16 %v5155_v19, %v5154_v11  ;;  %v5021_v11 = vshll.u32 %v11267_v23, 16  ;;  %v8551_v54 = vor.u32 %v9084_v61, %v8550_v37  ;;  %v8726_v61 = vld [vmem:[%s13070_s17 + $0x158] sm:$0xf] }
 0x589   : > { %v5186_v20 = vpack.c.b16 %v5135_v57, %v5134_v36  ;;  %v11259_v36 = vld [vmem:[#allocation2 + $0x34] sm:$0x1] }
 0x58a   : > { %5202 = vrot.lane.b32.xlu0 %v5198_v4, %s13149_s25  ;;  %v11219_v4 = vld [vmem:[#allocation2 + $0x30] sm:$0xf]  ;;  %v5002_v49 = vsel %vm9671_vm11, %v4997_v6, %v5001_v9  ;;  %v5013_v13 = vshll.u32 %v11259_v36, 16  ;;  %v9087_v6 = vld [vmem:[%s13070_s17 + $0x34] sm:$0xf]  ;;  %v5023_v26 = vrot.slane %v5021_v11, 5  ;;  %4374 = vmatpush.bf16.msra.mxu1 %v8551_v54 }
 0x58b   : > { %v5004_v29 = vshrl.u32 %v11219_v4, 16  ;;  %v5007_v8 = vshll.u32 %v11219_v4, 16  ;;  %v11257_v18 = vunpack.c.l.b16 %v5002_v49  ;;  %4428 = vmatpush.bf16.msra.mxu0 %v8651_v55  ;;  %v8576_v9 = vld [vmem:[%s13070_s17 + $0x48] sm:$0xf0]  ;;  %v5125_v24 = vunpack.c.l.b16 %v11219_v4 }
 0x58c   : > { %v8579_v49 = vor.u32 %v9087_v6, %v8576_v9  ;;  %v8760_v55 = vld [vmem:[%s13070_s17 + $0x1a8] sm:$0xf0]  ;;  %v5015_v0 = vrot.slane %v5013_v13, 5  ;;  %v8794_v37 = vrot.slane %v11219_v4, 9  ;;  %v9127_v6 = vld [vmem:[%s13070_s17 + $0x16c] sm:$0xf0] }
 0x58d   : > { %v5006_v45 = vrot.slane %v5004_v29, 4  ;;  %v5009_v48 = vrot.slane %v5007_v8, 5  ;;  %v5141_v10 = vpack.c.b16 %v11257_v18, %v5135_v57  ;;  %v11290_v57 = vpop.permute.xlu2 %3884  ;;  %v9131_v8 = vld [vmem:[%s13070_s17 + $0x194] sm:$0xf]  ;;  %v5073_v54 = vrot.slane %v11259_v36, 5 }
 0x58e   : > { %v8763_v21 = vor.u32 %v9131_v8, %v8760_v55  ;;  %v8795_v36 = vrot.slane %v11267_v23, 9 }
 0x58f   : > { %5189 = vrot.lane.b32.xlu2 %v5185_v43, %s13148_s24  ;;  %v11261_v43 = vld [vmem:[#allocation2 + $0x40] sm:$0xf]  ;;  %4429 = vmatpush.bf16.msra.mxu0 %v8627_v50  ;;  %v5010_v46 = vor.u32 %v5009_v48, %v5006_v45  ;;  %v11328_v50 = vpack.c.b16 %v5124_v59, %v5123_v47  ;;  %v8797_v45 = vrot.slane %v11286_v31, 9  ;;  %v5117_v48 = vrot.slane %v11288_v40, 5 }
 0x590   : > { %5212 = vrot.lane.b32.xlu1 %v11180_v32, %s13143_s27  ;;  %4693 = vmatpush.bf16.msrb.mxu2 %v8763_v21  ;;  %v5174_v47 = vpack.c.b16 %v5125_v24, %v5124_v59  ;;  %v5080_v21 = vshrl.u32 %v11261_v43, 16 }
 0x591   : > { %8773 = vmatmul.msk.bf16.gmra.mxu3 %vm1198_vm12, %v10913_v14  ;;  %v5011_v34 = vrot.slane %v5010_v46, 4  ;;  %v5024_v46 = vor.u32 %v5023_v26, %v5020_v38 }
 0x592   : > { %5145 = vrot.lane.b32.xlu0 %v5140_v63, %s13153_s26  ;;  %8777 = vmatmul.msk.bf16.gmra.mxu2 %vm1198_vm12, %v10913_v14 }
 0x593   : > { %4430 = vmatpush.bf16.msra.mxu0 %v8603_v27  ;;  %v5016_v13 = vsel %vm9671_vm11, %v5011_v34, %v5015_v0  ;;  %v5074_v34 = vsel %vm9626_vm10, %v8794_v37, %v5073_v54 }
 0x594   : > { %v5137_v4 = vunpack.c.l.b16 %v5016_v13 }
 0x596   : > { %v5187_v28 = vpack.c.b16 %v5137_v4, %v11257_v18  ;;  %v8702_v18 = vld [vmem:[%s13070_s17 + $0x128] sm:$0xf] }
 0x597   : > { %5222 = vrot.lane.b32.xlu2 %v5140_v63, %s13150_s2  ;;  %v5069_v63 = vrot.slane %v11186_v41, 5  ;;  %v8796_v41 = vrot.slane %v11261_v43, 9  ;;  %4431 = vmatpush.bf16.msra.mxu0 %v8579_v49  ;;  %v5126_v49 = vunpack.c.l.b16 %v11267_v23 }
 0x598   : > { %5165 = vrot.lane.b32.xlu1 %v11224_v3, %s13144_s0 }
 0x599   : > { %v11326_v2 = vsel %vm9626_vm10, %v8796_v41, %v5097_v52  ;;  %v4914_v41 = vld [vmem:[#allocation2 + $0x3c] sm:$0x1]  ;;  %v9081_v52 = vld [vmem:[%s13070_s17 + $0x4] sm:$0xf] }
 0x59a   : > { %5191 = vrot.lane.b32.xlu0 %v5186_v20, %s13148_s24  ;;  %v8758_v20 = vld [vmem:[%s13070_s17 + $0x190] sm:$0xf]  ;;  %v5197_v5 = vunpack.c.l.b16 %v11326_v2  ;;  %v5027_v9 = vshll.u32 %v4914_v41, 16  ;;  %v5077_v55 = vrot.slane %v4914_v41, 5  ;;  %v9109_v2 = vld [vmem:[%s13070_s17 + $0xdc] sm:$0xf0] }
 0x59b   : > { %v8759_v29 = vor.u32 %v9134_v30, %v8758_v20  ;;  %v8727_v20 = vor.u32 %v9127_v6, %v8726_v61  ;;  %v11366_v30 = vpop.permute.xlu2 %3923 }
 0x59c   : > { %v5029_v26 = vrot.slane %v5027_v9, 5  ;;  %v5078_v41 = vsel %vm9626_vm10, %v8795_v36, %v5077_v55  ;;  %v5100_v9 = vshrl.u32 %v11286_v31, 16 }
 0x59d   : > { %4635 = vmatpush.bf16.msra.mxu3 %v8759_v29  ;;  %v5025_v29 = vrot.slane %v5024_v46, 4  ;;  %4483 = vmatpush.bf16.msrb.mxu1 %v8727_v20  ;;  %v5158_v37 = vunpack.c.l.b16 %v5078_v41  ;;  %v5103_v20 = vshll.u32 %v11286_v31, 16  ;;  %v5109_v41 = vshll.u32 %v11288_v40, 16 }
 0x59f   : > { %5178 = vrot.lane.b32.xlu2 %v5173_v60, %s13147_s29  ;;  %v11334_v60 = vsel %vm9626_vm10, %v8793_v22, %v5069_v63  ;;  %v8552_v22 = vld [vmem:[%s13070_s17 + $0x18] sm:$0xf0]  ;;  %v5118_v63 = vsel %vm9626_vm10, %v8797_v45, %v5117_v48  ;;  %v5083_v45 = vshll.u32 %v11261_v43, 16  ;;  %v5030_v0 = vsel %vm9671_vm11, %v5025_v29, %v5029_v26 }
 0x5a0   : > { %5204 = vrot.lane.b32.xlu1 %v5199_v58, %s13149_s25  ;;  %v8555_v35 = vor.u32 %v9081_v52, %v8552_v22  ;;  %v5230_v11 = vunpack.c.l.b16 %v5118_v63  ;;  %v5156_v27 = vunpack.c.l.b16 %v11334_v60  ;;  %v11385_v60 = vpack.c.b16 %v5126_v49, %v5125_v24  ;;  %v9121_v24 = vld [vmem:[%s13070_s17 + $0x13c] sm:$0xf0] }
 0x5a1   : > { %8774 = vmatmul.msk.bf16.gmra.mxu3 %vm1198_vm12, %v10986_v62  ;;  %v5082_v52 = vrot.slane %v5080_v21, 4  ;;  %v5085_v22 = vrot.slane %v5083_v45, 5  ;;  %v8703_v63 = vor.u32 %v9121_v24, %v8702_v18  ;;  %v5105_v26 = vrot.slane %v5103_v20, 5 }
 0x5a2   : > { %5224 = vrot.lane.b32.xlu0 %v5141_v10, %s13150_s2  ;;  %8778 = vmatmul.msk.bf16.gmra.mxu2 %vm1198_vm12, %v10986_v62  ;;  %v11371_v8 = vpack.c.b16 %v5156_v27, %v5155_v19  ;;  %v9256_v19 = vld [vmem:[#allocation2] sm:$0xf] }
 0x5a3   : > { %4432 = vmatpush.bf16.msra.mxu0 %v8555_v35  ;;  %v3840_v48 = vunpack.c.l.b16 %v9256_v19  ;;  %v5138_v35 = vunpack.c.l.b16 %v5030_v0  ;;  %4484 = vmatpush.bf16.msrb.mxu1 %v8703_v63  ;;  %v5086_v54 = vor.u32 %v5085_v22, %v5082_v52  ;;  %v5210_v22 = vunpack.c.l.b16 %v11286_v31 }
 0x5a5   : > { %v11404_v13 = vpop.permute.xlu2 %3866  ;;  %v5142_v29 = vpack.c.b16 %v5138_v35, %v5137_v4  ;;  %v5102_v4 = vrot.slane %v5100_v9, 4  ;;  %v9124_v9 = vld [vmem:[%s13070_s17 + $0x15c] sm:$0xf] }
 0x5a6   : > { %v11336_v58 = vpop.permute.xlu0 %3897  ;;  %v3958_v31 = vsel %vm1198_vm12, %v10799_v33, %v11404_v13  ;;  %v8728_v33 = vld [vmem:[%s13070_s17 + $0x170] sm:$0xf0]  ;;  %v9118_v13 = vld [vmem:[%s13070_s17 + $0x12c] sm:$0xf] }
 0x5a7   : > { %5214 = vrot.lane.b32.xlu2 %v11328_v50, %s13143_s27 }
 0x5a8   : > { %5147 = vrot.lane.b32.xlu1 %v5141_v10, %s13153_s26  ;;  %v11364_v10 = vpack.c.b16 %v5230_v11, %v5197_v5  ;;  %v3848_v11 = vpack.c.b16 %v3841_v16, %v3840_v48  ;;  %v8678_v16 = vld [vmem:[%s13070_s17 + $0xf8] sm:$0xf] }
 0x5a9   : > { %v3865_v59 = vpop.permute.xlu1 %3864 }
 0x5aa   : > { %5180 = vrot.lane.b32.xlu0 %v5174_v47, %s13147_s29  ;;  %v5157_v47 = vunpack.c.l.b16 %v5074_v34  ;;  %v3955_v6 = vsel %vm1198_vm12, %v3848_v11, %v3865_v59  ;;  %v5089_v34 = vshll.u32 %v11263_v53, 16  ;;  %v5087_v59 = vrot.slane %v5086_v54, 4  ;;  %v9103_v54 = vld [vmem:[%s13070_s17 + $0xac] sm:$0xf0] }
 0x5ab   : > { %v3966_v44 = vsel %vm1211_vm13, %v3955_v6, %v11290_v57  ;;  %v5171_v57 = vunpack.c.l.b16 %v11261_v43 }
 0x5ac   : > { %v5200_v61 = vpack.c.b16 %v5157_v47, %v5156_v27  ;;  %v11412_v36 = vpack.c.b16 %v5158_v37, %v5157_v47  ;;  %v9115_v27 = vld [vmem:[%s13070_s17 + $0x10c] sm:$0xf0]  ;;  %v3974_v45 = vsel %vm1220_vm14, %v3966_v44, %v11336_v58  ;;  %v5106_v47 = vor.u32 %v5105_v26, %v5102_v4 }
 0x5ad   : > { %v8679_v53 = vor.u32 %v9115_v27, %v8678_v16  ;;  %v5175_v18 = vpack.c.b16 %v5171_v57, %v5126_v49  ;;  %v5201_v58 = vpack.c.b16 %v5197_v5, %v5158_v37  ;;  %v5111_v49 = vrot.slane %v5109_v41, 5  ;;  %v9106_v41 = vld [vmem:[%s13070_s17 + $0xcc] sm:$0xf] }
 0x5ae   : > { %v11376_v38 = vpop.permute.xlu0 %3933  ;;  %v5107_v23 = vrot.slane %v5106_v47, 4 }
 0x5af   : > { %5167 = vrot.lane.b32.xlu2 %v11371_v8, %s13144_s0  ;;  %4485 = vmatpush.bf16.msrb.mxu1 %v8679_v53 }
 0x5b0   : > { %5193 = vrot.lane.b32.xlu1 %v5187_v28, %s13148_s24  ;;  %v5091_v28 = vrot.slane %v5089_v34, 5  ;;  %v5112_v11 = vsel %vm9671_vm11, %v5107_v23, %v5111_v49  ;;  %v8731_v34 = vor.u32 %v9124_v9, %v8728_v33  ;;  %v8582_v23 = vld [vmem:[%s13070_s17 + $0x38] sm:$0xf]  ;;  %v9091_v49 = vld [vmem:[%s13070_s17 + $0x4c] sm:$0xf0] }
 0x5b1   : > { %8775 = vmatmul.msk.bf16.gmra.mxu3 %vm1198_vm12, %v11060_v25  ;;  %v3913_v19 = vpop.permute.xlu2 %3912  ;;  %v5220_v6 = vunpack.c.l.b16 %v5112_v11  ;;  %v8608_v11 = vld [vmem:[%s13070_s17 + $0x80] sm:$0xf0]  ;;  %v9088_v9 = vld [vmem:[%s13070_s17 + $0x3c] sm:$0xf]  ;;  %v8584_v33 = vld [vmem:[%s13070_s17 + $0x50] sm:$0xf0] }
 0x5b2   : > { %5216 = vrot.lane.b32.xlu0 %v11385_v60, %s13143_s27  ;;  %8779 = vmatmul.msk.bf16.gmra.mxu2 %vm1198_vm12, %v11060_v25  ;;  %v3911_v46 = vpop.permute.xlu1 %3910  ;;  %v5092_v0 = vsel %vm9671_vm11, %v5087_v59, %v5091_v28  ;;  %v9112_v28 = vld [vmem:[%s13070_s17 + $0xfc] sm:$0xf] }
 0x5b3   : > { %v3982_v48 = vsel %vm1229_vm15, %v3974_v45, %v3911_v46  ;;  %v5184_v24 = vunpack.c.l.b16 %v5092_v0  ;;  %4541 = vmatpush.bf16.msrb.mxu0 %v8731_v34  ;;  %v9097_v45 = vld [vmem:[%s13070_s17 + $0x7c] sm:$0xf0]  ;;  %v9082_v34 = vld [vmem:[%s13070_s17 + $0xc] sm:$0xf] }
 0x5b4   : > { %v3990_v43 = vsel %vm1238_vm0, %v3982_v48, %v11366_v30  ;;  %v8654_v30 = vld [vmem:[%s13070_s17 + $0xc8] sm:$0xf]  ;;  %v8680_v48 = vld [vmem:[%s13070_s17 + $0x110] sm:$0xf0] }
 0x5b5   : > { %v3998_v52 = vsel %vm1247_vm1, %v3990_v43, %v11376_v38  ;;  %v8655_v63 = vor.u32 %v9109_v2, %v8654_v30  ;;  %v5221_v27 = vpack.c.b16 %v5220_v6, %v5184_v24  ;;  %v8683_v47 = vor.u32 %v9112_v28, %v8680_v48  ;;  %v9100_v30 = vld [vmem:[%s13070_s17 + $0x9c] sm:$0xf] }
 0x5b6   : > { %v3887_v55 = vpop.permute.xlu0 %3886 }
 0x5b7   : > { %5206 = vrot.lane.b32.xlu2 %v5200_v61, %s13149_s25  ;;  %4486 = vmatpush.bf16.msrb.mxu1 %v8655_v63  ;;  %v5211_v61 = vpack.c.b16 %v5210_v22, %v5171_v57  ;;  %v3968_v38 = vsel %vm1211_vm13, %v3958_v31, %v3887_v55 }
 0x5b8   : > { %5226 = vrot.lane.b32.xlu1 %v5142_v29, %s13150_s2 }
 0x5b9   : > { %v3946_v37 = vpop.permute.xlu2 %3945 }
 0x5ba   : > { %5169 = vrot.lane.b32.xlu0 %v11412_v36, %s13144_s0  ;;  %v3900_v21 = vpop.permute.xlu1 %3899 }
 0x5bb   : > { %v3976_v44 = vsel %vm1220_vm14, %v3968_v38, %v3900_v21  ;;  %v8606_v21 = vld [vmem:[%s13070_s17 + $0x68] sm:$0xf] }
 0x5bc   : > { %v3984_v4 = vsel %vm1229_vm15, %v3976_v44, %v3913_v19  ;;  %v8607_v19 = vor.u32 %v9097_v45, %v8606_v21 }
 0x5be   : > { %v3926_v40 = vpop.permute.xlu0 %3925 }
 0x5bf   : > { %5149 = vrot.lane.b32.xlu2 %v5142_v29, %s13153_s26  ;;  %v8704_v29 = vld [vmem:[%s13070_s17 + $0x140] sm:$0xf0]  ;;  %v3992_v26 = vsel %vm1238_vm0, %v3984_v4, %v3926_v40 }
 0x5c0   : > { %5182 = vrot.lane.b32.xlu1 %v5175_v18, %s13147_s29  ;;  %v8707_v59 = vor.u32 %v9118_v13, %v8704_v29  ;;  %v8656_v18 = vld [vmem:[%s13070_s17 + $0xe0] sm:$0xf0] }
 0x5c1   : > { %8780 = vmatmul.msk.bf16.vlgmr.msra.gmra.mxu3 %vm1198_vm12, %v10824_v56  ;;  %v3902_v53 = vpop.permute.xlu2 %3901  ;;  %v9143_v13 = vld [vmem:[%s13062_s9 + $0x40] sm:$0xff] }
 0x5c2   : > { %5208 = vrot.lane.b32.xlu0 %v5201_v58, %s13149_s25  ;;  %8784 = vmatmul.msk.bf16.vlgmr.msrb.gmra.mxu2 %vm1198_vm12, %v10824_v56  ;;  %v3944_v5 = vpop.permute.xlu1 %3943  ;;  %v5188_v56 = vpack.c.b16 %v5184_v24, %v5138_v35  ;;  %v8630_v35 = vld [vmem:[%s13070_s17 + $0x98] sm:$0xf]  ;;  %v8659_v24 = vor.u32 %v9106_v41, %v8656_v18  ;;  %v9122_v41 = vld [vmem:[%s13070_s17 + $0x144] sm:$0xf0] }
 0x5c3   : > { %v11456_v46 = vsel %vm1256_vm2, %v3998_v52, %v3944_v5  ;;  %v8631_v20 = vor.u32 %v9103_v54, %v8630_v35  ;;  %4542 = vmatpush.bf16.msrb.mxu0 %v8707_v59  ;;  %v8632_v5 = vld [vmem:[%s13070_s17 + $0xb0] sm:$0xf0]  ;;  %v8558_v35 = vld [vmem:[%s13070_s17 + $0x8] sm:$0xf]  ;;  %v9085_v54 = vld [vmem:[%s13070_s17 + $0x1c] sm:$0xf0]  ;;  %5420 = vmatpush.bf16.msrb.mxu3 %v9143_v13  ;;  %v11582_v45 = vpop.f32.mrf.mxu3 }
 0x5c4   : > { %4375 = vmatmul.bf16.vlgmr.msra.gmra.mxu1 %v11456_v46  ;;  %4433 = vmatmul.bf16.vlgmr.msra.gmra.mxu0 %v11456_v46  ;;  %v8635_v63 = vor.u32 %v9100_v30, %v8632_v5  ;;  %v9110_v5 = vld [vmem:[%s13070_s17 + $0xe4] sm:$0xf0] }
 0x5c5   : > { %4487 = vmatpush.bf16.msrb.mxu1 %v8631_v20  ;;  %v8559_v20 = vor.u32 %v9085_v54, %v8558_v35  ;;  %v8614_v35 = vld [vmem:[%s13070_s17 + $0x70] sm:$0xf]  ;;  %v9098_v54 = vld [vmem:[%s13070_s17 + $0x84] sm:$0xf0] }
 0x5c7   : > { %5195 = vrot.lane.b32.xlu2 %v5188_v56, %s13148_s24  ;;  %4543 = vmatpush.bf16.msrb.mxu0 %v8683_v47  ;;  %v9094_v56 = vld [vmem:[%s13070_s17 + $0x6c] sm:$0xf]  ;;  %v8710_v47 = vld [vmem:[%s13070_s17 + $0x130] sm:$0xf] }
 0x5c8   : > { %5218 = vrot.lane.b32.xlu1 %v5211_v61, %s13143_s27  ;;  %v8611_v38 = vor.u32 %v9094_v56, %v8608_v11  ;;  %v9125_v56 = vld [vmem:[%s13070_s17 + $0x164] sm:$0xf] }
 0x5c9   : > { %4488 = vmatpush.bf16.msrb.mxu1 %v8607_v19  ;;  %v3938_v52 = vpop.permute.xlu2 %3937 }
 0x5ca   : > { %v3936_v55 = vpop.permute.xlu1 %3935 }
 0x5cb   : > { %v4000_v57 = vsel %vm1247_vm1, %v3992_v26, %v3936_v55  ;;  %4544 = vmatpush.bf16.msrb.mxu0 %v8659_v24  ;;  %v8587_v55 = vor.u32 %v9088_v9, %v8584_v33  ;;  %v8615_v9 = vor.u32 %v9098_v54, %v8614_v35  ;;  %v8688_v33 = vld [vmem:[%s13070_s17 + $0x118] sm:$0xf0] }
 0x5cc   : > { %v3869_v16 = vpop.permute.xlu0 %3868  ;;  %v11514_v43 = vsel %vm1256_vm2, %v4000_v57, %v3946_v37  ;;  %v9128_v57 = vld [vmem:[%s13070_s17 + $0x174] sm:$0xf0] }
 0x5cf   : > { %5228 = vrot.lane.b32.xlu2 %v5221_v27, %s13150_s2  ;;  %4545 = vmatpush.bf16.msrb.mxu0 %v8635_v63  ;;  %v9104_v63 = vld [vmem:[%s13070_s17 + $0xb4] sm:$0xf0] }
 0x5d1   : > { %8781 = vmatmul.msk.bf16.gmra.mxu3 %vm1198_vm12, %v10913_v14 }
 0x5d2   : > { %8785 = vmatmul.msk.bf16.gmra.mxu2 %vm1198_vm12, %v10913_v14  ;;  %v3889_v0 = vpop.permute.xlu1 %3888  ;;  %v3961_v14 = vsel %vm1198_vm12, %v10947_v15, %v3869_v16  ;;  %v8583_v15 = vor.u32 %v9091_v49, %v8582_v23  ;;  %v3891_v16 = vpop.permute.xlu2 %3890  ;;  %v8686_v49 = vld [vmem:[%s13070_s17 + $0x100] sm:$0xf] }
 0x5d3   : > { %v3970_v40 = vsel %vm1211_vm13, %v3961_v14, %v3889_v0  ;;  %4546 = vmatpush.bf16.msrb.mxu0 %v8611_v38  ;;  %v11601_v23 = vpop.f32.mrf.mxu3 }
 0x5d4   : > { %v3915_v58 = vpop.permute.xlu0 %3914  ;;  %4380 = vmatmul.bf16.gmra.mxu1 %v11514_v43  ;;  %4438 = vmatmul.bf16.gmra.mxu0 %v11514_v43  ;;  %v3978_v2 = vsel %vm1220_vm14, %v3970_v40, %v3902_v53  ;;  %v8734_v53 = vld [vmem:[%s13070_s17 + $0x160] sm:$0xf] }
 0x5d5   : > { %4489 = vmatpush.bf16.msrb.mxu1 %v8583_v15  ;;  %v3986_v37 = vsel %vm1229_vm15, %v3978_v2, %v3915_v58  ;;  %v8735_v21 = vor.u32 %v9128_v57, %v8734_v53  ;;  %v8711_v58 = vor.u32 %v9122_v41, %v8710_v47  ;;  %v8662_v15 = vld [vmem:[%s13070_s17 + $0xd0] sm:$0xf]  ;;  %v9095_v57 = vld [vmem:[%s13070_s17 + $0x74] sm:$0xf]  ;;  %v9089_v41 = vld [vmem:[%s13070_s17 + $0x44] sm:$0xf] }
 0x5d7   : > { %4547 = vmatpush.bf16.msrb.mxu0 %v8587_v55  ;;  %v9107_v55 = vld [vmem:[%s13070_s17 + $0xd4] sm:$0xf] }
 0x5d9   : > { %4490 = vmatpush.bf16.msrb.mxu1 %v8559_v20  ;;  %v9113_v20 = vld [vmem:[%s13070_s17 + $0x104] sm:$0xf] }
 0x5da   : > { %v3928_v22 = vpop.permute.xlu1 %3927  ;;  %v3930_v48 = vpop.permute.xlu2 %3929  ;;  %v8691_v13 = vor.u32 %v9113_v20, %v8688_v33  ;;  %v9138_v20 = vld [vmem:[%s13062_s9 + $0x18] sm:$0xff] }
 0x5db   : > { %v3994_v61 = vsel %vm1238_vm0, %v3986_v37, %v3928_v22  ;;  %v11611_v2 = vpop.f32.mrf.mxu3  ;;  %v8736_v37 = vld [vmem:[%s13070_s17 + $0x178] sm:$0xf0] }
 0x5dc   : > { %v3948_v31 = vpop.permute.xlu0 %3947  ;;  %v4002_v6 = vsel %vm1247_vm1, %v3994_v61, %v3938_v52  ;;  %v8663_v52 = vor.u32 %v9110_v5, %v8662_v15  ;;  %v9119_v61 = vld [vmem:[%s13070_s17 + $0x134] sm:$0xf]  ;;  %v8739_v38 = vor.u32 %v9125_v56, %v8736_v37  ;;  %v9139_v37 = vld [vmem:[%s13062_s9 + $0x20] sm:$0xff] }
 0x5dd   : > { %v11569_v44 = vsel %vm1256_vm2, %v4002_v6, %v3948_v31  ;;  %4599 = vmatpush.bf16.msra.mxu1 %v8735_v21  ;;  %v8712_v31 = vld [vmem:[%s13070_s17 + $0x148] sm:$0xf0]  ;;  %v9141_v15 = vld [vmem:[%s13062_s9 + $0x30] sm:$0xff] }
 0x5de   : > { %v8715_v6 = vor.u32 %v9119_v61, %v8712_v31  ;;  %v8616_v21 = vld [vmem:[%s13070_s17 + $0x88] sm:$0xf0] }
 0x5e1   : > { %8782 = vmatmul.msk.bf16.gmra.mxu3 %vm1198_vm12, %v10986_v62  ;;  %4600 = vmatpush.bf16.msra.mxu1 %v8711_v58 }
 0x5e2   : > { %8786 = vmatmul.msk.bf16.gmra.mxu2 %vm1198_vm12, %v10986_v62  ;;  %v3871_v29 = vpop.permute.xlu1 %3870  ;;  %v8560_v62 = vld [vmem:[%s13070_s17 + $0x20] sm:$0xf0] }
 0x5e3   : > { %v3964_v27 = vsel %vm1198_vm12, %v11052_v7, %v3871_v29  ;;  %v8563_v59 = vor.u32 %v9082_v34, %v8560_v62  ;;  %v11623_v22 = vpop.f32.mrf.mxu3  ;;  %v8664_v34 = vld [vmem:[%s13070_s17 + $0xe8] sm:$0xf0]  ;;  %v4463_v62 = vpop.f32.mrf.mxu2 }
 0x5e4   : > { %4385 = vmatmul.bf16.gmra.mxu1 %v11569_v44  ;;  %4443 = vmatmul.bf16.gmra.mxu0 %v11569_v44  ;;  %v3904_v4 = vpop.permute.xlu0 %3903  ;;  %v3972_v26 = vsel %vm1211_vm13, %v3964_v27, %v3891_v16  ;;  %v8667_v16 = vor.u32 %v9107_v55, %v8664_v34  ;;  %v9092_v27 = vld [vmem:[%s13070_s17 + $0x54] sm:$0xf0] }
 0x5e5   : > { %4548 = vmatpush.bf16.msrb.mxu0 %v8563_v59  ;;  %v3980_v7 = vsel %vm1220_vm14, %v3972_v26, %v3904_v4  ;;  %v9101_v4 = vld [vmem:[%s13070_s17 + $0xa4] sm:$0xf]  ;;  %v8640_v26 = vld [vmem:[%s13070_s17 + $0xb8] sm:$0xf0] }
 0x5e6   : > { %v8643_v53 = vor.u32 %v9101_v4, %v8640_v26 }
 0x5e9   : > { %4657 = vmatpush.bf16.msra.mxu0 %v8739_v38 }
 0x5ea   : > { %v3917_v28 = vpop.permute.xlu1 %3916 }
 0x5eb   : > { %v3988_v19 = vsel %vm1229_vm15, %v3980_v7, %v3917_v28  ;;  %v11657_v29 = vpop.f32.mrf.mxu3  ;;  %v8566_v28 = vld [vmem:[%s13070_s17 + $0x10] sm:$0xf]  ;;  %v9086_v7 = vld [vmem:[%s13070_s17 + $0x24] sm:$0xf0]  ;;  %v4465_v47 = vpop.f32.mrf.mxu2 }
 0x5ec   : > { %v3996_v0 = vsel %vm1238_vm0, %v3988_v19, %v3930_v48  ;;  %v3940_v18 = vpop.permute.xlu0 %3939  ;;  %v8567_v48 = vor.u32 %v9086_v7, %v8566_v28 }
 0x5ed   : > { %v4004_v14 = vsel %vm1247_vm1, %v3996_v0, %v3940_v18  ;;  %4658 = vmatpush.bf16.msra.mxu0 %v8715_v6  ;;  %v8619_v0 = vor.u32 %v9095_v57, %v8616_v21  ;;  %v8592_v18 = vld [vmem:[%s13070_s17 + $0x58] sm:$0xf0]  ;;  %v9136_v57 = vld [vmem:[%s13062_s9 + $0x8] sm:$0xff]  ;;  %v5144_v21 = vpop.permute.xlu2 %5143 }
 0x5ee   : > { %v8595_v58 = vor.u32 %v9089_v41, %v8592_v18 }
 0x5f1   : > { %8783 = vmatmul.msk.bf16.gmra.mxu3 %vm1198_vm12, %v11060_v25  ;;  %4659 = vmatpush.bf16.msra.mxu0 %v8691_v13 }
 0x5f2   : > { %8787 = vmatmul.msk.bf16.gmra.mxu2 %vm1198_vm12, %v11060_v25  ;;  %v3950_v24 = vpop.permute.xlu1 %3949  ;;  %v9116_v25 = vld [vmem:[%s13070_s17 + $0x114] sm:$0xf0] }
 0x5f3   : > { %v11599_v40 = vsel %vm1256_vm2, %v4004_v14, %v3950_v24  ;;  %v8687_v30 = vor.u32 %v9116_v25, %v8686_v49  ;;  %v11691_v19 = vpop.f32.mrf.mxu3  ;;  %v9083_v24 = vld [vmem:[%s13070_s17 + $0x14] sm:$0xf]  ;;  %v8568_v49 = vld [vmem:[%s13070_s17 + $0x28] sm:$0xf0]  ;;  %v4468_v25 = vpop.f32.mrf.mxu2 }
 0x5f4   : > { %4390 = vmatmul.bf16.gmra.mxu1 %v11599_v40  ;;  %4448 = vmatmul.bf16.gmra.mxu0 %v11599_v40  ;;  %v5164_v18 = vpop.permute.xlu0 %5163 }
 0x5f5   : > { %4601 = vmatpush.bf16.msra.mxu1 %v8687_v30  ;;  %4660 = vmatpush.bf16.msra.mxu0 %v8667_v16  ;;  %v8571_v30 = vor.u32 %v9083_v24, %v8568_v49  ;;  %v9135_v24 = vld [vmem:[%s13062_s9] sm:$0xff] }
 0x5f9   : > { %4602 = vmatpush.bf16.msra.mxu1 %v8663_v52  ;;  %4661 = vmatpush.bf16.msra.mxu0 %v8643_v53 }
 0x5fb   : > { %v11703_v14 = vpop.f32.mrf.mxu3  ;;  %v4470_v52 = vpop.f32.mrf.mxu2 }
 0x5fd   : > { %4662 = vmatpush.bf16.msra.mxu0 %v8619_v0 }
 0x601   : > { %8834 = vmatmul.msk.bf16.vlgmr.msrb.gmra.mxu3 %vm1198_vm12, %v11224_v3  ;;  %v8638_v3 = vld [vmem:[%s13070_s17 + $0xa0] sm:$0xf]  ;;  %4663 = vmatpush.bf16.msra.mxu0 %v8595_v58 }
 0x602   : > { %v8639_v11 = vor.u32 %v9104_v63, %v8638_v3  ;;  %v9140_v3 = vld [vmem:[%s13062_s9 + $0x28] sm:$0xff]  ;;  %v11729_v63 = vld [vmem:[%s13071_s18] sm:$0x3f] }
 0x603   : > { %v11717_v5 = vpop.f32.mrf.mxu3  ;;  %v11731_v56 = vpop.f32.mrf.mxu2 }
 0x604   : > { %4491 = vmatmul.bf16.vlgmr.msrb.gmra.mxu1 %v11456_v46  ;;  %4549 = vmatmul.bf16.vlgmr.msrb.gmra.mxu0 %v11456_v46 }
 0x605   : > { %4603 = vmatpush.bf16.msra.mxu1 %v8639_v11  ;;  %4664 = vmatpush.bf16.msra.mxu0 %v8571_v30  ;;  %v11740_v11 = vperm.slane %v11729_v63, 1 }
 0x609   : > { %4604 = vmatpush.bf16.msra.mxu1 %v8615_v9 }
 0x60b   : > { %v11751_v9 = vpop.f32.mrf.mxu2  ;;  %v11772_v26 = vpop.f32.mrf.mxu3 }
 0x611   : > { %8835 = vmatmul.msk.bf16.gmra.mxu3 %vm1198_vm12, %v11371_v8  ;;  %v8590_v8 = vld [vmem:[%s13070_s17 + $0x40] sm:$0xf] }
 0x612   : > { %v8591_v59 = vor.u32 %v9092_v27, %v8590_v8 }
 0x613   : > { %v11768_v16 = vpop.f32.mrf.mxu2  ;;  %v11787_v58 = vpop.f32.mrf.mxu3 }
 0x614   : > { %4496 = vmatmul.bf16.gmra.mxu1 %v11514_v43  ;;  %4554 = vmatmul.bf16.gmra.mxu0 %v11514_v43 }
 0x615   : > { %4605 = vmatpush.bf16.msra.mxu1 %v8591_v59 }
 0x619   : > { %4606 = vmatpush.bf16.msra.mxu1 %v8567_v48 }
 0x61b   : > { %v11782_v48 = vpop.f32.mrf.mxu2 }
 0x621   : > { %8836 = vmatmul.msk.bf16.gmra.mxu3 %vm1198_vm12, %v11412_v36  ;;  %v9142_v36 = vld [vmem:[%s13062_s9 + $0x38] sm:$0xff] }
 0x622   : > { %5384 = vmatpush.bf16.msrb.mxu1 %v9142_v36 }
 0x624   : > { %4501 = vmatmul.bf16.gmra.mxu1 %v11569_v44  ;;  %4559 = vmatmul.bf16.gmra.mxu0 %v11569_v44 }
 0x626   : > { %5385 = vmatpush.bf16.msrb.mxu1 %v9141_v15  ;;  %v11796_v15 = vpop.f32.mrf.mxu2 }
 0x62a   : > { %5386 = vmatpush.bf16.msrb.mxu1 %v9140_v3 }
 0x62e   : > { %5387 = vmatpush.bf16.msrb.mxu1 %v9139_v37 }
 0x631   : > { %8837 = vmatmul.msk.bf16.gmra.mxu3 %vm1198_vm12, %v11364_v10  ;;  %v11737_v10 = vperm.slane %v11729_v63, 0 }
 0x632   : > { %5388 = vmatpush.bf16.msrb.mxu1 %v9138_v20 }
 0x634   : > { %4506 = vmatmul.bf16.gmra.mxu1 %v11599_v40  ;;  %4564 = vmatmul.bf16.gmra.mxu0 %v11599_v40 }
 0x641   : > { %v4376_v61 = vpop.f32.mrf.mxu1  ;;  %v4434_v31 = vpop.f32.mrf.mxu0 }
 0x642   : > { %v4377_v38 = vadd.f32 %v4376_v61, %v11737_v10  ;;  %v4435_v6 = vadd.f32 %v4434_v31, %v11740_v11  ;;  %v5203_v61 = vpop.permute.xlu0 %5202  ;;  %v11804_v31 = vpop.f32.mrf.mxu3 }
 0x644   : > { %v4406_v35 = vadd.f32 %v11582_v45, %v4377_v38  ;;  %v4464_v54 = vadd.f32 %v4463_v62, %v4435_v6  ;;  %4607 = vmatmul.bf16.vlgmr.msra.gmra.mxu1 %v11456_v46  ;;  %4665 = vmatmul.bf16.vlgmr.msra.gmra.mxu0 %v11456_v46  ;;  %v9137_v62 = vld [vmem:[%s13062_s9 + $0x10] sm:$0xff] }
 0x645   : > { %5389 = vmatpush.bf16.msrb.mxu1 %v9137_v62 }
 0x646   : > { %4715 = vst [vmem:[%s11753_s5] sm:$0xff] %v4406_v35 }
 0x647   : > { %4716 = vst [vmem:[%s11753_s5 + $0x8] sm:$0xff] %v4464_v54 }
 0x649   : > { %v4378_v45 = vpop.f32.mrf.mxu1  ;;  %v4436_v33 = vpop.f32.mrf.mxu0  ;;  %5390 = vmatpush.bf16.msrb.mxu1 %v9136_v57 }
 0x64a   : > { %v4379_v13 = vadd.f32 %v4378_v45, %v11737_v10  ;;  %v4437_v46 = vadd.f32 %v4436_v33, %v11740_v11  ;;  %v11810_v45 = vpop.f32.mrf.mxu2  ;;  %v9257_v33 = vld [vmem:[#allocation2] sm:$0xf]  ;;  %v11814_v62 = vpop.f32.mrf.mxu3 }
 0x64c   : > { %v4408_v55 = vadd.f32 %v11601_v23, %v4379_v13  ;;  %v4466_v34 = vadd.f32 %v4465_v47, %v4437_v46  ;;  %v5177_v47 = vpop.permute.xlu1 %5176  ;;  %v5119_v13 = vunpack.c.l.b16 %v9257_v33 }
 0x64d   : > { %5391 = vmatpush.bf16.msrb.mxu1 %v9135_v24 }
 0x64e   : > { %4721 = vst [vmem:[%s11753_s5 + $0x30] sm:$0xff] %v4408_v55 }
 0x64f   : > { %4722 = vst [vmem:[%s11753_s5 + $0x38] sm:$0xff] %v4466_v34  ;;  %v5146_v34 = vpop.permute.xlu0 %5145 }
 0x651   : > { %v4381_v8 = vpop.f32.mrf.mxu1  ;;  %v4439_v27 = vpop.f32.mrf.mxu0 }
 0x652   : > { %v4382_v59 = vadd.f32 %v4381_v8, %v11737_v10  ;;  %v4440_v4 = vadd.f32 %v4439_v27, %v11740_v11  ;;  %v4584_v57 = vpop.f32.mrf.mxu2 }
 0x654   : > { %v4411_v23 = vadd.f32 %v11611_v2, %v4382_v59  ;;  %v4469_v53 = vadd.f32 %v4468_v25, %v4440_v4  ;;  %4612 = vmatmul.bf16.gmra.mxu1 %v11514_v43  ;;  %4670 = vmatmul.bf16.gmra.mxu0 %v11514_v43  ;;  %v5190_v25 = vpop.permute.xlu2 %5189  ;;  %v5213_v37 = vpop.permute.xlu1 %5212  ;;  %v5127_v59 = vpack.c.b16 %v5120_v17, %v5119_v13 }
 0x656   : > { %4727 = vst [vmem:[%s11753_s5 + $0x60] sm:$0xff] %v4411_v23  ;;  %v5234_v23 = vsel %vm1198_vm12, %v5127_v59, %v5144_v21 }
 0x657   : > { %4728 = vst [vmem:[%s11753_s5 + $0x68] sm:$0xff] %v4469_v53  ;;  %v5245_v53 = vsel %vm1211_vm13, %v5234_v23, %v5164_v18 }
 0x659   : > { %v4383_v28 = vpop.f32.mrf.mxu1  ;;  %v4441_v7 = vpop.f32.mrf.mxu0 }
 0x65a   : > { %v4384_v2 = vadd.f32 %v4383_v28, %v11737_v10  ;;  %v4442_v0 = vadd.f32 %v4441_v7, %v11740_v11 }
 0x65c   : > { %v4413_v43 = vadd.f32 %v11623_v22, %v4384_v2  ;;  %v4471_v41 = vadd.f32 %v4470_v52, %v4442_v0  ;;  %v5223_v54 = vpop.permute.xlu2 %5222  ;;  %v5192_v2 = vpop.permute.xlu0 %5191 }
 0x65d   : > { %v11832_v0 = vpop.f32.mrf.mxu3 }
 0x65e   : > { %4733 = vst [vmem:[%s11753_s5 + $0x90] sm:$0xff] %v4413_v43 }
 0x65f   : > { %4734 = vst [vmem:[%s11753_s5 + $0x98] sm:$0xff] %v4471_v41  ;;  %v11838_v41 = vperm.slane %v11729_v63, 2 }
 0x661   : > { %v4386_v49 = vpop.f32.mrf.mxu1  ;;  %v4444_v36 = vpop.f32.mrf.mxu0 }
 0x662   : > { %v4387_v30 = vadd.f32 %v4386_v49, %v11737_v10  ;;  %v4445_v22 = vadd.f32 %v4444_v36, %v11740_v11 }
 0x664   : > { %v4416_v52 = vadd.f32 %v11657_v29, %v4387_v30  ;;  %v4474_v3 = vadd.f32 %v11731_v56, %v4445_v22  ;;  %4617 = vmatmul.bf16.gmra.mxu1 %v11569_v44  ;;  %4675 = vmatmul.bf16.gmra.mxu0 %v11569_v44  ;;  %v5166_v44 = vpop.permute.xlu1 %5165  ;;  %v5179_v4 = vpop.permute.xlu2 %5178 }
 0x666   : > { %4739 = vst [vmem:[%s11753_s5 + $0xc0] sm:$0xff] %v4416_v52 }
 0x667   : > { %4740 = vst [vmem:[%s11753_s5 + $0xc8] sm:$0xff] %v4474_v3  ;;  %v5237_v3 = vsel %vm1198_vm12, %v11180_v32, %v5146_v34 }
 0x669   : > { %v4388_v38 = vpop.f32.mrf.mxu1  ;;  %v4446_v6 = vpop.f32.mrf.mxu0 }
 0x66a   : > { %v4389_v35 = vadd.f32 %v4388_v38, %v11737_v10  ;;  %v4447_v29 = vadd.f32 %v4446_v6, %v11740_v11  ;;  %v11854_v38 = vpop.f32.mrf.mxu3 }
 0x66c   : > { %v4418_v56 = vadd.f32 %v11691_v19, %v4389_v35  ;;  %v4476_v20 = vadd.f32 %v11751_v9, %v4447_v29  ;;  %v5205_v7 = vpop.permute.xlu1 %5204 }
 0x66e   : > { %4745 = vst [vmem:[%s11753_s5 + $0xf0] sm:$0xff] %v4418_v56 }
 0x66f   : > { %4746 = vst [vmem:[%s11753_s5 + $0xf8] sm:$0xff] %v4476_v20 }
 0x671   : > { %v4391_v46 = vpop.f32.mrf.mxu1  ;;  %v4449_v55 = vpop.f32.mrf.mxu0 }
 0x672   : > { %v4392_v8 = vadd.f32 %v4391_v46, %v11737_v10  ;;  %v4450_v19 = vadd.f32 %v4449_v55, %v11740_v11  ;;  %v11867_v55 = vpop.f32.mrf.mxu3 }
 0x674   : > { %v4421_v9 = vadd.f32 %v11703_v14, %v4392_v8  ;;  %v4479_v27 = vadd.f32 %v11768_v16, %v4450_v19  ;;  %4622 = vmatmul.bf16.gmra.mxu1 %v11599_v40  ;;  %4680 = vmatmul.bf16.gmra.mxu0 %v11599_v40  ;;  %v5253_v14 = vsel %vm1220_vm14, %v5245_v53, %v5177_v47  ;;  %v11841_v47 = vperm.slane %v11729_v63, 3  ;;  %v5148_v30 = vpop.permute.xlu1 %5147 }
 0x675   : > { %v5261_v17 = vsel %vm1229_vm15, %v5253_v14, %v5190_v25  ;;  %v5240_v23 = vsel %vm1198_vm12, %v11328_v50, %v5148_v30 }
 0x676   : > { %4751 = vst [vmem:[%s11753_s5 + $0x120] sm:$0xff] %v4421_v9 }
 0x677   : > { %4752 = vst [vmem:[%s11753_s5 + $0x128] sm:$0xff] %v4479_v27 }
 0x679   : > { %v4393_v16 = vpop.f32.mrf.mxu1  ;;  %v4451_v28 = vpop.f32.mrf.mxu0 }
 0x67a   : > { %v4394_v40 = vadd.f32 %v4393_v16, %v11737_v10  ;;  %v4452_v51 = vadd.f32 %v4451_v28, %v11740_v11  ;;  %v5269_v10 = vsel %vm1238_vm0, %v5261_v17, %v5203_v61  ;;  %v5215_v11 = vpop.permute.xlu2 %5214  ;;  %v5225_v61 = vpop.permute.xlu0 %5224 }
 0x67b   : > { %v5277_v18 = vsel %vm1247_vm1, %v5269_v10, %v5213_v37  ;;  %v5247_v37 = vsel %vm1211_vm13, %v5237_v3, %v5166_v44 }
 0x67c   : > { %v4423_v21 = vadd.f32 %v11717_v5, %v4394_v40  ;;  %v4481_v43 = vadd.f32 %v11782_v48, %v4452_v51  ;;  %v4586_v5 = vpop.f32.mrf.mxu2  ;;  %v5285_v25 = vsel %vm1256_vm2, %v5277_v18, %v5223_v54  ;;  %v5255_v6 = vsel %vm1220_vm14, %v5247_v37, %v5179_v4  ;;  %v5194_v13 = vpop.permute.xlu1 %5193 }
 0x67d   : > { %v5263_v32 = vsel %vm1229_vm15, %v5255_v6, %v5192_v2  ;;  %v4538_v51 = vpop.f32.mrf.mxu3 }
 0x67e   : > { %4757 = vst [vmem:[%s11753_s5 + $0x150] sm:$0xff] %v4423_v21  ;;  %v5271_v33 = vsel %vm1238_vm0, %v5263_v32, %v5205_v7 }
 0x67f   : > { %4758 = vst [vmem:[%s11753_s5 + $0x158] sm:$0xff] %v4481_v43  ;;  %v5279_v34 = vsel %vm1247_vm1, %v5271_v33, %v5215_v11 }
 0x681   : > { %v4492_v24 = vpop.f32.mrf.mxu1  ;;  %v4550_v49 = vpop.f32.mrf.mxu0 }
 0x682   : > { %v4493_v48 = vadd.f32 %v4492_v24, %v11838_v41  ;;  %v4551_v36 = vadd.f32 %v4550_v49, %v11841_v47  ;;  %v5181_v46 = vpop.permute.xlu0 %5180 }
 0x684   : > { %v4522_v22 = vadd.f32 %v11772_v26, %v4493_v48  ;;  %v4580_v52 = vadd.f32 %v11796_v15, %v4551_v36  ;;  %5392 = vmatmul.bf16.vlgmr.msrb.gmra.mxu1 %v5285_v25  ;;  %v5168_v26 = vpop.permute.xlu2 %5167  ;;  %v4589_v56 = vpop.f32.mrf.mxu2 }
 0x685   : > { %v5249_v14 = vsel %vm1211_vm13, %v5240_v23, %v5168_v26  ;;  %v5227_v16 = vpop.permute.xlu1 %5226  ;;  %v4637_v30 = vpop.f32.mrf.mxu3 }
 0x686   : > { %4717 = vst [vmem:[%s11753_s5 + $0x10] sm:$0xff] %v4522_v22 }
 0x687   : > { %4718 = vst [vmem:[%s11753_s5 + $0x18] sm:$0xff] %v4580_v52 }
 0x689   : > { %v4494_v35 = vpop.f32.mrf.mxu1  ;;  %v4552_v29 = vpop.f32.mrf.mxu0 }
 0x68a   : > { %v4495_v15 = vadd.f32 %v4494_v35, %v11838_v41  ;;  %v4553_v54 = vadd.f32 %v4552_v29, %v11841_v47  ;;  %v5217_v40 = vpop.permute.xlu0 %5216 }
 0x68c   : > { %v4524_v20 = vadd.f32 %v11787_v58, %v4495_v15  ;;  %v4582_v44 = vadd.f32 %v11810_v45, %v4553_v54  ;;  %v5288_v45 = vsel %vm1256_vm2, %v5279_v34, %v5225_v61  ;;  %v5207_v27 = vpop.permute.xlu2 %5206  ;;  %v4591_v53 = vpop.f32.mrf.mxu2 }
 0x68d   : > { %v5183_v25 = vpop.permute.xlu1 %5182 }
 0x68e   : > { %4723 = vst [vmem:[%s11753_s5 + $0x40] sm:$0xff] %v4524_v20 }
 0x68f   : > { %4724 = vst [vmem:[%s11753_s5 + $0x48] sm:$0xff] %v4582_v44  ;;  %v4639_v44 = vpop.f32.mrf.mxu3 }
 0x691   : > { %v4497_v8 = vpop.f32.mrf.mxu1  ;;  %v4555_v19 = vpop.f32.mrf.mxu0 }
 0x692   : > { %v4498_v9 = vadd.f32 %v4497_v8, %v11838_v41  ;;  %v4556_v58 = vadd.f32 %v4555_v19, %v11841_v47 }
 0x694   : > { %v4527_v59 = vadd.f32 %v11804_v31, %v4498_v9  ;;  %v4585_v4 = vadd.f32 %v4584_v57, %v4556_v58  ;;  %5397 = vmatmul.bf16.gmra.mxu1 %v5288_v45  ;;  %v5257_v57 = vsel %vm1220_vm14, %v5249_v14, %v5181_v46  ;;  %v5150_v43 = vpop.permute.xlu2 %5149  ;;  %v4594_v11 = vpop.f32.mrf.mxu2 }
 0x695   : > { %v5265_v50 = vsel %vm1229_vm15, %v5257_v57, %v5194_v13  ;;  %v5243_v3 = vsel %vm1198_vm12, %v11385_v60, %v5150_v43 }
 0x696   : > { %4729 = vst [vmem:[%s11753_s5 + $0x70] sm:$0xff] %v4527_v59  ;;  %v5273_v10 = vsel %vm1238_vm0, %v5265_v50, %v5207_v27 }
 0x697   : > { %4730 = vst [vmem:[%s11753_s5 + $0x78] sm:$0xff] %v4585_v4  ;;  %v5281_v49 = vsel %vm1247_vm1, %v5273_v10, %v5217_v40  ;;  %v4642_v59 = vpop.f32.mrf.mxu3  ;;  %v11919_v40 = vperm.slane %v11729_v63, 5 }
 0x699   : > { %v4499_v28 = vpop.f32.mrf.mxu1  ;;  %v4557_v7 = vpop.f32.mrf.mxu0 }
 0x69a   : > { %v4500_v17 = vadd.f32 %v4499_v28, %v11838_v41  ;;  %v4558_v31 = vadd.f32 %v4557_v7, %v11841_v47 }
 0x69c   : > { %v4529_v2 = vadd.f32 %v11814_v62, %v4500_v17  ;;  %v4587_v21 = vadd.f32 %v4586_v5, %v4558_v31  ;;  %v5291_v62 = vsel %vm1256_vm2, %v5281_v49, %v5227_v16  ;;  %v5170_v5 = vpop.permute.xlu0 %5169  ;;  %v5196_v37 = vpop.permute.xlu2 %5195 }
 0x69d   : > { %v5251_v61 = vsel %vm1211_vm13, %v5243_v3, %v5170_v5  ;;  %v4596_v26 = vpop.f32.mrf.mxu2 }
 0x69e   : > { %4735 = vst [vmem:[%s11753_s5 + $0xa0] sm:$0xff] %v4529_v2  ;;  %v5259_v6 = vsel %vm1220_vm14, %v5251_v61, %v5183_v25 }
 0x69f   : > { %4736 = vst [vmem:[%s11753_s5 + $0xa8] sm:$0xff] %v4587_v21  ;;  %v5267_v54 = vsel %vm1229_vm15, %v5259_v6, %v5196_v37  ;;  %v4644_v57 = vpop.f32.mrf.mxu3 }
 0x6a1   : > { %v4502_v18 = vpop.f32.mrf.mxu1  ;;  %v4560_v24 = vpop.f32.mrf.mxu0 }
 0x6a2   : > { %v4503_v48 = vadd.f32 %v4502_v18, %v11838_v41  ;;  %v4561_v36 = vadd.f32 %v4560_v24, %v11841_v47 }
 0x6a4   : > { %v4532_v22 = vadd.f32 %v11832_v0, %v4503_v48  ;;  %v4590_v52 = vadd.f32 %v4589_v56, %v4561_v36  ;;  %5402 = vmatmul.bf16.gmra.mxu1 %v5291_v62  ;;  %v5219_v56 = vpop.permute.xlu1 %5218  ;;  %v5209_v20 = vpop.permute.xlu0 %5208 }
 0x6a5   : > { %v5275_v33 = vsel %vm1238_vm0, %v5267_v54, %v5209_v20  ;;  %v5229_v8 = vpop.permute.xlu2 %5228  ;;  %v4695_v58 = vpop.f32.mrf.mxu2 }
 0x6a6   : > { %4741 = vst [vmem:[%s11753_s5 + $0xd0] sm:$0xff] %v4532_v22  ;;  %v5283_v13 = vsel %vm1247_vm1, %v5275_v33, %v5219_v56 }
 0x6a7   : > { %4742 = vst [vmem:[%s11753_s5 + $0xd8] sm:$0xff] %v4590_v52 }
 0x6a9   : > { %v4504_v35 = vpop.f32.mrf.mxu1  ;;  %v4562_v29 = vpop.f32.mrf.mxu0 }
 0x6aa   : > { %v4505_v15 = vadd.f32 %v4504_v35, %v11838_v41  ;;  %v4563_v0 = vadd.f32 %v4562_v29, %v11841_v47 }
 0x6ac   : > { %v4534_v32 = vadd.f32 %v11854_v38, %v4505_v15  ;;  %v4592_v60 = vadd.f32 %v4591_v53, %v4563_v0  ;;  %v5294_v38 = vsel %vm1256_vm2, %v5283_v13, %v5229_v8 }
 0x6ad   : > { %v4697_v7 = vpop.f32.mrf.mxu2 }
 0x6ae   : > { %4747 = vst [vmem:[%s11753_s5 + $0x100] sm:$0xff] %v4534_v32 }
 0x6af   : > { %4748 = vst [vmem:[%s11753_s5 + $0x108] sm:$0xff] %v4592_v60 }
 0x6b1   : > { %v4507_v46 = vpop.f32.mrf.mxu1  ;;  %v4565_v34 = vpop.f32.mrf.mxu0 }
 0x6b2   : > { %v4508_v19 = vadd.f32 %v4507_v46, %v11838_v41  ;;  %v4566_v9 = vadd.f32 %v4565_v34, %v11841_v47 }
 0x6b4   : > { %v4537_v45 = vadd.f32 %v11867_v55, %v4508_v19  ;;  %v4595_v27 = vadd.f32 %v4594_v11, %v4566_v9  ;;  %5407 = vmatmul.bf16.gmra.mxu1 %v5294_v38  ;;  %v11916_v55 = vperm.slane %v11729_v63, 4  ;;  %v4647_v11 = vpop.f32.mrf.mxu3 }
 0x6b5   : > { %v4700_v2 = vpop.f32.mrf.mxu2 }
 0x6b6   : > { %4753 = vst [vmem:[%s11753_s5 + $0x130] sm:$0xff] %v4537_v45 }
 0x6b7   : > { %4754 = vst [vmem:[%s11753_s5 + $0x138] sm:$0xff] %v4595_v27 }
 0x6b9   : > { %v4509_v4 = vpop.f32.mrf.mxu1  ;;  %v4567_v23 = vpop.f32.mrf.mxu0 }
 0x6ba   : > { %v4510_v53 = vadd.f32 %v4509_v4, %v11838_v41  ;;  %v4568_v14 = vadd.f32 %v4567_v23, %v11841_v47 }
 0x6bc   : > { %v4539_v16 = vadd.f32 %v4538_v51, %v4510_v53  ;;  %v4597_v28 = vadd.f32 %v4596_v26, %v4568_v14  ;;  %v4649_v22 = vpop.f32.mrf.mxu3 }
 0x6bd   : > { %v4702_v36 = vpop.f32.mrf.mxu2 }
 0x6be   : > { %4759 = vst [vmem:[%s11753_s5 + $0x160] sm:$0xff] %v4539_v16 }
 0x6bf   : > { %4760 = vst [vmem:[%s11753_s5 + $0x168] sm:$0xff] %v4597_v28 }
 0x6c1   : > { %v4608_v17 = vpop.f32.mrf.mxu1  ;;  %v4666_v31 = vpop.f32.mrf.mxu0 }
 0x6c2   : > { %v4609_v41 = vadd.f32 %v4608_v17, %v11916_v55  ;;  %v4667_v47 = vadd.f32 %v4666_v31, %v11919_v40 }
 0x6c4   : > { %v4638_v51 = vadd.f32 %v4637_v30, %v4609_v41  ;;  %v4696_v50 = vadd.f32 %v4695_v58, %v4667_v47  ;;  %v4652_v26 = vpop.f32.mrf.mxu3 }
 0x6c5   : > { %v4705_v6 = vpop.f32.mrf.mxu2 }
 0x6c6   : > { %4719 = vst [vmem:[%s11753_s5 + $0x20] sm:$0xff] %v4638_v51 }
 0x6c7   : > { %4720 = vst [vmem:[%s11753_s5 + $0x28] sm:$0xff] %v4696_v50 }
 0x6c9   : > { %v4610_v21 = vpop.f32.mrf.mxu1  ;;  %v4668_v43 = vpop.f32.mrf.mxu0 }
 0x6ca   : > { %v4611_v63 = vadd.f32 %v4610_v21, %v11916_v55  ;;  %v4669_v10 = vadd.f32 %v4668_v43, %v11919_v40 }
 0x6cc   : > { %v4640_v18 = vadd.f32 %v4639_v44, %v4611_v63  ;;  %v4698_v24 = vadd.f32 %v4697_v7, %v4669_v10  ;;  %v4654_v34 = vpop.f32.mrf.mxu3 }
 0x6cd   : > { %v4707_v20 = vpop.f32.mrf.mxu2 }
 0x6ce   : > { %4725 = vst [vmem:[%s11753_s5 + $0x50] sm:$0xff] %v4640_v18 }
 0x6cf   : > { %4726 = vst [vmem:[%s11753_s5 + $0x58] sm:$0xff] %v4698_v24 }
 0x6d1   : > { %v4613_v49 = vpop.f32.mrf.mxu1  ;;  %v4671_v48 = vpop.f32.mrf.mxu0 }
 0x6d2   : > { %v4614_v25 = vadd.f32 %v4613_v49, %v11916_v55  ;;  %v4672_v62 = vadd.f32 %v4671_v48, %v11919_v40 }
 0x6d4   : > { %v4643_v5 = vadd.f32 %v4642_v59, %v4614_v25  ;;  %v4701_v30 = vadd.f32 %v4700_v2, %v4672_v62  ;;  %v5422_v23 = vpop.f32.mrf.mxu3  ;;  %v5541_v25 = vld [vmem:[#allocation2 + $0xc] sm:$0x1]  ;;  %v11961_v62 = vld [vmem:[#allocation2] sm:$0xf] }
 0x6d5   : > { %v4710_v9 = vpop.f32.mrf.mxu2 }
 0x6d6   : > { %4731 = vst [vmem:[%s11753_s5 + $0x80] sm:$0xff] %v4643_v5 }
 0x6d7   : > { %4732 = vst [vmem:[%s11753_s5 + $0x88] sm:$0xff] %v4701_v30 }
 0x6d9   : > { %v4615_v52 = vpop.f32.mrf.mxu1  ;;  %v4673_v3 = vpop.f32.mrf.mxu0 }
 0x6da   : > { %v4616_v37 = vadd.f32 %v4615_v52, %v11916_v55  ;;  %v4674_v61 = vadd.f32 %v4673_v3, %v11919_v40  ;;  %v5587_v52 = vld [vmem:[#allocation2 + $0x4] sm:$0x1] }
 0x6dc   : > { %v4645_v35 = vadd.f32 %v4644_v57, %v4616_v37  ;;  %v4703_v29 = vadd.f32 %v4702_v36, %v4674_v61  ;;  %v11956_v57 = vld [vmem:[%s13066_s13] ss:$0 sm:$0xff]  ;;  %v5424_v41 = vpop.f32.mrf.mxu3  ;;  %v5538_v36 = vld [vmem:[#allocation2 + $0x8] sm:$0xf] }
 0x6dd   : > { %v4712_v7 = vpop.f32.mrf.mxu2 }
 0x6de   : > { %4737 = vst [vmem:[%s11753_s5 + $0xb0] sm:$0xff] %v4645_v35 }
 0x6df   : > { %4738 = vst [vmem:[%s11753_s5 + $0xb8] sm:$0xff] %v4703_v29  ;;  %v8838_v29 = vrot.slane %v11961_v62, 9 }
 0x6e1   : > { %v4618_v15 = vpop.f32.mrf.mxu1  ;;  %v4676_v0 = vpop.f32.mrf.mxu0 }
 0x6e2   : > { %v4619_v54 = vadd.f32 %v4618_v15, %v11916_v55  ;;  %v4677_v32 = vadd.f32 %v4676_v0, %v11919_v40  ;;  %v5610_v15 = vshll.u32 %v11961_v62, 16 }
 0x6e4   : > { %v4648_v60 = vadd.f32 %v4647_v11, %v4619_v54  ;;  %v4706_v56 = vadd.f32 %v4705_v6, %v4677_v32  ;;  %v5607_v6 = vshrl.u32 %v11961_v62, 16 }
 0x6e6   : > { %4743 = vst [vmem:[%s11753_s5 + $0xe0] sm:$0xff] %v4648_v60  ;;  %v5609_v60 = vrot.slane %v5607_v6, 4 }
 0x6e7   : > { %4744 = vst [vmem:[%s11753_s5 + $0xe8] sm:$0xff] %v4706_v56  ;;  %v5612_v56 = vrot.slane %v5610_v15, 5 }
 0x6e9   : > { %v4620_v44 = vpop.f32.mrf.mxu1  ;;  %v4678_v33 = vpop.f32.mrf.mxu0 }
 0x6ea   : > { %v4621_v13 = vadd.f32 %v4620_v44, %v11916_v55  ;;  %v4679_v46 = vadd.f32 %v4678_v33, %v11919_v40 }
 0x6ec   : > { %v4650_v8 = vadd.f32 %v4649_v22, %v4621_v13  ;;  %v4708_v19 = vadd.f32 %v4707_v20, %v4679_v46  ;;  %v5616_v20 = vshll.u32 %v5587_v52, 16  ;;  %v5544_v46 = vld [vmem:[#allocation2 + $0x10] sm:$0xf] }
 0x6ee   : > { %4749 = vst [vmem:[%s11753_s5 + $0x110] sm:$0xff] %v4650_v8  ;;  %v5613_v8 = vor.u32 %v5612_v56, %v5609_v60 }
 0x6ef   : > { %4750 = vst [vmem:[%s11753_s5 + $0x118] sm:$0xff] %v4708_v19 }
 0x6f1   : > { %v4623_v38 = vpop.f32.mrf.mxu1  ;;  %v4681_v58 = vpop.f32.mrf.mxu0 }
 0x6f2   : > { %v4624_v45 = vadd.f32 %v4623_v38, %v11916_v55  ;;  %v4682_v27 = vadd.f32 %v4681_v58, %v11919_v40 }
 0x6f4   : > { %v4653_v59 = vadd.f32 %v4652_v26, %v4624_v45  ;;  %v4711_v4 = vadd.f32 %v4710_v9, %v4682_v27  ;;  %v5736_v26 = vrot.slane %v5587_v52, 5 }
 0x6f6   : > { %4755 = vst [vmem:[%s11753_s5 + $0x140] sm:$0xff] %v4653_v59  ;;  %v5737_v45 = vsel %vm9626_vm10, %v8838_v29, %v5736_v26 }
 0x6f7   : > { %4756 = vst [vmem:[%s11753_s5 + $0x148] sm:$0xff] %v4711_v4 }
 0x6f9   : > { %v4625_v53 = vpop.f32.mrf.mxu1  ;;  %v4683_v14 = vpop.f32.mrf.mxu0 }
 0x6fa   : > { %v4626_v16 = vadd.f32 %v4625_v53, %v11916_v55  ;;  %v4684_v28 = vadd.f32 %v4683_v14, %v11919_v40  ;;  %v5427_v55 = vpop.f32.mrf.mxu3 }
 0x6fc   : > { %v4655_v17 = vadd.f32 %v4654_v34, %v4626_v16  ;;  %v4713_v31 = vadd.f32 %v4712_v7, %v4684_v28  ;;  %v5547_v34 = vld [vmem:[#allocation2 + $0x14] sm:$0x1]  ;;  %v5614_v28 = vrot.slane %v5613_v8, 4  ;;  %v9152_v7 = vld [vmem:[%s13063_s10 + $0x40] sm:$0xff] }
 0x6fd   : > { %6107 = vmatpush.bf16.msra.mxu2 %v9152_v7 }
 0x6fe   : > { %4761 = vst [vmem:[%s11753_s5 + $0x170] sm:$0xff] %v4655_v17 }
 0x6ff   : > { %4762 = vst [vmem:[%s11753_s5 + $0x178] sm:$0xff] %v4713_v31  ;;  %v5838_v31 = vunpack.c.l.b16 %v5737_v45 }
 0x701   : > { %v5393_v47 = vpop.f32.mrf.mxu1 }
 0x702   : > { %v5394_v51 = vadd.f32 %v11956_v57, %v5393_v47  ;;  %v5429_v35 = vpop.f32.mrf.mxu3 }
 0x704   : > { %v5423_v50 = vadd.f32 %v5422_v23, %v5394_v51  ;;  %v5618_v23 = vrot.slane %v5616_v20, 5 }
 0x706   : > { %v5442_v2 = vmax.f32 %v5423_v50, 0.0 }
 0x708   : > { %v5450_v21 = vpack.c.bf16 %v5442_v2, %v5442_v2 }
 0x709   : > { %v5395_v43 = vpop.f32.mrf.mxu1 }
 0x70a   : > { %v5459_v40 = vshrl.u32 %v5450_v21, 16  ;;  %v5396_v63 = vadd.f32 %v11956_v57, %v5395_v43  ;;  %v5462_v11 = vshll.u32 %v5450_v21, 16 }
 0x70c   : > { %v5461_v10 = vrot.slane %v5459_v40, 7  ;;  %v5425_v18 = vadd.f32 %v5424_v41, %v5396_v63 }
 0x70e   : > { %v5464_v24 = vor.u32 %v5462_v11, %v5461_v10  ;;  %v5465_v49 = vrot.slane %v5461_v10, 4  ;;  %v5443_v48 = vmax.f32 %v5425_v18, 0.0 }
 0x710   : > { %v5539_v5 = vsel %vm9562_vm4, %v5464_v24, %v5538_v36  ;;  %v5542_v30 = vsel %vm9594_vm7, %v5465_v49, %v5541_v25  ;;  %v5451_v22 = vpack.c.bf16 %v5443_v48, %v5443_v48  ;;  %v5619_v24 = vsel %vm9671_vm11, %v5614_v28, %v5618_v23  ;;  %v5550_v49 = vld [vmem:[#allocation2 + $0x18] sm:$0xf]  ;;  %v5553_v48 = vld [vmem:[#allocation2 + $0x1c] sm:$0x1] }
 0x711   : > { %5540 = vst [vmem:[#allocation2 + $0x8] sm:$0xf] %v5539_v5  ;;  %v5398_v3 = vpop.f32.mrf.mxu1  ;;  %v5818_v29 = vunpack.c.l.b16 %v5619_v24 }
 0x712   : > { %5543 = vst [vmem:[#allocation2 + $0xc] sm:$0x1] %v5542_v30  ;;  %v5467_v37 = vshrl.u32 %v5451_v22, 16  ;;  %v5399_v61 = vadd.f32 %v11956_v57, %v5398_v3  ;;  %v5470_v54 = vshll.u32 %v5451_v22, 16 }
 0x714   : > { %v5469_v0 = vrot.slane %v5467_v37, 7  ;;  %v5428_v32 = vadd.f32 %v5427_v55, %v5399_v61  ;;  %v5432_v55 = vpop.f32.mrf.mxu3 }
 0x716   : > { %v5472_v44 = vor.u32 %v5470_v54, %v5469_v0  ;;  %v5473_v33 = vrot.slane %v5469_v0, 4  ;;  %v5444_v13 = vmax.f32 %v5428_v32, 0.0 }
 0x718   : > { %v5545_v19 = vsel %vm9562_vm4, %v5472_v44, %v5544_v46  ;;  %v5548_v9 = vsel %vm9594_vm7, %v5473_v33, %v5547_v34  ;;  %v5452_v38 = vpack.c.bf16 %v5444_v13, %v5444_v13  ;;  %v11975_v58 = vld [vmem:[#allocation2 + $0x8] sm:$0xf] }
 0x719   : > { %5546 = vst [vmem:[#allocation2 + $0x10] sm:$0xf] %v5545_v19  ;;  %v5400_v27 = vpop.f32.mrf.mxu1  ;;  %v5589_v59 = vld [vmem:[#allocation2 + $0xc] sm:$0x1]  ;;  %v8839_v4 = vrot.slane %v11975_v58, 9  ;;  %v5621_v41 = vshrl.u32 %v11975_v58, 16  ;;  %v5807_v25 = vunpack.c.l.b16 %v11975_v58 }
 0x71a   : > { %5549 = vst [vmem:[#allocation2 + $0x14] sm:$0x1] %v5548_v9  ;;  %v5475_v53 = vshrl.u32 %v5452_v38, 16  ;;  %v5401_v14 = vadd.f32 %v11956_v57, %v5400_v27  ;;  %v5740_v16 = vrot.slane %v5589_v59, 5  ;;  %v5478_v17 = vshll.u32 %v5452_v38, 16 }
 0x71b   : > { %v5624_v47 = vshll.u32 %v11975_v58, 16  ;;  %v5630_v21 = vshll.u32 %v5589_v59, 16  ;;  %v5623_v40 = vrot.slane %v5621_v41, 4 }
 0x71c   : > { %v5477_v51 = vrot.slane %v5475_v53, 7  ;;  %v5430_v50 = vadd.f32 %v5429_v35, %v5401_v14  ;;  %v5741_v2 = vsel %vm9626_vm10, %v8839_v4, %v5740_v16  ;;  %v5434_v53 = vpop.f32.mrf.mxu3  ;;  %v5556_v14 = vld [vmem:[#allocation2 + $0x20] sm:$0xf]  ;;  %v5559_v16 = vld [vmem:[#allocation2 + $0x24] sm:$0x1] }
 0x71d   : > { %v5839_v43 = vunpack.c.l.b16 %v5741_v2  ;;  %v5626_v63 = vrot.slane %v5624_v47, 5  ;;  %v5632_v37 = vrot.slane %v5630_v21, 5 }
 0x71e   : > { %v5480_v10 = vor.u32 %v5478_v17, %v5477_v51  ;;  %v5481_v11 = vrot.slane %v5477_v51, 4  ;;  %v5445_v18 = vmax.f32 %v5430_v50, 0.0 }
 0x71f   : > { %v5846_v36 = vpack.c.b16 %v5839_v43, %v5838_v31  ;;  %v5627_v5 = vor.u32 %v5626_v63, %v5623_v40 }
 0x720   : > { %v5551_v30 = vsel %vm9562_vm4, %v5480_v10, %v5550_v49  ;;  %v5554_v22 = vsel %vm9594_vm7, %v5481_v11, %v5553_v48  ;;  %v5453_v52 = vpack.c.bf16 %v5445_v18, %v5445_v18  ;;  %v5590_v3 = vld [vmem:[#allocation2 + $0x10] sm:$0xf] }
 0x721   : > { %5552 = vst [vmem:[#allocation2 + $0x18] sm:$0xf] %v5551_v30  ;;  %5850 = vrot.lane.b32.xlu1 %v5846_v36, %s13144_s0  ;;  %v5403_v61 = vpop.f32.mrf.mxu1  ;;  %v5808_v6 = vunpack.c.l.b16 %v5590_v3  ;;  %v5628_v35 = vrot.slane %v5627_v5, 4  ;;  %v5591_v26 = vld [vmem:[#allocation2 + $0x14] sm:$0x1]  ;;  %v8840_v15 = vrot.slane %v5590_v3, 9 }
 0x722   : > { %5555 = vst [vmem:[#allocation2 + $0x1c] sm:$0x1] %v5554_v22  ;;  %v5483_v0 = vshrl.u32 %v5453_v52, 16  ;;  %v5486_v54 = vshll.u32 %v5453_v52, 16  ;;  %v5404_v32 = vadd.f32 %v11956_v57, %v5403_v61  ;;  %v5744_v60 = vrot.slane %v5591_v26, 5 }
 0x723   : > { %v5859_v56 = vpack.c.b16 %v5808_v6, %v5807_v25  ;;  %v5633_v20 = vsel %vm9671_vm11, %v5628_v35, %v5632_v37  ;;  %v5635_v44 = vshrl.u32 %v5590_v3, 16  ;;  %v5638_v33 = vshll.u32 %v5590_v3, 16 }
 0x724   : > { %v5485_v13 = vrot.slane %v5483_v0, 7  ;;  %v5433_v46 = vadd.f32 %v5432_v55, %v5404_v32  ;;  %v5819_v34 = vunpack.c.l.b16 %v5633_v20  ;;  %v5745_v8 = vsel %vm9626_vm10, %v8840_v15, %v5744_v60  ;;  %v5562_v15 = vld [vmem:[#allocation2 + $0x28] sm:$0xf]  ;;  %v5565_v0 = vld [vmem:[#allocation2 + $0x2c] sm:$0x1] }
 0x725   : > { %5863 = vrot.lane.b32.xlu2 %v5859_v56, %s13147_s29  ;;  %v5840_v19 = vunpack.c.l.b16 %v5745_v8  ;;  %v5637_v9 = vrot.slane %v5635_v44, 4  ;;  %v5640_v38 = vrot.slane %v5638_v33, 5  ;;  %v5644_v45 = vshll.u32 %v5591_v26, 16 }
 0x726   : > { %v5488_v27 = vor.u32 %v5486_v54, %v5485_v13  ;;  %v5489_v59 = vrot.slane %v5485_v13, 4  ;;  %v5446_v4 = vmax.f32 %v5433_v46, 0.0  ;;  %v5826_v23 = vpack.c.b16 %v5819_v34, %v5818_v29  ;;  %v5437_v13 = vpop.f32.mrf.mxu3 }
 0x727   : > { %v5885_v28 = vpack.c.b16 %v5840_v19, %v5839_v43  ;;  %v5641_v7 = vor.u32 %v5640_v38, %v5637_v9  ;;  %v5646_v51 = vrot.slane %v5644_v45, 5 }
 0x728   : > { %v5557_v17 = vsel %vm9562_vm4, %v5488_v27, %v5556_v14  ;;  %v5560_v31 = vsel %vm9594_vm7, %v5489_v59, %v5559_v16  ;;  %v5454_v41 = vpack.c.bf16 %v5446_v4, %v5446_v4  ;;  %5830 = vrot.lane.b32.xlu0 %v5826_v23, %s13153_s26  ;;  %v5592_v47 = vld [vmem:[#allocation2 + $0x18] sm:$0xf] }
 0x729   : > { %5558 = vst [vmem:[#allocation2 + $0x20] sm:$0xf] %v5557_v17  ;;  %5889 = vrot.lane.b32.xlu1 %v5885_v28, %s13149_s25  ;;  %v5593_v50 = vld [vmem:[#allocation2 + $0x1c] sm:$0x1]  ;;  %v8841_v2 = vrot.slane %v5592_v47, 9  ;;  %v5405_v21 = vpop.f32.mrf.mxu1  ;;  %v5809_v55 = vunpack.c.l.b16 %v5592_v47  ;;  %v5642_v43 = vrot.slane %v5641_v7, 4 }
 0x72a   : > { %5561 = vst [vmem:[#allocation2 + $0x24] sm:$0x1] %v5560_v31  ;;  %v5491_v40 = vshrl.u32 %v5454_v41, 16  ;;  %v5494_v63 = vshll.u32 %v5454_v41, 16  ;;  %v5748_v10 = vrot.slane %v5593_v50, 5  ;;  %v5406_v11 = vadd.f32 %v11956_v57, %v5405_v21 }
 0x72b   : > { %v12011_v18 = vpack.c.b16 %v5809_v55, %v5808_v6  ;;  %v5647_v24 = vsel %vm9671_vm11, %v5642_v43, %v5646_v51  ;;  %v5649_v49 = vshrl.u32 %v5592_v47, 16  ;;  %v5652_v48 = vshll.u32 %v5592_v47, 16  ;;  %v5568_v43 = vld [vmem:[#allocation2 + $0x30] sm:$0xf] }
 0x72c   : > { %v5493_v36 = vrot.slane %v5491_v40, 7  ;;  %v12017_v5 = vsel %vm9626_vm10, %v8841_v2, %v5748_v10  ;;  %v5435_v30 = vadd.f32 %v5434_v53, %v5406_v11  ;;  %v5820_v22 = vunpack.c.l.b16 %v5647_v24  ;;  %v5571_v40 = vld [vmem:[#allocation2 + $0x34] sm:$0x1] }
 0x72d   : > { %v5841_v52 = vunpack.c.l.b16 %v12017_v5  ;;  %5899 = vrot.lane.b32.xlu2 %v12011_v18, %s13143_s27  ;;  %v5651_v3 = vrot.slane %v5649_v49, 4  ;;  %v5654_v37 = vrot.slane %v5652_v48, 5  ;;  %v5658_v61 = vshll.u32 %v5593_v50, 16 }
 0x72e   : > { %v5496_v6 = vor.u32 %v5494_v63, %v5493_v36  ;;  %v5497_v35 = vrot.slane %v5493_v36, 4  ;;  %v5447_v29 = vmax.f32 %v5435_v30, 0.0  ;;  %v5872_v26 = vpack.c.b16 %v5820_v22, %v5819_v34 }
 0x72f   : > { %v5847_v54 = vpack.c.b16 %v5841_v52, %v5840_v19  ;;  %v5655_v32 = vor.u32 %v5654_v37, %v5651_v3  ;;  %v5660_v33 = vrot.slane %v5658_v61, 5 }
 0x730   : > { %v5563_v60 = vsel %vm9562_vm4, %v5496_v6, %v5562_v15  ;;  %v5566_v56 = vsel %vm9594_vm7, %v5497_v35, %v5565_v0  ;;  %v5455_v20 = vpack.c.bf16 %v5447_v29, %v5447_v29  ;;  %5876 = vrot.lane.b32.xlu0 %v5872_v26, %s13148_s24  ;;  %v12029_v44 = vld [vmem:[#allocation2 + $0x20] sm:$0xf]  ;;  %v5439_v29 = vpop.f32.mrf.mxu3 }
 0x731   : > { %5564 = vst [vmem:[#allocation2 + $0x28] sm:$0xf] %v5563_v60  ;;  %8884 = vmatmul.msk.bf16.vlgmr.msra.gmra.mxu2 %vm1198_vm12, %v5847_v54  ;;  %v5408_v46 = vpop.f32.mrf.mxu1  ;;  %v5810_v34 = vunpack.c.l.b16 %v12029_v44  ;;  %v5656_v8 = vrot.slane %v5655_v32, 4  ;;  %v5595_v19 = vld [vmem:[#allocation2 + $0x24] sm:$0x1]  ;;  %v8842_v9 = vrot.slane %v12029_v44, 9 }
 0x732   : > { %5567 = vst [vmem:[#allocation2 + $0x2c] sm:$0x1] %v5566_v56  ;;  %v5499_v38 = vshrl.u32 %v5455_v20, 16  ;;  %v5502_v45 = vshll.u32 %v5455_v20, 16  ;;  %v5409_v27 = vadd.f32 %v11956_v57, %v5408_v46  ;;  %v5752_v59 = vrot.slane %v5595_v19, 5 }
 0x733   : > { %v5860_v4 = vpack.c.b16 %v5810_v34, %v5809_v55  ;;  %v5661_v23 = vsel %vm9671_vm11, %v5656_v8, %v5660_v33  ;;  %v5663_v53 = vshrl.u32 %v12029_v44, 16  ;;  %v5666_v14 = vshll.u32 %v12029_v44, 16 }
 0x734   : > { %v5501_v16 = vrot.slane %v5499_v38, 7  ;;  %v5438_v28 = vadd.f32 %v5437_v13, %v5409_v27  ;;  %v5821_v7 = vunpack.c.l.b16 %v5661_v23  ;;  %v5753_v17 = vsel %vm9626_vm10, %v8842_v9, %v5752_v59  ;;  %v5574_v9 = vld [vmem:[#allocation2 + $0x38] sm:$0xf]  ;;  %v5577_v38 = vld [vmem:[#allocation2 + $0x3c] sm:$0x1] }
 0x735   : > { %5852 = vrot.lane.b32.xlu2 %v5847_v54, %s13144_s0  ;;  %v5842_v31 = vunpack.c.l.b16 %v5753_v17  ;;  %v5665_v41 = vrot.slane %v5663_v53, 4  ;;  %v5668_v47 = vrot.slane %v5666_v14, 5  ;;  %v5672_v51 = vshll.u32 %v5595_v19, 16 }
 0x736   : > { %v5504_v50 = vor.u32 %v5502_v45, %v5501_v16  ;;  %v5505_v2 = vrot.slane %v5501_v16, 4  ;;  %v5448_v21 = vmax.f32 %v5438_v28, 0.0  ;;  %v5827_v55 = vpack.c.b16 %v5821_v7, %v5820_v22 }
 0x737   : > { %v5669_v63 = vor.u32 %v5668_v47, %v5665_v41  ;;  %v5674_v49 = vrot.slane %v5672_v51, 5  ;;  %v5886_v6 = vpack.c.b16 %v5842_v31, %v5841_v52 }
 0x738   : > { %v5569_v10 = vsel %vm9562_vm4, %v5504_v50, %v5568_v43  ;;  %v5572_v11 = vsel %vm9594_vm7, %v5505_v2, %v5571_v40  ;;  %v5456_v24 = vpack.c.bf16 %v5448_v21, %v5448_v21  ;;  %5865 = vrot.lane.b32.xlu0 %v5860_v4, %s13147_s29  ;;  %5832 = vrot.lane.b32.xlu1 %v5827_v55, %s13153_s26  ;;  %v12050_v48 = vld [vmem:[#allocation2 + $0x28] sm:$0xf] }
 0x739   : > { %5570 = vst [vmem:[#allocation2 + $0x30] sm:$0xf] %v5569_v10  ;;  %v5410_v36 = vpop.f32.mrf.mxu1  ;;  %v5670_v30 = vrot.slane %v5669_v63, 4  ;;  %v5597_v22 = vld [vmem:[#allocation2 + $0x2c] sm:$0x1]  ;;  %v8843_v3 = vrot.slane %v12050_v48, 9  ;;  %v5811_v16 = vunpack.c.l.b16 %v12050_v48 }
 0x73a   : > { %5573 = vst [vmem:[#allocation2 + $0x34] sm:$0x1] %v5572_v11  ;;  %v5507_v37 = vshrl.u32 %v5456_v24, 16  ;;  %v5411_v61 = vadd.f32 %v11956_v57, %v5410_v36  ;;  %v5756_v35 = vrot.slane %v5597_v22, 5  ;;  %v5510_v26 = vshll.u32 %v5456_v24, 16 }
 0x73b   : > { %v5675_v15 = vsel %vm9671_vm11, %v5670_v30, %v5674_v49  ;;  %v5677_v0 = vshrl.u32 %v12050_v48, 16  ;;  %v5680_v54 = vshll.u32 %v12050_v48, 16  ;;  %v5686_v33 = vshll.u32 %v5597_v22, 16  ;;  %v5580_v36 = vld [vmem:[#allocation2 + $0x40] sm:$0xf] }
 0x73c   : > { %v5509_v32 = vrot.slane %v5507_v37, 7  ;;  %v5440_v60 = vadd.f32 %v5439_v29, %v5411_v61  ;;  %v5822_v56 = vunpack.c.l.b16 %v5675_v15  ;;  %v12062_v20 = vsel %vm9626_vm10, %v8843_v3, %v5756_v35  ;;  %v5583_v30 = vld [vmem:[#allocation2 + $0x44] sm:$0x1] }
 0x73d   : > { %5891 = vrot.lane.b32.xlu2 %v5886_v6, %s13149_s25  ;;  %v5843_v57 = vunpack.c.l.b16 %v12062_v20  ;;  %v5679_v5 = vrot.slane %v5677_v0, 4  ;;  %v5682_v52 = vrot.slane %v5680_v54, 5  ;;  %v5688_v53 = vrot.slane %v5686_v33, 5 }
 0x73e   : > { %v5512_v13 = vor.u32 %v5510_v26, %v5509_v32  ;;  %v5513_v46 = vrot.slane %v5509_v32, 4  ;;  %v5449_v8 = vmax.f32 %v5440_v60, 0.0  ;;  %v5873_v19 = vpack.c.b16 %v5822_v56, %v5821_v7 }
 0x73f   : > { %v12068_v45 = vpack.c.b16 %v5843_v57, %v5842_v31  ;;  %v5683_v27 = vor.u32 %v5682_v52, %v5679_v5  ;;  %v12087_v40 = vpack.c.b16 %v5811_v16, %v5810_v34 }
 0x740   : > { %v5575_v59 = vsel %vm9562_vm4, %v5512_v13, %v5574_v9  ;;  %v5578_v4 = vsel %vm9594_vm7, %v5513_v46, %v5577_v38  ;;  %v5457_v23 = vpack.c.bf16 %v5449_v8, %v5449_v8  ;;  %5878 = vrot.lane.b32.xlu1 %v5873_v19, %s13148_s24  ;;  %5909 = vrot.lane.b32.xlu0 %v5827_v55, %s13150_s2  ;;  %v12076_v14 = vld [vmem:[#allocation2 + $0x30] sm:$0xf]  ;;  %v5604_v38 = vld [vmem:[#allocation2 + $0x48] sm:$0xf] }
 0x741   : > { %5576 = vst [vmem:[#allocation2 + $0x38] sm:$0xf] %v5575_v59  ;;  %8885 = vmatmul.msk.bf16.gmra.mxu2 %vm1198_vm12, %v12068_v45  ;;  %v5684_v28 = vrot.slane %v5683_v27, 4  ;;  %v5599_v7 = vld [vmem:[#allocation2 + $0x34] sm:$0x1]  ;;  %v5691_v17 = vshrl.u32 %v12076_v14, 16  ;;  %v5812_v32 = vunpack.c.l.b16 %v12076_v14 }
 0x742   : > { %5579 = vst [vmem:[#allocation2 + $0x3c] sm:$0x1] %v5578_v4  ;;  %v5515_v31 = vshrl.u32 %v5457_v23, 16  ;;  %v5694_v41 = vshll.u32 %v12076_v14, 16  ;;  %v5518_v47 = vshll.u32 %v5457_v23, 16  ;;  %v5700_v43 = vshll.u32 %v5599_v7, 16 }
 0x743   : > { %v5689_v51 = vsel %vm9671_vm11, %v5684_v28, %v5688_v53  ;;  %v5693_v50 = vrot.slane %v5691_v17, 4  ;;  %v8844_v63 = vrot.slane %v12076_v14, 9  ;;  %v5760_v10 = vrot.slane %v5599_v7, 5  ;;  %v5605_v27 = vld [vmem:[#allocation2 + $0x4c] sm:$0x1]  ;;  %v9151_v53 = vld [vmem:[%s13063_s10 + $0x38] sm:$0xff] }
 0x744   : > { %v5517_v2 = vrot.slane %v5515_v31, 7  ;;  %v5823_v21 = vunpack.c.l.b16 %v5689_v51  ;;  %v5696_v55 = vrot.slane %v5694_v41, 5  ;;  %v5702_v34 = vrot.slane %v5700_v43, 5  ;;  %6071 = vmatpush.bf16.msrb.mxu0 %v9151_v53  ;;  %v9150_v31 = vld [vmem:[%s13063_s10 + $0x30] sm:$0xff] }
 0x745   : > { %v5761_v26 = vsel %vm9626_vm10, %v8844_v63, %v5760_v10  ;;  %v5861_v19 = vpack.c.b16 %v5812_v32, %v5811_v16  ;;  %v5804_v17 = vrot.slane %v5605_v27, 5  ;;  %v5806_v53 = vunpack.c.l.b16 %v11961_v62 }
 0x746   : > { %v5520_v11 = vor.u32 %v5518_v47, %v5517_v2  ;;  %v5521_v24 = vrot.slane %v5517_v2, 4  ;;  %v5828_v49 = vpack.c.b16 %v5823_v21, %v5822_v56  ;;  %v5697_v48 = vor.u32 %v5696_v55, %v5693_v50 }
 0x747   : > { %v5844_v13 = vunpack.c.l.b16 %v5761_v26  ;;  %v9149_v26 = vld [vmem:[%s13063_s10 + $0x28] sm:$0xff] }
 0x748   : > { %v5581_v22 = vsel %vm9562_vm4, %v5520_v11, %v5580_v36  ;;  %v5584_v3 = vsel %vm9594_vm7, %v5521_v24, %v5583_v30  ;;  %5901 = vrot.lane.b32.xlu0 %v12087_v40, %s13143_s27  ;;  %5834 = vrot.lane.b32.xlu2 %v5828_v49, %s13153_s26  ;;  %v5698_v44 = vrot.slane %v5697_v48, 4  ;;  %v12097_v37 = vld [vmem:[#allocation2 + $0x38] sm:$0xf]  ;;  %v5787_v24 = vshrl.u32 %v5604_v38, 16 }
 0x749   : > { %5582 = vst [vmem:[#allocation2 + $0x40] sm:$0xf] %v5581_v22  ;;  %5911 = vrot.lane.b32.xlu1 %v5828_v49, %s13150_s2  ;;  %v5601_v61 = vld [vmem:[#allocation2 + $0x3c] sm:$0x1]  ;;  %v8845_v6 = vrot.slane %v12097_v37, 9  ;;  %v5705_v35 = vshrl.u32 %v12097_v37, 16  ;;  %v5813_v41 = vunpack.c.l.b16 %v12097_v37  ;;  %v5887_v43 = vpack.c.b16 %v5844_v13, %v5843_v57  ;;  %6072 = vmatpush.bf16.msrb.mxu0 %v9150_v31 }
 0x74a   : > { %5585 = vst [vmem:[#allocation2 + $0x44] sm:$0x1] %v5584_v3  ;;  %v5703_v29 = vsel %vm9671_vm11, %v5698_v44, %v5702_v34  ;;  %v5764_v15 = vrot.slane %v5601_v61, 5  ;;  %v5708_v0 = vshll.u32 %v12097_v37, 16  ;;  %v5714_v52 = vshll.u32 %v5601_v61, 16 }
 0x74b   : > { %v5824_v54 = vunpack.c.l.b16 %v5703_v29  ;;  %v5707_v60 = vrot.slane %v5705_v35, 4  ;;  %v12133_v10 = vpack.c.b16 %v5813_v41, %v5812_v32  ;;  %v5790_v49 = vshll.u32 %v5604_v38, 16 }
 0x74c   : > { %v12110_v56 = vsel %vm9626_vm10, %v8845_v6, %v5764_v15  ;;  %v5710_v5 = vrot.slane %v5708_v0, 5  ;;  %v5716_v4 = vrot.slane %v5714_v52, 5  ;;  %v5789_v3 = vrot.slane %v5787_v24, 4 }
 0x74d   : > { %v5874_v33 = vpack.c.b16 %v5824_v54, %v5823_v21  ;;  %v5845_v46 = vunpack.c.l.b16 %v12110_v56  ;;  %v5792_v44 = vrot.slane %v5790_v49, 5  ;;  %v5796_v29 = vshll.u32 %v5605_v27, 16  ;;  %6073 = vmatpush.bf16.msrb.mxu0 %v9149_v26  ;;  %v9147_v56 = vld [vmem:[%s13063_s10 + $0x18] sm:$0xff] }
 0x74e   : > { %v5711_v8 = vor.u32 %v5710_v5, %v5707_v60  ;;  %v5897_v0 = vunpack.c.l.b16 %v5604_v38 }
 0x74f   : > { %v5849_v9 = vpack.c.b16 %v5845_v46, %v5844_v13  ;;  %v5793_v35 = vor.u32 %v5792_v44, %v5789_v3  ;;  %v5798_v32 = vrot.slane %v5796_v29, 5  ;;  %v9148_v13 = vld [vmem:[%s13063_s10 + $0x20] sm:$0xff] }
 0x750   : > { %5854 = vrot.lane.b32.xlu0 %v12068_v45, %s13144_s0  ;;  %5880 = vrot.lane.b32.xlu2 %v5874_v33, %s13148_s24  ;;  %v5712_v59 = vrot.slane %v5711_v8, 4  ;;  %v5602_v23 = vld [vmem:[#allocation2 + $0x40] sm:$0xf]  ;;  %v8847_v45 = vrot.slane %v5604_v38, 9 }
 0x751   : > { %5867 = vrot.lane.b32.xlu1 %v5861_v19, %s13147_s29  ;;  %8886 = vmatmul.msk.bf16.gmra.mxu2 %vm1198_vm12, %v5849_v9  ;;  %v5603_v14 = vld [vmem:[#allocation2 + $0x44] sm:$0x1]  ;;  %v5767_v16 = vshrl.u32 %v5602_v23, 16  ;;  %v5770_v28 = vshll.u32 %v5602_v23, 16  ;;  %v8846_v2 = vrot.slane %v5602_v23, 9  ;;  %v5858_v57 = vunpack.c.l.b16 %v5602_v23 }
 0x752   : > { %v5717_v7 = vsel %vm9671_vm11, %v5712_v59, %v5716_v4  ;;  %v5784_v21 = vrot.slane %v5603_v14, 5  ;;  %v5805_v63 = vsel %vm9626_vm10, %v8847_v45, %v5804_v17  ;;  %v5776_v20 = vshll.u32 %v5603_v14, 16  ;;  %6074 = vmatpush.bf16.msrb.mxu0 %v9148_v13  ;;  %v9144_v38 = vld [vmem:[%s13063_s10] sm:$0xff] }
 0x753   : > { %v5825_v47 = vunpack.c.l.b16 %v5717_v7  ;;  %v5769_v51 = vrot.slane %v5767_v16, 4  ;;  %v5772_v50 = vrot.slane %v5770_v28, 5  ;;  %v5917_v36 = vunpack.c.l.b16 %v5805_v63 }
 0x754   : > { %v5785_v48 = vsel %vm9626_vm10, %v8846_v2, %v5784_v21  ;;  %v5778_v34 = vrot.slane %v5776_v20, 5  ;;  %v5862_v37 = vpack.c.b16 %v5858_v57, %v5813_v41  ;;  %v5898_v5 = vpack.c.b16 %v5897_v0, %v5858_v57 }
 0x755   : > { %v5829_v55 = vpack.c.b16 %v5825_v47, %v5824_v54  ;;  %v5773_v11 = vor.u32 %v5772_v50, %v5769_v51  ;;  %v5884_v30 = vunpack.c.l.b16 %v5785_v48  ;;  %v5794_v54 = vrot.slane %v5793_v35, 4 }
 0x756   : > { %6075 = vmatpush.bf16.msrb.mxu0 %v9147_v56  ;;  %v5814_v28 = vpack.c.b16 %v5807_v25, %v5806_v53 }
 0x757   : > { %v5774_v22 = vrot.slane %v5773_v11, 4  ;;  %v5918_v61 = vpack.c.b16 %v5917_v36, %v5884_v30  ;;  %v5888_v52 = vpack.c.b16 %v5884_v30, %v5845_v46  ;;  %v5799_v33 = vsel %vm9671_vm11, %v5794_v54, %v5798_v32  ;;  %v9146_v46 = vld [vmem:[%s13063_s10 + $0x10] sm:$0xff] }
 0x758   : > { %5893 = vrot.lane.b32.xlu0 %v5887_v43, %s13149_s25  ;;  %5913 = vrot.lane.b32.xlu2 %v5829_v55, %s13150_s2  ;;  %v5907_v8 = vunpack.c.l.b16 %v5799_v33 }
 0x759   : > { %5903 = vrot.lane.b32.xlu1 %v12133_v10, %s13143_s27  ;;  %v5779_v6 = vsel %vm9671_vm11, %v5774_v22, %v5778_v34 }
 0x75a   : > { %v5871_v15 = vunpack.c.l.b16 %v5779_v6  ;;  %6076 = vmatpush.bf16.msrb.mxu0 %v9146_v46 }
 0x75c   : > { %v5875_v60 = vpack.c.b16 %v5871_v15, %v5825_v47  ;;  %v5908_v19 = vpack.c.b16 %v5907_v8, %v5871_v15 }
 0x760   : > { %5836 = vrot.lane.b32.xlu0 %v5829_v55, %s13153_s26  ;;  %5869 = vrot.lane.b32.xlu2 %v5862_v37, %s13147_s29 }
 0x761   : > { %5856 = vrot.lane.b32.xlu1 %v5849_v9, %s13144_s0  ;;  %8887 = vmatmul.msk.bf16.gmra.mxu2 %vm1198_vm12, %v5918_v61  ;;  %v9145_v9 = vld [vmem:[%s13063_s10 + $0x8] sm:$0xff] }
 0x762   : > { %6077 = vmatpush.bf16.msrb.mxu0 %v9145_v9 }
 0x766   : > { %6078 = vmatpush.bf16.msrb.mxu0 %v9144_v38 }
 0x768   : > { %5882 = vrot.lane.b32.xlu0 %v5875_v60, %s13148_s24  ;;  %5905 = vrot.lane.b32.xlu2 %v5898_v5, %s13143_s27 }
 0x769   : > { %5895 = vrot.lane.b32.xlu1 %v5888_v52, %s13149_s25 }
 0x770   : > { %5915 = vrot.lane.b32.xlu0 %v5908_v19, %s13150_s2 }
 0x77f   : > { %v5864_v27 = vpop.permute.xlu2 %5863 }
 0x787   : > { %v5900_v23 = vpop.permute.xlu2 %5899 }
 0x78f   : > { %v5853_v7 = vpop.permute.xlu2 %5852 }
 0x793   : > { %v5851_v59 = vpop.permute.xlu1 %5850 }
 0x797   : > { %v5892_v50 = vpop.permute.xlu2 %5891 }
 0x79a   : > { %v5831_v4 = vpop.permute.xlu0 %5830 }
 0x79b   : > { %v5890_v14 = vpop.permute.xlu1 %5889  ;;  %v5921_v45 = vsel %vm1198_vm12, %v5814_v28, %v5831_v4 }
 0x79c   : > { %v5932_v17 = vsel %vm1211_vm13, %v5921_v45, %v5851_v59 }
 0x79d   : > { %v5940_v47 = vsel %vm1220_vm14, %v5932_v17, %v5864_v27 }
 0x7a2   : > { %v5877_v16 = vpop.permute.xlu0 %5876  ;;  %v5835_v63 = vpop.permute.xlu2 %5834 }
 0x7a3   : > { %v5948_v51 = vsel %vm1229_vm15, %v5940_v47, %v5877_v16 }
 0x7a4   : > { %v5956_v2 = vsel %vm1238_vm0, %v5948_v51, %v5890_v14 }
 0x7a5   : > { %v5964_v21 = vsel %vm1247_vm1, %v5956_v2, %v5900_v23  ;;  %v6225_v2 = vld [vmem:[#allocation2 + $0x8] sm:$0xf] }
 0x7aa   : > { %v5833_v31 = vpop.permute.xlu1 %5832  ;;  %v5866_v41 = vpop.permute.xlu0 %5865 }
 0x7ab   : > { %v5924_v25 = vsel %vm1198_vm12, %v12011_v18, %v5833_v31  ;;  %v5881_v22 = vpop.permute.xlu2 %5880  ;;  %v5927_v18 = vsel %vm1198_vm12, %v12087_v40, %v5835_v63 }
 0x7ac   : > { %v5934_v43 = vsel %vm1211_vm13, %v5924_v25, %v5853_v7 }
 0x7ad   : > { %v5942_v49 = vsel %vm1220_vm14, %v5934_v43, %v5866_v41  ;;  %v6274_v43 = vld [vmem:[#allocation2 + $0x4] sm:$0x1] }
 0x7b2   : > { %v5879_v62 = vpop.permute.xlu1 %5878  ;;  %v5910_v55 = vpop.permute.xlu0 %5909 }
 0x7b3   : > { %v5972_v58 = vsel %vm1256_vm2, %v5964_v21, %v5910_v55  ;;  %v5950_v48 = vsel %vm1229_vm15, %v5942_v49, %v5879_v62  ;;  %v5914_v35 = vpop.permute.xlu2 %5913  ;;  %v6228_v62 = vld [vmem:[#allocation2 + $0xc] sm:$0x1]  ;;  %v12214_v21 = vld [vmem:[#allocation2] sm:$0xf] }
 0x7b4   : > { %6079 = vmatmul.bf16.vlgmr.msrb.gmra.mxu0 %v5972_v58  ;;  %v5958_v20 = vsel %vm1238_vm0, %v5950_v48, %v5892_v50  ;;  %v6109_v38 = vpop.f32.mrf.mxu2  ;;  %v6294_v49 = vshrl.u32 %v12214_v21, 16 }
 0x7ba   : > { %v5902_v24 = vpop.permute.xlu0 %5901 }
 0x7bb   : > { %v5912_v11 = vpop.permute.xlu1 %5911  ;;  %v5966_v57 = vsel %vm1247_vm1, %v5958_v20, %v5902_v24  ;;  %v5870_v32 = vpop.permute.xlu2 %5869  ;;  %v8888_v20 = vrot.slane %v12214_v21, 9 }
 0x7bc   : > { %v5975_v3 = vsel %vm1256_vm2, %v5966_v57, %v5912_v11  ;;  %v6111_v27 = vpop.f32.mrf.mxu2  ;;  %v6423_v57 = vrot.slane %v6274_v43, 5 }
 0x7c2   : > { %v5855_v30 = vpop.permute.xlu0 %5854 }
 0x7c3   : > { %v5868_v36 = vpop.permute.xlu1 %5867  ;;  %v5936_v44 = vsel %vm1211_vm13, %v5927_v18, %v5855_v30  ;;  %v5906_v19 = vpop.permute.xlu2 %5905  ;;  %v6296_v18 = vrot.slane %v6294_v49, 4 }
 0x7c4   : > { %6084 = vmatmul.bf16.gmra.mxu0 %v5975_v3  ;;  %v5944_v34 = vsel %vm1220_vm14, %v5936_v44, %v5868_v36  ;;  %v6114_v16 = vpop.f32.mrf.mxu2  ;;  %v6297_v36 = vshll.u32 %v12214_v21, 16 }
 0x7c5   : > { %v5952_v6 = vsel %vm1229_vm15, %v5944_v34, %v5881_v22  ;;  %v6303_v34 = vshll.u32 %v6274_v43, 16 }
 0x7c6   : > { %v6299_v44 = vrot.slane %v6297_v36, 5 }
 0x7ca   : > { %v5894_v61 = vpop.permute.xlu0 %5893 }
 0x7cb   : > { %v5904_v37 = vpop.permute.xlu1 %5903  ;;  %v5960_v29 = vsel %vm1238_vm0, %v5952_v6, %v5894_v61 }
 0x7cc   : > { %v5968_v26 = vsel %vm1247_vm1, %v5960_v29, %v5904_v37  ;;  %v6116_v48 = vpop.f32.mrf.mxu2  ;;  %v6234_v29 = vld [vmem:[#allocation2 + $0x14] sm:$0x1] }
 0x7cd   : > { %v5978_v54 = vsel %vm1256_vm2, %v5968_v26, %v5914_v35  ;;  %v6231_v35 = vld [vmem:[#allocation2 + $0x10] sm:$0xf]  ;;  %v6300_v26 = vor.u32 %v6299_v44, %v6296_v18 }
 0x7d2   : > { %v5837_v0 = vpop.permute.xlu0 %5836 }
 0x7d3   : > { %v5857_v15 = vpop.permute.xlu1 %5856  ;;  %v5930_v40 = vsel %vm1198_vm12, %v12133_v10, %v5837_v0  ;;  %v12210_v10 = vld [vmem:[%s13067_s14] ss:$0 sm:$0xff] }
 0x7d4   : > { %6089 = vmatmul.bf16.gmra.mxu0 %v5978_v54  ;;  %v5938_v60 = vsel %vm1211_vm13, %v5930_v40, %v5857_v15 }
 0x7d5   : > { %v5946_v52 = vsel %vm1220_vm14, %v5938_v60, %v5870_v32  ;;  %v6424_v32 = vsel %vm9626_vm10, %v8888_v20, %v6423_v57 }
 0x7da   : > { %v5883_v5 = vpop.permute.xlu0 %5882 }
 0x7db   : > { %v5896_v33 = vpop.permute.xlu1 %5895  ;;  %v5954_v13 = vsel %vm1229_vm15, %v5946_v52, %v5883_v5 }
 0x7dc   : > { %v5962_v8 = vsel %vm1238_vm0, %v5954_v13, %v5896_v33  ;;  %v6305_v33 = vrot.slane %v6303_v34, 5 }
 0x7dd   : > { %v5970_v46 = vsel %vm1247_vm1, %v5962_v8, %v5906_v19 }
 0x7e2   : > { %v5916_v56 = vpop.permute.xlu0 %5915 }
 0x7e3   : > { %v5981_v9 = vsel %vm1256_vm2, %v5970_v46, %v5916_v56  ;;  %v6301_v56 = vrot.slane %v6300_v26, 4  ;;  %v9161_v46 = vld [vmem:[%s13064_s11 + $0x40] sm:$0xff] }
 0x7e4   : > { %6094 = vmatmul.bf16.gmra.mxu0 %v5981_v9  ;;  %6794 = vmatpush.bf16.msra.mxu3 %v9161_v46 }
 0x831   : > { %v6080_v59 = vpop.f32.mrf.mxu0 }
 0x832   : > { %v6081_v4 = vadd.f32 %v12210_v10, %v6080_v59 }
 0x834   : > { %v6110_v23 = vadd.f32 %v6109_v38, %v6081_v4  ;;  %v6525_v38 = vunpack.c.l.b16 %v6424_v32 }
 0x836   : > { %v6129_v53 = vmax.f32 %v6110_v23, 0.0 }
 0x838   : > { %v6137_v14 = vpack.c.bf16 %v6129_v53, %v6129_v53 }
 0x839   : > { %v6082_v28 = vpop.f32.mrf.mxu0 }
 0x83a   : > { %v6146_v7 = vshrl.u32 %v6137_v14, 16  ;;  %v6083_v45 = vadd.f32 %v12210_v10, %v6082_v28  ;;  %v6149_v31 = vshll.u32 %v6137_v14, 16 }
 0x83c   : > { %v6148_v17 = vrot.slane %v6146_v7, 7  ;;  %v6112_v41 = vadd.f32 %v6111_v27, %v6083_v45 }
 0x83e   : > { %v6151_v47 = vor.u32 %v6149_v31, %v6148_v17  ;;  %v6152_v51 = vrot.slane %v6148_v17, 4  ;;  %v6130_v50 = vmax.f32 %v6112_v41, 0.0 }
 0x840   : > { %v6226_v55 = vsel %vm9562_vm4, %v6151_v47, %v6225_v2  ;;  %v6229_v58 = vsel %vm9594_vm7, %v6152_v51, %v6228_v62  ;;  %v6138_v25 = vpack.c.bf16 %v6130_v50, %v6130_v50  ;;  %v6306_v47 = vsel %vm9671_vm11, %v6301_v56, %v6305_v33  ;;  %v6237_v51 = vld [vmem:[#allocation2 + $0x18] sm:$0xf]  ;;  %v6240_v50 = vld [vmem:[#allocation2 + $0x1c] sm:$0x1] }
 0x841   : > { %6227 = vst [vmem:[#allocation2 + $0x8] sm:$0xf] %v6226_v55  ;;  %v6085_v63 = vpop.f32.mrf.mxu0  ;;  %v6505_v20 = vunpack.c.l.b16 %v6306_v47 }
 0x842   : > { %6230 = vst [vmem:[#allocation2 + $0xc] sm:$0x1] %v6229_v58  ;;  %v6154_v11 = vshrl.u32 %v6138_v25, 16  ;;  %v6086_v24 = vadd.f32 %v12210_v10, %v6085_v63  ;;  %v6157_v22 = vshll.u32 %v6138_v25, 16 }
 0x844   : > { %v6156_v30 = vrot.slane %v6154_v11, 7  ;;  %v6115_v3 = vadd.f32 %v6114_v16, %v6086_v24  ;;  %v6119_v16 = vpop.f32.mrf.mxu2 }
 0x846   : > { %v6159_v37 = vor.u32 %v6157_v22, %v6156_v30  ;;  %v6160_v61 = vrot.slane %v6156_v30, 4  ;;  %v6131_v6 = vmax.f32 %v6115_v3, 0.0 }
 0x848   : > { %v6232_v15 = vsel %vm9562_vm4, %v6159_v37, %v6231_v35  ;;  %v6235_v0 = vsel %vm9594_vm7, %v6160_v61, %v6234_v29  ;;  %v6139_v54 = vpack.c.bf16 %v6131_v6, %v6131_v6  ;;  %v12228_v40 = vld [vmem:[#allocation2 + $0x8] sm:$0xf] }
 0x849   : > { %6233 = vst [vmem:[#allocation2 + $0x10] sm:$0xf] %v6232_v15  ;;  %v6087_v60 = vpop.f32.mrf.mxu0  ;;  %v6276_v5 = vld [vmem:[#allocation2 + $0xc] sm:$0x1]  ;;  %v8889_v52 = vrot.slane %v12228_v40, 9  ;;  %v6308_v27 = vshrl.u32 %v12228_v40, 16  ;;  %v6494_v62 = vunpack.c.l.b16 %v12228_v40 }
 0x84a   : > { %6236 = vst [vmem:[#allocation2 + $0x14] sm:$0x1] %v6235_v0  ;;  %v6162_v13 = vshrl.u32 %v6139_v54, 16  ;;  %v6088_v8 = vadd.f32 %v12210_v10, %v6087_v60  ;;  %v6427_v19 = vrot.slane %v6276_v5, 5  ;;  %v6165_v9 = vshll.u32 %v6139_v54, 16 }
 0x84b   : > { %v6311_v59 = vshll.u32 %v12228_v40, 16  ;;  %v6317_v14 = vshll.u32 %v6276_v5, 16  ;;  %v6310_v7 = vrot.slane %v6308_v27, 4  ;;  %v9160_v40 = vld [vmem:[%s13064_s11 + $0x38] sm:$0xff] }
 0x84c   : > { %v6164_v4 = vrot.slane %v6162_v13, 7  ;;  %v6117_v23 = vadd.f32 %v6116_v48, %v6088_v8  ;;  %v6428_v53 = vsel %vm9626_vm10, %v8889_v52, %v6427_v19  ;;  %v6121_v13 = vpop.f32.mrf.mxu2  ;;  %v6243_v8 = vld [vmem:[#allocation2 + $0x20] sm:$0xf]  ;;  %v6246_v19 = vld [vmem:[#allocation2 + $0x24] sm:$0x1]  ;;  %6758 = vmatpush.bf16.msra.mxu1 %v9160_v40 }
 0x84d   : > { %v6526_v28 = vunpack.c.l.b16 %v6428_v53  ;;  %v6313_v45 = vrot.slane %v6311_v59, 5  ;;  %v6319_v11 = vrot.slane %v6317_v14, 5 }
 0x84e   : > { %v6167_v17 = vor.u32 %v6165_v9, %v6164_v4  ;;  %v6168_v31 = vrot.slane %v6164_v4, 4  ;;  %v6132_v41 = vmax.f32 %v6117_v23, 0.0 }
 0x84f   : > { %v6533_v2 = vpack.c.b16 %v6526_v28, %v6525_v38  ;;  %v6314_v55 = vor.u32 %v6313_v45, %v6310_v7 }
 0x850   : > { %v6238_v58 = vsel %vm9562_vm4, %v6167_v17, %v6237_v51  ;;  %v6241_v25 = vsel %vm9594_vm7, %v6168_v31, %v6240_v50  ;;  %v6140_v43 = vpack.c.bf16 %v6132_v41, %v6132_v41  ;;  %v6277_v63 = vld [vmem:[#allocation2 + $0x10] sm:$0xf] }
 0x851   : > { %6239 = vst [vmem:[#allocation2 + $0x18] sm:$0xf] %v6238_v58  ;;  %6537 = vrot.lane.b32.xlu2 %v6533_v2, %s13144_s0  ;;  %v6090_v24 = vpop.f32.mrf.mxu0  ;;  %v6495_v49 = vunpack.c.l.b16 %v6277_v63  ;;  %v6315_v48 = vrot.slane %v6314_v55, 4  ;;  %v6278_v57 = vld [vmem:[#allocation2 + $0x14] sm:$0x1]  ;;  %v8890_v36 = vrot.slane %v6277_v63, 9 }
 0x852   : > { %6242 = vst [vmem:[#allocation2 + $0x1c] sm:$0x1] %v6241_v25  ;;  %v6170_v30 = vshrl.u32 %v6140_v43, 16  ;;  %v6173_v22 = vshll.u32 %v6140_v43, 16  ;;  %v6091_v3 = vadd.f32 %v12210_v10, %v6090_v24  ;;  %v6431_v18 = vrot.slane %v6278_v57, 5 }
 0x853   : > { %v6546_v44 = vpack.c.b16 %v6495_v49, %v6494_v62  ;;  %v6320_v34 = vsel %vm9671_vm11, %v6315_v48, %v6319_v11  ;;  %v6322_v37 = vshrl.u32 %v6277_v63, 16  ;;  %v6325_v61 = vshll.u32 %v6277_v63, 16 }
 0x854   : > { %v6172_v6 = vrot.slane %v6170_v30, 7  ;;  %v6120_v35 = vadd.f32 %v6119_v16, %v6091_v3  ;;  %v6506_v29 = vunpack.c.l.b16 %v6320_v34  ;;  %v6432_v26 = vsel %vm9626_vm10, %v8890_v36, %v6431_v18  ;;  %v6249_v36 = vld [vmem:[#allocation2 + $0x28] sm:$0xf]  ;;  %v6252_v30 = vld [vmem:[#allocation2 + $0x2c] sm:$0x1] }
 0x855   : > { %6550 = vrot.lane.b32.xlu0 %v6546_v44, %s13147_s29  ;;  %v6527_v15 = vunpack.c.l.b16 %v6432_v26  ;;  %v6324_v0 = vrot.slane %v6322_v37, 4  ;;  %v6327_v54 = vrot.slane %v6325_v61, 5  ;;  %v6331_v32 = vshll.u32 %v6278_v57, 16 }
 0x856   : > { %v6175_v60 = vor.u32 %v6173_v22, %v6172_v6  ;;  %v6176_v5 = vrot.slane %v6172_v6, 4  ;;  %v6133_v52 = vmax.f32 %v6120_v35, 0.0  ;;  %v6513_v33 = vpack.c.b16 %v6506_v29, %v6505_v20  ;;  %v6124_v6 = vpop.f32.mrf.mxu2 }
 0x857   : > { %v6572_v56 = vpack.c.b16 %v6527_v15, %v6526_v28  ;;  %v6328_v46 = vor.u32 %v6327_v54, %v6324_v0  ;;  %v6333_v4 = vrot.slane %v6331_v32, 5 }
 0x858   : > { %v6244_v9 = vsel %vm9562_vm4, %v6175_v60, %v6243_v8  ;;  %v6247_v38 = vsel %vm9594_vm7, %v6176_v5, %v6246_v19  ;;  %v6141_v27 = vpack.c.bf16 %v6133_v52, %v6133_v52  ;;  %6517 = vrot.lane.b32.xlu1 %v6513_v33, %s13153_s26  ;;  %v6279_v59 = vld [vmem:[#allocation2 + $0x18] sm:$0xf] }
 0x859   : > { %6245 = vst [vmem:[#allocation2 + $0x20] sm:$0xf] %v6244_v9  ;;  %6576 = vrot.lane.b32.xlu2 %v6572_v56, %s13149_s25  ;;  %v6280_v23 = vld [vmem:[#allocation2 + $0x1c] sm:$0x1]  ;;  %v8891_v53 = vrot.slane %v6279_v59, 9  ;;  %v6092_v14 = vpop.f32.mrf.mxu0  ;;  %v6496_v16 = vunpack.c.l.b16 %v6279_v59  ;;  %v6329_v28 = vrot.slane %v6328_v46, 4 }
 0x85a   : > { %6248 = vst [vmem:[#allocation2 + $0x24] sm:$0x1] %v6247_v38  ;;  %v6178_v7 = vshrl.u32 %v6141_v27, 16  ;;  %v6181_v45 = vshll.u32 %v6141_v27, 16  ;;  %v6435_v17 = vrot.slane %v6280_v23, 5  ;;  %v6093_v31 = vadd.f32 %v12210_v10, %v6092_v14 }
 0x85b   : > { %v12264_v41 = vpack.c.b16 %v6496_v16, %v6495_v49  ;;  %v6334_v47 = vsel %vm9671_vm11, %v6329_v28, %v6333_v4  ;;  %v6336_v51 = vshrl.u32 %v6279_v59, 16  ;;  %v6339_v50 = vshll.u32 %v6279_v59, 16  ;;  %v6255_v28 = vld [vmem:[#allocation2 + $0x30] sm:$0xf] }
 0x85c   : > { %v6180_v2 = vrot.slane %v6178_v7, 7  ;;  %v12270_v55 = vsel %vm9626_vm10, %v8891_v53, %v6435_v17  ;;  %v6122_v58 = vadd.f32 %v6121_v13, %v6093_v31  ;;  %v6507_v25 = vunpack.c.l.b16 %v6334_v47  ;;  %v6258_v7 = vld [vmem:[#allocation2 + $0x34] sm:$0x1] }
 0x85d   : > { %v6528_v43 = vunpack.c.l.b16 %v12270_v55  ;;  %6586 = vrot.lane.b32.xlu0 %v12264_v41, %s13143_s27  ;;  %v6338_v63 = vrot.slane %v6336_v51, 4  ;;  %v6341_v11 = vrot.slane %v6339_v50, 5  ;;  %v6345_v24 = vshll.u32 %v6280_v23, 16 }
 0x85e   : > { %v6183_v49 = vor.u32 %v6181_v45, %v6180_v2  ;;  %v6184_v48 = vrot.slane %v6180_v2, 4  ;;  %v6134_v20 = vmax.f32 %v6122_v58, 0.0  ;;  %v6559_v57 = vpack.c.b16 %v6507_v25, %v6506_v29 }
 0x85f   : > { %v6534_v22 = vpack.c.b16 %v6528_v43, %v6527_v15  ;;  %v6342_v3 = vor.u32 %v6341_v11, %v6338_v63  ;;  %v6347_v61 = vrot.slane %v6345_v24, 5 }
 0x860   : > { %v6250_v18 = vsel %vm9562_vm4, %v6183_v49, %v6249_v36  ;;  %v6253_v44 = vsel %vm9594_vm7, %v6184_v48, %v6252_v30  ;;  %v6142_v34 = vpack.c.bf16 %v6134_v20, %v6134_v20  ;;  %6563 = vrot.lane.b32.xlu1 %v6559_v57, %s13148_s24  ;;  %v12282_v37 = vld [vmem:[#allocation2 + $0x20] sm:$0xf]  ;;  %v6126_v20 = vpop.f32.mrf.mxu2 }
 0x861   : > { %6251 = vst [vmem:[#allocation2 + $0x28] sm:$0xf] %v6250_v18  ;;  %8934 = vmatmul.msk.bf16.vlgmr.msra.gmra.mxu3 %vm1198_vm12, %v6534_v22  ;;  %v6095_v35 = vpop.f32.mrf.mxu0  ;;  %v6497_v29 = vunpack.c.l.b16 %v12282_v37  ;;  %v6343_v26 = vrot.slane %v6342_v3, 4  ;;  %v6282_v15 = vld [vmem:[#allocation2 + $0x24] sm:$0x1]  ;;  %v8892_v0 = vrot.slane %v12282_v37, 9 }
 0x862   : > { %6254 = vst [vmem:[#allocation2 + $0x2c] sm:$0x1] %v6253_v44  ;;  %v6186_v54 = vshrl.u32 %v6142_v34, 16  ;;  %v6189_v32 = vshll.u32 %v6142_v34, 16  ;;  %v6096_v60 = vadd.f32 %v12210_v10, %v6095_v35  ;;  %v6439_v5 = vrot.slane %v6282_v15, 5 }
 0x863   : > { %v6547_v52 = vpack.c.b16 %v6497_v29, %v6496_v16  ;;  %v6348_v33 = vsel %vm9671_vm11, %v6343_v26, %v6347_v61  ;;  %v6350_v13 = vshrl.u32 %v12282_v37, 16  ;;  %v6353_v8 = vshll.u32 %v12282_v37, 16 }
 0x864   : > { %v6188_v19 = vrot.slane %v6186_v54, 7  ;;  %v6125_v56 = vadd.f32 %v6124_v6, %v6096_v60  ;;  %v6508_v46 = vunpack.c.l.b16 %v6348_v33  ;;  %v6440_v9 = vsel %vm9626_vm10, %v8892_v0, %v6439_v5  ;;  %v6261_v0 = vld [vmem:[#allocation2 + $0x38] sm:$0xf]  ;;  %v6264_v54 = vld [vmem:[#allocation2 + $0x3c] sm:$0x1] }
 0x865   : > { %6539 = vrot.lane.b32.xlu0 %v6534_v22, %s13144_s0  ;;  %v6529_v38 = vunpack.c.l.b16 %v6440_v9  ;;  %v6352_v27 = vrot.slane %v6350_v13, 4  ;;  %v6355_v59 = vrot.slane %v6353_v8, 5  ;;  %v6359_v4 = vshll.u32 %v6282_v15, 16 }
 0x866   : > { %v6191_v23 = vor.u32 %v6189_v32, %v6188_v19  ;;  %v6192_v53 = vrot.slane %v6188_v19, 4  ;;  %v6135_v14 = vmax.f32 %v6125_v56, 0.0  ;;  %v6514_v16 = vpack.c.b16 %v6508_v46, %v6507_v25 }
 0x867   : > { %v6356_v45 = vor.u32 %v6355_v59, %v6352_v27  ;;  %v6361_v51 = vrot.slane %v6359_v4, 5  ;;  %v6573_v49 = vpack.c.b16 %v6529_v38, %v6528_v43 }
 0x868   : > { %v6256_v17 = vsel %vm9562_vm4, %v6191_v23, %v6255_v28  ;;  %v6259_v31 = vsel %vm9594_vm7, %v6192_v53, %v6258_v7  ;;  %v6143_v47 = vpack.c.bf16 %v6135_v14, %v6135_v14  ;;  %6552 = vrot.lane.b32.xlu1 %v6547_v52, %s13147_s29  ;;  %6519 = vrot.lane.b32.xlu2 %v6514_v16, %s13153_s26  ;;  %v12303_v50 = vld [vmem:[#allocation2 + $0x28] sm:$0xf] }
 0x869   : > { %6257 = vst [vmem:[#allocation2 + $0x30] sm:$0xf] %v6256_v17  ;;  %v6097_v2 = vpop.f32.mrf.mxu0  ;;  %v6357_v58 = vrot.slane %v6356_v45, 4  ;;  %v6284_v25 = vld [vmem:[#allocation2 + $0x2c] sm:$0x1]  ;;  %v8893_v63 = vrot.slane %v12303_v50, 9  ;;  %v6498_v19 = vunpack.c.l.b16 %v12303_v50 }
 0x86a   : > { %6260 = vst [vmem:[#allocation2 + $0x34] sm:$0x1] %v6259_v31  ;;  %v6194_v11 = vshrl.u32 %v6143_v47, 16  ;;  %v6098_v24 = vadd.f32 %v12210_v10, %v6097_v2  ;;  %v6443_v48 = vrot.slane %v6284_v25, 5  ;;  %v6197_v57 = vshll.u32 %v6143_v47, 16 }
 0x86b   : > { %v6362_v36 = vsel %vm9671_vm11, %v6357_v58, %v6361_v51  ;;  %v6364_v30 = vshrl.u32 %v12303_v50, 16  ;;  %v6367_v22 = vshll.u32 %v12303_v50, 16  ;;  %v6373_v61 = vshll.u32 %v6284_v25, 16  ;;  %v6267_v2 = vld [vmem:[#allocation2 + $0x40] sm:$0xf] }
 0x86c   : > { %v6196_v3 = vrot.slane %v6194_v11, 7  ;;  %v6127_v18 = vadd.f32 %v6126_v20, %v6098_v24  ;;  %v6509_v44 = vunpack.c.l.b16 %v6362_v36  ;;  %v12315_v34 = vsel %vm9626_vm10, %v8893_v63, %v6443_v48  ;;  %v6270_v58 = vld [vmem:[#allocation2 + $0x44] sm:$0x1] }
 0x86d   : > { %6578 = vrot.lane.b32.xlu0 %v6573_v49, %s13149_s25  ;;  %v6530_v10 = vunpack.c.l.b16 %v12315_v34  ;;  %v6366_v55 = vrot.slane %v6364_v30, 4  ;;  %v6369_v43 = vrot.slane %v6367_v22, 5  ;;  %v6375_v13 = vrot.slane %v6373_v61, 5 }
 0x86e   : > { %v6199_v6 = vor.u32 %v6197_v57, %v6196_v3  ;;  %v6200_v35 = vrot.slane %v6196_v3, 4  ;;  %v6136_v26 = vmax.f32 %v6127_v18, 0.0  ;;  %v6560_v15 = vpack.c.b16 %v6509_v44, %v6508_v46 }
 0x86f   : > { %v12321_v32 = vpack.c.b16 %v6530_v10, %v6529_v38  ;;  %v6370_v60 = vor.u32 %v6369_v43, %v6366_v55  ;;  %v12340_v7 = vpack.c.b16 %v6498_v19, %v6497_v29  ;;  %v6493_v22 = vunpack.c.l.b16 %v12214_v21 }
 0x870   : > { %v6262_v5 = vsel %vm9562_vm4, %v6199_v6, %v6261_v0  ;;  %v6265_v52 = vsel %vm9594_vm7, %v6200_v35, %v6264_v54  ;;  %v6144_v33 = vpack.c.bf16 %v6136_v26, %v6136_v26  ;;  %6565 = vrot.lane.b32.xlu2 %v6560_v15, %s13148_s24  ;;  %6596 = vrot.lane.b32.xlu1 %v6514_v16, %s13150_s2  ;;  %v12329_v8 = vld [vmem:[#allocation2 + $0x30] sm:$0xf] }
 0x871   : > { %6263 = vst [vmem:[#allocation2 + $0x38] sm:$0xf] %v6262_v5  ;;  %8935 = vmatmul.msk.bf16.gmra.mxu3 %vm1198_vm12, %v12321_v32  ;;  %v6371_v56 = vrot.slane %v6370_v60, 4  ;;  %v6286_v46 = vld [vmem:[#allocation2 + $0x34] sm:$0x1]  ;;  %v6378_v9 = vshrl.u32 %v12329_v8, 16  ;;  %v6499_v18 = vunpack.c.l.b16 %v12329_v8  ;;  %v12369_v0 = vpack.c.b16 %v6494_v62, %v6493_v22 }
 0x872   : > { %6266 = vst [vmem:[#allocation2 + $0x3c] sm:$0x1] %v6265_v52  ;;  %v6202_v38 = vshrl.u32 %v6144_v33, 16  ;;  %v6381_v27 = vshll.u32 %v12329_v8, 16  ;;  %v6205_v59 = vshll.u32 %v6144_v33, 16  ;;  %v6387_v28 = vshll.u32 %v6286_v46, 16 }
 0x873   : > { %v6376_v4 = vsel %vm9671_vm11, %v6371_v56, %v6375_v13  ;;  %v6380_v23 = vrot.slane %v6378_v9, 4  ;;  %v8894_v45 = vrot.slane %v12329_v8, 9  ;;  %v6447_v17 = vrot.slane %v6286_v46, 5  ;;  %v12373_v60 = vld [vmem:[#allocation2 + $0x48] sm:$0xf]  ;;  %v9159_v9 = vld [vmem:[%s13064_s11 + $0x30] sm:$0xff] }
 0x874   : > { %v6204_v53 = vrot.slane %v6202_v38, 7  ;;  %v6510_v14 = vunpack.c.l.b16 %v6376_v4  ;;  %v6383_v16 = vrot.slane %v6381_v27, 5  ;;  %v6389_v29 = vrot.slane %v6387_v28, 5  ;;  %v6292_v5 = vld [vmem:[#allocation2 + $0x4c] sm:$0x1]  ;;  %6759 = vmatpush.bf16.msra.mxu1 %v9159_v9 }
 0x875   : > { %v6448_v49 = vsel %vm9626_vm10, %v8894_v45, %v6447_v17  ;;  %v6548_v21 = vpack.c.b16 %v6499_v18, %v6498_v19  ;;  %v6491_v46 = vrot.slane %v6292_v5, 5 }
 0x876   : > { %v6207_v31 = vor.u32 %v6205_v59, %v6204_v53  ;;  %v6208_v47 = vrot.slane %v6204_v53, 4  ;;  %v6515_v51 = vpack.c.b16 %v6510_v14, %v6509_v44  ;;  %v6384_v50 = vor.u32 %v6383_v16, %v6380_v23 }
 0x877   : > { %v6531_v35 = vunpack.c.l.b16 %v6448_v49 }
 0x878   : > { %v6268_v25 = vsel %vm9562_vm4, %v6207_v31, %v6267_v2  ;;  %v6271_v63 = vsel %vm9594_vm7, %v6208_v47, %v6270_v58  ;;  %6588 = vrot.lane.b32.xlu1 %v12340_v7, %s13143_s27  ;;  %6521 = vrot.lane.b32.xlu0 %v6515_v51, %s13153_s26  ;;  %v6385_v37 = vrot.slane %v6384_v50, 4  ;;  %v12350_v11 = vld [vmem:[#allocation2 + $0x38] sm:$0xf]  ;;  %v6474_v31 = vshrl.u32 %v12373_v60, 16 }
 0x879   : > { %6269 = vst [vmem:[#allocation2 + $0x40] sm:$0xf] %v6268_v25  ;;  %6598 = vrot.lane.b32.xlu2 %v6515_v51, %s13150_s2  ;;  %v6288_v24 = vld [vmem:[#allocation2 + $0x3c] sm:$0x1]  ;;  %v8895_v48 = vrot.slane %v12350_v11, 9  ;;  %v6392_v20 = vshrl.u32 %v12350_v11, 16  ;;  %v6500_v38 = vunpack.c.l.b16 %v12350_v11  ;;  %v6574_v16 = vpack.c.b16 %v6531_v35, %v6530_v10 }
 0x87a   : > { %6272 = vst [vmem:[#allocation2 + $0x44] sm:$0x1] %v6271_v63  ;;  %v6390_v57 = vsel %vm9671_vm11, %v6385_v37, %v6389_v29  ;;  %v6451_v36 = vrot.slane %v6288_v24, 5  ;;  %v6395_v30 = vshll.u32 %v12350_v11, 16  ;;  %v6401_v61 = vshll.u32 %v6288_v24, 16  ;;  %v9158_v37 = vld [vmem:[%s13064_s11 + $0x28] sm:$0xff] }
 0x87b   : > { %v6511_v3 = vunpack.c.l.b16 %v6390_v57  ;;  %v6394_v44 = vrot.slane %v6392_v20, 4  ;;  %v12394_v45 = vpack.c.b16 %v6500_v38, %v6499_v18  ;;  %v6477_v47 = vshll.u32 %v12373_v60, 16  ;;  %6760 = vmatpush.bf16.msra.mxu1 %v9158_v37 }
 0x87c   : > { %v12364_v55 = vsel %vm9626_vm10, %v8895_v48, %v6451_v36  ;;  %v6397_v43 = vrot.slane %v6395_v30, 5  ;;  %v6403_v33 = vrot.slane %v6401_v61, 5  ;;  %v6476_v25 = vrot.slane %v6474_v31, 4 }
 0x87d   : > { %v6561_v6 = vpack.c.b16 %v6511_v3, %v6510_v14  ;;  %v6532_v26 = vunpack.c.l.b16 %v12364_v55  ;;  %v6479_v63 = vrot.slane %v6477_v47, 5  ;;  %v6483_v20 = vshll.u32 %v6292_v5, 16  ;;  %v9155_v55 = vld [vmem:[%s13064_s11 + $0x10] sm:$0xff] }
 0x87e   : > { %v6398_v15 = vor.u32 %v6397_v43, %v6394_v44  ;;  %v6584_v36 = vunpack.c.l.b16 %v12373_v60 }
 0x87f   : > { %v6536_v54 = vpack.c.b16 %v6532_v26, %v6531_v35  ;;  %v6480_v48 = vor.u32 %v6479_v63, %v6476_v25  ;;  %v6485_v22 = vrot.slane %v6483_v20, 5 }
 0x880   : > { %6541 = vrot.lane.b32.xlu1 %v12321_v32, %s13144_s0  ;;  %6567 = vrot.lane.b32.xlu0 %v6561_v6, %s13148_s24  ;;  %v6399_v52 = vrot.slane %v6398_v15, 4  ;;  %v6289_v13 = vld [vmem:[#allocation2 + $0x40] sm:$0xf]  ;;  %v8897_v32 = vrot.slane %v12373_v60, 9  ;;  %v9156_v15 = vld [vmem:[%s13064_s11 + $0x18] sm:$0xff] }
 0x881   : > { %6554 = vrot.lane.b32.xlu2 %v6548_v21, %s13147_s29  ;;  %8936 = vmatmul.msk.bf16.gmra.mxu3 %vm1198_vm12, %v6536_v54  ;;  %v6290_v62 = vld [vmem:[#allocation2 + $0x44] sm:$0x1]  ;;  %v6454_v8 = vshrl.u32 %v6289_v13, 16  ;;  %v6457_v19 = vshll.u32 %v6289_v13, 16  ;;  %v8896_v23 = vrot.slane %v6289_v13, 9  ;;  %v6545_v10 = vunpack.c.l.b16 %v6289_v13 }
 0x882   : > { %v6404_v56 = vsel %vm9671_vm11, %v6399_v52, %v6403_v33  ;;  %v6471_v53 = vrot.slane %v6290_v62, 5  ;;  %v6492_v28 = vsel %vm9626_vm10, %v8897_v32, %v6491_v46  ;;  %v6463_v34 = vshll.u32 %v6290_v62, 16  ;;  %v9153_v21 = vld [vmem:[%s13064_s11] sm:$0xff] }
 0x883   : > { %v6512_v27 = vunpack.c.l.b16 %v6404_v56  ;;  %v6456_v59 = vrot.slane %v6454_v8, 4  ;;  %v6459_v4 = vrot.slane %v6457_v19, 5  ;;  %v6604_v50 = vunpack.c.l.b16 %v6492_v28 }
 0x884   : > { %v6472_v51 = vsel %vm9626_vm10, %v8896_v23, %v6471_v53  ;;  %v6465_v29 = vrot.slane %v6463_v34, 5  ;;  %v6549_v11 = vpack.c.b16 %v6545_v10, %v6500_v38  ;;  %v6481_v30 = vrot.slane %v6480_v48, 4 }
 0x885   : > { %v6516_v14 = vpack.c.b16 %v6512_v27, %v6511_v3  ;;  %v6460_v17 = vor.u32 %v6459_v4, %v6456_v59  ;;  %v6571_v2 = vunpack.c.l.b16 %v6472_v51  ;;  %v9157_v3 = vld [vmem:[%s13064_s11 + $0x20] sm:$0xff]  ;;  %v6585_v44 = vpack.c.b16 %v6584_v36, %v6545_v10 }
 0x886   : > { %6761 = vmatpush.bf16.msra.mxu1 %v9157_v3  ;;  %v6486_v61 = vsel %vm9671_vm11, %v6481_v30, %v6485_v22 }
 0x887   : > { %v6461_v58 = vrot.slane %v6460_v17, 4  ;;  %v6605_v24 = vpack.c.b16 %v6604_v50, %v6571_v2  ;;  %v6575_v43 = vpack.c.b16 %v6571_v2, %v6532_v26  ;;  %v6594_v6 = vunpack.c.l.b16 %v6486_v61  ;;  %v9154_v26 = vld [vmem:[%s13064_s11 + $0x8] sm:$0xff] }
 0x888   : > { %6580 = vrot.lane.b32.xlu1 %v6574_v16, %s13149_s25  ;;  %6600 = vrot.lane.b32.xlu0 %v6516_v14, %s13150_s2 }
 0x889   : > { %6590 = vrot.lane.b32.xlu2 %v12394_v45, %s13143_s27  ;;  %v6466_v49 = vsel %vm9671_vm11, %v6461_v58, %v6465_v29 }
 0x88a   : > { %v6558_v57 = vunpack.c.l.b16 %v6466_v49  ;;  %6762 = vmatpush.bf16.msra.mxu1 %v9156_v15 }
 0x88c   : > { %v6562_v18 = vpack.c.b16 %v6558_v57, %v6512_v27  ;;  %v6595_v35 = vpack.c.b16 %v6594_v6, %v6558_v57 }
 0x88e   : > { %6763 = vmatpush.bf16.msra.mxu1 %v9155_v55 }
 0x890   : > { %6523 = vrot.lane.b32.xlu1 %v6516_v14, %s13153_s26  ;;  %6556 = vrot.lane.b32.xlu0 %v6549_v11, %s13147_s29 }
 0x891   : > { %6543 = vrot.lane.b32.xlu2 %v6536_v54, %s13144_s0  ;;  %8937 = vmatmul.msk.bf16.gmra.mxu3 %vm1198_vm12, %v6605_v24 }
 0x892   : > { %6764 = vmatpush.bf16.msra.mxu1 %v9154_v26 }
 0x896   : > { %6765 = vmatpush.bf16.msra.mxu1 %v9153_v21 }
 0x898   : > { %6569 = vrot.lane.b32.xlu1 %v6562_v18, %s13148_s24  ;;  %6592 = vrot.lane.b32.xlu0 %v6585_v44, %s13143_s27 }
 0x899   : > { %6582 = vrot.lane.b32.xlu2 %v6575_v43, %s13149_s25 }
 0x8a0   : > { %6602 = vrot.lane.b32.xlu1 %v6595_v35, %s13150_s2 }
 0x8ab   : > { %v6538_v54 = vpop.permute.xlu2 %6537 }
 0x8b3   : > { %v6577_v5 = vpop.permute.xlu2 %6576 }
 0x8c2   : > { %v6520_v13 = vpop.permute.xlu2 %6519 }
 0x8c7   : > { %v6551_v60 = vpop.permute.xlu0 %6550 }
 0x8ca   : > { %v6518_v52 = vpop.permute.xlu1 %6517  ;;  %v6566_v46 = vpop.permute.xlu2 %6565 }
 0x8cb   : > { %v6608_v62 = vsel %vm1198_vm12, %v12369_v0, %v6518_v52  ;;  %v6611_v0 = vsel %vm1198_vm12, %v12264_v41, %v6520_v13 }
 0x8cc   : > { %v6619_v19 = vsel %vm1211_vm13, %v6608_v62, %v6538_v54 }
 0x8cd   : > { %v6627_v32 = vsel %vm1220_vm14, %v6619_v19, %v6551_v60 }
 0x8cf   : > { %v6587_v33 = vpop.permute.xlu0 %6586 }
 0x8d2   : > { %v6564_v40 = vpop.permute.xlu1 %6563 }
 0x8d3   : > { %v6635_v9 = vsel %vm1229_vm15, %v6627_v32, %v6564_v40  ;;  %v6599_v53 = vpop.permute.xlu2 %6598 }
 0x8d4   : > { %v6643_v38 = vsel %vm1238_vm0, %v6635_v9, %v6577_v5 }
 0x8d5   : > { %v6651_v4 = vsel %vm1247_vm1, %v6643_v38, %v6587_v33  ;;  %v6912_v38 = vld [vmem:[#allocation2 + $0x8] sm:$0xf] }
 0x8d7   : > { %v6540_v8 = vpop.permute.xlu0 %6539 }
 0x8d8   : > { %v6621_v14 = vsel %vm1211_vm13, %v6611_v0, %v6540_v8  ;;  %v6961_v0 = vld [vmem:[#allocation2 + $0x4] sm:$0x1] }
 0x8da   : > { %v6553_v56 = vpop.permute.xlu1 %6552 }
 0x8db   : > { %v6629_v17 = vsel %vm1220_vm14, %v6621_v14, %v6553_v56  ;;  %v6555_v51 = vpop.permute.xlu2 %6554 }
 0x8dc   : > { %v6637_v31 = vsel %vm1229_vm15, %v6629_v17, %v6566_v46 }
 0x8df   : > { %v6579_v27 = vpop.permute.xlu0 %6578 }
 0x8e0   : > { %v6645_v47 = vsel %vm1238_vm0, %v6637_v31, %v6579_v27  ;;  %v6915_v27 = vld [vmem:[#allocation2 + $0xc] sm:$0x1] }
 0x8e2   : > { %v6597_v59 = vpop.permute.xlu1 %6596 }
 0x8e3   : > { %v6659_v23 = vsel %vm1256_vm2, %v6651_v4, %v6597_v59  ;;  %v6591_v63 = vpop.permute.xlu2 %6590  ;;  %v12476_v59 = vld [vmem:[#allocation2] sm:$0xf] }
 0x8e4   : > { %6766 = vmatmul.bf16.vlgmr.msra.gmra.mxu1 %v6659_v23  ;;  %v6796_v55 = vpop.f32.mrf.mxu3  ;;  %v6981_v17 = vshrl.u32 %v12476_v59, 16 }
 0x8ea   : > { %v6589_v16 = vpop.permute.xlu1 %6588  ;;  %v6522_v28 = vpop.permute.xlu0 %6521 }
 0x8eb   : > { %v6653_v34 = vsel %vm1247_vm1, %v6645_v47, %v6589_v16  ;;  %v6614_v41 = vsel %vm1198_vm12, %v12340_v7, %v6522_v28  ;;  %v6544_v57 = vpop.permute.xlu2 %6543  ;;  %v8938_v47 = vrot.slane %v12476_v59, 9 }
 0x8ec   : > { %v6662_v2 = vsel %vm1256_vm2, %v6653_v34, %v6599_v53  ;;  %v6798_v26 = vpop.f32.mrf.mxu3  ;;  %v6984_v34 = vshll.u32 %v12476_v59, 16 }
 0x8f2   : > { %v6542_v10 = vpop.permute.xlu1 %6541  ;;  %v6568_v50 = vpop.permute.xlu0 %6567 }
 0x8f3   : > { %v6623_v58 = vsel %vm1211_vm13, %v6614_v41, %v6542_v10  ;;  %v6583_v44 = vpop.permute.xlu2 %6582  ;;  %v6983_v41 = vrot.slane %v6981_v17, 4 }
 0x8f4   : > { %6771 = vmatmul.bf16.gmra.mxu1 %v6662_v2  ;;  %v6631_v25 = vsel %vm1220_vm14, %v6623_v58, %v6555_v51  ;;  %v6801_v33 = vpop.f32.mrf.mxu3  ;;  %v7110_v51 = vrot.slane %v6961_v0, 5  ;;  %v6986_v58 = vrot.slane %v6984_v34, 5 }
 0x8f5   : > { %v6639_v29 = vsel %vm1229_vm15, %v6631_v25, %v6568_v50  ;;  %v6990_v25 = vshll.u32 %v6961_v0, 16 }
 0x8fa   : > { %v6581_v37 = vpop.permute.xlu1 %6580  ;;  %v6601_v24 = vpop.permute.xlu0 %6600 }
 0x8fb   : > { %v6647_v11 = vsel %vm1238_vm0, %v6639_v29, %v6581_v37 }
 0x8fc   : > { %v6655_v49 = vsel %vm1247_vm1, %v6647_v11, %v6591_v63  ;;  %v6803_v31 = vpop.f32.mrf.mxu3  ;;  %v6918_v11 = vld [vmem:[#allocation2 + $0x10] sm:$0xf] }
 0x8fd   : > { %v6665_v20 = vsel %vm1256_vm2, %v6655_v49, %v6601_v24  ;;  %v6921_v24 = vld [vmem:[#allocation2 + $0x14] sm:$0x1]  ;;  %v6987_v49 = vor.u32 %v6986_v58, %v6983_v41 }
 0x902   : > { %v6524_v48 = vpop.permute.xlu1 %6523  ;;  %v6557_v36 = vpop.permute.xlu0 %6556 }
 0x903   : > { %v6617_v7 = vsel %vm1198_vm12, %v12394_v45, %v6524_v48  ;;  %v12472_v45 = vld [vmem:[%s13068_s15] ss:$0 sm:$0xff] }
 0x904   : > { %6776 = vmatmul.bf16.gmra.mxu1 %v6665_v20  ;;  %v6625_v30 = vsel %vm1211_vm13, %v6617_v7, %v6544_v57 }
 0x905   : > { %v6633_v3 = vsel %vm1220_vm14, %v6625_v30, %v6557_v36  ;;  %v7111_v36 = vsel %vm9626_vm10, %v8938_v47, %v7110_v51 }
 0x90a   : > { %v6570_v22 = vpop.permute.xlu1 %6569  ;;  %v6593_v61 = vpop.permute.xlu0 %6592 }
 0x90b   : > { %v6641_v18 = vsel %vm1229_vm15, %v6633_v3, %v6570_v22 }
 0x90c   : > { %v6649_v43 = vsel %vm1238_vm0, %v6641_v18, %v6583_v44  ;;  %v6992_v18 = vrot.slane %v6990_v25, 5 }
 0x90d   : > { %v6657_v6 = vsel %vm1247_vm1, %v6649_v43, %v6593_v61 }
 0x912   : > { %v6603_v35 = vpop.permute.xlu1 %6602 }
 0x913   : > { %v6668_v15 = vsel %vm1256_vm2, %v6657_v6, %v6603_v35  ;;  %v6988_v6 = vrot.slane %v6987_v49, 4  ;;  %v9170_v35 = vld [vmem:[%s13065_s12 + $0x40] sm:$0xff] }
 0x914   : > { %6781 = vmatmul.bf16.gmra.mxu1 %v6668_v15  ;;  %7481 = vmatpush.bf16.msrb.mxu2 %v9170_v35 }
 0x961   : > { %v6767_v21 = vpop.f32.mrf.mxu1 }
 0x962   : > { %v6768_v54 = vadd.f32 %v12472_v45, %v6767_v21 }
 0x964   : > { %v6797_v60 = vadd.f32 %v6796_v55, %v6768_v54  ;;  %v7212_v55 = vunpack.c.l.b16 %v7111_v36 }
 0x966   : > { %v6816_v5 = vmax.f32 %v6797_v60, 0.0 }
 0x968   : > { %v6824_v52 = vpack.c.bf16 %v6816_v5, %v6816_v5 }
 0x969   : > { %v6769_v13 = vpop.f32.mrf.mxu1 }
 0x96a   : > { %v6833_v40 = vshrl.u32 %v6824_v52, 16  ;;  %v6770_v62 = vadd.f32 %v12472_v45, %v6769_v13  ;;  %v6836_v19 = vshll.u32 %v6824_v52, 16 }
 0x96c   : > { %v6835_v8 = vrot.slane %v6833_v40, 7  ;;  %v6799_v56 = vadd.f32 %v6798_v26, %v6770_v62 }
 0x96e   : > { %v6838_v32 = vor.u32 %v6836_v19, %v6835_v8  ;;  %v6839_v46 = vrot.slane %v6835_v8, 4  ;;  %v6817_v9 = vmax.f32 %v6799_v56, 0.0 }
 0x970   : > { %v6913_v4 = vsel %vm9562_vm4, %v6838_v32, %v6912_v38  ;;  %v6916_v23 = vsel %vm9594_vm7, %v6839_v46, %v6915_v27  ;;  %v6825_v53 = vpack.c.bf16 %v6817_v9, %v6817_v9  ;;  %v6993_v32 = vsel %vm9671_vm11, %v6988_v6, %v6992_v18  ;;  %v6924_v46 = vld [vmem:[#allocation2 + $0x18] sm:$0xf]  ;;  %v6927_v9 = vld [vmem:[#allocation2 + $0x1c] sm:$0x1] }
 0x971   : > { %6914 = vst [vmem:[#allocation2 + $0x8] sm:$0xf] %v6913_v4  ;;  %v6772_v14 = vpop.f32.mrf.mxu1  ;;  %v7192_v47 = vunpack.c.l.b16 %v6993_v32 }
 0x972   : > { %6917 = vst [vmem:[#allocation2 + $0xc] sm:$0x1] %v6916_v23  ;;  %v6841_v16 = vshrl.u32 %v6825_v53, 16  ;;  %v6773_v28 = vadd.f32 %v12472_v45, %v6772_v14  ;;  %v6844_v50 = vshll.u32 %v6825_v53, 16 }
 0x974   : > { %v6843_v10 = vrot.slane %v6841_v16, 7  ;;  %v6802_v2 = vadd.f32 %v6801_v33, %v6773_v28  ;;  %v6806_v33 = vpop.f32.mrf.mxu3 }
 0x976   : > { %v6846_v63 = vor.u32 %v6844_v50, %v6843_v10  ;;  %v6847_v37 = vrot.slane %v6843_v10, 4  ;;  %v6818_v29 = vmax.f32 %v6802_v2, 0.0 }
 0x978   : > { %v6919_v48 = vsel %vm9562_vm4, %v6846_v63, %v6918_v11  ;;  %v6922_v20 = vsel %vm9594_vm7, %v6847_v37, %v6921_v24  ;;  %v6826_v57 = vpack.c.bf16 %v6818_v29, %v6818_v29  ;;  %v12490_v7 = vld [vmem:[#allocation2 + $0x8] sm:$0xf] }
 0x979   : > { %6920 = vst [vmem:[#allocation2 + $0x10] sm:$0xf] %v6919_v48  ;;  %v6774_v30 = vpop.f32.mrf.mxu1  ;;  %v6963_v22 = vld [vmem:[#allocation2 + $0xc] sm:$0x1]  ;;  %v8939_v3 = vrot.slane %v12490_v7, 9  ;;  %v6995_v26 = vshrl.u32 %v12490_v7, 16  ;;  %v7181_v27 = vunpack.c.l.b16 %v12490_v7 }
 0x97a   : > { %6923 = vst [vmem:[#allocation2 + $0x14] sm:$0x1] %v6922_v20  ;;  %v6849_v44 = vshrl.u32 %v6826_v57, 16  ;;  %v6775_v43 = vadd.f32 %v12472_v45, %v6774_v30  ;;  %v7114_v61 = vrot.slane %v6963_v22, 5  ;;  %v6852_v15 = vshll.u32 %v6826_v57, 16 }
 0x97b   : > { %v6998_v21 = vshll.u32 %v12490_v7, 16  ;;  %v7004_v52 = vshll.u32 %v6963_v22, 16  ;;  %v6997_v40 = vrot.slane %v6995_v26, 4 }
 0x97c   : > { %v6851_v54 = vrot.slane %v6849_v44, 7  ;;  %v6804_v60 = vadd.f32 %v6803_v31, %v6775_v43  ;;  %v7115_v5 = vsel %vm9626_vm10, %v8939_v3, %v7114_v61  ;;  %v6808_v44 = vpop.f32.mrf.mxu3  ;;  %v6930_v43 = vld [vmem:[#allocation2 + $0x20] sm:$0xf]  ;;  %v6933_v61 = vld [vmem:[#allocation2 + $0x24] sm:$0x1] }
 0x97d   : > { %v7213_v13 = vunpack.c.l.b16 %v7115_v5  ;;  %v7000_v62 = vrot.slane %v6998_v21, 5  ;;  %v7006_v16 = vrot.slane %v7004_v52, 5 }
 0x97e   : > { %v6854_v8 = vor.u32 %v6852_v15, %v6851_v54  ;;  %v6855_v19 = vrot.slane %v6851_v54, 4  ;;  %v6819_v56 = vmax.f32 %v6804_v60, 0.0 }
 0x97f   : > { %v7220_v38 = vpack.c.b16 %v7213_v13, %v7212_v55  ;;  %v7001_v4 = vor.u32 %v7000_v62, %v6997_v40 }
 0x980   : > { %v6925_v23 = vsel %vm9562_vm4, %v6854_v8, %v6924_v46  ;;  %v6928_v53 = vsel %vm9594_vm7, %v6855_v19, %v6927_v9  ;;  %v6827_v0 = vpack.c.bf16 %v6819_v56, %v6819_v56  ;;  %v6964_v14 = vld [vmem:[#allocation2 + $0x10] sm:$0xf] }
 0x981   : > { %6926 = vst [vmem:[#allocation2 + $0x18] sm:$0xf] %v6925_v23  ;;  %7224 = vrot.lane.b32.xlu0 %v7220_v38, %s13144_s0  ;;  %v6777_v28 = vpop.f32.mrf.mxu1  ;;  %v7182_v17 = vunpack.c.l.b16 %v6964_v14  ;;  %v7002_v31 = vrot.slane %v7001_v4, 4  ;;  %v6965_v51 = vld [vmem:[#allocation2 + $0x14] sm:$0x1]  ;;  %v8940_v34 = vrot.slane %v6964_v14, 9 }
 0x982   : > { %6929 = vst [vmem:[#allocation2 + $0x1c] sm:$0x1] %v6928_v53  ;;  %v6857_v10 = vshrl.u32 %v6827_v0, 16  ;;  %v6860_v50 = vshll.u32 %v6827_v0, 16  ;;  %v6778_v2 = vadd.f32 %v12472_v45, %v6777_v28  ;;  %v7118_v41 = vrot.slane %v6965_v51, 5 }
 0x983   : > { %v7233_v58 = vpack.c.b16 %v7182_v17, %v7181_v27  ;;  %v7007_v25 = vsel %vm9671_vm11, %v7002_v31, %v7006_v16  ;;  %v7009_v63 = vshrl.u32 %v6964_v14, 16  ;;  %v7012_v37 = vshll.u32 %v6964_v14, 16 }
 0x984   : > { %v6859_v29 = vrot.slane %v6857_v10, 7  ;;  %v6807_v11 = vadd.f32 %v6806_v33, %v6778_v2  ;;  %v7193_v24 = vunpack.c.l.b16 %v7007_v25  ;;  %v7119_v49 = vsel %vm9626_vm10, %v8940_v34, %v7118_v41  ;;  %v6936_v34 = vld [vmem:[#allocation2 + $0x28] sm:$0xf]  ;;  %v6939_v10 = vld [vmem:[#allocation2 + $0x2c] sm:$0x1] }
 0x985   : > { %7237 = vrot.lane.b32.xlu1 %v7233_v58, %s13147_s29  ;;  %v7214_v48 = vunpack.c.l.b16 %v7119_v49  ;;  %v7011_v20 = vrot.slane %v7009_v63, 4  ;;  %v7014_v57 = vrot.slane %v7012_v37, 5  ;;  %v7018_v36 = vshll.u32 %v6965_v51, 16 }
 0x986   : > { %v6862_v30 = vor.u32 %v6860_v50, %v6859_v29  ;;  %v6863_v22 = vrot.slane %v6859_v29, 4  ;;  %v6820_v3 = vmax.f32 %v6807_v11, 0.0  ;;  %v7200_v18 = vpack.c.b16 %v7193_v24, %v7192_v47  ;;  %v6811_v29 = vpop.f32.mrf.mxu3 }
 0x987   : > { %v7259_v6 = vpack.c.b16 %v7214_v48, %v7213_v13  ;;  %v7015_v35 = vor.u32 %v7014_v57, %v7011_v20  ;;  %v7020_v54 = vrot.slane %v7018_v36, 5 }
 0x988   : > { %v6931_v15 = vsel %vm9562_vm4, %v6862_v30, %v6930_v43  ;;  %v6934_v55 = vsel %vm9594_vm7, %v6863_v22, %v6933_v61  ;;  %v6828_v26 = vpack.c.bf16 %v6820_v3, %v6820_v3  ;;  %7204 = vrot.lane.b32.xlu2 %v7200_v18, %s13153_s26  ;;  %v6966_v21 = vld [vmem:[#allocation2 + $0x18] sm:$0xf] }
 0x989   : > { %6932 = vst [vmem:[#allocation2 + $0x20] sm:$0xf] %v6931_v15  ;;  %7263 = vrot.lane.b32.xlu0 %v7259_v6, %s13149_s25  ;;  %v6967_v60 = vld [vmem:[#allocation2 + $0x1c] sm:$0x1]  ;;  %v8941_v5 = vrot.slane %v6966_v21, 9  ;;  %v6779_v52 = vpop.f32.mrf.mxu1  ;;  %v7183_v33 = vunpack.c.l.b16 %v6966_v21  ;;  %v7016_v13 = vrot.slane %v7015_v35, 4 }
 0x98a   : > { %6935 = vst [vmem:[#allocation2 + $0x24] sm:$0x1] %v6934_v55  ;;  %v6865_v40 = vshrl.u32 %v6828_v26, 16  ;;  %v6868_v62 = vshll.u32 %v6828_v26, 16  ;;  %v7122_v8 = vrot.slane %v6967_v60, 5  ;;  %v6780_v19 = vadd.f32 %v12472_v45, %v6779_v52 }
 0x98b   : > { %v12526_v56 = vpack.c.b16 %v7183_v33, %v7182_v17  ;;  %v7021_v32 = vsel %vm9671_vm11, %v7016_v13, %v7020_v54  ;;  %v7023_v46 = vshrl.u32 %v6966_v21, 16  ;;  %v7026_v9 = vshll.u32 %v6966_v21, 16  ;;  %v6942_v13 = vld [vmem:[#allocation2 + $0x30] sm:$0xf] }
 0x98c   : > { %v6867_v38 = vrot.slane %v6865_v40, 7  ;;  %v12532_v4 = vsel %vm9626_vm10, %v8941_v5, %v7122_v8  ;;  %v6809_v23 = vadd.f32 %v6808_v44, %v6780_v19  ;;  %v7194_v53 = vunpack.c.l.b16 %v7021_v32  ;;  %v6945_v40 = vld [vmem:[#allocation2 + $0x34] sm:$0x1] }
 0x98d   : > { %v7215_v0 = vunpack.c.l.b16 %v12532_v4  ;;  %7273 = vrot.lane.b32.xlu1 %v12526_v56, %s13143_s27  ;;  %v7025_v14 = vrot.slane %v7023_v46, 4  ;;  %v7028_v16 = vrot.slane %v7026_v9, 5  ;;  %v7032_v28 = vshll.u32 %v6967_v60, 16 }
 0x98e   : > { %v6870_v17 = vor.u32 %v6868_v62, %v6867_v38  ;;  %v6871_v31 = vrot.slane %v6867_v38, 4  ;;  %v6821_v47 = vmax.f32 %v6809_v23, 0.0  ;;  %v7246_v51 = vpack.c.b16 %v7194_v53, %v7193_v24 }
 0x98f   : > { %v7221_v50 = vpack.c.b16 %v7215_v0, %v7214_v48  ;;  %v7029_v2 = vor.u32 %v7028_v16, %v7025_v14  ;;  %v7034_v37 = vrot.slane %v7032_v28, 5 }
 0x990   : > { %v6937_v41 = vsel %vm9562_vm4, %v6870_v17, %v6936_v34  ;;  %v6940_v58 = vsel %vm9594_vm7, %v6871_v31, %v6939_v10  ;;  %v6829_v25 = vpack.c.bf16 %v6821_v47, %v6821_v47  ;;  %7250 = vrot.lane.b32.xlu2 %v7246_v51, %s13148_s24  ;;  %v12544_v63 = vld [vmem:[#allocation2 + $0x20] sm:$0xf]  ;;  %v6813_v47 = vpop.f32.mrf.mxu3 }
 0x991   : > { %6938 = vst [vmem:[#allocation2 + $0x28] sm:$0xf] %v6937_v41  ;;  %8984 = vmatmul.msk.bf16.vlgmr.msrb.gmra.mxu2 %vm1198_vm12, %v7221_v50  ;;  %v6782_v11 = vpop.f32.mrf.mxu1  ;;  %v7184_v24 = vunpack.c.l.b16 %v12544_v63  ;;  %v7030_v49 = vrot.slane %v7029_v2, 4  ;;  %v6969_v48 = vld [vmem:[#allocation2 + $0x24] sm:$0x1]  ;;  %v8942_v20 = vrot.slane %v12544_v63, 9 }
 0x992   : > { %6941 = vst [vmem:[#allocation2 + $0x2c] sm:$0x1] %v6940_v58  ;;  %v6873_v57 = vshrl.u32 %v6829_v25, 16  ;;  %v6876_v36 = vshll.u32 %v6829_v25, 16  ;;  %v6783_v30 = vadd.f32 %v12472_v45, %v6782_v11  ;;  %v7126_v22 = vrot.slane %v6969_v48, 5 }
 0x993   : > { %v7234_v3 = vpack.c.b16 %v7184_v24, %v7183_v33  ;;  %v7035_v18 = vsel %vm9671_vm11, %v7030_v49, %v7034_v37  ;;  %v7037_v44 = vshrl.u32 %v12544_v63, 16  ;;  %v7040_v43 = vshll.u32 %v12544_v63, 16 }
 0x994   : > { %v6875_v61 = vrot.slane %v6873_v57, 7  ;;  %v6812_v6 = vadd.f32 %v6811_v29, %v6783_v30  ;;  %v7195_v35 = vunpack.c.l.b16 %v7035_v18  ;;  %v7127_v15 = vsel %vm9626_vm10, %v8942_v20, %v7126_v22  ;;  %v6948_v20 = vld [vmem:[#allocation2 + $0x38] sm:$0xf]  ;;  %v6951_v57 = vld [vmem:[#allocation2 + $0x3c] sm:$0x1] }
 0x995   : > { %7226 = vrot.lane.b32.xlu1 %v7221_v50, %s13144_s0  ;;  %v7216_v55 = vunpack.c.l.b16 %v7127_v15  ;;  %v7039_v26 = vrot.slane %v7037_v44, 4  ;;  %v7042_v21 = vrot.slane %v7040_v43, 5  ;;  %v7046_v54 = vshll.u32 %v6969_v48, 16 }
 0x996   : > { %v6878_v60 = vor.u32 %v6876_v36, %v6875_v61  ;;  %v6879_v5 = vrot.slane %v6875_v61, 4  ;;  %v6822_v52 = vmax.f32 %v6812_v6, 0.0  ;;  %v7201_v33 = vpack.c.b16 %v7195_v35, %v7194_v53 }
 0x997   : > { %v7043_v62 = vor.u32 %v7042_v21, %v7039_v26  ;;  %v7048_v46 = vrot.slane %v7046_v54, 5  ;;  %v7260_v17 = vpack.c.b16 %v7216_v55, %v7215_v0 }
 0x998   : > { %v6943_v8 = vsel %vm9562_vm4, %v6878_v60, %v6942_v13  ;;  %v6946_v19 = vsel %vm9594_vm7, %v6879_v5, %v6945_v40  ;;  %v6830_v32 = vpack.c.bf16 %v6822_v52, %v6822_v52  ;;  %7239 = vrot.lane.b32.xlu2 %v7234_v3, %s13147_s29  ;;  %7206 = vrot.lane.b32.xlu0 %v7201_v33, %s13153_s26  ;;  %v12565_v9 = vld [vmem:[#allocation2 + $0x28] sm:$0xf] }
 0x999   : > { %6944 = vst [vmem:[#allocation2 + $0x30] sm:$0xf] %v6943_v8  ;;  %v6784_v38 = vpop.f32.mrf.mxu1  ;;  %v7044_v23 = vrot.slane %v7043_v62, 4  ;;  %v6971_v53 = vld [vmem:[#allocation2 + $0x2c] sm:$0x1]  ;;  %v8943_v14 = vrot.slane %v12565_v9, 9  ;;  %v7185_v61 = vunpack.c.l.b16 %v12565_v9 }
 0x99a   : > { %6947 = vst [vmem:[#allocation2 + $0x34] sm:$0x1] %v6946_v19  ;;  %v6881_v16 = vshrl.u32 %v6830_v32, 16  ;;  %v6785_v28 = vadd.f32 %v12472_v45, %v6784_v38  ;;  %v7130_v31 = vrot.slane %v6971_v53, 5  ;;  %v6884_v51 = vshll.u32 %v6830_v32, 16 }
 0x99b   : > { %v7049_v34 = vsel %vm9671_vm11, %v7044_v23, %v7048_v46  ;;  %v7051_v10 = vshrl.u32 %v12565_v9, 16  ;;  %v7054_v50 = vshll.u32 %v12565_v9, 16  ;;  %v7060_v37 = vshll.u32 %v6971_v53, 16  ;;  %v6954_v23 = vld [vmem:[#allocation2 + $0x40] sm:$0xf] }
 0x99c   : > { %v6883_v2 = vrot.slane %v6881_v16, 7  ;;  %v6814_v41 = vadd.f32 %v6813_v47, %v6785_v28  ;;  %v7196_v58 = vunpack.c.l.b16 %v7049_v34  ;;  %v12577_v25 = vsel %vm9626_vm10, %v8943_v14, %v7130_v31  ;;  %v6957_v53 = vld [vmem:[#allocation2 + $0x44] sm:$0x1] }
 0x99d   : > { %7265 = vrot.lane.b32.xlu1 %v7260_v17, %s13149_s25  ;;  %v7217_v45 = vunpack.c.l.b16 %v12577_v25  ;;  %v7053_v4 = vrot.slane %v7051_v10, 4  ;;  %v7056_v0 = vrot.slane %v7054_v50, 5  ;;  %v7062_v44 = vrot.slane %v7060_v37, 5  ;;  %v9169_v10 = vld [vmem:[%s13065_s12 + $0x38] sm:$0xff] }
 0x99e   : > { %v6886_v29 = vor.u32 %v6884_v51, %v6883_v2  ;;  %v6887_v11 = vrot.slane %v6883_v2, 4  ;;  %v6823_v49 = vmax.f32 %v6814_v41, 0.0  ;;  %v7247_v48 = vpack.c.b16 %v7196_v58, %v7195_v35  ;;  %7445 = vmatpush.bf16.msra.mxu0 %v9169_v10  ;;  %v9166_v10 = vld [vmem:[%s13065_s12 + $0x20] sm:$0xff] }
 0x99f   : > { %v12583_v36 = vpack.c.b16 %v7217_v45, %v7216_v55  ;;  %v7057_v30 = vor.u32 %v7056_v0, %v7053_v4  ;;  %v12602_v40 = vpack.c.b16 %v7185_v61, %v7184_v24  ;;  %v7180_v19 = vunpack.c.l.b16 %v12476_v59 }
 0x9a0   : > { %v6949_v22 = vsel %vm9562_vm4, %v6886_v29, %v6948_v20  ;;  %v6952_v3 = vsel %vm9594_vm7, %v6887_v11, %v6951_v57  ;;  %v6831_v18 = vpack.c.bf16 %v6823_v49, %v6823_v49  ;;  %7252 = vrot.lane.b32.xlu0 %v7247_v48, %s13148_s24  ;;  %7283 = vrot.lane.b32.xlu2 %v7201_v33, %s13150_s2  ;;  %v12591_v43 = vld [vmem:[#allocation2 + $0x30] sm:$0xf]  ;;  %v6978_v57 = vld [vmem:[#allocation2 + $0x48] sm:$0xf] }
 0x9a1   : > { %6950 = vst [vmem:[#allocation2 + $0x38] sm:$0xf] %v6949_v22  ;;  %8985 = vmatmul.msk.bf16.gmra.mxu2 %vm1198_vm12, %v12583_v36  ;;  %v7058_v6 = vrot.slane %v7057_v30, 4  ;;  %v6973_v35 = vld [vmem:[#allocation2 + $0x34] sm:$0x1]  ;;  %v7065_v15 = vshrl.u32 %v12591_v43, 16  ;;  %v12608_v14 = vpack.c.b16 %v7181_v27, %v7180_v19  ;;  %v7186_v2 = vunpack.c.l.b16 %v12591_v43 }
 0x9a2   : > { %6953 = vst [vmem:[#allocation2 + $0x3c] sm:$0x1] %v6952_v3  ;;  %v6889_v55 = vshrl.u32 %v6831_v18, 16  ;;  %v7068_v26 = vshll.u32 %v12591_v43, 16  ;;  %v6892_v21 = vshll.u32 %v6831_v18, 16  ;;  %v7074_v13 = vshll.u32 %v6973_v35, 16 }
 0x9a3   : > { %v7063_v54 = vsel %vm9671_vm11, %v7058_v6, %v7062_v44  ;;  %v7067_v60 = vrot.slane %v7065_v15, 4  ;;  %v8944_v62 = vrot.slane %v12591_v43, 9  ;;  %v7134_v8 = vrot.slane %v6973_v35, 5  ;;  %v6979_v30 = vld [vmem:[#allocation2 + $0x4c] sm:$0x1]  ;;  %v9168_v44 = vld [vmem:[%s13065_s12 + $0x30] sm:$0xff] }
 0x9a4   : > { %v6891_v5 = vrot.slane %v6889_v55, 7  ;;  %v7197_v52 = vunpack.c.l.b16 %v7063_v54  ;;  %v7070_v33 = vrot.slane %v7068_v26, 5  ;;  %v7076_v16 = vrot.slane %v7074_v13, 5  ;;  %7446 = vmatpush.bf16.msra.mxu0 %v9168_v44  ;;  %v9167_v55 = vld [vmem:[%s13065_s12 + $0x28] sm:$0xff] }
 0x9a5   : > { %v7135_v47 = vsel %vm9626_vm10, %v8944_v62, %v7134_v8  ;;  %v7235_v48 = vpack.c.b16 %v7186_v2, %v7185_v61  ;;  %v7178_v15 = vrot.slane %v6979_v30, 5 }
 0x9a6   : > { %v6894_v32 = vor.u32 %v6892_v21, %v6891_v5  ;;  %v6895_v46 = vrot.slane %v6891_v5, 4  ;;  %v7202_v9 = vpack.c.b16 %v7197_v52, %v7196_v58  ;;  %v7071_v38 = vor.u32 %v7070_v33, %v7067_v60 }
 0x9a7   : > { %v7218_v29 = vunpack.c.l.b16 %v7135_v47  ;;  %v7271_v47 = vunpack.c.l.b16 %v6978_v57 }
 0x9a8   : > { %v6955_v63 = vsel %vm9562_vm4, %v6894_v32, %v6954_v23  ;;  %v6958_v24 = vsel %vm9594_vm7, %v6895_v46, %v6957_v53  ;;  %7275 = vrot.lane.b32.xlu2 %v12602_v40, %s13143_s27  ;;  %7208 = vrot.lane.b32.xlu1 %v7202_v9, %s13153_s26  ;;  %v7072_v59 = vrot.slane %v7071_v38, 4  ;;  %v12617_v28 = vld [vmem:[#allocation2 + $0x38] sm:$0xf]  ;;  %v7161_v32 = vshrl.u32 %v6978_v57, 16 }
 0x9a9   : > { %6956 = vst [vmem:[#allocation2 + $0x40] sm:$0xf] %v6955_v63  ;;  %7285 = vrot.lane.b32.xlu0 %v7202_v9, %s13150_s2  ;;  %v6975_v7 = vld [vmem:[#allocation2 + $0x3c] sm:$0x1]  ;;  %v8945_v27 = vrot.slane %v12617_v28, 9  ;;  %v7079_v17 = vshrl.u32 %v12617_v28, 16  ;;  %v7187_v26 = vunpack.c.l.b16 %v12617_v28  ;;  %v7261_v13 = vpack.c.b16 %v7218_v29, %v7217_v45  ;;  %7447 = vmatpush.bf16.msra.mxu0 %v9167_v55 }
 0x9aa   : > { %6959 = vst [vmem:[#allocation2 + $0x44] sm:$0x1] %v6958_v24  ;;  %v7077_v31 = vsel %vm9671_vm11, %v7072_v59, %v7076_v16  ;;  %v7138_v51 = vrot.slane %v6975_v7, 5  ;;  %v7082_v34 = vshll.u32 %v12617_v28, 16  ;;  %v7088_v0 = vshll.u32 %v6975_v7, 16 }
 0x9ab   : > { %v7198_v50 = vunpack.c.l.b16 %v7077_v31  ;;  %v7081_v41 = vrot.slane %v7079_v17, 4  ;;  %v12656_v8 = vpack.c.b16 %v7187_v26, %v7186_v2  ;;  %v7164_v46 = vshll.u32 %v6978_v57, 16 }
 0x9ac   : > { %v12633_v58 = vsel %vm9626_vm10, %v8945_v27, %v7138_v51  ;;  %v7084_v4 = vrot.slane %v7082_v34, 5  ;;  %v7090_v3 = vrot.slane %v7088_v0, 5  ;;  %v7163_v63 = vrot.slane %v7161_v32, 4 }
 0x9ad   : > { %v7248_v37 = vpack.c.b16 %v7198_v50, %v7197_v52  ;;  %v7219_v11 = vunpack.c.l.b16 %v12633_v58  ;;  %v7166_v24 = vrot.slane %v7164_v46, 5  ;;  %v7170_v17 = vshll.u32 %v6979_v30, 16  ;;  %7448 = vmatpush.bf16.msra.mxu0 %v9166_v10  ;;  %v9164_v58 = vld [vmem:[%s13065_s12 + $0x10] sm:$0xff] }
 0x9ae   : > { %v7085_v49 = vor.u32 %v7084_v4, %v7081_v41 }
 0x9af   : > { %v7223_v20 = vpack.c.b16 %v7219_v11, %v7218_v29  ;;  %v7167_v27 = vor.u32 %v7166_v24, %v7163_v63  ;;  %v7172_v34 = vrot.slane %v7170_v17, 5 }
 0x9b0   : > { %7228 = vrot.lane.b32.xlu2 %v12583_v36, %s13144_s0  ;;  %7254 = vrot.lane.b32.xlu1 %v7248_v37, %s13148_s24  ;;  %v7086_v22 = vrot.slane %v7085_v49, 4  ;;  %v6976_v18 = vld [vmem:[#allocation2 + $0x40] sm:$0xf]  ;;  %v8947_v36 = vrot.slane %v6978_v57, 9  ;;  %v9165_v37 = vld [vmem:[%s13065_s12 + $0x18] sm:$0xff] }
 0x9b1   : > { %7241 = vrot.lane.b32.xlu0 %v7235_v48, %s13147_s29  ;;  %8986 = vmatmul.msk.bf16.gmra.mxu2 %vm1198_vm12, %v7223_v20  ;;  %v6977_v43 = vld [vmem:[#allocation2 + $0x44] sm:$0x1]  ;;  %v7141_v61 = vshrl.u32 %v6976_v18, 16  ;;  %v7144_v6 = vshll.u32 %v6976_v18, 16  ;;  %v8946_v5 = vrot.slane %v6976_v18, 9  ;;  %v7232_v45 = vunpack.c.l.b16 %v6976_v18 }
 0x9b2   : > { %v7091_v35 = vsel %vm9671_vm11, %v7086_v22, %v7090_v3  ;;  %v7158_v52 = vrot.slane %v6977_v43, 5  ;;  %v7179_v62 = vsel %vm9626_vm10, %v8947_v36, %v7178_v15  ;;  %v7150_v25 = vshll.u32 %v6977_v43, 16  ;;  %7449 = vmatpush.bf16.msra.mxu0 %v9165_v37  ;;  %v9162_v49 = vld [vmem:[%s13065_s12] sm:$0xff] }
 0x9b3   : > { %v7199_v21 = vunpack.c.l.b16 %v7091_v35  ;;  %v7143_v54 = vrot.slane %v7141_v61, 4  ;;  %v7146_v60 = vrot.slane %v7144_v6, 5  ;;  %v7291_v38 = vunpack.c.l.b16 %v7179_v62 }
 0x9b4   : > { %v7159_v9 = vsel %vm9626_vm10, %v8946_v5, %v7158_v52  ;;  %v7152_v59 = vrot.slane %v7150_v25, 5  ;;  %v7236_v16 = vpack.c.b16 %v7232_v45, %v7187_v26  ;;  %v7168_v51 = vrot.slane %v7167_v27, 4 }
 0x9b5   : > { %v7203_v33 = vpack.c.b16 %v7199_v21, %v7198_v50  ;;  %v7147_v19 = vor.u32 %v7146_v60, %v7143_v54  ;;  %v7258_v23 = vunpack.c.l.b16 %v7159_v9  ;;  %v7272_v2 = vpack.c.b16 %v7271_v47, %v7232_v45 }
 0x9b6   : > { %v7173_v4 = vsel %vm9671_vm11, %v7168_v51, %v7172_v34  ;;  %7450 = vmatpush.bf16.msra.mxu0 %v9164_v58 }
 0x9b7   : > { %v7148_v53 = vrot.slane %v7147_v19, 4  ;;  %v7292_v28 = vpack.c.b16 %v7291_v38, %v7258_v23  ;;  %v7262_v41 = vpack.c.b16 %v7258_v23, %v7219_v11  ;;  %v7281_v0 = vunpack.c.l.b16 %v7173_v4  ;;  %v9163_v11 = vld [vmem:[%s13065_s12 + $0x8] sm:$0xff] }
 0x9b8   : > { %7267 = vrot.lane.b32.xlu2 %v7261_v13, %s13149_s25  ;;  %7287 = vrot.lane.b32.xlu1 %v7203_v33, %s13150_s2 }
 0x9b9   : > { %7277 = vrot.lane.b32.xlu0 %v12656_v8, %s13143_s27  ;;  %v7153_v7 = vsel %vm9671_vm11, %v7148_v53, %v7152_v59 }
 0x9ba   : > { %v7245_v31 = vunpack.c.l.b16 %v7153_v7  ;;  %7451 = vmatpush.bf16.msra.mxu0 %v9163_v11 }
 0x9bc   : > { %v7249_v50 = vpack.c.b16 %v7245_v31, %v7199_v21  ;;  %v7282_v29 = vpack.c.b16 %v7281_v0, %v7245_v31 }
 0x9be   : > { %7452 = vmatpush.bf16.msra.mxu0 %v9162_v49 }
 0x9c0   : > { %7210 = vrot.lane.b32.xlu2 %v7203_v33, %s13153_s26  ;;  %7243 = vrot.lane.b32.xlu1 %v7236_v16, %s13147_s29 }
 0x9c1   : > { %7230 = vrot.lane.b32.xlu0 %v7223_v20, %s13144_s0  ;;  %8987 = vmatmul.msk.bf16.gmra.mxu2 %vm1198_vm12, %v7292_v28 }
 0x9c8   : > { %7256 = vrot.lane.b32.xlu2 %v7249_v50, %s13148_s24  ;;  %7279 = vrot.lane.b32.xlu1 %v7272_v2, %s13143_s27 }
 0x9c9   : > { %7269 = vrot.lane.b32.xlu0 %v7262_v41, %s13149_s25 }
 0x9d0   : > { %7289 = vrot.lane.b32.xlu2 %v7282_v29, %s13150_s2 }
 0x9e2   : > { %v7205_v48 = vpop.permute.xlu2 %7204 }
 0x9e3   : > { %v7295_v22 = vsel %vm1198_vm12, %v12608_v14, %v7205_v48 }
 0x9ea   : > { %v7251_v20 = vpop.permute.xlu2 %7250 }
 0x9f2   : > { %v7240_v30 = vpop.permute.xlu2 %7239 }
 0x9f3   : > { %v7225_v57 = vpop.permute.xlu0 %7224 }
 0x9f4   : > { %v7306_v18 = vsel %vm1211_vm13, %v7295_v22, %v7225_v57 }
 0x9f7   : > { %v7238_v3 = vpop.permute.xlu1 %7237 }
 0x9f8   : > { %v7314_v44 = vsel %vm1220_vm14, %v7306_v18, %v7238_v3 }
 0x9f9   : > { %v7322_v43 = vsel %vm1229_vm15, %v7314_v44, %v7251_v20 }
 0x9fa   : > { %v7284_v36 = vpop.permute.xlu2 %7283 }
 0x9fb   : > { %v7264_v61 = vpop.permute.xlu0 %7263 }
 0x9fc   : > { %v7330_v6 = vsel %vm1238_vm0, %v7322_v43, %v7264_v61 }
 0x9ff   : > { %v7274_v35 = vpop.permute.xlu1 %7273 }
 0xa00   : > { %v7338_v15 = vsel %vm1247_vm1, %v7330_v6, %v7274_v35 }
 0xa01   : > { %v7346_v55 = vsel %vm1256_vm2, %v7338_v15, %v7284_v36  ;;  %v7599_v15 = vld [vmem:[#allocation2 + $0x8] sm:$0xf] }
 0xa02   : > { %7453 = vmatmul.bf16.vlgmr.msra.gmra.mxu0 %v7346_v55  ;;  %v7276_v14 = vpop.permute.xlu2 %7275  ;;  %v7602_v55 = vld [vmem:[#allocation2 + $0xc] sm:$0x1] }
 0xa07   : > { %v7227_v26 = vpop.permute.xlu1 %7226 }
 0xa0a   : > { %v7207_v21 = vpop.permute.xlu0 %7206  ;;  %v7229_v13 = vpop.permute.xlu2 %7228 }
 0xa0b   : > { %v7298_v54 = vsel %vm1198_vm12, %v12526_v56, %v7207_v21 }
 0xa0c   : > { %v7308_v5 = vsel %vm1211_vm13, %v7298_v54, %v7227_v26  ;;  %v12736_v54 = vld [vmem:[#allocation2] sm:$0xf] }
 0xa0d   : > { %v7316_v33 = vsel %vm1220_vm14, %v7308_v5, %v7240_v30 }
 0xa0f   : > { %v7266_v60 = vpop.permute.xlu1 %7265 }
 0xa12   : > { %v7253_v52 = vpop.permute.xlu0 %7252  ;;  %v7268_v45 = vpop.permute.xlu2 %7267 }
 0xa13   : > { %v7324_v62 = vsel %vm1229_vm15, %v7316_v33, %v7253_v52 }
 0xa14   : > { %v7332_v19 = vsel %vm1238_vm0, %v7324_v62, %v7266_v60  ;;  %v7483_v58 = vpop.f32.mrf.mxu2  ;;  %v7648_v60 = vld [vmem:[#allocation2 + $0x4] sm:$0x1] }
 0xa15   : > { %v7340_v9 = vsel %vm1247_vm1, %v7332_v19, %v7276_v14  ;;  %v7797_v62 = vrot.slane %v7648_v60, 5  ;;  %v7668_v19 = vshrl.u32 %v12736_v54, 16 }
 0xa1a   : > { %v7209_v32 = vpop.permute.xlu1 %7208  ;;  %v7211_v59 = vpop.permute.xlu2 %7210 }
 0xa1b   : > { %v7286_v46 = vpop.permute.xlu0 %7285  ;;  %v7301_v56 = vsel %vm1198_vm12, %v12602_v40, %v7209_v32  ;;  %v7304_v51 = vsel %vm1198_vm12, %v12656_v8, %v7211_v59  ;;  %v12728_v8 = vld [vmem:[%s13159_s30] ss:$0 sm:$0xff]  ;;  %v7671_v32 = vshll.u32 %v12736_v54, 16 }
 0xa1c   : > { %v7349_v25 = vsel %vm1256_vm2, %v7340_v9, %v7286_v46  ;;  %v7310_v53 = vsel %vm1211_vm13, %v7301_v56, %v7229_v13  ;;  %v7485_v18 = vpop.f32.mrf.mxu2  ;;  %v8988_v13 = vrot.slane %v12736_v54, 9  ;;  %v7677_v46 = vshll.u32 %v7648_v60, 16  ;;  %v7605_v56 = vld [vmem:[#allocation2 + $0x10] sm:$0xf] }
 0xa1d   : > { %7458 = vmatmul.bf16.gmra.mxu0 %v7349_v25 }
 0xa22   : > { %v7255_v38 = vpop.permute.xlu1 %7254  ;;  %v7257_v40 = vpop.permute.xlu2 %7256 }
 0xa23   : > { %v7242_v23 = vpop.permute.xlu0 %7241 }
 0xa24   : > { %v7318_v63 = vsel %vm1220_vm14, %v7310_v53, %v7242_v23  ;;  %v7488_v9 = vpop.f32.mrf.mxu2  ;;  %v7670_v23 = vrot.slane %v7668_v19, 4  ;;  %v7673_v53 = vrot.slane %v7671_v32, 5 }
 0xa25   : > { %v7326_v24 = vsel %vm1229_vm15, %v7318_v63, %v7255_v38  ;;  %v7608_v38 = vld [vmem:[#allocation2 + $0x14] sm:$0x1] }
 0xa26   : > { %v7334_v28 = vsel %vm1238_vm0, %v7326_v24, %v7268_v45 }
 0xa2a   : > { %v7288_v16 = vpop.permute.xlu1 %7287  ;;  %v7290_v0 = vpop.permute.xlu2 %7289 }
 0xa2b   : > { %v7278_v7 = vpop.permute.xlu0 %7277 }
 0xa2c   : > { %v7342_v27 = vsel %vm1247_vm1, %v7334_v28, %v7278_v7  ;;  %v7679_v28 = vrot.slane %v7677_v46, 5 }
 0xa2d   : > { %v7352_v17 = vsel %vm1256_vm2, %v7342_v27, %v7288_v16  ;;  %v7798_v16 = vsel %vm9626_vm10, %v8988_v13, %v7797_v62  ;;  %v9179_v62 = vld [vmem:[%s13160_s4 + $0x40] sm:$0xff] }
 0xa2e   : > { %7463 = vmatmul.bf16.gmra.mxu0 %v7352_v17  ;;  %v7674_v17 = vor.u32 %v7673_v53, %v7670_v23  ;;  %8168 = vmatpush.bf16.msrb.mxu3 %v9179_v62  ;;  %v7611_v53 = vld [vmem:[#allocation2 + $0x18] sm:$0xf] }
 0xa32   : > { %v7244_v31 = vpop.permute.xlu1 %7243 }
 0xa33   : > { %v7231_v47 = vpop.permute.xlu0 %7230 }
 0xa34   : > { %v7312_v34 = vsel %vm1211_vm13, %v7304_v51, %v7231_v47  ;;  %v7899_v51 = vunpack.c.l.b16 %v7798_v16 }
 0xa35   : > { %v7320_v10 = vsel %vm1220_vm14, %v7312_v34, %v7244_v31  ;;  %v7675_v34 = vrot.slane %v7674_v17, 4 }
 0xa36   : > { %v7328_v2 = vsel %vm1229_vm15, %v7320_v10, %v7257_v40 }
 0xa3a   : > { %v7280_v50 = vpop.permute.xlu1 %7279 }
 0xa3b   : > { %v7270_v41 = vpop.permute.xlu0 %7269 }
 0xa3c   : > { %v7336_v4 = vsel %vm1238_vm0, %v7328_v2, %v7270_v41 }
 0xa3d   : > { %v7344_v37 = vsel %vm1247_vm1, %v7336_v4, %v7280_v50 }
 0xa3e   : > { %v7355_v29 = vsel %vm1256_vm2, %v7344_v37, %v7290_v0 }
 0xa3f   : > { %7468 = vmatmul.bf16.gmra.mxu0 %v7355_v29  ;;  %v7680_v29 = vsel %vm9671_vm11, %v7675_v34, %v7679_v28 }
 0xa7f   : > { %v7454_v11 = vpop.f32.mrf.mxu0 }
 0xa80   : > { %v7455_v49 = vadd.f32 %v12728_v8, %v7454_v11 }
 0xa82   : > { %v7484_v48 = vadd.f32 %v7483_v58, %v7455_v49 }
 0xa84   : > { %v7503_v20 = vmax.f32 %v7484_v48, 0.0  ;;  %v7490_v48 = vpop.f32.mrf.mxu2 }
 0xa86   : > { %v7511_v57 = vpack.c.bf16 %v7503_v20, %v7503_v20 }
 0xa87   : > { %v7456_v30 = vpop.f32.mrf.mxu0 }
 0xa88   : > { %v7520_v22 = vshrl.u32 %v7511_v57, 16  ;;  %v7457_v3 = vadd.f32 %v12728_v8, %v7456_v30  ;;  %v7523_v43 = vshll.u32 %v7511_v57, 16 }
 0xa8a   : > { %v7522_v44 = vrot.slane %v7520_v22, 7  ;;  %v7486_v61 = vadd.f32 %v7485_v18, %v7457_v3  ;;  %v7879_v3 = vunpack.c.l.b16 %v7680_v29  ;;  %v7617_v29 = vld [vmem:[#allocation2 + $0x20] sm:$0xf] }
 0xa8c   : > { %v7525_v6 = vor.u32 %v7523_v43, %v7522_v44  ;;  %v7526_v35 = vrot.slane %v7522_v44, 4  ;;  %v7504_v36 = vmax.f32 %v7486_v61, 0.0  ;;  %v7493_v23 = vpop.f32.mrf.mxu2 }
 0xa8e   : > { %v7600_v26 = vsel %vm9562_vm4, %v7525_v6, %v7599_v15  ;;  %v7603_v21 = vsel %vm9594_vm7, %v7526_v35, %v7602_v55  ;;  %v7512_v14 = vpack.c.bf16 %v7504_v36, %v7504_v36 }
 0xa8f   : > { %7601 = vst [vmem:[#allocation2 + $0x8] sm:$0xf] %v7600_v26 }
 0xa90   : > { %7604 = vst [vmem:[#allocation2 + $0xc] sm:$0x1] %v7603_v21  ;;  %v7528_v5 = vshrl.u32 %v7512_v14, 16  ;;  %v7531_v33 = vshll.u32 %v7512_v14, 16 }
 0xa92   : > { %v7530_v52 = vrot.slane %v7528_v5, 7 }
 0xa94   : > { %v7533_v25 = vor.u32 %v7531_v33, %v7530_v52  ;;  %v7534_v45 = vrot.slane %v7530_v52, 4 }
 0xa96   : > { %v7606_v63 = vsel %vm9562_vm4, %v7533_v25, %v7605_v56  ;;  %v7609_v24 = vsel %vm9594_vm7, %v7534_v45, %v7608_v38  ;;  %v12745_v59 = vld [vmem:[#allocation2 + $0x8] sm:$0xf] }
 0xa97   : > { %7607 = vst [vmem:[#allocation2 + $0x10] sm:$0xf] %v7606_v63  ;;  %v7650_v7 = vld [vmem:[#allocation2 + $0xc] sm:$0x1]  ;;  %v8989_v27 = vrot.slane %v12745_v59, 9  ;;  %v7682_v31 = vshrl.u32 %v12745_v59, 16  ;;  %v7868_v57 = vunpack.c.l.b16 %v12745_v59 }
 0xa98   : > { %7610 = vst [vmem:[#allocation2 + $0x14] sm:$0x1] %v7609_v24  ;;  %v7801_v40 = vrot.slane %v7650_v7, 5  ;;  %v7685_v47 = vshll.u32 %v12745_v59, 16  ;;  %v7691_v4 = vshll.u32 %v7650_v7, 16 }
 0xa99   : > { %v7684_v10 = vrot.slane %v7682_v31, 4  ;;  %v7614_v63 = vld [vmem:[#allocation2 + $0x1c] sm:$0x1] }
 0xa9a   : > { %v7459_v50 = vpop.f32.mrf.mxu0  ;;  %v12754_v2 = vsel %vm9626_vm10, %v8989_v27, %v7801_v40  ;;  %v7687_v41 = vrot.slane %v7685_v47, 5  ;;  %v7693_v22 = vrot.slane %v7691_v4, 5 }
 0xa9b   : > { %v7460_v0 = vadd.f32 %v12728_v8, %v7459_v50  ;;  %v7900_v37 = vunpack.c.l.b16 %v12754_v2  ;;  %v9177_v2 = vld [vmem:[%s13160_s4 + $0x30] sm:$0xff] }
 0xa9c   : > { %v7688_v58 = vor.u32 %v7687_v41, %v7684_v10 }
 0xa9d   : > { %v7489_v11 = vadd.f32 %v7488_v9, %v7460_v0  ;;  %v7907_v49 = vpack.c.b16 %v7900_v37, %v7899_v51 }
 0xa9e   : > { %v12762_v20 = vld [vmem:[#allocation2 + $0x10] sm:$0xf]  ;;  %v7689_v30 = vrot.slane %v7688_v58, 4  ;;  %v7620_v58 = vld [vmem:[#allocation2 + $0x24] sm:$0x1] }
 0xa9f   : > { %v7505_v18 = vmax.f32 %v7489_v11, 0.0  ;;  %7911 = vrot.lane.b32.xlu1 %v7907_v49, %s13144_s0  ;;  %v7869_v44 = vunpack.c.l.b16 %v12762_v20  ;;  %v7652_v43 = vld [vmem:[#allocation2 + $0x14] sm:$0x1]  ;;  %v7696_v61 = vshrl.u32 %v12762_v20, 16  ;;  %v7699_v6 = vshll.u32 %v12762_v20, 16 }
 0xaa0   : > { %v7694_v35 = vsel %vm9671_vm11, %v7689_v30, %v7693_v22  ;;  %v7705_v60 = vshll.u32 %v7652_v43, 16  ;;  %v8990_v50 = vrot.slane %v12762_v20, 9  ;;  %v7805_v41 = vrot.slane %v7652_v43, 5  ;;  %v7495_v22 = vpop.f32.mrf.mxu2 }
 0xaa1   : > { %v7513_v36 = vpack.c.bf16 %v7505_v18, %v7505_v18  ;;  %v7920_v15 = vpack.c.b16 %v7869_v44, %v7868_v57  ;;  %v7880_v55 = vunpack.c.l.b16 %v7694_v35  ;;  %v7698_v26 = vrot.slane %v7696_v61, 4 }
 0xaa2   : > { %v7461_v21 = vpop.f32.mrf.mxu0  ;;  %v7701_v14 = vrot.slane %v7699_v6, 5  ;;  %v7707_v25 = vrot.slane %v7705_v60, 5  ;;  %v12801_v43 = vsel %vm9626_vm10, %v8990_v50, %v7805_v41 }
 0xaa3   : > { %v7536_v5 = vshrl.u32 %v7513_v36, 16  ;;  %v7462_v52 = vadd.f32 %v12728_v8, %v7461_v21  ;;  %7924 = vrot.lane.b32.xlu0 %v7920_v15, %s13147_s29  ;;  %v7887_v33 = vpack.c.b16 %v7880_v55, %v7879_v3  ;;  %v7539_v32 = vshll.u32 %v7513_v36, 16 }
 0xaa4   : > { %v7702_v13 = vor.u32 %v7701_v14, %v7698_v26  ;;  %v7901_v60 = vunpack.c.l.b16 %v12801_v43 }
 0xaa5   : > { %v7538_v19 = vrot.slane %v7536_v5, 7  ;;  %v7491_v46 = vadd.f32 %v7490_v48, %v7462_v52  ;;  %7891 = vrot.lane.b32.xlu2 %v7887_v33, %s13153_s26 }
 0xaa6   : > { %v7703_v9 = vrot.slane %v7702_v13, 4 }
 0xaa7   : > { %v7541_v45 = vor.u32 %v7539_v32, %v7538_v19  ;;  %v7542_v56 = vrot.slane %v7538_v19, 4  ;;  %v7506_v38 = vmax.f32 %v7491_v46, 0.0 }
 0xaa8   : > { %v7708_v24 = vsel %vm9671_vm11, %v7703_v9, %v7707_v25  ;;  %v7623_v25 = vld [vmem:[#allocation2 + $0x28] sm:$0xf] }
 0xaa9   : > { %v7612_v16 = vsel %vm9562_vm4, %v7541_v45, %v7611_v53  ;;  %v7615_v28 = vsel %vm9594_vm7, %v7542_v56, %v7614_v63  ;;  %v7514_v7 = vpack.c.bf16 %v7506_v38, %v7506_v38  ;;  %v12787_v27 = vunpack.c.l.b16 %v7708_v24  ;;  %v7626_v38 = vld [vmem:[#allocation2 + $0x2c] sm:$0x1] }
 0xaaa   : > { %7613 = vst [vmem:[#allocation2 + $0x18] sm:$0xf] %v7612_v16 }
 0xaab   : > { %7616 = vst [vmem:[#allocation2 + $0x1c] sm:$0x1] %v7615_v28  ;;  %v7544_v17 = vshrl.u32 %v7514_v7, 16  ;;  %v7464_v31 = vpop.f32.mrf.mxu0  ;;  %v7933_v40 = vpack.c.b16 %v12787_v27, %v7880_v55  ;;  %v7547_v34 = vshll.u32 %v7514_v7, 16 }
 0xaac   : > { %v7465_v47 = vadd.f32 %v12728_v8, %v7464_v31 }
 0xaad   : > { %v7546_v51 = vrot.slane %v7544_v17, 7  ;;  %7937 = vrot.lane.b32.xlu2 %v7933_v40, %s13148_s24 }
 0xaae   : > { %v7494_v10 = vadd.f32 %v7493_v23, %v7465_v47 }
 0xaaf   : > { %v7549_v4 = vor.u32 %v7547_v34, %v7546_v51  ;;  %v7550_v0 = vrot.slane %v7546_v51, 4 }
 0xab0   : > { %v7507_v11 = vmax.f32 %v7494_v10, 0.0  ;;  %v7498_v10 = vpop.f32.mrf.mxu2 }
 0xab1   : > { %v7618_v49 = vsel %vm9562_vm4, %v7549_v4, %v7617_v29  ;;  %v7621_v48 = vsel %vm9594_vm7, %v7550_v0, %v7620_v58  ;;  %v12797_v30 = vld [vmem:[#allocation2 + $0x18] sm:$0xf] }
 0xab2   : > { %7619 = vst [vmem:[#allocation2 + $0x20] sm:$0xf] %v7618_v49  ;;  %v7515_v3 = vpack.c.bf16 %v7507_v11, %v7507_v11  ;;  %v7654_v18 = vld [vmem:[#allocation2 + $0x1c] sm:$0x1]  ;;  %v8991_v61 = vrot.slane %v12797_v30, 9  ;;  %v7710_v6 = vshrl.u32 %v12797_v30, 16  ;;  %v7870_v53 = vunpack.c.l.b16 %v12797_v30 }
 0xab3   : > { %7622 = vst [vmem:[#allocation2 + $0x24] sm:$0x1] %v7621_v48  ;;  %v7466_v35 = vpop.f32.mrf.mxu0  ;;  %v7809_v36 = vrot.slane %v7654_v18, 5  ;;  %v7713_v15 = vshll.u32 %v12797_v30, 16  ;;  %v7719_v52 = vshll.u32 %v7654_v18, 16 }
 0xab4   : > { %v7552_v55 = vshrl.u32 %v7515_v3, 16  ;;  %v7467_v26 = vadd.f32 %v12728_v8, %v7466_v35  ;;  %v7712_v21 = vrot.slane %v7710_v6, 4  ;;  %v7555_v13 = vshll.u32 %v7515_v3, 16 }
 0xab5   : > { %v7810_v14 = vsel %vm9626_vm10, %v8991_v61, %v7809_v36  ;;  %v7715_v5 = vrot.slane %v7713_v15, 5  ;;  %v7721_v24 = vrot.slane %v7719_v52, 5 }
 0xab6   : > { %v7554_v33 = vrot.slane %v7552_v55, 7  ;;  %v7496_v62 = vadd.f32 %v7495_v22, %v7467_v26  ;;  %v7902_v19 = vunpack.c.l.b16 %v7810_v14  ;;  %v7629_v26 = vld [vmem:[#allocation2 + $0x30] sm:$0xf] }
 0xab7   : > { %v7716_v32 = vor.u32 %v7715_v5, %v7712_v21  ;;  %v7632_v21 = vld [vmem:[#allocation2 + $0x34] sm:$0x1] }
 0xab8   : > { %v7557_v46 = vor.u32 %v7555_v13, %v7554_v33  ;;  %v7558_v9 = vrot.slane %v7554_v33, 4  ;;  %v7508_v45 = vmax.f32 %v7496_v62, 0.0  ;;  %v7908_v56 = vpack.c.b16 %v7902_v19, %v7901_v60 }
 0xab9   : > { %v12812_v23 = vld [vmem:[#allocation2 + $0x20] sm:$0xf]  ;;  %v7717_v63 = vrot.slane %v7716_v32, 4  ;;  %v7867_v62 = vunpack.c.l.b16 %v12736_v54  ;;  %v7500_v54 = vpop.f32.mrf.mxu2 }
 0xaba   : > { %v7624_v16 = vsel %vm9562_vm4, %v7557_v46, %v7623_v25  ;;  %v7627_v28 = vsel %vm9594_vm7, %v7558_v9, %v7626_v38  ;;  %v7516_v7 = vpack.c.bf16 %v7508_v45, %v7508_v45  ;;  %7913 = vrot.lane.b32.xlu1 %v7908_v56, %s13144_s0  ;;  %9034 = vmatmul.msk.bf16.vlgmr.msrb.gmra.mxu3 %vm1198_vm12, %v7908_v56  ;;  %v7871_v17 = vunpack.c.l.b16 %v12812_v23  ;;  %v7656_v31 = vld [vmem:[#allocation2 + $0x24] sm:$0x1] }
 0xabb   : > { %7625 = vst [vmem:[#allocation2 + $0x28] sm:$0xf] %v7624_v16  ;;  %v7722_v40 = vsel %vm9671_vm11, %v7717_v63, %v7721_v24  ;;  %v8992_v47 = vrot.slane %v12812_v23, 9  ;;  %v7813_v51 = vrot.slane %v7656_v31, 5  ;;  %v7724_v34 = vshrl.u32 %v12812_v23, 16 }
 0xabc   : > { %7628 = vst [vmem:[#allocation2 + $0x2c] sm:$0x1] %v7627_v28  ;;  %v7560_v50 = vshrl.u32 %v7516_v7, 16  ;;  %v7563_v41 = vshll.u32 %v7516_v7, 16  ;;  %v7469_v4 = vpop.f32.mrf.mxu0  ;;  %v7921_v0 = vpack.c.b16 %v7871_v17, %v7870_v53  ;;  %v7882_v29 = vunpack.c.l.b16 %v7722_v40 }
 0xabd   : > { %v7470_v58 = vadd.f32 %v12728_v8, %v7469_v4  ;;  %v7814_v11 = vsel %vm9626_vm10, %v8992_v47, %v7813_v51  ;;  %v7726_v49 = vrot.slane %v7724_v34, 4  ;;  %v7727_v48 = vshll.u32 %v12812_v23, 16 }
 0xabe   : > { %v7562_v22 = vrot.slane %v7560_v50, 7  ;;  %7926 = vrot.lane.b32.xlu2 %v7921_v0, %s13147_s29  ;;  %v12834_v3 = vpack.c.b16 %v7882_v29, %v12787_v27  ;;  %v7903_v18 = vunpack.c.l.b16 %v7814_v11  ;;  %v7733_v61 = vshll.u32 %v7656_v31, 16 }
 0xabf   : > { %v7499_v6 = vadd.f32 %v7498_v10, %v7470_v58  ;;  %v7729_v35 = vrot.slane %v7727_v48, 5  ;;  %v7635_v58 = vld [vmem:[#allocation2 + $0x38] sm:$0xf]  ;;  %v7638_v48 = vld [vmem:[#allocation2 + $0x3c] sm:$0x1] }
 0xac0   : > { %v7565_v36 = vor.u32 %v7563_v41, %v7562_v22  ;;  %v7566_v15 = vrot.slane %v7562_v22, 4  ;;  %7893 = vrot.lane.b32.xlu0 %v12834_v3, %s13153_s26  ;;  %v7947_v55 = vpack.c.b16 %v7903_v18, %v7902_v19  ;;  %v7735_v33 = vrot.slane %v7733_v61, 5 }
 0xac1   : > { %v7509_v14 = vmax.f32 %v7499_v6, 0.0  ;;  %v7730_v5 = vor.u32 %v7729_v35, %v7726_v49 }
 0xac2   : > { %v7630_v52 = vsel %vm9562_vm4, %v7565_v36, %v7629_v26  ;;  %v7633_v27 = vsel %vm9594_vm7, %v7566_v15, %v7632_v21  ;;  %7952 = vrot.lane.b32.xlu1 %v7947_v55, %s13149_s25  ;;  %v7657_v13 = vld [vmem:[#allocation2 + $0x28] sm:$0xf] }
 0xac3   : > { %7631 = vst [vmem:[#allocation2 + $0x30] sm:$0xf] %v7630_v52  ;;  %v7517_v32 = vpack.c.bf16 %v7509_v14, %v7509_v14  ;;  %v7731_v46 = vrot.slane %v7730_v5, 4  ;;  %v7872_v19 = vunpack.c.l.b16 %v7657_v13  ;;  %v7658_v9 = vld [vmem:[#allocation2 + $0x2c] sm:$0x1]  ;;  %v8993_v25 = vrot.slane %v7657_v13, 9 }
 0xac4   : > { %7634 = vst [vmem:[#allocation2 + $0x34] sm:$0x1] %v7633_v27  ;;  %v7471_v45 = vpop.f32.mrf.mxu0  ;;  %v7817_v56 = vrot.slane %v7658_v9, 5  ;;  %v7738_v38 = vshrl.u32 %v7657_v13, 16  ;;  %v7741_v23 = vshll.u32 %v7657_v13, 16  ;;  %v7747_v63 = vshll.u32 %v7658_v9, 16 }
 0xac5   : > { %v7568_v24 = vshrl.u32 %v7517_v32, 16  ;;  %v7571_v16 = vshll.u32 %v7517_v32, 16  ;;  %v7472_v28 = vadd.f32 %v12728_v8, %v7471_v45  ;;  %v7736_v7 = vsel %vm9671_vm11, %v7731_v46, %v7735_v33 }
 0xac6   : > { %v7883_v31 = vunpack.c.l.b16 %v7736_v7  ;;  %v12847_v40 = vpack.c.b16 %v7872_v19, %v7871_v17  ;;  %v12851_v47 = vsel %vm9626_vm10, %v8993_v25, %v7817_v56  ;;  %v7740_v51 = vrot.slane %v7738_v38, 4  ;;  %v7641_v38 = vld [vmem:[#allocation2 + $0x40] sm:$0xf] }
 0xac7   : > { %v7570_v34 = vrot.slane %v7568_v24, 7  ;;  %v7501_v10 = vadd.f32 %v7500_v54, %v7472_v28  ;;  %v7904_v50 = vunpack.c.l.b16 %v12851_v47  ;;  %v7743_v41 = vrot.slane %v7741_v23, 5  ;;  %v7644_v23 = vld [vmem:[#allocation2 + $0x44] sm:$0x1] }
 0xac8   : > { %v7934_v4 = vpack.c.b16 %v7883_v31, %v7882_v29  ;;  %7962 = vrot.lane.b32.xlu2 %v12847_v40, %s13143_s27  ;;  %v12858_v8 = vpack.c.b16 %v7868_v57, %v7867_v62  ;;  %v7749_v6 = vrot.slane %v7747_v63, 5 }
 0xac9   : > { %v7573_v17 = vor.u32 %v7571_v16, %v7570_v34  ;;  %v7574_v0 = vrot.slane %v7570_v34, 4  ;;  %v7510_v11 = vmax.f32 %v7501_v10, 0.0  ;;  %v7909_v49 = vpack.c.b16 %v7904_v50, %v7903_v18 }
 0xaca   : > { %7939 = vrot.lane.b32.xlu0 %v7934_v4, %s13148_s24  ;;  %v12861_v22 = vld [vmem:[#allocation2 + $0x30] sm:$0xf]  ;;  %v7744_v61 = vor.u32 %v7743_v41, %v7740_v51 }
 0xacb   : > { %v7636_v29 = vsel %vm9562_vm4, %v7573_v17, %v7635_v58  ;;  %v7639_v59 = vsel %vm9594_vm7, %v7574_v0, %v7638_v48  ;;  %v7518_v57 = vpack.c.bf16 %v7510_v11, %v7510_v11  ;;  %9035 = vmatmul.msk.bf16.gmra.mxu3 %vm1198_vm12, %v7909_v49  ;;  %v7873_v35 = vunpack.c.l.b16 %v12861_v22  ;;  %v7660_v36 = vld [vmem:[#allocation2 + $0x34] sm:$0x1] }
 0xacc   : > { %7637 = vst [vmem:[#allocation2 + $0x38] sm:$0xf] %v7636_v29  ;;  %v7745_v18 = vrot.slane %v7744_v61, 4  ;;  %v8994_v15 = vrot.slane %v12861_v22, 9  ;;  %v7821_v55 = vrot.slane %v7660_v36, 5  ;;  %v7752_v26 = vshrl.u32 %v12861_v22, 16 }
 0xacd   : > { %7640 = vst [vmem:[#allocation2 + $0x3c] sm:$0x1] %v7639_v59  ;;  %v7576_v21 = vshrl.u32 %v7518_v57, 16  ;;  %v7579_v14 = vshll.u32 %v7518_v57, 16  ;;  %v7755_v5 = vshll.u32 %v12861_v22, 16  ;;  %v7922_v52 = vpack.c.b16 %v7873_v35, %v7872_v19 }
 0xace   : > { %v7750_v27 = vsel %vm9671_vm11, %v7745_v18, %v7749_v6  ;;  %v7822_v33 = vsel %vm9626_vm10, %v8994_v15, %v7821_v55  ;;  %v7754_v13 = vrot.slane %v7752_v26, 4  ;;  %v7761_v9 = vshll.u32 %v7660_v36, 16  ;;  %v7665_v61 = vld [vmem:[#allocation2 + $0x48] sm:$0xf]  ;;  %v7666_v18 = vld [vmem:[#allocation2 + $0x4c] sm:$0x1] }
 0xacf   : > { %v7578_v62 = vrot.slane %v7576_v21, 7  ;;  %v7884_v32 = vunpack.c.l.b16 %v7750_v27  ;;  %v7757_v46 = vrot.slane %v7755_v5, 5  ;;  %v7905_v19 = vunpack.c.l.b16 %v7822_v33 }
 0xad0   : > { %7915 = vrot.lane.b32.xlu2 %v7909_v49, %s13144_s0  ;;  %v7763_v28 = vrot.slane %v7761_v9, 5  ;;  %v7865_v5 = vrot.slane %v7666_v18, 5 }
 0xad1   : > { %v7581_v25 = vor.u32 %v7579_v14, %v7578_v62  ;;  %v7582_v45 = vrot.slane %v7578_v62, 4  ;;  %v7889_v56 = vpack.c.b16 %v7884_v32, %v7883_v31  ;;  %v7758_v63 = vor.u32 %v7757_v46, %v7754_v13 }
 0xad2   : > { %7928 = vrot.lane.b32.xlu0 %v7922_v52, %s13147_s29  ;;  %v7948_v41 = vpack.c.b16 %v7905_v19, %v7904_v50  ;;  %v8997_v14 = vrot.slane %v7665_v61, 9 }
 0xad3   : > { %v7642_v24 = vsel %vm9562_vm4, %v7581_v25, %v7641_v38  ;;  %v7645_v16 = vsel %vm9594_vm7, %v7582_v45, %v7644_v23  ;;  %7895 = vrot.lane.b32.xlu1 %v7889_v56, %s13153_s26  ;;  %v7661_v7 = vld [vmem:[#allocation2 + $0x38] sm:$0xf]  ;;  %v7759_v54 = vrot.slane %v7758_v63, 4  ;;  %v12914_v38 = vpack.c.b16 %v7870_v53, %v7869_v44 }
 0xad4   : > { %7643 = vst [vmem:[#allocation2 + $0x40] sm:$0xf] %v7642_v24  ;;  %v7662_v47 = vld [vmem:[#allocation2 + $0x3c] sm:$0x1]  ;;  %v8995_v31 = vrot.slane %v7661_v7, 9  ;;  %v7766_v34 = vshrl.u32 %v7661_v7, 16  ;;  %v7874_v6 = vunpack.c.l.b16 %v7661_v7  ;;  %v7866_v46 = vsel %vm9626_vm10, %v8997_v14, %v7865_v5 }
 0xad5   : > { %7646 = vst [vmem:[#allocation2 + $0x44] sm:$0x1] %v7645_v16  ;;  %v7825_v51 = vrot.slane %v7662_v47, 5  ;;  %v7769_v10 = vshll.u32 %v7661_v7, 16  ;;  %v7764_v12 = vsel %vm9671_vm11, %v7759_v54, %v7763_v28  ;;  %v7775_v36 = vshll.u32 %v7662_v47, 16 }
 0xad6   : > { %v7885_v4 = vunpack.c.l.b16 %v7764_v12  ;;  %v7768_v17 = vrot.slane %v7766_v34, 4  ;;  %v12897_v52 = vpack.c.b16 %v7874_v6, %v7873_v35  ;;  %v7978_v45 = vunpack.c.l.b16 %v7866_v46  ;;  %v9176_v12 = vld [vmem:[%s13160_s4 + $0x28] sm:$0xff] }
 0xad7   : > { %v7826_v42 = vsel %vm9626_vm10, %v8995_v31, %v7825_v51  ;;  %v7771_v0 = vrot.slane %v7769_v10, 5  ;;  %v7777_v27 = vrot.slane %v7775_v36, 5  ;;  %v7851_v63 = vshll.u32 %v7665_v61, 16 }
 0xad8   : > { %7954 = vrot.lane.b32.xlu2 %v7948_v41, %s13149_s25  ;;  %v7906_v58 = vunpack.c.l.b16 %v7826_v42  ;;  %v7935_v11 = vpack.c.b16 %v7885_v4, %v7884_v32  ;;  %v7946_v28 = vpack.c.b16 %v7901_v60, %v7900_v37  ;;  %v7857_v47 = vshll.u32 %v7666_v18, 16 }
 0xad9   : > { %v7772_v48 = vor.u32 %v7771_v0, %v7768_v17  ;;  %v7853_v30 = vrot.slane %v7851_v63, 5  ;;  %v7958_v51 = vunpack.c.l.b16 %v7665_v61  ;;  %v9173_v17 = vld [vmem:[%s13160_s4 + $0x10] sm:$0xff] }
 0xada   : > { %7972 = vrot.lane.b32.xlu0 %v7889_v56, %s13150_s2  ;;  %v7910_v49 = vpack.c.b16 %v7906_v58, %v7905_v19  ;;  %v9178_v56 = vld [vmem:[%s13160_s4 + $0x38] sm:$0xff]  ;;  %v7848_v19 = vshrl.u32 %v7665_v61, 16  ;;  %v7859_v10 = vrot.slane %v7857_v47, 5 }
 0xadb   : > { %7941 = vrot.lane.b32.xlu1 %v7935_v11, %s13148_s24  ;;  %v7663_v50 = vld [vmem:[#allocation2 + $0x40] sm:$0xf]  ;;  %v7773_v55 = vrot.slane %v7772_v48, 4  ;;  %9182 = vmatpush.bf16.msrb.mxu1 %v9178_v56 }
 0xadc   : > { %9036 = vmatmul.msk.bf16.gmra.mxu3 %vm1198_vm12, %v7910_v49  ;;  %v7919_v29 = vunpack.c.l.b16 %v7663_v50  ;;  %v7664_v59 = vld [vmem:[#allocation2 + $0x44] sm:$0x1]  ;;  %v8996_v57 = vrot.slane %v7663_v50, 9  ;;  %v7828_v33 = vshrl.u32 %v7663_v50, 16  ;;  %v7831_v13 = vshll.u32 %v7663_v50, 16  ;;  %8132 = vmatpush.bf16.msrb.mxu0 %v9178_v56 }
 0xadd   : > { %v7845_v15 = vrot.slane %v7664_v59, 5  ;;  %v7778_v32 = vsel %vm9671_vm11, %v7773_v55, %v7777_v27  ;;  %v7837_v16 = vshll.u32 %v7664_v59, 16  ;;  %v7850_v44 = vrot.slane %v7848_v19, 4  ;;  %v9171_v11 = vld [vmem:[%s13160_s4] sm:$0xff] }
 0xade   : > { %v7923_v26 = vpack.c.b16 %v7919_v29, %v7874_v6  ;;  %v7886_v22 = vunpack.c.l.b16 %v7778_v32  ;;  %v7830_v35 = vrot.slane %v7828_v33, 4  ;;  %v7833_v9 = vrot.slane %v7831_v13, 5 }
 0xadf   : > { %v7846_v21 = vsel %vm9626_vm10, %v8996_v57, %v7845_v15  ;;  %v7839_v53 = vrot.slane %v7837_v16, 5  ;;  %v7854_v54 = vor.u32 %v7853_v30, %v7850_v44  ;;  %v7959_v43 = vpack.c.b16 %v7958_v51, %v7919_v29  ;;  %9183 = vmatpush.bf16.msrb.mxu1 %v9177_v2 }
 0xae0   : > { %7917 = vrot.lane.b32.xlu2 %v7910_v49, %s13144_s0  ;;  %v7945_v62 = vunpack.c.l.b16 %v7846_v21  ;;  %v7890_v23 = vpack.c.b16 %v7886_v22, %v7885_v4  ;;  %v7834_v1 = vor.u32 %v7833_v9, %v7830_v35  ;;  %8133 = vmatpush.bf16.msrb.mxu0 %v9177_v2  ;;  %v9174_v4 = vld [vmem:[%s13160_s4 + $0x18] sm:$0xff] }
 0xae1   : > { %v7855_v34 = vrot.slane %v7854_v54, 4 }
 0xae2   : > { %7964 = vrot.lane.b32.xlu0 %v12897_v52, %s13143_s27  ;;  %v7949_v25 = vpack.c.b16 %v7945_v62, %v7906_v58  ;;  %v7979_v24 = vpack.c.b16 %v7978_v45, %v7945_v62  ;;  %v7835_v20 = vrot.slane %v7834_v1, 4  ;;  %v9172_v58 = vld [vmem:[%s13160_s4 + $0x8] sm:$0xff] }
 0xae3   : > { %7930 = vrot.lane.b32.xlu1 %v7923_v26, %s13147_s29  ;;  %v7860_v37 = vsel %vm9671_vm11, %v7855_v34, %v7859_v10  ;;  %9184 = vmatpush.bf16.msrb.mxu1 %v9176_v12 }
 0xae4   : > { %v7840_v7 = vsel %vm9671_vm11, %v7835_v20, %v7839_v53  ;;  %v7968_v60 = vunpack.c.l.b16 %v7860_v37  ;;  %8134 = vmatpush.bf16.msrb.mxu0 %v9176_v12 }
 0xae5   : > { %v7932_v31 = vunpack.c.l.b16 %v7840_v7 }
 0xae7   : > { %v7936_v41 = vpack.c.b16 %v7932_v31, %v7886_v22  ;;  %9185 = vmatpush.bf16.msrb.mxu1 %v9175_v39 }
 0xae8   : > { %7956 = vrot.lane.b32.xlu2 %v7949_v25, %s13149_s25  ;;  %8135 = vmatpush.bf16.msrb.mxu0 %v9175_v39 }
 0xaea   : > { %7960 = vrot.lane.b32.xlu0 %v12914_v38, %s13143_s27 }
 0xaeb   : > { %7974 = vrot.lane.b32.xlu1 %v7890_v23, %s13150_s2  ;;  %9186 = vmatpush.bf16.msrb.mxu1 %v9174_v4 }
 0xaec   : > { %9037 = vmatmul.msk.bf16.gmra.mxu3 %vm1198_vm12, %v7979_v24  ;;  %8136 = vmatpush.bf16.msrb.mxu0 %v9174_v4 }
 0xaef   : > { %9187 = vmatpush.bf16.msrb.mxu1 %v9173_v17 }
 0xaf0   : > { %7970 = vrot.lane.b32.xlu2 %v12834_v3, %s13150_s2  ;;  %v7969_v3 = vpack.c.b16 %v7968_v60, %v7932_v31  ;;  %8137 = vmatpush.bf16.msrb.mxu0 %v9173_v17 }
 0xaf2   : > { %7897 = vrot.lane.b32.xlu0 %v7890_v23, %s13153_s26  ;;  %s8216_s26 = sshll.u32 %s11753_s5, 4  ;;  %s8217_s26 = int_to_ptr.vmem [resolvable:$true] %s8216_s26 }
 0xaf3   : > { %7950 = vrot.lane.b32.xlu1 %v7946_v28, %s13149_s25  ;;  %9188 = vmatpush.bf16.msrb.mxu1 %v9172_v58  ;;  %s9191_s25 = smul.u32 384, %s13161_s3 }
 0xaf4   : > { %8138 = vmatpush.bf16.msrb.mxu0 %v9172_v58 }
 0xaf7   : > { %9189 = vmatpush.bf16.msrb.mxu1 %v9171_v11 }
 0xaf8   : > { %8139 = vmatpush.bf16.msrb.mxu0 %v9171_v11 }
 0xafa   : > { %7943 = vrot.lane.b32.xlu0 %v7936_v41, %s13148_s24  ;;  %s13163_s24 = sld [smem:[#allocation29_spill]] }
 0xafb   : > { %7966 = vrot.lane.b32.xlu1 %v7959_v43, %s13143_s27 }
 0xaff   : > { %v7892_v42 = vpop.permute.xlu2 %7891 }
 0xb00   : > { %s8215_s30 = scalar_lea.hbm %s13163_s24, %s9191_s25  ;;  %s9278_s4 = scalar_lea.hbm %s13163_s24, 768 }
 0xb01   : > { %s8218_s27 = sshll.u32 %s8215_s30, 4  ;;  %s8219_s27 = int_to_ptr.hbm [resolvable:$true] %s8218_s27 }
 0xb02   : > { %7976 = vrot.lane.b32.xlu0 %v7969_v3, %s13150_s2  ;;  %s8199_s2 = scalar_lea.sflag [#allocation4], %s11734_s7  ;;  %s9272_s16 = sshra.s32 %s8219_s27, 4  ;;  %s9273_s16 = int_to_ptr.hbm [resolvable:$true] %s9272_s16 }
 0xb03   : > { %s9274_s23 = scalar_lea.hbm %s9273_s16, 384  ;;  %p9279_p0 = scmp.lt.s32.totalorder %s9273_s16, %s13163_s24 }
 0xb04   : > { %p9275_p11 = scmp.ne.s32.totalorder %s9273_s16, %s9274_s23  ;;  %p9280_p1 = scmp.lt.s32.totalorder %s9278_s4, %s9274_s23 }
 0xb06   : > { %p9276_p12 = pnand %p9275_p11, %p9518_p5  ;;  %p9281_p2 = por %p9280_p1, %p9279_p0 }
 0xb07   : > { %v7938_v0 = vpop.permute.xlu2 %7937 }
 0xb08   : > { %p9277_p13 = pneg %p9276_p12 }
 0xb0a   : > { %p9282_p3 = pnand %p9281_p2, %p9277_p13 }
 0xb11   : > { %v7912_v48 = vpop.permute.xlu1 %7911 }
 0xb15   : > { %v7925_v49 = vpop.permute.xlu0 %7924 }
 0xb18   : > { %v7927_v50 = vpop.permute.xlu2 %7926 }
 0xb22   : > { %v7963_v29 = vpop.permute.xlu2 %7962 }
 0xb2a   : > { %v7916_v36 = vpop.permute.xlu2 %7915 }
 0xb2c   : > { %v7914_v6 = vpop.permute.xlu1 %7913 }
 0xb32   : > { %v7894_v61 = vpop.permute.xlu0 %7893  ;;  %v7955_v5 = vpop.permute.xlu2 %7954 }
 0xb33   : > { %v7985_v18 = vsel %vm1198_vm12, %v12914_v38, %v7894_v61 }
 0xb34   : > { %v7953_v57 = vpop.permute.xlu1 %7952  ;;  %v7995_v15 = vsel %vm1211_vm13, %v7985_v18, %v7914_v6 }
 0xb35   : > { %v8003_v26 = vsel %vm1220_vm14, %v7995_v15, %v7927_v50 }
 0xb3a   : > { %v7918_v22 = vpop.permute.xlu2 %7917 }
 0xb3c   : > { %v7940_v59 = vpop.permute.xlu0 %7939 }
 0xb3d   : > { %v8011_v14 = vsel %vm1229_vm15, %v8003_v26, %v7940_v59 }
 0xb3e   : > { %v8019_v27 = vsel %vm1238_vm0, %v8011_v14, %v7953_v57 }
 0xb3f   : > { %v8027_v33 = vsel %vm1247_vm1, %v8019_v27, %v7963_v29 }
 0xb42   : > { %v7957_v1 = vpop.permute.xlu2 %7956 }
 0xb44   : > { %v7929_v55 = vpop.permute.xlu0 %7928 }
 0xb45   : > { %v7896_v21 = vpop.permute.xlu1 %7895 }
 0xb46   : > { %v7988_v46 = vsel %vm1198_vm12, %v12847_v40, %v7896_v21  ;;  %v7982_v40 = vsel %vm1198_vm12, %v12858_v8, %v7892_v42 }
 0xb47   : > { %v7997_v9 = vsel %vm1211_vm13, %v7988_v46, %v7916_v36  ;;  %v7993_v16 = vsel %vm1211_vm13, %v7982_v40, %v7912_v48 }
 0xb48   : > { %v8005_v45 = vsel %vm1220_vm14, %v7997_v9, %v7929_v55  ;;  %v8001_v20 = vsel %vm1220_vm14, %v7993_v16, %v7925_v49 }
 0xb49   : > { %v8009_v53 = vsel %vm1229_vm15, %v8001_v20, %v7938_v0 }
 0xb4a   : > { %v7971_v7 = vpop.permute.xlu2 %7970 }
 0xb4c   : > { %v7973_v13 = vpop.permute.xlu0 %7972 }
 0xb4d   : > { %v8036_v62 = vsel %vm1256_vm2, %v8027_v33, %v7973_v13  ;;  %v7942_v32 = vpop.permute.xlu1 %7941 }
 0xb4e   : > { %8145 = vmatmul.bf16.vlgmr.msrb.gmra.mxu1 %v8036_v62  ;;  %v8013_v56 = vsel %vm1229_vm15, %v8005_v45, %v7942_v32 }
 0xb4f   : > { %v8021_v38 = vsel %vm1238_vm0, %v8013_v56, %v7955_v5 }
 0xb54   : > { %v7965_v35 = vpop.permute.xlu0 %7964 }
 0xb55   : > { %v7931_v25 = vpop.permute.xlu1 %7930  ;;  %v8029_v19 = vsel %vm1247_vm1, %v8021_v38, %v7965_v35 }
 0xb5c   : > { %v7961_v23 = vpop.permute.xlu0 %7960 }
 0xb5d   : > { %v7975_v63 = vpop.permute.xlu1 %7974 }
 0xb5e   : > { %v8039_v24 = vsel %vm1256_vm2, %v8029_v19, %v7975_v63 }
 0xb5f   : > { %8150 = vmatmul.bf16.gmra.mxu1 %v8039_v24 }
 0xb64   : > { %v7898_v44 = vpop.permute.xlu0 %7897 }
 0xb65   : > { %v7951_v30 = vpop.permute.xlu1 %7950  ;;  %v7991_v54 = vsel %vm1198_vm12, %v12897_v52, %v7898_v44 }
 0xb66   : > { %v8017_v28 = vsel %vm1238_vm0, %v8009_v53, %v7951_v30  ;;  %v7999_v31 = vsel %vm1211_vm13, %v7991_v54, %v7918_v22 }
 0xb67   : > { %v8025_v47 = vsel %vm1247_vm1, %v8017_v28, %v7961_v23  ;;  %v8007_v34 = vsel %vm1220_vm14, %v7999_v31, %v7931_v25 }
 0xb68   : > { %v8033_v8 = vsel %vm1256_vm2, %v8025_v47, %v7971_v7 }
 0xb69   : > { %8140 = vmatmul.bf16.vlgmr.msrb.gmra.mxu0 %v8033_v8 }
 0xb6c   : > { %v7944_v51 = vpop.permute.xlu0 %7943 }
 0xb6d   : > { %v8015_v10 = vsel %vm1229_vm15, %v8007_v34, %v7944_v51  ;;  %v7967_v41 = vpop.permute.xlu1 %7966 }
 0xb6e   : > { %v8023_v2 = vsel %vm1238_vm0, %v8015_v10, %v7957_v1 }
 0xb6f   : > { %v8031_v43 = vsel %vm1247_vm1, %v8023_v2, %v7967_v41 }
 0xb74   : > { %v7977_v52 = vpop.permute.xlu0 %7976 }
 0xb75   : > { %v8042_v37 = vsel %vm1256_vm2, %v8031_v43, %v7977_v52 }
 0xb76   : > { %8155 = vmatmul.bf16.gmra.mxu1 %v8042_v37 }
 0xb77   : > { %9285 = shalt.err (!%p9282_p3)
}
 0xb78   : > { %s9362_s25 = smov 768   ;;  %v8170_v60 = vpop.f32.mrf.mxu3  ;;  %s13164_s30 = sld [smem:[#allocation28_spill]] }
 0xb79   : > { %9192 = dma.vmem_to_hbm [thread:$0]  (%p9518_p5), %s8217_s26, 6144, %s8219_s27, %s8199_s2, %s9362_s25, %s9362_s25, %s13147_s29  }
 0xb7a   : > { %s8335_s0 = sshll.u32 %s11734_s7, 6  ;;  %s9180_s29 = sshll.u32 %s13161_s3, 6 }
 0xb7b   : > { %s13010_s8 = scalar_lea.vmem [#allocation5], %s8335_s0  ;;  %s13165_s27 = sld [smem:[#allocation30_spill]] }
 0xb7c   : > { %s8233_s16 = sshll.u32 %s13010_s8, 4  ;;  %s8204_s6 = scalar_lea.sflag [#allocation6], %s11734_s7  ;;  %s8234_s16 = int_to_ptr.vmem [resolvable:$true] %s8233_s16 }
 0xb7e   : > { %v9255_v39 = vld [vmem:[%s13164_s30] ss:$0 sm:$0xff] }
 0xb80   : > { %v8172_v3 = vpop.f32.mrf.mxu3 }
 0xb81   : > { %s8232_s2 = scalar_lea.hbm %s13165_s27, %s9180_s29  ;;  %s9306_s1 = scalar_lea.hbm %s13165_s27, 128 }
 0xb82   : > { %s8235_s23 = sshll.u32 %s8232_s2, 4  ;;  %s8236_s23 = int_to_ptr.hbm [resolvable:$true] %s8235_s23 }
 0xb83   : > { %s9300_s5 = sshra.s32 %s8236_s23, 4  ;;  %s9301_s5 = int_to_ptr.hbm [resolvable:$true] %s9300_s5 }
 0xb84   : > { %s9302_s3 = scalar_lea.hbm %s9301_s5, 64  ;;  %p9307_p9 = scmp.lt.s32.totalorder %s9301_s5, %s13165_s27 }
 0xb85   : > { %p9303_p4 = scmp.ne.s32.totalorder %s9301_s5, %s9302_s3  ;;  %p9308_p10 = scmp.lt.s32.totalorder %s9306_s1, %s9302_s3 }
 0xb87   : > { %p9304_p7 = pnand %p9303_p4, %p9518_p5  ;;  %p9309_p11 = por %p9308_p10, %p9307_p9 }
 0xb88   : > { %v8175_v12 = vpop.f32.mrf.mxu3 }
 0xb89   : > { %p9305_p8 = pneg %p9304_p7 }
 0xb8b   : > { %p9310_p12 = pnand %p9309_p11, %p9305_p8 }
 0xb90   : > { %v8177_v0 = vpop.f32.mrf.mxu3 }
 0xb98   : > { %v8180_v48 = vpop.f32.mrf.mxu3 }
 0xba0   : > { %v8182_v57 = vpop.f32.mrf.mxu3 }
 0xba8   : > { %v8185_v5 = vpop.f32.mrf.mxu3 }
 0xbb0   : > { %v8187_v46 = vpop.f32.mrf.mxu3 }
 0xbcb   : > { %v8146_v4 = vpop.f32.mrf.mxu1 }
 0xbcc   : > { %v8147_v42 = vadd.f32 %v9255_v39, %v8146_v4 }
 0xbce   : > { %v8176_v17 = vadd.f32 %v8175_v12, %v8147_v42 }
 0xbd0   : > { %8192 = vst [vmem:[%s13010_s8 + $0x10] sm:$0xff] %v8176_v17 }
 0xbd3   : > { %v8148_v58 = vpop.f32.mrf.mxu1 }
 0xbd4   : > { %v8149_v11 = vadd.f32 %v9255_v39, %v8148_v58 }
 0xbd6   : > { %v8178_v49 = vadd.f32 %v8177_v0, %v8149_v11 }
 0xbd8   : > { %8193 = vst [vmem:[%s13010_s8 + $0x18] sm:$0xff] %v8178_v49 }
 0xbdc   : > { %v8151_v50 = vpop.f32.mrf.mxu1 }
 0xbdd   : > { %v8152_v61 = vadd.f32 %v9255_v39, %v8151_v50 }
 0xbdf   : > { %v8181_v6 = vadd.f32 %v8180_v48, %v8152_v61 }
 0xbe1   : > { %8194 = vst [vmem:[%s13010_s8 + $0x20] sm:$0xff] %v8181_v6 }
 0xbe4   : > { %v8153_v29 = vpop.f32.mrf.mxu1 }
 0xbe5   : > { %v8154_v59 = vadd.f32 %v9255_v39, %v8153_v29 }
 0xbe6   : > { %v8141_v36 = vpop.f32.mrf.mxu0 }
 0xbe7   : > { %v8183_v18 = vadd.f32 %v8182_v57, %v8154_v59  ;;  %v8142_v15 = vadd.f32 %v9255_v39, %v8141_v36 }
 0xbe9   : > { %8195 = vst [vmem:[%s13010_s8 + $0x28] sm:$0xff] %v8183_v18  ;;  %v8171_v55 = vadd.f32 %v8170_v60, %v8142_v15 }
 0xbeb   : > { %8190 = vst [vmem:[%s13010_s8] sm:$0xff] %v8171_v55 }
 0xbee   : > { %v8143_v26 = vpop.f32.mrf.mxu0 }
 0xbef   : > { %v8144_v21 = vadd.f32 %v9255_v39, %v8143_v26 }
 0xbf1   : > { %v8173_v14 = vadd.f32 %v8172_v3, %v8144_v21 }
 0xbf3   : > { %8191 = vst [vmem:[%s13010_s8 + $0x8] sm:$0xff] %v8173_v14  ;;  %v8156_v27 = vpop.f32.mrf.mxu1 }
 0xbf4   : > { %v8157_v33 = vadd.f32 %v9255_v39, %v8156_v27 }
 0xbf6   : > { %v8186_v13 = vadd.f32 %v8185_v5, %v8157_v33 }
 0xbf8   : > { %8196 = vst [vmem:[%s13010_s8 + $0x30] sm:$0xff] %v8186_v13 }
 0xbfb   : > { %v8158_v62 = vpop.f32.mrf.mxu1 }
 0xbfc   : > { %v8159_v32 = vadd.f32 %v9255_v39, %v8158_v62 }
 0xbfe   : > { %v8188_v22 = vadd.f32 %v8187_v46, %v8159_v32 }
 0xc00   : > { %8197 = vst [vmem:[%s13010_s8 + $0x38] sm:$0xff] %v8188_v22 }
 0xc01   : > { %9313 = shalt.err (!%p9310_p12)
}
 0xc02   : > { %s9363_s7 = smov 128   ;;  %s9364_s8 = smov 8  }
 0xc03   : > { %9193 = dma.vmem_to_hbm [thread:$0]  (%p9518_p5), %s8234_s16, 1024, %s8236_s23, %s8204_s6, %s9363_s7, %s9363_s7, %s9364_s8  }
 0xc04 PF: > { %s13166_s29 = sld [smem:[#allocation11_spill]] }
 0xc05   : > { %s13167_s4 = sld [smem:[#allocation9_spill]] }
 0xc0a   : > { %p9203_p13 = scmp.ge.s32.totalorder %s13166_s29, 2 }
 0xc0b   : > { %s8250_s2 = sand.u32 1, %s13167_s4  }
 0xc0c   : > { %p9197_p0 = pnand %p9203_p13, %p9522_p6  ;;  %s8251_s25 = scalar_lea.sflag [#allocation4], %s8250_s2 }
 0xc0e   : > { %p9198_p1 = pneg %p9197_p0 }
 0xc10   : > { %9331 = dma.done.wait (%p9198_p1), %s8251_s25, 6144  }
 0xc11   : > { %9333 = vsyncadd (%p9198_p1), %s8251_s25, 4294961152  ;;  %s8261_s5 = scalar_lea.sflag [#allocation6], %s8250_s2 }
 0xc12   : > { %9335 = dma.done.wait (%p9198_p1), %s8261_s5, 1024  }
 0xc13   : > { %9337 = vsyncadd (%p9198_p1), %s8261_s5, 4294966272  ;;  %s13169_s30 = sld [smem:[#allocation13_spill]]  ;;  %s13172_s3 = smov %s9344_s28 }
 0xc14   : > { %s13170_s19 = sld [smem:[#allocation10_spill]] }
 0xc15   : > { %s13171_s29 = sld [smem:[#allocation14_spill]] }
 0xc19   : > { %p36_p5 = scmp.ge.s32.totalorder %s13169_s30, 4  }
 0xc1a   : > { %s13173_s28 = smov %s13170_s19 }
 0xc1b   :  { %38 = sbr.rel (!%p36_p5) target bundleno = 20 (0x14), region = 157 }
 0xc20   :  { %8267 = vsyncpa [#allocation4], 1 }
 0xc21   :  { %8269 = vsyncpa [#allocation4 + $0x1], 1 }
 0xc22   :  { %8270 = vsyncpa [#allocation6], 1 }
 0xc23   :  { %8272 = vsyncpa [#allocation6 + $0x1], 1 }

</bundles_post_ra>
